<compile_context>
chip_gen: v7x
topology: tpu7x:2x2x1
jax: 0.10.0
libtpu: 0.0.40
codegen_flags: <defaults>
</compile_context>

<pallas_src>
import functools

import numpy as np

import jax
import jax.numpy as jnp
from jax import lax
from jax.experimental import pallas as pl
from jax.experimental.pallas import tpu as pltpu

EPS = 1e-5


# --------------------------------------------------------------------------
# hardware-aware knobs
# --------------------------------------------------------------------------
def _vmem_limit_bytes():
    """Scoped-VMEM budget derived from the running generation
    (v5e/v6e: 128 MiB physical -> 64 MiB budget, v7x: 64 MiB -> 32 MiB)."""
    cap = 64 * 1024 * 1024                       # conservative fallback (v7x-sized)
    try:
        cap = int(getattr(pltpu.get_tpu_info(), "vmem_capacity_bytes", cap))
    except Exception:
        pass
    return int(min(cap // 2, 100 * 1024 * 1024))


def _compiler_params(vmem_limit):
    # grid = (B,): every step writes disjoint per-image blocks -> "parallel"
    # (megacore sharding on v7x).
    return pltpu.CompilerParams(
        dimension_semantics=("parallel",),
        vmem_limit_bytes=vmem_limit,
    )


# --------------------------------------------------------------------------
# in-kernel helpers
# --------------------------------------------------------------------------
def _shift_rows(x, d):
    """output[r, :] = x[r + d, :], zero at the image boundary (d in {-1, +1})."""
    h = x.shape[0]
    z = jnp.zeros((1, x.shape[1]), x.dtype)
    if d == -1:
        return jnp.concatenate([z, x[: h - 1, :]], axis=0)
    return jnp.concatenate([x[1:, :], z], axis=0)


def _shift_cols(x, d):
    """output[:, j] = x[:, j + d], zero at the image boundary (d in {-1, +1})."""
    # TODO(synk): move these +-1 lane/sublane shifts onto the XLU with
    # pltpu.roll + iota masks once roll's shift-sign convention is pinned down
    # across toolchains; the concat form is kept here because it is proven to
    # lower and the kernel stays bandwidth/VALU-bound either way.
    w = x.shape[1]
    z = jnp.zeros((x.shape[0], 1), x.dtype)
    if d == -1:
        return jnp.concatenate([z, x[:, : w - 1]], axis=1)
    return jnp.concatenate([x[:, 1:], z], axis=1)


def _dsconv_fused(load_chan, n_in, dw_ref, db_ref, pw_ref, pb_ref,
                  out_ref, stats_ref):
    """Depthwise 3x3 (padding=1) fused with pointwise 1x1 over one whole image.

    load_chan(ci) -> (H, W) f32 activated input channel.  The pointwise FMA is
    folded into the per-input-channel loop so only n_out accumulators stay
    live.  Writes the pre-BN activations (in out_ref's dtype) and per-image BN
    partials (sum, sum of squared deviations from the image mean) per channel.
    """
    n_out = pw_ref.shape[0]
    h, w = out_ref.shape[-2], out_ref.shape[-1]
    inv_n = 1.0 / float(h * w)

    accs = [jnp.zeros((h, w), jnp.float32) for _ in range(n_out)]
    for ci in range(n_in):
        x = load_chan(ci)
        bands = (_shift_rows(x, -1), x, _shift_rows(x, 1))        # x[r-1], x[r], x[r+1]
        d = jnp.zeros((h, w), jnp.float32)
        for ky, rows in enumerate(bands):
            d = (d
                 + dw_ref[ci, 3 * ky + 0] * _shift_cols(rows, -1)  # x[., j-1]
                 + dw_ref[ci, 3 * ky + 1] * rows
                 + dw_ref[ci, 3 * ky + 2] * _shift_cols(rows, 1))  # x[., j+1]
        d = d + db_ref[ci]
        # fused 1x1 conv: FMA this channel's depthwise result into every output
        for co in range(n_out):
            accs[co] = accs[co] + pw_ref[co, ci] * d

    s_parts, m2_parts = [], []
    for co in range(n_out):
        y = accs[co] + pb_ref[co]
        out_ref[0, co] = y.astype(out_ref.dtype)
        # mean-shifted partials for a numerically stable batch variance
        s = jnp.sum(jnp.sum(y, axis=1, keepdims=True), axis=0, keepdims=True)  # (1,1)
        m = s * inv_n
        dev = y - m
        m2 = jnp.sum(jnp.sum(dev * dev, axis=1, keepdims=True), axis=0, keepdims=True)
        s_parts.append(s)
        m2_parts.append(m2)
    stats_ref[0] = jnp.concatenate(
        [jnp.concatenate(s_parts, axis=1),
         jnp.concatenate(m2_parts, axis=1)], axis=0)               # (2, n_out)


def _stage1_kernel(x2_ref, x1_ref, wy_ref, wxt_ref,
                   dw_ref, db_ref, pw_ref, pb_ref, out_ref, stats_ref):
    """concat([x2, pad(up(x1))]) -> DSConv1 (pre-BN) + BN partial stats.

    The bilinear 2x upsample + F.pad of x1 is fused in as two small MXU
    matmuls; the channel concat is pure bookkeeping (never materialized)."""
    c_skip = x2_ref.shape[1]
    c_up = x1_ref.shape[1]

    def load_chan(ci):
        if ci < c_skip:
            return x2_ref[0, ci].astype(jnp.float32)
        xr = x1_ref[0, ci - c_skip].astype(jnp.float32)            # (H1, W1)
        t = jnp.dot(xr, wxt_ref[...], preferred_element_type=jnp.float32)   # (H1, W)
        return jnp.dot(wy_ref[...], t, preferred_element_type=jnp.float32)  # (H, W)

    _dsconv_fused(load_chan, c_skip + c_up,
                  dw_ref, db_ref, pw_ref, pb_ref, out_ref, stats_ref)


def _stage2_kernel(h_ref, a_ref, c_ref,
                   dw_ref, db_ref, pw_ref, pb_ref, out_ref, stats_ref):
    """BN1 (folded scale/shift) + ReLU fused into the load, then DSConv2."""
    def load_chan(ci):
        x = h_ref[0, ci].astype(jnp.float32)
        return jnp.maximum(x * a_ref[ci] + c_ref[ci], 0.0)

    _dsconv_fused(load_chan, h_ref.shape[1],
                  dw_ref, db_ref, pw_ref, pb_ref, out_ref, stats_ref)


def _bn_relu_kernel(h_ref, a_ref, c_ref, out_ref):
    """BN2 (folded) + ReLU, whole-image blocks."""
    for ci in range(h_ref.shape[1]):
        out_ref[0, ci] = jnp.maximum(
            h_ref[0, ci].astype(jnp.float32) * a_ref[ci] + c_ref[ci], 0.0
        ).astype(out_ref.dtype)


# --------------------------------------------------------------------------
# wrapper-side helpers
# --------------------------------------------------------------------------
def _fold_bn(stats, n_per_image, gamma, beta):
    """Merge per-image (sum, M2) partials -> folded BatchNorm scale/shift.

    Parallel-variance combination (Chan et al.): numerically stable, biased
    variance like PyTorch BatchNorm's training-mode forward."""
    s = stats[:, 0, :]                                  # (B, C)
    m2 = stats[:, 1, :]                                 # (B, C)
    n_total = stats.shape[0] * n_per_image
    mean = jnp.sum(s, axis=0) / n_total                 # (C,)
    img_mean = s / n_per_image
    between = jnp.sum((img_mean - mean[None, :]) ** 2, axis=0) * n_per_image
    var = (jnp.sum(m2, axis=0) + between) / n_total
    scale = gamma * lax.rsqrt(var + EPS)
    shift = beta - mean * scale
    return scale, shift


def _upsample_pad_matrix(n_in, n_target):
    """(n_target, n_in) dense matrix: bilinear 2x upsample (align_corners=True,
    as nn.Upsample) followed by UpDS's centered zero F.pad."""
    n_up = 2 * n_in
    pad = (n_target - n_up) // 2
    m = np.zeros((n_target, n_in), np.float32)
    sc = (n_in - 1) / (n_up - 1) if n_up > 1 else 0.0
    for r in range(n_up):
        s = r * sc
        i0 = min(int(np.floor(s)), n_in - 1)
        i1 = min(i0 + 1, n_in - 1)
        f = s - i0
        m[pad + r, i0] += 1.0 - f
        m[pad + r, i1] += f
    return jnp.asarray(m)


@functools.partial(jax.jit, static_argnames=("interm_dtype",))
def up_ds_forward(x1, x2, params, *, interm_dtype=jnp.bfloat16):
    """UpDS.forward(x1, x2) with bilinear=True.  NCHW in / NCHW (f32) out.

    interm_dtype: HBM storage dtype of the pre-BN intermediates h1/h2
    (in-kernel compute is always f32); bf16 halves the dominant HBM traffic.
    """
    # TODO(synk): bilinear=False (ConvTranspose2d up-path) not implemented.
    b, c1, h1s, w1s = x1.shape
    _, c2, h, w = x2.shape
    c_in = c1 + c2
    c_mid = params["pw1_w"].shape[0]
    c_out = params["pw2_w"].shape[0]

    wy = _upsample_pad_matrix(h1s, h)            # (H, H1)
    wxt = _upsample_pad_matrix(w1s, w).T         # (W1, W)

    vmem_limit = _vmem_limit_bytes()
    # rough per-step VMEM need: double-buffered I/O blocks + live f32 working set
    est = (2 * (c_in + c_mid + c_out) * h * w * 4
           + (max(c_mid, c_out) + 8) * h * w * 4)
    # TODO(synk): tile over H with halo blocks when whole-image blocks exceed VMEM.
    assert est <= vmem_limit, (est, vmem_limit)
    cparams = _compiler_params(vmem_limit)

    grid = (b,)
    smem = pl.BlockSpec(memory_space=pltpu.MemorySpace.SMEM)

    def img_spec(channels):
        return pl.BlockSpec((1, channels, h, w), lambda bi: (bi, 0, 0, 0))

    def stats_spec(channels):
        # tiny (2, C) partials, written once per image; traffic is negligible.
        return pl.BlockSpec((1, 2, channels), lambda bi: (bi, 0, 0))

    x1_spec = pl.BlockSpec((1, c1, h1s, w1s), lambda bi: (bi, 0, 0, 0))
    wy_spec = pl.BlockSpec(wy.shape, lambda bi: (0, 0))
    wxt_spec = pl.BlockSpec(wxt.shape, lambda bi: (0, 0))

    isz = jnp.dtype(interm_dtype).itemsize
    fl_dw = 2 * 9 * h * w
    fl_pw = 2 * h * w

    # ---- stage 1: concat(x2, up(x1)) -> DSConv1 (pre-BN) + BN partial stats ----
    cost1 = pl.CostEstimate(
        flops=int(b * (c_in * fl_dw + c_in * c_mid * fl_pw
                       + c1 * 2 * (h1s * w1s * w + h * h1s * w))),
        transcendentals=0,
        bytes_accessed=int(b * (c2 * h * w * 4 + c1 * h1s * w1s * 4
                                + c_mid * h * w * isz)),
    )
    h1, st1 = pl.pallas_call(
        _stage1_kernel,
        grid=grid,
        in_specs=[img_spec(c2), x1_spec, wy_spec, wxt_spec, smem, smem, smem, smem],
        out_specs=[img_spec(c_mid), stats_spec(c_mid)],
        out_shape=[jax.ShapeDtypeStruct((b, c_mid, h, w), interm_dtype),
                   jax.ShapeDtypeStruct((b, 2, c_mid), jnp.float32)],
        compiler_params=cparams,
        cost_estimate=cost1,
    )(x2, x1, wy, wxt,
      params["dw1_w"], params["dw1_b"], params["pw1_w"], params["pw1_b"])

    a1, s1 = _fold_bn(st1, float(h * w), params["bn1_g"], params["bn1_b"])

    # ---- stage 2: BN1+ReLU (folded into load) -> DSConv2 (pre-BN) + stats ----
    cost2 = pl.CostEstimate(
        flops=int(b * (c_mid * fl_dw + c_mid * c_out * fl_pw)),
        transcendentals=0,
        bytes_accessed=int(b * h * w * (c_mid + c_out) * isz),
    )
    h2, st2 = pl.pallas_call(
        _stage2_kernel,
        grid=grid,
        in_specs=[img_spec(c_mid), smem, smem, smem, smem, smem, smem],
        out_specs=[img_spec(c_out), stats_spec(c_out)],
        out_shape=[jax.ShapeDtypeStruct((b, c_out, h, w), interm_dtype),
                   jax.ShapeDtypeStruct((b, 2, c_out), jnp.float32)],
        compiler_params=cparams,
        cost_estimate=cost2,
    )(h1, a1, s1,
      params["dw2_w"], params["dw2_b"], params["pw2_w"], params["pw2_b"])

    a2, s2 = _fold_bn(st2, float(h * w), params["bn2_g"], params["bn2_b"])

    # ---- stage 3: BN2 + ReLU -> f32 output (whole-image blocks) ----
    cost3 = pl.CostEstimate(
        flops=int(b * c_out * h * w * 2),
        transcendentals=0,
        bytes_accessed=int(b * c_out * h * w * (isz + 4)),
    )
    out = pl.pallas_call(
        _bn_relu_kernel,
        grid=grid,
        in_specs=[img_spec(c_out), smem, smem],
        out_specs=img_spec(c_out),
        out_shape=jax.ShapeDtypeStruct((b, c_out, h, w), jnp.float32),
        compiler_params=cparams,
        cost_estimate=cost3,
    )(h2, a2, s2)
    return out


# --------------------------------------------------------------------------
# parameters + pure-JAX reference (for correctness cross-check)
# --------------------------------------------------------------------------
def init_params(key, in_channels, out_channels):
    """Kernel-layout params.  depthwise: (C, 9) [c, ky*3+kx]; pointwise: (Co, Ci)."""
    mid = in_channels // 2
    ks = jax.random.split(key, 12)

    def nrm(k, shape, scale=0.1):
        return jax.random.normal(k, shape, jnp.float32) * scale

    return dict(
        dw1_w=nrm(ks[0], (in_channels, 1, 3, 3)).reshape(in_channels, 9),
        dw1_b=nrm(ks[1], (in_channels,)),
        pw1_w=nrm(ks[2], (mid, in_channels)),
        pw1_b=nrm(ks[3], (mid,)),
        bn1_g=1.0 + nrm(ks[4], (mid,)),
        bn1_b=nrm(ks[5], (mid,)),
        dw2_w=nrm(ks[6], (mid, 1, 3, 3)).reshape(mid, 9),
        dw2_b=nrm(ks[7], (mid,)),
        pw2_w=nrm(ks[8], (out_channels, mid)),
        pw2_b=nrm(ks[9], (out_channels,)),
        bn2_g=1.0 + nrm(ks[10], (out_channels,)),
        bn2_b=nrm(ks[11], (out_channels,)),
    )


def _bilinear_up2_align_corners(x):
    """NCHW, scale_factor=2, mode='bilinear', align_corners=True (nn.Upsample)."""
    b, c, h, w = x.shape
    ho, wo = 2 * h, 2 * w

    def coords(n_in, n_out):
        sc = (n_in - 1) / (n_out - 1) if n_out > 1 else 0.0
        s = jnp.arange(n_out, dtype=jnp.float32) * sc
        i0 = jnp.clip(jnp.floor(s).astype(jnp.int32), 0, n_in - 1)
        i1 = jnp.clip(i0 + 1, 0, n_in - 1)
        return i0, i1, s - i0.astype(jnp.float32)

    y0, y1, wy = coords(h, ho)
    x0, x1, wx = coords(w, wo)
    rows = (x[:, :, y0, :] * (1.0 - wy)[None, None, :, None]
            + x[:, :, y1, :] * wy[None, None, :, None])
    return (rows[:, :, :, x0] * (1.0 - wx)[None, None, None, :]
            + rows[:, :, :, x1] * wx[None, None, None, :])


def _ref_double_conv(x, p):
    def dsconv(x, dw, db, pw, pb):
        _, _, hh, ww = x.shape
        xp = jnp.pad(x, ((0, 0), (0, 0), (1, 1), (1, 1)))
        acc = jnp.zeros_like(x)
        for ky in range(3):
            for kx in range(3):
                acc = acc + (xp[:, :, ky:ky + hh, kx:kx + ww]
                             * dw[:, 3 * ky + kx][None, :, None, None])
        acc = acc + db[None, :, None, None]
        return jnp.einsum("bchw,oc->bohw", acc, pw) + pb[None, :, None, None]

    def bn_relu(y, g, bb):
        mean = y.mean(axis=(0, 2, 3), keepdims=True)
        var = ((y - mean) ** 2).mean(axis=(0, 2, 3), keepdims=True)
        yn = (y - mean) / jnp.sqrt(var + EPS)
        return jnp.maximum(yn * g[None, :, None, None] + bb[None, :, None, None], 0.0)

    h = bn_relu(dsconv(x, p["dw1_w"], p["dw1_b"], p["pw1_w"], p["pw1_b"]),
                p["bn1_g"], p["bn1_b"])
    return bn_relu(dsconv(h, p["dw2_w"], p["dw2_b"], p["pw2_w"], p["pw2_b"]),
                   p["bn2_g"], p["bn2_b"])


if __name__ == "__main__":
    key = jax.random.PRNGKey(0)
    k1, k2, kp = jax.random.split(key, 3)

    in_channels, out_channels = 8, 4          # UpDS(8, 4, bilinear=True)
    batch = 2
    h1sp, w1sp = 16, 64                       # x1 spatial; output is 32 x 128 (lane-dense)
    x1 = jax.random.normal(k1, (batch, in_channels // 2, h1sp, w1sp), jnp.float32)
    x2 = jax.random.normal(k2, (batch, in_channels // 2, 2 * h1sp, 2 * w1sp), jnp.float32)
    params = init_params(kp, in_channels, out_channels)

    # performance configuration: bf16 HBM intermediates (default)
    out = up_ds_forward(x1, x2, params)
    out = jax.block_until_ready(out)
    assert out.shape == (batch, out_channels, 2 * h1sp, 2 * w1sp)

    # correctness cross-check against plain JAX (same math, XLA ops)
    xcat = jnp.concatenate([x2, _bilinear_up2_align_corners(x1)], axis=1)
    ref = _ref_double_conv(xcat, params)

    # f32-intermediate run: tight check of the kernel math
    out_f32 = up_ds_forward(x1, x2, params, interm_dtype=jnp.float32)
    err32 = float(jnp.max(jnp.abs(out_f32 - ref)))
    assert jnp.allclose(out_f32, ref, atol=2e-2, rtol=2e-2), err32

    # bf16-intermediate run: pre-BN quantization (~2^-9 rel.) gets rescaled by the
    # BatchNorm fold, so only a loose tolerance is meaningful here.
    errbf = float(jnp.max(jnp.abs(out - ref)))
    assert jnp.allclose(out, ref, atol=1e-1, rtol=1e-1), errbf

    print("KERNEL_OK")
</pallas_src>

<mosaic_0001>
module attributes {stable_mosaic.version = 11 : i64} {
  func.func @_stage1_kernel(%arg0: i32, %arg1: memref<1x4x32x128xf32, #tpu.memory_space<vmem>>, %arg2: memref<1x4x16x64xf32, #tpu.memory_space<vmem>>, %arg3: memref<32x16xf32, #tpu.memory_space<vmem>>, %arg4: memref<64x128xf32, #tpu.memory_space<vmem>>, %arg5: memref<8x9xf32, #tpu.memory_space<smem>>, %arg6: memref<8xf32, #tpu.memory_space<smem>>, %arg7: memref<4x8xf32, #tpu.memory_space<smem>>, %arg8: memref<4xf32, #tpu.memory_space<smem>>, %arg9: memref<1x4x32x128xbf16, #tpu.memory_space<vmem>>, %arg10: memref<1x2x4xf32, #tpu.memory_space<vmem>>) attributes {dimension_semantics = [#tpu.dimension_semantics<parallel>], iteration_bounds = array<i64: 2>, scalar_prefetch = 0 : i64, scratch_operands = 0 : i64, tpu.core_type = #tpu.core_type<tc>, window_params = [{transform_indices = @transform_0, window_bounds = array<i64: 1, 4, 32, 128>}, {transform_indices = @transform_1, window_bounds = array<i64: 1, 4, 16, 64>}, {pipeline_mode = #tpu.pipeline_mode<synchronous>, transform_indices = @transform_2, window_bounds = array<i64: 32, 16>}, {pipeline_mode = #tpu.pipeline_mode<synchronous>, transform_indices = @transform_3, window_bounds = array<i64: 64, 128>}, {transform_indices = @transform_4, window_bounds = array<i64: 8, 9>}, {transform_indices = @transform_5, window_bounds = array<i64: 8>}, {transform_indices = @transform_6, window_bounds = array<i64: 4, 8>}, {transform_indices = @transform_7, window_bounds = array<i64: 4>}, {transform_indices = @transform_8, window_bounds = array<i64: 1, 4, 32, 128>}, {transform_indices = @transform_9, window_bounds = array<i64: 1, 2, 4>}]} {
    %cst = arith.constant 0.000000e+00 : f32
    %0 = vector.broadcast %cst : f32 to vector<32x128xf32>
    %cst_0 = arith.constant 0.000000e+00 : f32
    %1 = vector.broadcast %cst_0 : f32 to vector<32x128xf32>
    %cst_1 = arith.constant 0.000000e+00 : f32
    %2 = vector.broadcast %cst_1 : f32 to vector<32x128xf32>
    %cst_2 = arith.constant 0.000000e+00 : f32
    %3 = vector.broadcast %cst_2 : f32 to vector<32x128xf32>
    %c0 = arith.constant 0 : index
    %c0_3 = arith.constant 0 : index
    %c0_4 = arith.constant 0 : index
    %c0_5 = arith.constant 0 : index
    %4 = vector.load %arg1[%c0, %c0_3, %c0_4, %c0_5] : memref<1x4x32x128xf32, #tpu.memory_space<vmem>>, vector<1x1x32x128xf32>
    %5 = vector.shape_cast %4 : vector<1x1x32x128xf32> to vector<32x128xf32>
    %cst_6 = arith.constant 0.000000e+00 : f32
    %6 = vector.broadcast %cst_6 : f32 to vector<1x128xf32>
    %7 = vector.extract_strided_slice %5 {offsets = [0, 0], sizes = [31, 128], strides = [1, 1]} : vector<32x128xf32> to vector<31x128xf32>
    %8 = tpu.concatenate %6, %7 in 0 : vector<1x128xf32>, vector<31x128xf32> -> vector<32x128xf32>
    %cst_7 = arith.constant 0.000000e+00 : f32
    %9 = vector.broadcast %cst_7 : f32 to vector<1x128xf32>
    %10 = vector.extract_strided_slice %5 {offsets = [1, 0], sizes = [31, 128], strides = [1, 1]} : vector<32x128xf32> to vector<31x128xf32>
    %11 = tpu.concatenate %10, %9 in 0 : vector<31x128xf32>, vector<1x128xf32> -> vector<32x128xf32>
    %cst_8 = arith.constant 0.000000e+00 : f32
    %12 = vector.broadcast %cst_8 : f32 to vector<32x128xf32>
    %c0_9 = arith.constant 0 : index
    %c0_10 = arith.constant 0 : index
    %13 = memref.load %arg5[%c0_9, %c0_10] : memref<8x9xf32, #tpu.memory_space<smem>>
    %cst_11 = arith.constant 0.000000e+00 : f32
    %14 = vector.broadcast %cst_11 : f32 to vector<32x1xf32>
    %15 = vector.extract_strided_slice %8 {offsets = [0, 0], sizes = [32, 127], strides = [1, 1]} : vector<32x128xf32> to vector<32x127xf32>
    %16 = tpu.concatenate %14, %15 in 1 : vector<32x1xf32>, vector<32x127xf32> -> vector<32x128xf32>
    %17 = vector.broadcast %13 : f32 to vector<32x128xf32>
    %18 = arith.mulf %17, %16 : vector<32x128xf32>
    %19 = arith.addf %12, %18 : vector<32x128xf32>
    %c0_12 = arith.constant 0 : index
    %c1 = arith.constant 1 : index
    %20 = memref.load %arg5[%c0_12, %c1] : memref<8x9xf32, #tpu.memory_space<smem>>
    %21 = vector.broadcast %20 : f32 to vector<32x128xf32>
    %22 = arith.mulf %21, %8 : vector<32x128xf32>
    %23 = arith.addf %19, %22 : vector<32x128xf32>
    %c0_13 = arith.constant 0 : index
    %c2 = arith.constant 2 : index
    %24 = memref.load %arg5[%c0_13, %c2] : memref<8x9xf32, #tpu.memory_space<smem>>
    %cst_14 = arith.constant 0.000000e+00 : f32
    %25 = vector.broadcast %cst_14 : f32 to vector<32x1xf32>
    %26 = vector.extract_strided_slice %8 {offsets = [0, 1], sizes = [32, 127], strides = [1, 1]} : vector<32x128xf32> to vector<32x127xf32>
    %27 = tpu.concatenate %26, %25 in 1 : vector<32x127xf32>, vector<32x1xf32> -> vector<32x128xf32>
    %28 = vector.broadcast %24 : f32 to vector<32x128xf32>
    %29 = arith.mulf %28, %27 : vector<32x128xf32>
    %30 = arith.addf %23, %29 : vector<32x128xf32>
    %c0_15 = arith.constant 0 : index
    %c3 = arith.constant 3 : index
    %31 = memref.load %arg5[%c0_15, %c3] : memref<8x9xf32, #tpu.memory_space<smem>>
    %cst_16 = arith.constant 0.000000e+00 : f32
    %32 = vector.broadcast %cst_16 : f32 to vector<32x1xf32>
    %33 = vector.extract_strided_slice %5 {offsets = [0, 0], sizes = [32, 127], strides = [1, 1]} : vector<32x128xf32> to vector<32x127xf32>
    %34 = tpu.concatenate %32, %33 in 1 : vector<32x1xf32>, vector<32x127xf32> -> vector<32x128xf32>
    %35 = vector.broadcast %31 : f32 to vector<32x128xf32>
    %36 = arith.mulf %35, %34 : vector<32x128xf32>
    %37 = arith.addf %30, %36 : vector<32x128xf32>
    %c0_17 = arith.constant 0 : index
    %c4 = arith.constant 4 : index
    %38 = memref.load %arg5[%c0_17, %c4] : memref<8x9xf32, #tpu.memory_space<smem>>
    %39 = vector.broadcast %38 : f32 to vector<32x128xf32>
    %40 = arith.mulf %39, %5 : vector<32x128xf32>
    %41 = arith.addf %37, %40 : vector<32x128xf32>
    %c0_18 = arith.constant 0 : index
    %c5 = arith.constant 5 : index
    %42 = memref.load %arg5[%c0_18, %c5] : memref<8x9xf32, #tpu.memory_space<smem>>
    %cst_19 = arith.constant 0.000000e+00 : f32
    %43 = vector.broadcast %cst_19 : f32 to vector<32x1xf32>
    %44 = vector.extract_strided_slice %5 {offsets = [0, 1], sizes = [32, 127], strides = [1, 1]} : vector<32x128xf32> to vector<32x127xf32>
    %45 = tpu.concatenate %44, %43 in 1 : vector<32x127xf32>, vector<32x1xf32> -> vector<32x128xf32>
    %46 = vector.broadcast %42 : f32 to vector<32x128xf32>
    %47 = arith.mulf %46, %45 : vector<32x128xf32>
    %48 = arith.addf %41, %47 : vector<32x128xf32>
    %c0_20 = arith.constant 0 : index
    %c6 = arith.constant 6 : index
    %49 = memref.load %arg5[%c0_20, %c6] : memref<8x9xf32, #tpu.memory_space<smem>>
    %cst_21 = arith.constant 0.000000e+00 : f32
    %50 = vector.broadcast %cst_21 : f32 to vector<32x1xf32>
    %51 = vector.extract_strided_slice %11 {offsets = [0, 0], sizes = [32, 127], strides = [1, 1]} : vector<32x128xf32> to vector<32x127xf32>
    %52 = tpu.concatenate %50, %51 in 1 : vector<32x1xf32>, vector<32x127xf32> -> vector<32x128xf32>
    %53 = vector.broadcast %49 : f32 to vector<32x128xf32>
    %54 = arith.mulf %53, %52 : vector<32x128xf32>
    %55 = arith.addf %48, %54 : vector<32x128xf32>
    %c0_22 = arith.constant 0 : index
    %c7 = arith.constant 7 : index
    %56 = memref.load %arg5[%c0_22, %c7] : memref<8x9xf32, #tpu.memory_space<smem>>
    %57 = vector.broadcast %56 : f32 to vector<32x128xf32>
    %58 = arith.mulf %57, %11 : vector<32x128xf32>
    %59 = arith.addf %55, %58 : vector<32x128xf32>
    %c0_23 = arith.constant 0 : index
    %c8 = arith.constant 8 : index
    %60 = memref.load %arg5[%c0_23, %c8] : memref<8x9xf32, #tpu.memory_space<smem>>
    %cst_24 = arith.constant 0.000000e+00 : f32
    %61 = vector.broadcast %cst_24 : f32 to vector<32x1xf32>
    %62 = vector.extract_strided_slice %11 {offsets = [0, 1], sizes = [32, 127], strides = [1, 1]} : vector<32x128xf32> to vector<32x127xf32>
    %63 = tpu.concatenate %62, %61 in 1 : vector<32x127xf32>, vector<32x1xf32> -> vector<32x128xf32>
    %64 = vector.broadcast %60 : f32 to vector<32x128xf32>
    %65 = arith.mulf %64, %63 : vector<32x128xf32>
    %66 = arith.addf %59, %65 : vector<32x128xf32>
    %c0_25 = arith.constant 0 : index
    %67 = memref.load %arg6[%c0_25] : memref<8xf32, #tpu.memory_space<smem>>
    %68 = vector.broadcast %67 : f32 to vector<32x128xf32>
    %69 = arith.addf %66, %68 : vector<32x128xf32>
    %c0_26 = arith.constant 0 : index
    %c0_27 = arith.constant 0 : index
    %70 = memref.load %arg7[%c0_26, %c0_27] : memref<4x8xf32, #tpu.memory_space<smem>>
    %71 = vector.broadcast %70 : f32 to vector<32x128xf32>
    %72 = arith.mulf %71, %69 : vector<32x128xf32>
    %73 = arith.addf %0, %72 : vector<32x128xf32>
    %c1_28 = arith.constant 1 : index
    %c0_29 = arith.constant 0 : index
    %74 = memref.load %arg7[%c1_28, %c0_29] : memref<4x8xf32, #tpu.memory_space<smem>>
    %75 = vector.broadcast %74 : f32 to vector<32x128xf32>
    %76 = arith.mulf %75, %69 : vector<32x128xf32>
    %77 = arith.addf %1, %76 : vector<32x128xf32>
    %c2_30 = arith.constant 2 : index
    %c0_31 = arith.constant 0 : index
    %78 = memref.load %arg7[%c2_30, %c0_31] : memref<4x8xf32, #tpu.memory_space<smem>>
    %79 = vector.broadcast %78 : f32 to vector<32x128xf32>
    %80 = arith.mulf %79, %69 : vector<32x128xf32>
    %81 = arith.addf %2, %80 : vector<32x128xf32>
    %c3_32 = arith.constant 3 : index
    %c0_33 = arith.constant 0 : index
    %82 = memref.load %arg7[%c3_32, %c0_33] : memref<4x8xf32, #tpu.memory_space<smem>>
    %83 = vector.broadcast %82 : f32 to vector<32x128xf32>
    %84 = arith.mulf %83, %69 : vector<32x128xf32>
    %85 = arith.addf %3, %84 : vector<32x128xf32>
    %c0_34 = arith.constant 0 : index
    %c1_35 = arith.constant 1 : index
    %c0_36 = arith.constant 0 : index
    %c0_37 = arith.constant 0 : index
    %86 = vector.load %arg1[%c0_34, %c1_35, %c0_36, %c0_37] : memref<1x4x32x128xf32, #tpu.memory_space<vmem>>, vector<1x1x32x128xf32>
    %87 = vector.shape_cast %86 : vector<1x1x32x128xf32> to vector<32x128xf32>
    %cst_38 = arith.constant 0.000000e+00 : f32
    %88 = vector.broadcast %cst_38 : f32 to vector<1x128xf32>
    %89 = vector.extract_strided_slice %87 {offsets = [0, 0], sizes = [31, 128], strides = [1, 1]} : vector<32x128xf32> to vector<31x128xf32>
    %90 = tpu.concatenate %88, %89 in 0 : vector<1x128xf32>, vector<31x128xf32> -> vector<32x128xf32>
    %cst_39 = arith.constant 0.000000e+00 : f32
    %91 = vector.broadcast %cst_39 : f32 to vector<1x128xf32>
    %92 = vector.extract_strided_slice %87 {offsets = [1, 0], sizes = [31, 128], strides = [1, 1]} : vector<32x128xf32> to vector<31x128xf32>
    %93 = tpu.concatenate %92, %91 in 0 : vector<31x128xf32>, vector<1x128xf32> -> vector<32x128xf32>
    %cst_40 = arith.constant 0.000000e+00 : f32
    %94 = vector.broadcast %cst_40 : f32 to vector<32x128xf32>
    %c1_41 = arith.constant 1 : index
    %c0_42 = arith.constant 0 : index
    %95 = memref.load %arg5[%c1_41, %c0_42] : memref<8x9xf32, #tpu.memory_space<smem>>
    %cst_43 = arith.constant 0.000000e+00 : f32
    %96 = vector.broadcast %cst_43 : f32 to vector<32x1xf32>
    %97 = vector.extract_strided_slice %90 {offsets = [0, 0], sizes = [32, 127], strides = [1, 1]} : vector<32x128xf32> to vector<32x127xf32>
    %98 = tpu.concatenate %96, %97 in 1 : vector<32x1xf32>, vector<32x127xf32> -> vector<32x128xf32>
    %99 = vector.broadcast %95 : f32 to vector<32x128xf32>
    %100 = arith.mulf %99, %98 : vector<32x128xf32>
    %101 = arith.addf %94, %100 : vector<32x128xf32>
    %c1_44 = arith.constant 1 : index
    %c1_45 = arith.constant 1 : index
    %102 = memref.load %arg5[%c1_44, %c1_45] : memref<8x9xf32, #tpu.memory_space<smem>>
    %103 = vector.broadcast %102 : f32 to vector<32x128xf32>
    %104 = arith.mulf %103, %90 : vector<32x128xf32>
    %105 = arith.addf %101, %104 : vector<32x128xf32>
    %c1_46 = arith.constant 1 : index
    %c2_47 = arith.constant 2 : index
    %106 = memref.load %arg5[%c1_46, %c2_47] : memref<8x9xf32, #tpu.memory_space<smem>>
    %cst_48 = arith.constant 0.000000e+00 : f32
    %107 = vector.broadcast %cst_48 : f32 to vector<32x1xf32>
    %108 = vector.extract_strided_slice %90 {offsets = [0, 1], sizes = [32, 127], strides = [1, 1]} : vector<32x128xf32> to vector<32x127xf32>
    %109 = tpu.concatenate %108, %107 in 1 : vector<32x127xf32>, vector<32x1xf32> -> vector<32x128xf32>
    %110 = vector.broadcast %106 : f32 to vector<32x128xf32>
    %111 = arith.mulf %110, %109 : vector<32x128xf32>
    %112 = arith.addf %105, %111 : vector<32x128xf32>
    %c1_49 = arith.constant 1 : index
    %c3_50 = arith.constant 3 : index
    %113 = memref.load %arg5[%c1_49, %c3_50] : memref<8x9xf32, #tpu.memory_space<smem>>
    %cst_51 = arith.constant 0.000000e+00 : f32
    %114 = vector.broadcast %cst_51 : f32 to vector<32x1xf32>
    %115 = vector.extract_strided_slice %87 {offsets = [0, 0], sizes = [32, 127], strides = [1, 1]} : vector<32x128xf32> to vector<32x127xf32>
    %116 = tpu.concatenate %114, %115 in 1 : vector<32x1xf32>, vector<32x127xf32> -> vector<32x128xf32>
    %117 = vector.broadcast %113 : f32 to vector<32x128xf32>
    %118 = arith.mulf %117, %116 : vector<32x128xf32>
    %119 = arith.addf %112, %118 : vector<32x128xf32>
    %c1_52 = arith.constant 1 : index
    %c4_53 = arith.constant 4 : index
    %120 = memref.load %arg5[%c1_52, %c4_53] : memref<8x9xf32, #tpu.memory_space<smem>>
    %121 = vector.broadcast %120 : f32 to vector<32x128xf32>
    %122 = arith.mulf %121, %87 : vector<32x128xf32>
    %123 = arith.addf %119, %122 : vector<32x128xf32>
    %c1_54 = arith.constant 1 : index
    %c5_55 = arith.constant 5 : index
    %124 = memref.load %arg5[%c1_54, %c5_55] : memref<8x9xf32, #tpu.memory_space<smem>>
    %cst_56 = arith.constant 0.000000e+00 : f32
    %125 = vector.broadcast %cst_56 : f32 to vector<32x1xf32>
    %126 = vector.extract_strided_slice %87 {offsets = [0, 1], sizes = [32, 127], strides = [1, 1]} : vector<32x128xf32> to vector<32x127xf32>
    %127 = tpu.concatenate %126, %125 in 1 : vector<32x127xf32>, vector<32x1xf32> -> vector<32x128xf32>
    %128 = vector.broadcast %124 : f32 to vector<32x128xf32>
    %129 = arith.mulf %128, %127 : vector<32x128xf32>
    %130 = arith.addf %123, %129 : vector<32x128xf32>
    %c1_57 = arith.constant 1 : index
    %c6_58 = arith.constant 6 : index
    %131 = memref.load %arg5[%c1_57, %c6_58] : memref<8x9xf32, #tpu.memory_space<smem>>
    %cst_59 = arith.constant 0.000000e+00 : f32
    %132 = vector.broadcast %cst_59 : f32 to vector<32x1xf32>
    %133 = vector.extract_strided_slice %93 {offsets = [0, 0], sizes = [32, 127], strides = [1, 1]} : vector<32x128xf32> to vector<32x127xf32>
    %134 = tpu.concatenate %132, %133 in 1 : vector<32x1xf32>, vector<32x127xf32> -> vector<32x128xf32>
    %135 = vector.broadcast %131 : f32 to vector<32x128xf32>
    %136 = arith.mulf %135, %134 : vector<32x128xf32>
    %137 = arith.addf %130, %136 : vector<32x128xf32>
    %c1_60 = arith.constant 1 : index
    %c7_61 = arith.constant 7 : index
    %138 = memref.load %arg5[%c1_60, %c7_61] : memref<8x9xf32, #tpu.memory_space<smem>>
    %139 = vector.broadcast %138 : f32 to vector<32x128xf32>
    %140 = arith.mulf %139, %93 : vector<32x128xf32>
    %141 = arith.addf %137, %140 : vector<32x128xf32>
    %c1_62 = arith.constant 1 : index
    %c8_63 = arith.constant 8 : index
    %142 = memref.load %arg5[%c1_62, %c8_63] : memref<8x9xf32, #tpu.memory_space<smem>>
    %cst_64 = arith.constant 0.000000e+00 : f32
    %143 = vector.broadcast %cst_64 : f32 to vector<32x1xf32>
    %144 = vector.extract_strided_slice %93 {offsets = [0, 1], sizes = [32, 127], strides = [1, 1]} : vector<32x128xf32> to vector<32x127xf32>
    %145 = tpu.concatenate %144, %143 in 1 : vector<32x127xf32>, vector<32x1xf32> -> vector<32x128xf32>
    %146 = vector.broadcast %142 : f32 to vector<32x128xf32>
    %147 = arith.mulf %146, %145 : vector<32x128xf32>
    %148 = arith.addf %141, %147 : vector<32x128xf32>
    %c1_65 = arith.constant 1 : index
    %149 = memref.load %arg6[%c1_65] : memref<8xf32, #tpu.memory_space<smem>>
    %150 = vector.broadcast %149 : f32 to vector<32x128xf32>
    %151 = arith.addf %148, %150 : vector<32x128xf32>
    %c0_66 = arith.constant 0 : index
    %c1_67 = arith.constant 1 : index
    %152 = memref.load %arg7[%c0_66, %c1_67] : memref<4x8xf32, #tpu.memory_space<smem>>
    %153 = vector.broadcast %152 : f32 to vector<32x128xf32>
    %154 = arith.mulf %153, %151 : vector<32x128xf32>
    %155 = arith.addf %73, %154 : vector<32x128xf32>
    %c1_68 = arith.constant 1 : index
    %c1_69 = arith.constant 1 : index
    %156 = memref.load %arg7[%c1_68, %c1_69] : memref<4x8xf32, #tpu.memory_space<smem>>
    %157 = vector.broadcast %156 : f32 to vector<32x128xf32>
    %158 = arith.mulf %157, %151 : vector<32x128xf32>
    %159 = arith.addf %77, %158 : vector<32x128xf32>
    %c2_70 = arith.constant 2 : index
    %c1_71 = arith.constant 1 : index
    %160 = memref.load %arg7[%c2_70, %c1_71] : memref<4x8xf32, #tpu.memory_space<smem>>
    %161 = vector.broadcast %160 : f32 to vector<32x128xf32>
    %162 = arith.mulf %161, %151 : vector<32x128xf32>
    %163 = arith.addf %81, %162 : vector<32x128xf32>
    %c3_72 = arith.constant 3 : index
    %c1_73 = arith.constant 1 : index
    %164 = memref.load %arg7[%c3_72, %c1_73] : memref<4x8xf32, #tpu.memory_space<smem>>
    %165 = vector.broadcast %164 : f32 to vector<32x128xf32>
    %166 = arith.mulf %165, %151 : vector<32x128xf32>
    %167 = arith.addf %85, %166 : vector<32x128xf32>
    %c0_74 = arith.constant 0 : index
    %c2_75 = arith.constant 2 : index
    %c0_76 = arith.constant 0 : index
    %c0_77 = arith.constant 0 : index
    %168 = vector.load %arg1[%c0_74, %c2_75, %c0_76, %c0_77] : memref<1x4x32x128xf32, #tpu.memory_space<vmem>>, vector<1x1x32x128xf32>
    %169 = vector.shape_cast %168 : vector<1x1x32x128xf32> to vector<32x128xf32>
    %cst_78 = arith.constant 0.000000e+00 : f32
    %170 = vector.broadcast %cst_78 : f32 to vector<1x128xf32>
    %171 = vector.extract_strided_slice %169 {offsets = [0, 0], sizes = [31, 128], strides = [1, 1]} : vector<32x128xf32> to vector<31x128xf32>
    %172 = tpu.concatenate %170, %171 in 0 : vector<1x128xf32>, vector<31x128xf32> -> vector<32x128xf32>
    %cst_79 = arith.constant 0.000000e+00 : f32
    %173 = vector.broadcast %cst_79 : f32 to vector<1x128xf32>
    %174 = vector.extract_strided_slice %169 {offsets = [1, 0], sizes = [31, 128], strides = [1, 1]} : vector<32x128xf32> to vector<31x128xf32>
    %175 = tpu.concatenate %174, %173 in 0 : vector<31x128xf32>, vector<1x128xf32> -> vector<32x128xf32>
    %cst_80 = arith.constant 0.000000e+00 : f32
    %176 = vector.broadcast %cst_80 : f32 to vector<32x128xf32>
    %c2_81 = arith.constant 2 : index
    %c0_82 = arith.constant 0 : index
    %177 = memref.load %arg5[%c2_81, %c0_82] : memref<8x9xf32, #tpu.memory_space<smem>>
    %cst_83 = arith.constant 0.000000e+00 : f32
    %178 = vector.broadcast %cst_83 : f32 to vector<32x1xf32>
    %179 = vector.extract_strided_slice %172 {offsets = [0, 0], sizes = [32, 127], strides = [1, 1]} : vector<32x128xf32> to vector<32x127xf32>
    %180 = tpu.concatenate %178, %179 in 1 : vector<32x1xf32>, vector<32x127xf32> -> vector<32x128xf32>
    %181 = vector.broadcast %177 : f32 to vector<32x128xf32>
    %182 = arith.mulf %181, %180 : vector<32x128xf32>
    %183 = arith.addf %176, %182 : vector<32x128xf32>
    %c2_84 = arith.constant 2 : index
    %c1_85 = arith.constant 1 : index
    %184 = memref.load %arg5[%c2_84, %c1_85] : memref<8x9xf32, #tpu.memory_space<smem>>
    %185 = vector.broadcast %184 : f32 to vector<32x128xf32>
    %186 = arith.mulf %185, %172 : vector<32x128xf32>
    %187 = arith.addf %183, %186 : vector<32x128xf32>
    %c2_86 = arith.constant 2 : index
    %c2_87 = arith.constant 2 : index
    %188 = memref.load %arg5[%c2_86, %c2_87] : memref<8x9xf32, #tpu.memory_space<smem>>
    %cst_88 = arith.constant 0.000000e+00 : f32
    %189 = vector.broadcast %cst_88 : f32 to vector<32x1xf32>
    %190 = vector.extract_strided_slice %172 {offsets = [0, 1], sizes = [32, 127], strides = [1, 1]} : vector<32x128xf32> to vector<32x127xf32>
    %191 = tpu.concatenate %190, %189 in 1 : vector<32x127xf32>, vector<32x1xf32> -> vector<32x128xf32>
    %192 = vector.broadcast %188 : f32 to vector<32x128xf32>
    %193 = arith.mulf %192, %191 : vector<32x128xf32>
    %194 = arith.addf %187, %193 : vector<32x128xf32>
    %c2_89 = arith.constant 2 : index
    %c3_90 = arith.constant 3 : index
    %195 = memref.load %arg5[%c2_89, %c3_90] : memref<8x9xf32, #tpu.memory_space<smem>>
    %cst_91 = arith.constant 0.000000e+00 : f32
    %196 = vector.broadcast %cst_91 : f32 to vector<32x1xf32>
    %197 = vector.extract_strided_slice %169 {offsets = [0, 0], sizes = [32, 127], strides = [1, 1]} : vector<32x128xf32> to vector<32x127xf32>
    %198 = tpu.concatenate %196, %197 in 1 : vector<32x1xf32>, vector<32x127xf32> -> vector<32x128xf32>
    %199 = vector.broadcast %195 : f32 to vector<32x128xf32>
    %200 = arith.mulf %199, %198 : vector<32x128xf32>
    %201 = arith.addf %194, %200 : vector<32x128xf32>
    %c2_92 = arith.constant 2 : index
    %c4_93 = arith.constant 4 : index
    %202 = memref.load %arg5[%c2_92, %c4_93] : memref<8x9xf32, #tpu.memory_space<smem>>
    %203 = vector.broadcast %202 : f32 to vector<32x128xf32>
    %204 = arith.mulf %203, %169 : vector<32x128xf32>
    %205 = arith.addf %201, %204 : vector<32x128xf32>
    %c2_94 = arith.constant 2 : index
    %c5_95 = arith.constant 5 : index
    %206 = memref.load %arg5[%c2_94, %c5_95] : memref<8x9xf32, #tpu.memory_space<smem>>
    %cst_96 = arith.constant 0.000000e+00 : f32
    %207 = vector.broadcast %cst_96 : f32 to vector<32x1xf32>
    %208 = vector.extract_strided_slice %169 {offsets = [0, 1], sizes = [32, 127], strides = [1, 1]} : vector<32x128xf32> to vector<32x127xf32>
    %209 = tpu.concatenate %208, %207 in 1 : vector<32x127xf32>, vector<32x1xf32> -> vector<32x128xf32>
    %210 = vector.broadcast %206 : f32 to vector<32x128xf32>
    %211 = arith.mulf %210, %209 : vector<32x128xf32>
    %212 = arith.addf %205, %211 : vector<32x128xf32>
    %c2_97 = arith.constant 2 : index
    %c6_98 = arith.constant 6 : index
    %213 = memref.load %arg5[%c2_97, %c6_98] : memref<8x9xf32, #tpu.memory_space<smem>>
    %cst_99 = arith.constant 0.000000e+00 : f32
    %214 = vector.broadcast %cst_99 : f32 to vector<32x1xf32>
    %215 = vector.extract_strided_slice %175 {offsets = [0, 0], sizes = [32, 127], strides = [1, 1]} : vector<32x128xf32> to vector<32x127xf32>
    %216 = tpu.concatenate %214, %215 in 1 : vector<32x1xf32>, vector<32x127xf32> -> vector<32x128xf32>
    %217 = vector.broadcast %213 : f32 to vector<32x128xf32>
    %218 = arith.mulf %217, %216 : vector<32x128xf32>
    %219 = arith.addf %212, %218 : vector<32x128xf32>
    %c2_100 = arith.constant 2 : index
    %c7_101 = arith.constant 7 : index
    %220 = memref.load %arg5[%c2_100, %c7_101] : memref<8x9xf32, #tpu.memory_space<smem>>
    %221 = vector.broadcast %220 : f32 to vector<32x128xf32>
    %222 = arith.mulf %221, %175 : vector<32x128xf32>
    %223 = arith.addf %219, %222 : vector<32x128xf32>
    %c2_102 = arith.constant 2 : index
    %c8_103 = arith.constant 8 : index
    %224 = memref.load %arg5[%c2_102, %c8_103] : memref<8x9xf32, #tpu.memory_space<smem>>
    %cst_104 = arith.constant 0.000000e+00 : f32
    %225 = vector.broadcast %cst_104 : f32 to vector<32x1xf32>
    %226 = vector.extract_strided_slice %175 {offsets = [0, 1], sizes = [32, 127], strides = [1, 1]} : vector<32x128xf32> to vector<32x127xf32>
    %227 = tpu.concatenate %226, %225 in 1 : vector<32x127xf32>, vector<32x1xf32> -> vector<32x128xf32>
    %228 = vector.broadcast %224 : f32 to vector<32x128xf32>
    %229 = arith.mulf %228, %227 : vector<32x128xf32>
    %230 = arith.addf %223, %229 : vector<32x128xf32>
    %c2_105 = arith.constant 2 : index
    %231 = memref.load %arg6[%c2_105] : memref<8xf32, #tpu.memory_space<smem>>
    %232 = vector.broadcast %231 : f32 to vector<32x128xf32>
    %233 = arith.addf %230, %232 : vector<32x128xf32>
    %c0_106 = arith.constant 0 : index
    %c2_107 = arith.constant 2 : index
    %234 = memref.load %arg7[%c0_106, %c2_107] : memref<4x8xf32, #tpu.memory_space<smem>>
    %235 = vector.broadcast %234 : f32 to vector<32x128xf32>
    %236 = arith.mulf %235, %233 : vector<32x128xf32>
    %237 = arith.addf %155, %236 : vector<32x128xf32>
    %c1_108 = arith.constant 1 : index
    %c2_109 = arith.constant 2 : index
    %238 = memref.load %arg7[%c1_108, %c2_109] : memref<4x8xf32, #tpu.memory_space<smem>>
    %239 = vector.broadcast %238 : f32 to vector<32x128xf32>
    %240 = arith.mulf %239, %233 : vector<32x128xf32>
    %241 = arith.addf %159, %240 : vector<32x128xf32>
    %c2_110 = arith.constant 2 : index
    %c2_111 = arith.constant 2 : index
    %242 = memref.load %arg7[%c2_110, %c2_111] : memref<4x8xf32, #tpu.memory_space<smem>>
    %243 = vector.broadcast %242 : f32 to vector<32x128xf32>
    %244 = arith.mulf %243, %233 : vector<32x128xf32>
    %245 = arith.addf %163, %244 : vector<32x128xf32>
    %c3_112 = arith.constant 3 : index
    %c2_113 = arith.constant 2 : index
    %246 = memref.load %arg7[%c3_112, %c2_113] : memref<4x8xf32, #tpu.memory_space<smem>>
    %247 = vector.broadcast %246 : f32 to vector<32x128xf32>
    %248 = arith.mulf %247, %233 : vector<32x128xf32>
    %249 = arith.addf %167, %248 : vector<32x128xf32>
    %c0_114 = arith.constant 0 : index
    %c3_115 = arith.constant 3 : index
    %c0_116 = arith.constant 0 : index
    %c0_117 = arith.constant 0 : index
    %250 = vector.load %arg1[%c0_114, %c3_115, %c0_116, %c0_117] : memref<1x4x32x128xf32, #tpu.memory_space<vmem>>, vector<1x1x32x128xf32>
    %251 = vector.shape_cast %250 : vector<1x1x32x128xf32> to vector<32x128xf32>
    %cst_118 = arith.constant 0.000000e+00 : f32
    %252 = vector.broadcast %cst_118 : f32 to vector<1x128xf32>
    %253 = vector.extract_strided_slice %251 {offsets = [0, 0], sizes = [31, 128], strides = [1, 1]} : vector<32x128xf32> to vector<31x128xf32>
    %254 = tpu.concatenate %252, %253 in 0 : vector<1x128xf32>, vector<31x128xf32> -> vector<32x128xf32>
    %cst_119 = arith.constant 0.000000e+00 : f32
    %255 = vector.broadcast %cst_119 : f32 to vector<1x128xf32>
    %256 = vector.extract_strided_slice %251 {offsets = [1, 0], sizes = [31, 128], strides = [1, 1]} : vector<32x128xf32> to vector<31x128xf32>
    %257 = tpu.concatenate %256, %255 in 0 : vector<31x128xf32>, vector<1x128xf32> -> vector<32x128xf32>
    %cst_120 = arith.constant 0.000000e+00 : f32
    %258 = vector.broadcast %cst_120 : f32 to vector<32x128xf32>
    %c3_121 = arith.constant 3 : index
    %c0_122 = arith.constant 0 : index
    %259 = memref.load %arg5[%c3_121, %c0_122] : memref<8x9xf32, #tpu.memory_space<smem>>
    %cst_123 = arith.constant 0.000000e+00 : f32
    %260 = vector.broadcast %cst_123 : f32 to vector<32x1xf32>
    %261 = vector.extract_strided_slice %254 {offsets = [0, 0], sizes = [32, 127], strides = [1, 1]} : vector<32x128xf32> to vector<32x127xf32>
    %262 = tpu.concatenate %260, %261 in 1 : vector<32x1xf32>, vector<32x127xf32> -> vector<32x128xf32>
    %263 = vector.broadcast %259 : f32 to vector<32x128xf32>
    %264 = arith.mulf %263, %262 : vector<32x128xf32>
    %265 = arith.addf %258, %264 : vector<32x128xf32>
    %c3_124 = arith.constant 3 : index
    %c1_125 = arith.constant 1 : index
    %266 = memref.load %arg5[%c3_124, %c1_125] : memref<8x9xf32, #tpu.memory_space<smem>>
    %267 = vector.broadcast %266 : f32 to vector<32x128xf32>
    %268 = arith.mulf %267, %254 : vector<32x128xf32>
    %269 = arith.addf %265, %268 : vector<32x128xf32>
    %c3_126 = arith.constant 3 : index
    %c2_127 = arith.constant 2 : index
    %270 = memref.load %arg5[%c3_126, %c2_127] : memref<8x9xf32, #tpu.memory_space<smem>>
    %cst_128 = arith.constant 0.000000e+00 : f32
    %271 = vector.broadcast %cst_128 : f32 to vector<32x1xf32>
    %272 = vector.extract_strided_slice %254 {offsets = [0, 1], sizes = [32, 127], strides = [1, 1]} : vector<32x128xf32> to vector<32x127xf32>
    %273 = tpu.concatenate %272, %271 in 1 : vector<32x127xf32>, vector<32x1xf32> -> vector<32x128xf32>
    %274 = vector.broadcast %270 : f32 to vector<32x128xf32>
    %275 = arith.mulf %274, %273 : vector<32x128xf32>
    %276 = arith.addf %269, %275 : vector<32x128xf32>
    %c3_129 = arith.constant 3 : index
    %c3_130 = arith.constant 3 : index
    %277 = memref.load %arg5[%c3_129, %c3_130] : memref<8x9xf32, #tpu.memory_space<smem>>
    %cst_131 = arith.constant 0.000000e+00 : f32
    %278 = vector.broadcast %cst_131 : f32 to vector<32x1xf32>
    %279 = vector.extract_strided_slice %251 {offsets = [0, 0], sizes = [32, 127], strides = [1, 1]} : vector<32x128xf32> to vector<32x127xf32>
    %280 = tpu.concatenate %278, %279 in 1 : vector<32x1xf32>, vector<32x127xf32> -> vector<32x128xf32>
    %281 = vector.broadcast %277 : f32 to vector<32x128xf32>
    %282 = arith.mulf %281, %280 : vector<32x128xf32>
    %283 = arith.addf %276, %282 : vector<32x128xf32>
    %c3_132 = arith.constant 3 : index
    %c4_133 = arith.constant 4 : index
    %284 = memref.load %arg5[%c3_132, %c4_133] : memref<8x9xf32, #tpu.memory_space<smem>>
    %285 = vector.broadcast %284 : f32 to vector<32x128xf32>
    %286 = arith.mulf %285, %251 : vector<32x128xf32>
    %287 = arith.addf %283, %286 : vector<32x128xf32>
    %c3_134 = arith.constant 3 : index
    %c5_135 = arith.constant 5 : index
    %288 = memref.load %arg5[%c3_134, %c5_135] : memref<8x9xf32, #tpu.memory_space<smem>>
    %cst_136 = arith.constant 0.000000e+00 : f32
    %289 = vector.broadcast %cst_136 : f32 to vector<32x1xf32>
    %290 = vector.extract_strided_slice %251 {offsets = [0, 1], sizes = [32, 127], strides = [1, 1]} : vector<32x128xf32> to vector<32x127xf32>
    %291 = tpu.concatenate %290, %289 in 1 : vector<32x127xf32>, vector<32x1xf32> -> vector<32x128xf32>
    %292 = vector.broadcast %288 : f32 to vector<32x128xf32>
    %293 = arith.mulf %292, %291 : vector<32x128xf32>
    %294 = arith.addf %287, %293 : vector<32x128xf32>
    %c3_137 = arith.constant 3 : index
    %c6_138 = arith.constant 6 : index
    %295 = memref.load %arg5[%c3_137, %c6_138] : memref<8x9xf32, #tpu.memory_space<smem>>
    %cst_139 = arith.constant 0.000000e+00 : f32
    %296 = vector.broadcast %cst_139 : f32 to vector<32x1xf32>
    %297 = vector.extract_strided_slice %257 {offsets = [0, 0], sizes = [32, 127], strides = [1, 1]} : vector<32x128xf32> to vector<32x127xf32>
    %298 = tpu.concatenate %296, %297 in 1 : vector<32x1xf32>, vector<32x127xf32> -> vector<32x128xf32>
    %299 = vector.broadcast %295 : f32 to vector<32x128xf32>
    %300 = arith.mulf %299, %298 : vector<32x128xf32>
    %301 = arith.addf %294, %300 : vector<32x128xf32>
    %c3_140 = arith.constant 3 : index
    %c7_141 = arith.constant 7 : index
    %302 = memref.load %arg5[%c3_140, %c7_141] : memref<8x9xf32, #tpu.memory_space<smem>>
    %303 = vector.broadcast %302 : f32 to vector<32x128xf32>
    %304 = arith.mulf %303, %257 : vector<32x128xf32>
    %305 = arith.addf %301, %304 : vector<32x128xf32>
    %c3_142 = arith.constant 3 : index
    %c8_143 = arith.constant 8 : index
    %306 = memref.load %arg5[%c3_142, %c8_143] : memref<8x9xf32, #tpu.memory_space<smem>>
    %cst_144 = arith.constant 0.000000e+00 : f32
    %307 = vector.broadcast %cst_144 : f32 to vector<32x1xf32>
    %308 = vector.extract_strided_slice %257 {offsets = [0, 1], sizes = [32, 127], strides = [1, 1]} : vector<32x128xf32> to vector<32x127xf32>
    %309 = tpu.concatenate %308, %307 in 1 : vector<32x127xf32>, vector<32x1xf32> -> vector<32x128xf32>
    %310 = vector.broadcast %306 : f32 to vector<32x128xf32>
    %311 = arith.mulf %310, %309 : vector<32x128xf32>
    %312 = arith.addf %305, %311 : vector<32x128xf32>
    %c3_145 = arith.constant 3 : index
    %313 = memref.load %arg6[%c3_145] : memref<8xf32, #tpu.memory_space<smem>>
    %314 = vector.broadcast %313 : f32 to vector<32x128xf32>
    %315 = arith.addf %312, %314 : vector<32x128xf32>
    %c0_146 = arith.constant 0 : index
    %c3_147 = arith.constant 3 : index
    %316 = memref.load %arg7[%c0_146, %c3_147] : memref<4x8xf32, #tpu.memory_space<smem>>
    %317 = vector.broadcast %316 : f32 to vector<32x128xf32>
    %318 = arith.mulf %317, %315 : vector<32x128xf32>
    %319 = arith.addf %237, %318 : vector<32x128xf32>
    %c1_148 = arith.constant 1 : index
    %c3_149 = arith.constant 3 : index
    %320 = memref.load %arg7[%c1_148, %c3_149] : memref<4x8xf32, #tpu.memory_space<smem>>
    %321 = vector.broadcast %320 : f32 to vector<32x128xf32>
    %322 = arith.mulf %321, %315 : vector<32x128xf32>
    %323 = arith.addf %241, %322 : vector<32x128xf32>
    %c2_150 = arith.constant 2 : index
    %c3_151 = arith.constant 3 : index
    %324 = memref.load %arg7[%c2_150, %c3_151] : memref<4x8xf32, #tpu.memory_space<smem>>
    %325 = vector.broadcast %324 : f32 to vector<32x128xf32>
    %326 = arith.mulf %325, %315 : vector<32x128xf32>
    %327 = arith.addf %245, %326 : vector<32x128xf32>
    %c3_152 = arith.constant 3 : index
    %c3_153 = arith.constant 3 : index
    %328 = memref.load %arg7[%c3_152, %c3_153] : memref<4x8xf32, #tpu.memory_space<smem>>
    %329 = vector.broadcast %328 : f32 to vector<32x128xf32>
    %330 = arith.mulf %329, %315 : vector<32x128xf32>
    %331 = arith.addf %249, %330 : vector<32x128xf32>
    %c0_154 = arith.constant 0 : index
    %c0_155 = arith.constant 0 : index
    %c0_156 = arith.constant 0 : index
    %c0_157 = arith.constant 0 : index
    %332 = vector.load %arg2[%c0_154, %c0_155, %c0_156, %c0_157] : memref<1x4x16x64xf32, #tpu.memory_space<vmem>>, vector<1x1x16x64xf32>
    %333 = vector.shape_cast %332 : vector<1x1x16x64xf32> to vector<16x64xf32>
    %c0_158 = arith.constant 0 : index
    %c0_159 = arith.constant 0 : index
    %334 = vector.load %arg4[%c0_158, %c0_159] : memref<64x128xf32, #tpu.memory_space<vmem>>, vector<64x128xf32>
    %cst_160 = arith.constant dense<0.000000e+00> : vector<16x128xf32>
    %335 = tpu.matmul %333, %334, %cst_160 {dimension_numbers = #tpu.dot_dimension_numbers<[1], [0], [0], [1], [0, 0, 1, 1], [], []>} : vector<16x64xf32>, vector<64x128xf32>, vector<16x128xf32> -> vector<16x128xf32>
    %c0_161 = arith.constant 0 : index
    %c0_162 = arith.constant 0 : index
    %336 = vector.load %arg3[%c0_161, %c0_162] : memref<32x16xf32, #tpu.memory_space<vmem>>, vector<32x16xf32>
    %cst_163 = arith.constant dense<0.000000e+00> : vector<32x128xf32>
    %337 = tpu.matmul %336, %335, %cst_163 {dimension_numbers = #tpu.dot_dimension_numbers<[1], [0], [0], [1], [0, 0, 1, 1], [], []>} : vector<32x16xf32>, vector<16x128xf32>, vector<32x128xf32> -> vector<32x128xf32>
    %cst_164 = arith.constant 0.000000e+00 : f32
    %338 = vector.broadcast %cst_164 : f32 to vector<1x128xf32>
    %339 = vector.extract_strided_slice %337 {offsets = [0, 0], sizes = [31, 128], strides = [1, 1]} : vector<32x128xf32> to vector<31x128xf32>
    %340 = tpu.concatenate %338, %339 in 0 : vector<1x128xf32>, vector<31x128xf32> -> vector<32x128xf32>
    %cst_165 = arith.constant 0.000000e+00 : f32
    %341 = vector.broadcast %cst_165 : f32 to vector<1x128xf32>
    %342 = vector.extract_strided_slice %337 {offsets = [1, 0], sizes = [31, 128], strides = [1, 1]} : vector<32x128xf32> to vector<31x128xf32>
    %343 = tpu.concatenate %342, %341 in 0 : vector<31x128xf32>, vector<1x128xf32> -> vector<32x128xf32>
    %cst_166 = arith.constant 0.000000e+00 : f32
    %344 = vector.broadcast %cst_166 : f32 to vector<32x128xf32>
    %c4_167 = arith.constant 4 : index
    %c0_168 = arith.constant 0 : index
    %345 = memref.load %arg5[%c4_167, %c0_168] : memref<8x9xf32, #tpu.memory_space<smem>>
    %cst_169 = arith.constant 0.000000e+00 : f32
    %346 = vector.broadcast %cst_169 : f32 to vector<32x1xf32>
    %347 = vector.extract_strided_slice %340 {offsets = [0, 0], sizes = [32, 127], strides = [1, 1]} : vector<32x128xf32> to vector<32x127xf32>
    %348 = tpu.concatenate %346, %347 in 1 : vector<32x1xf32>, vector<32x127xf32> -> vector<32x128xf32>
    %349 = vector.broadcast %345 : f32 to vector<32x128xf32>
    %350 = arith.mulf %349, %348 : vector<32x128xf32>
    %351 = arith.addf %344, %350 : vector<32x128xf32>
    %c4_170 = arith.constant 4 : index
    %c1_171 = arith.constant 1 : index
    %352 = memref.load %arg5[%c4_170, %c1_171] : memref<8x9xf32, #tpu.memory_space<smem>>
    %353 = vector.broadcast %352 : f32 to vector<32x128xf32>
    %354 = arith.mulf %353, %340 : vector<32x128xf32>
    %355 = arith.addf %351, %354 : vector<32x128xf32>
    %c4_172 = arith.constant 4 : index
    %c2_173 = arith.constant 2 : index
    %356 = memref.load %arg5[%c4_172, %c2_173] : memref<8x9xf32, #tpu.memory_space<smem>>
    %cst_174 = arith.constant 0.000000e+00 : f32
    %357 = vector.broadcast %cst_174 : f32 to vector<32x1xf32>
    %358 = vector.extract_strided_slice %340 {offsets = [0, 1], sizes = [32, 127], strides = [1, 1]} : vector<32x128xf32> to vector<32x127xf32>
    %359 = tpu.concatenate %358, %357 in 1 : vector<32x127xf32>, vector<32x1xf32> -> vector<32x128xf32>
    %360 = vector.broadcast %356 : f32 to vector<32x128xf32>
    %361 = arith.mulf %360, %359 : vector<32x128xf32>
    %362 = arith.addf %355, %361 : vector<32x128xf32>
    %c4_175 = arith.constant 4 : index
    %c3_176 = arith.constant 3 : index
    %363 = memref.load %arg5[%c4_175, %c3_176] : memref<8x9xf32, #tpu.memory_space<smem>>
    %cst_177 = arith.constant 0.000000e+00 : f32
    %364 = vector.broadcast %cst_177 : f32 to vector<32x1xf32>
    %365 = vector.extract_strided_slice %337 {offsets = [0, 0], sizes = [32, 127], strides = [1, 1]} : vector<32x128xf32> to vector<32x127xf32>
    %366 = tpu.concatenate %364, %365 in 1 : vector<32x1xf32>, vector<32x127xf32> -> vector<32x128xf32>
    %367 = vector.broadcast %363 : f32 to vector<32x128xf32>
    %368 = arith.mulf %367, %366 : vector<32x128xf32>
    %369 = arith.addf %362, %368 : vector<32x128xf32>
    %c4_178 = arith.constant 4 : index
    %c4_179 = arith.constant 4 : index
    %370 = memref.load %arg5[%c4_178, %c4_179] : memref<8x9xf32, #tpu.memory_space<smem>>
    %371 = vector.broadcast %370 : f32 to vector<32x128xf32>
    %372 = arith.mulf %371, %337 : vector<32x128xf32>
    %373 = arith.addf %369, %372 : vector<32x128xf32>
    %c4_180 = arith.constant 4 : index
    %c5_181 = arith.constant 5 : index
    %374 = memref.load %arg5[%c4_180, %c5_181] : memref<8x9xf32, #tpu.memory_space<smem>>
    %cst_182 = arith.constant 0.000000e+00 : f32
    %375 = vector.broadcast %cst_182 : f32 to vector<32x1xf32>
    %376 = vector.extract_strided_slice %337 {offsets = [0, 1], sizes = [32, 127], strides = [1, 1]} : vector<32x128xf32> to vector<32x127xf32>
    %377 = tpu.concatenate %376, %375 in 1 : vector<32x127xf32>, vector<32x1xf32> -> vector<32x128xf32>
    %378 = vector.broadcast %374 : f32 to vector<32x128xf32>
    %379 = arith.mulf %378, %377 : vector<32x128xf32>
    %380 = arith.addf %373, %379 : vector<32x128xf32>
    %c4_183 = arith.constant 4 : index
    %c6_184 = arith.constant 6 : index
    %381 = memref.load %arg5[%c4_183, %c6_184] : memref<8x9xf32, #tpu.memory_space<smem>>
    %cst_185 = arith.constant 0.000000e+00 : f32
    %382 = vector.broadcast %cst_185 : f32 to vector<32x1xf32>
    %383 = vector.extract_strided_slice %343 {offsets = [0, 0], sizes = [32, 127], strides = [1, 1]} : vector<32x128xf32> to vector<32x127xf32>
    %384 = tpu.concatenate %382, %383 in 1 : vector<32x1xf32>, vector<32x127xf32> -> vector<32x128xf32>
    %385 = vector.broadcast %381 : f32 to vector<32x128xf32>
    %386 = arith.mulf %385, %384 : vector<32x128xf32>
    %387 = arith.addf %380, %386 : vector<32x128xf32>
    %c4_186 = arith.constant 4 : index
    %c7_187 = arith.constant 7 : index
    %388 = memref.load %arg5[%c4_186, %c7_187] : memref<8x9xf32, #tpu.memory_space<smem>>
    %389 = vector.broadcast %388 : f32 to vector<32x128xf32>
    %390 = arith.mulf %389, %343 : vector<32x128xf32>
    %391 = arith.addf %387, %390 : vector<32x128xf32>
    %c4_188 = arith.constant 4 : index
    %c8_189 = arith.constant 8 : index
    %392 = memref.load %arg5[%c4_188, %c8_189] : memref<8x9xf32, #tpu.memory_space<smem>>
    %cst_190 = arith.constant 0.000000e+00 : f32
    %393 = vector.broadcast %cst_190 : f32 to vector<32x1xf32>
    %394 = vector.extract_strided_slice %343 {offsets = [0, 1], sizes = [32, 127], strides = [1, 1]} : vector<32x128xf32> to vector<32x127xf32>
    %395 = tpu.concatenate %394, %393 in 1 : vector<32x127xf32>, vector<32x1xf32> -> vector<32x128xf32>
    %396 = vector.broadcast %392 : f32 to vector<32x128xf32>
    %397 = arith.mulf %396, %395 : vector<32x128xf32>
    %398 = arith.addf %391, %397 : vector<32x128xf32>
    %c4_191 = arith.constant 4 : index
    %399 = memref.load %arg6[%c4_191] : memref<8xf32, #tpu.memory_space<smem>>
    %400 = vector.broadcast %399 : f32 to vector<32x128xf32>
    %401 = arith.addf %398, %400 : vector<32x128xf32>
    %c0_192 = arith.constant 0 : index
    %c4_193 = arith.constant 4 : index
    %402 = memref.load %arg7[%c0_192, %c4_193] : memref<4x8xf32, #tpu.memory_space<smem>>
    %403 = vector.broadcast %402 : f32 to vector<32x128xf32>
    %404 = arith.mulf %403, %401 : vector<32x128xf32>
    %405 = arith.addf %319, %404 : vector<32x128xf32>
    %c1_194 = arith.constant 1 : index
    %c4_195 = arith.constant 4 : index
    %406 = memref.load %arg7[%c1_194, %c4_195] : memref<4x8xf32, #tpu.memory_space<smem>>
    %407 = vector.broadcast %406 : f32 to vector<32x128xf32>
    %408 = arith.mulf %407, %401 : vector<32x128xf32>
    %409 = arith.addf %323, %408 : vector<32x128xf32>
    %c2_196 = arith.constant 2 : index
    %c4_197 = arith.constant 4 : index
    %410 = memref.load %arg7[%c2_196, %c4_197] : memref<4x8xf32, #tpu.memory_space<smem>>
    %411 = vector.broadcast %410 : f32 to vector<32x128xf32>
    %412 = arith.mulf %411, %401 : vector<32x128xf32>
    %413 = arith.addf %327, %412 : vector<32x128xf32>
    %c3_198 = arith.constant 3 : index
    %c4_199 = arith.constant 4 : index
    %414 = memref.load %arg7[%c3_198, %c4_199] : memref<4x8xf32, #tpu.memory_space<smem>>
    %415 = vector.broadcast %414 : f32 to vector<32x128xf32>
    %416 = arith.mulf %415, %401 : vector<32x128xf32>
    %417 = arith.addf %331, %416 : vector<32x128xf32>
    %c0_200 = arith.constant 0 : index
    %c1_201 = arith.constant 1 : index
    %c0_202 = arith.constant 0 : index
    %c0_203 = arith.constant 0 : index
    %418 = vector.load %arg2[%c0_200, %c1_201, %c0_202, %c0_203] : memref<1x4x16x64xf32, #tpu.memory_space<vmem>>, vector<1x1x16x64xf32>
    %419 = vector.shape_cast %418 : vector<1x1x16x64xf32> to vector<16x64xf32>
    %c0_204 = arith.constant 0 : index
    %c0_205 = arith.constant 0 : index
    %420 = vector.load %arg4[%c0_204, %c0_205] : memref<64x128xf32, #tpu.memory_space<vmem>>, vector<64x128xf32>
    %cst_206 = arith.constant dense<0.000000e+00> : vector<16x128xf32>
    %421 = tpu.matmul %419, %420, %cst_206 {dimension_numbers = #tpu.dot_dimension_numbers<[1], [0], [0], [1], [0, 0, 1, 1], [], []>} : vector<16x64xf32>, vector<64x128xf32>, vector<16x128xf32> -> vector<16x128xf32>
    %c0_207 = arith.constant 0 : index
    %c0_208 = arith.constant 0 : index
    %422 = vector.load %arg3[%c0_207, %c0_208] : memref<32x16xf32, #tpu.memory_space<vmem>>, vector<32x16xf32>
    %cst_209 = arith.constant dense<0.000000e+00> : vector<32x128xf32>
    %423 = tpu.matmul %422, %421, %cst_209 {dimension_numbers = #tpu.dot_dimension_numbers<[1], [0], [0], [1], [0, 0, 1, 1], [], []>} : vector<32x16xf32>, vector<16x128xf32>, vector<32x128xf32> -> vector<32x128xf32>
    %cst_210 = arith.constant 0.000000e+00 : f32
    %424 = vector.broadcast %cst_210 : f32 to vector<1x128xf32>
    %425 = vector.extract_strided_slice %423 {offsets = [0, 0], sizes = [31, 128], strides = [1, 1]} : vector<32x128xf32> to vector<31x128xf32>
    %426 = tpu.concatenate %424, %425 in 0 : vector<1x128xf32>, vector<31x128xf32> -> vector<32x128xf32>
    %cst_211 = arith.constant 0.000000e+00 : f32
    %427 = vector.broadcast %cst_211 : f32 to vector<1x128xf32>
    %428 = vector.extract_strided_slice %423 {offsets = [1, 0], sizes = [31, 128], strides = [1, 1]} : vector<32x128xf32> to vector<31x128xf32>
    %429 = tpu.concatenate %428, %427 in 0 : vector<31x128xf32>, vector<1x128xf32> -> vector<32x128xf32>
    %cst_212 = arith.constant 0.000000e+00 : f32
    %430 = vector.broadcast %cst_212 : f32 to vector<32x128xf32>
    %c5_213 = arith.constant 5 : index
    %c0_214 = arith.constant 0 : index
    %431 = memref.load %arg5[%c5_213, %c0_214] : memref<8x9xf32, #tpu.memory_space<smem>>
    %cst_215 = arith.constant 0.000000e+00 : f32
    %432 = vector.broadcast %cst_215 : f32 to vector<32x1xf32>
    %433 = vector.extract_strided_slice %426 {offsets = [0, 0], sizes = [32, 127], strides = [1, 1]} : vector<32x128xf32> to vector<32x127xf32>
    %434 = tpu.concatenate %432, %433 in 1 : vector<32x1xf32>, vector<32x127xf32> -> vector<32x128xf32>
    %435 = vector.broadcast %431 : f32 to vector<32x128xf32>
    %436 = arith.mulf %435, %434 : vector<32x128xf32>
    %437 = arith.addf %430, %436 : vector<32x128xf32>
    %c5_216 = arith.constant 5 : index
    %c1_217 = arith.constant 1 : index
    %438 = memref.load %arg5[%c5_216, %c1_217] : memref<8x9xf32, #tpu.memory_space<smem>>
    %439 = vector.broadcast %438 : f32 to vector<32x128xf32>
    %440 = arith.mulf %439, %426 : vector<32x128xf32>
    %441 = arith.addf %437, %440 : vector<32x128xf32>
    %c5_218 = arith.constant 5 : index
    %c2_219 = arith.constant 2 : index
    %442 = memref.load %arg5[%c5_218, %c2_219] : memref<8x9xf32, #tpu.memory_space<smem>>
    %cst_220 = arith.constant 0.000000e+00 : f32
    %443 = vector.broadcast %cst_220 : f32 to vector<32x1xf32>
    %444 = vector.extract_strided_slice %426 {offsets = [0, 1], sizes = [32, 127], strides = [1, 1]} : vector<32x128xf32> to vector<32x127xf32>
    %445 = tpu.concatenate %444, %443 in 1 : vector<32x127xf32>, vector<32x1xf32> -> vector<32x128xf32>
    %446 = vector.broadcast %442 : f32 to vector<32x128xf32>
    %447 = arith.mulf %446, %445 : vector<32x128xf32>
    %448 = arith.addf %441, %447 : vector<32x128xf32>
    %c5_221 = arith.constant 5 : index
    %c3_222 = arith.constant 3 : index
    %449 = memref.load %arg5[%c5_221, %c3_222] : memref<8x9xf32, #tpu.memory_space<smem>>
    %cst_223 = arith.constant 0.000000e+00 : f32
    %450 = vector.broadcast %cst_223 : f32 to vector<32x1xf32>
    %451 = vector.extract_strided_slice %423 {offsets = [0, 0], sizes = [32, 127], strides = [1, 1]} : vector<32x128xf32> to vector<32x127xf32>
    %452 = tpu.concatenate %450, %451 in 1 : vector<32x1xf32>, vector<32x127xf32> -> vector<32x128xf32>
    %453 = vector.broadcast %449 : f32 to vector<32x128xf32>
    %454 = arith.mulf %453, %452 : vector<32x128xf32>
    %455 = arith.addf %448, %454 : vector<32x128xf32>
    %c5_224 = arith.constant 5 : index
    %c4_225 = arith.constant 4 : index
    %456 = memref.load %arg5[%c5_224, %c4_225] : memref<8x9xf32, #tpu.memory_space<smem>>
    %457 = vector.broadcast %456 : f32 to vector<32x128xf32>
    %458 = arith.mulf %457, %423 : vector<32x128xf32>
    %459 = arith.addf %455, %458 : vector<32x128xf32>
    %c5_226 = arith.constant 5 : index
    %c5_227 = arith.constant 5 : index
    %460 = memref.load %arg5[%c5_226, %c5_227] : memref<8x9xf32, #tpu.memory_space<smem>>
    %cst_228 = arith.constant 0.000000e+00 : f32
    %461 = vector.broadcast %cst_228 : f32 to vector<32x1xf32>
    %462 = vector.extract_strided_slice %423 {offsets = [0, 1], sizes = [32, 127], strides = [1, 1]} : vector<32x128xf32> to vector<32x127xf32>
    %463 = tpu.concatenate %462, %461 in 1 : vector<32x127xf32>, vector<32x1xf32> -> vector<32x128xf32>
    %464 = vector.broadcast %460 : f32 to vector<32x128xf32>
    %465 = arith.mulf %464, %463 : vector<32x128xf32>
    %466 = arith.addf %459, %465 : vector<32x128xf32>
    %c5_229 = arith.constant 5 : index
    %c6_230 = arith.constant 6 : index
    %467 = memref.load %arg5[%c5_229, %c6_230] : memref<8x9xf32, #tpu.memory_space<smem>>
    %cst_231 = arith.constant 0.000000e+00 : f32
    %468 = vector.broadcast %cst_231 : f32 to vector<32x1xf32>
    %469 = vector.extract_strided_slice %429 {offsets = [0, 0], sizes = [32, 127], strides = [1, 1]} : vector<32x128xf32> to vector<32x127xf32>
    %470 = tpu.concatenate %468, %469 in 1 : vector<32x1xf32>, vector<32x127xf32> -> vector<32x128xf32>
    %471 = vector.broadcast %467 : f32 to vector<32x128xf32>
    %472 = arith.mulf %471, %470 : vector<32x128xf32>
    %473 = arith.addf %466, %472 : vector<32x128xf32>
    %c5_232 = arith.constant 5 : index
    %c7_233 = arith.constant 7 : index
    %474 = memref.load %arg5[%c5_232, %c7_233] : memref<8x9xf32, #tpu.memory_space<smem>>
    %475 = vector.broadcast %474 : f32 to vector<32x128xf32>
    %476 = arith.mulf %475, %429 : vector<32x128xf32>
    %477 = arith.addf %473, %476 : vector<32x128xf32>
    %c5_234 = arith.constant 5 : index
    %c8_235 = arith.constant 8 : index
    %478 = memref.load %arg5[%c5_234, %c8_235] : memref<8x9xf32, #tpu.memory_space<smem>>
    %cst_236 = arith.constant 0.000000e+00 : f32
    %479 = vector.broadcast %cst_236 : f32 to vector<32x1xf32>
    %480 = vector.extract_strided_slice %429 {offsets = [0, 1], sizes = [32, 127], strides = [1, 1]} : vector<32x128xf32> to vector<32x127xf32>
    %481 = tpu.concatenate %480, %479 in 1 : vector<32x127xf32>, vector<32x1xf32> -> vector<32x128xf32>
    %482 = vector.broadcast %478 : f32 to vector<32x128xf32>
    %483 = arith.mulf %482, %481 : vector<32x128xf32>
    %484 = arith.addf %477, %483 : vector<32x128xf32>
    %c5_237 = arith.constant 5 : index
    %485 = memref.load %arg6[%c5_237] : memref<8xf32, #tpu.memory_space<smem>>
    %486 = vector.broadcast %485 : f32 to vector<32x128xf32>
    %487 = arith.addf %484, %486 : vector<32x128xf32>
    %c0_238 = arith.constant 0 : index
    %c5_239 = arith.constant 5 : index
    %488 = memref.load %arg7[%c0_238, %c5_239] : memref<4x8xf32, #tpu.memory_space<smem>>
    %489 = vector.broadcast %488 : f32 to vector<32x128xf32>
    %490 = arith.mulf %489, %487 : vector<32x128xf32>
    %491 = arith.addf %405, %490 : vector<32x128xf32>
    %c1_240 = arith.constant 1 : index
    %c5_241 = arith.constant 5 : index
    %492 = memref.load %arg7[%c1_240, %c5_241] : memref<4x8xf32, #tpu.memory_space<smem>>
    %493 = vector.broadcast %492 : f32 to vector<32x128xf32>
    %494 = arith.mulf %493, %487 : vector<32x128xf32>
    %495 = arith.addf %409, %494 : vector<32x128xf32>
    %c2_242 = arith.constant 2 : index
    %c5_243 = arith.constant 5 : index
    %496 = memref.load %arg7[%c2_242, %c5_243] : memref<4x8xf32, #tpu.memory_space<smem>>
    %497 = vector.broadcast %496 : f32 to vector<32x128xf32>
    %498 = arith.mulf %497, %487 : vector<32x128xf32>
    %499 = arith.addf %413, %498 : vector<32x128xf32>
    %c3_244 = arith.constant 3 : index
    %c5_245 = arith.constant 5 : index
    %500 = memref.load %arg7[%c3_244, %c5_245] : memref<4x8xf32, #tpu.memory_space<smem>>
    %501 = vector.broadcast %500 : f32 to vector<32x128xf32>
    %502 = arith.mulf %501, %487 : vector<32x128xf32>
    %503 = arith.addf %417, %502 : vector<32x128xf32>
    %c0_246 = arith.constant 0 : index
    %c2_247 = arith.constant 2 : index
    %c0_248 = arith.constant 0 : index
    %c0_249 = arith.constant 0 : index
    %504 = vector.load %arg2[%c0_246, %c2_247, %c0_248, %c0_249] : memref<1x4x16x64xf32, #tpu.memory_space<vmem>>, vector<1x1x16x64xf32>
    %505 = vector.shape_cast %504 : vector<1x1x16x64xf32> to vector<16x64xf32>
    %c0_250 = arith.constant 0 : index
    %c0_251 = arith.constant 0 : index
    %506 = vector.load %arg4[%c0_250, %c0_251] : memref<64x128xf32, #tpu.memory_space<vmem>>, vector<64x128xf32>
    %cst_252 = arith.constant dense<0.000000e+00> : vector<16x128xf32>
    %507 = tpu.matmul %505, %506, %cst_252 {dimension_numbers = #tpu.dot_dimension_numbers<[1], [0], [0], [1], [0, 0, 1, 1], [], []>} : vector<16x64xf32>, vector<64x128xf32>, vector<16x128xf32> -> vector<16x128xf32>
    %c0_253 = arith.constant 0 : index
    %c0_254 = arith.constant 0 : index
    %508 = vector.load %arg3[%c0_253, %c0_254] : memref<32x16xf32, #tpu.memory_space<vmem>>, vector<32x16xf32>
    %cst_255 = arith.constant dense<0.000000e+00> : vector<32x128xf32>
    %509 = tpu.matmul %508, %507, %cst_255 {dimension_numbers = #tpu.dot_dimension_numbers<[1], [0], [0], [1], [0, 0, 1, 1], [], []>} : vector<32x16xf32>, vector<16x128xf32>, vector<32x128xf32> -> vector<32x128xf32>
    %cst_256 = arith.constant 0.000000e+00 : f32
    %510 = vector.broadcast %cst_256 : f32 to vector<1x128xf32>
    %511 = vector.extract_strided_slice %509 {offsets = [0, 0], sizes = [31, 128], strides = [1, 1]} : vector<32x128xf32> to vector<31x128xf32>
    %512 = tpu.concatenate %510, %511 in 0 : vector<1x128xf32>, vector<31x128xf32> -> vector<32x128xf32>
    %cst_257 = arith.constant 0.000000e+00 : f32
    %513 = vector.broadcast %cst_257 : f32 to vector<1x128xf32>
    %514 = vector.extract_strided_slice %509 {offsets = [1, 0], sizes = [31, 128], strides = [1, 1]} : vector<32x128xf32> to vector<31x128xf32>
    %515 = tpu.concatenate %514, %513 in 0 : vector<31x128xf32>, vector<1x128xf32> -> vector<32x128xf32>
    %cst_258 = arith.constant 0.000000e+00 : f32
    %516 = vector.broadcast %cst_258 : f32 to vector<32x128xf32>
    %c6_259 = arith.constant 6 : index
    %c0_260 = arith.constant 0 : index
    %517 = memref.load %arg5[%c6_259, %c0_260] : memref<8x9xf32, #tpu.memory_space<smem>>
    %cst_261 = arith.constant 0.000000e+00 : f32
    %518 = vector.broadcast %cst_261 : f32 to vector<32x1xf32>
    %519 = vector.extract_strided_slice %512 {offsets = [0, 0], sizes = [32, 127], strides = [1, 1]} : vector<32x128xf32> to vector<32x127xf32>
    %520 = tpu.concatenate %518, %519 in 1 : vector<32x1xf32>, vector<32x127xf32> -> vector<32x128xf32>
    %521 = vector.broadcast %517 : f32 to vector<32x128xf32>
    %522 = arith.mulf %521, %520 : vector<32x128xf32>
    %523 = arith.addf %516, %522 : vector<32x128xf32>
    %c6_262 = arith.constant 6 : index
    %c1_263 = arith.constant 1 : index
    %524 = memref.load %arg5[%c6_262, %c1_263] : memref<8x9xf32, #tpu.memory_space<smem>>
    %525 = vector.broadcast %524 : f32 to vector<32x128xf32>
    %526 = arith.mulf %525, %512 : vector<32x128xf32>
    %527 = arith.addf %523, %526 : vector<32x128xf32>
    %c6_264 = arith.constant 6 : index
    %c2_265 = arith.constant 2 : index
    %528 = memref.load %arg5[%c6_264, %c2_265] : memref<8x9xf32, #tpu.memory_space<smem>>
    %cst_266 = arith.constant 0.000000e+00 : f32
    %529 = vector.broadcast %cst_266 : f32 to vector<32x1xf32>
    %530 = vector.extract_strided_slice %512 {offsets = [0, 1], sizes = [32, 127], strides = [1, 1]} : vector<32x128xf32> to vector<32x127xf32>
    %531 = tpu.concatenate %530, %529 in 1 : vector<32x127xf32>, vector<32x1xf32> -> vector<32x128xf32>
    %532 = vector.broadcast %528 : f32 to vector<32x128xf32>
    %533 = arith.mulf %532, %531 : vector<32x128xf32>
    %534 = arith.addf %527, %533 : vector<32x128xf32>
    %c6_267 = arith.constant 6 : index
    %c3_268 = arith.constant 3 : index
    %535 = memref.load %arg5[%c6_267, %c3_268] : memref<8x9xf32, #tpu.memory_space<smem>>
    %cst_269 = arith.constant 0.000000e+00 : f32
    %536 = vector.broadcast %cst_269 : f32 to vector<32x1xf32>
    %537 = vector.extract_strided_slice %509 {offsets = [0, 0], sizes = [32, 127], strides = [1, 1]} : vector<32x128xf32> to vector<32x127xf32>
    %538 = tpu.concatenate %536, %537 in 1 : vector<32x1xf32>, vector<32x127xf32> -> vector<32x128xf32>
    %539 = vector.broadcast %535 : f32 to vector<32x128xf32>
    %540 = arith.mulf %539, %538 : vector<32x128xf32>
    %541 = arith.addf %534, %540 : vector<32x128xf32>
    %c6_270 = arith.constant 6 : index
    %c4_271 = arith.constant 4 : index
    %542 = memref.load %arg5[%c6_270, %c4_271] : memref<8x9xf32, #tpu.memory_space<smem>>
    %543 = vector.broadcast %542 : f32 to vector<32x128xf32>
    %544 = arith.mulf %543, %509 : vector<32x128xf32>
    %545 = arith.addf %541, %544 : vector<32x128xf32>
    %c6_272 = arith.constant 6 : index
    %c5_273 = arith.constant 5 : index
    %546 = memref.load %arg5[%c6_272, %c5_273] : memref<8x9xf32, #tpu.memory_space<smem>>
    %cst_274 = arith.constant 0.000000e+00 : f32
    %547 = vector.broadcast %cst_274 : f32 to vector<32x1xf32>
    %548 = vector.extract_strided_slice %509 {offsets = [0, 1], sizes = [32, 127], strides = [1, 1]} : vector<32x128xf32> to vector<32x127xf32>
    %549 = tpu.concatenate %548, %547 in 1 : vector<32x127xf32>, vector<32x1xf32> -> vector<32x128xf32>
    %550 = vector.broadcast %546 : f32 to vector<32x128xf32>
    %551 = arith.mulf %550, %549 : vector<32x128xf32>
    %552 = arith.addf %545, %551 : vector<32x128xf32>
    %c6_275 = arith.constant 6 : index
    %c6_276 = arith.constant 6 : index
    %553 = memref.load %arg5[%c6_275, %c6_276] : memref<8x9xf32, #tpu.memory_space<smem>>
    %cst_277 = arith.constant 0.000000e+00 : f32
    %554 = vector.broadcast %cst_277 : f32 to vector<32x1xf32>
    %555 = vector.extract_strided_slice %515 {offsets = [0, 0], sizes = [32, 127], strides = [1, 1]} : vector<32x128xf32> to vector<32x127xf32>
    %556 = tpu.concatenate %554, %555 in 1 : vector<32x1xf32>, vector<32x127xf32> -> vector<32x128xf32>
    %557 = vector.broadcast %553 : f32 to vector<32x128xf32>
    %558 = arith.mulf %557, %556 : vector<32x128xf32>
    %559 = arith.addf %552, %558 : vector<32x128xf32>
    %c6_278 = arith.constant 6 : index
    %c7_279 = arith.constant 7 : index
    %560 = memref.load %arg5[%c6_278, %c7_279] : memref<8x9xf32, #tpu.memory_space<smem>>
    %561 = vector.broadcast %560 : f32 to vector<32x128xf32>
    %562 = arith.mulf %561, %515 : vector<32x128xf32>
    %563 = arith.addf %559, %562 : vector<32x128xf32>
    %c6_280 = arith.constant 6 : index
    %c8_281 = arith.constant 8 : index
    %564 = memref.load %arg5[%c6_280, %c8_281] : memref<8x9xf32, #tpu.memory_space<smem>>
    %cst_282 = arith.constant 0.000000e+00 : f32
    %565 = vector.broadcast %cst_282 : f32 to vector<32x1xf32>
    %566 = vector.extract_strided_slice %515 {offsets = [0, 1], sizes = [32, 127], strides = [1, 1]} : vector<32x128xf32> to vector<32x127xf32>
    %567 = tpu.concatenate %566, %565 in 1 : vector<32x127xf32>, vector<32x1xf32> -> vector<32x128xf32>
    %568 = vector.broadcast %564 : f32 to vector<32x128xf32>
    %569 = arith.mulf %568, %567 : vector<32x128xf32>
    %570 = arith.addf %563, %569 : vector<32x128xf32>
    %c6_283 = arith.constant 6 : index
    %571 = memref.load %arg6[%c6_283] : memref<8xf32, #tpu.memory_space<smem>>
    %572 = vector.broadcast %571 : f32 to vector<32x128xf32>
    %573 = arith.addf %570, %572 : vector<32x128xf32>
    %c0_284 = arith.constant 0 : index
    %c6_285 = arith.constant 6 : index
    %574 = memref.load %arg7[%c0_284, %c6_285] : memref<4x8xf32, #tpu.memory_space<smem>>
    %575 = vector.broadcast %574 : f32 to vector<32x128xf32>
    %576 = arith.mulf %575, %573 : vector<32x128xf32>
    %577 = arith.addf %491, %576 : vector<32x128xf32>
    %c1_286 = arith.constant 1 : index
    %c6_287 = arith.constant 6 : index
    %578 = memref.load %arg7[%c1_286, %c6_287] : memref<4x8xf32, #tpu.memory_space<smem>>
    %579 = vector.broadcast %578 : f32 to vector<32x128xf32>
    %580 = arith.mulf %579, %573 : vector<32x128xf32>
    %581 = arith.addf %495, %580 : vector<32x128xf32>
    %c2_288 = arith.constant 2 : index
    %c6_289 = arith.constant 6 : index
    %582 = memref.load %arg7[%c2_288, %c6_289] : memref<4x8xf32, #tpu.memory_space<smem>>
    %583 = vector.broadcast %582 : f32 to vector<32x128xf32>
    %584 = arith.mulf %583, %573 : vector<32x128xf32>
    %585 = arith.addf %499, %584 : vector<32x128xf32>
    %c3_290 = arith.constant 3 : index
    %c6_291 = arith.constant 6 : index
    %586 = memref.load %arg7[%c3_290, %c6_291] : memref<4x8xf32, #tpu.memory_space<smem>>
    %587 = vector.broadcast %586 : f32 to vector<32x128xf32>
    %588 = arith.mulf %587, %573 : vector<32x128xf32>
    %589 = arith.addf %503, %588 : vector<32x128xf32>
    %c0_292 = arith.constant 0 : index
    %c3_293 = arith.constant 3 : index
    %c0_294 = arith.constant 0 : index
    %c0_295 = arith.constant 0 : index
    %590 = vector.load %arg2[%c0_292, %c3_293, %c0_294, %c0_295] : memref<1x4x16x64xf32, #tpu.memory_space<vmem>>, vector<1x1x16x64xf32>
    %591 = vector.shape_cast %590 : vector<1x1x16x64xf32> to vector<16x64xf32>
    %c0_296 = arith.constant 0 : index
    %c0_297 = arith.constant 0 : index
    %592 = vector.load %arg4[%c0_296, %c0_297] : memref<64x128xf32, #tpu.memory_space<vmem>>, vector<64x128xf32>
    %cst_298 = arith.constant dense<0.000000e+00> : vector<16x128xf32>
    %593 = tpu.matmul %591, %592, %cst_298 {dimension_numbers = #tpu.dot_dimension_numbers<[1], [0], [0], [1], [0, 0, 1, 1], [], []>} : vector<16x64xf32>, vector<64x128xf32>, vector<16x128xf32> -> vector<16x128xf32>
    %c0_299 = arith.constant 0 : index
    %c0_300 = arith.constant 0 : index
    %594 = vector.load %arg3[%c0_299, %c0_300] : memref<32x16xf32, #tpu.memory_space<vmem>>, vector<32x16xf32>
    %cst_301 = arith.constant dense<0.000000e+00> : vector<32x128xf32>
    %595 = tpu.matmul %594, %593, %cst_301 {dimension_numbers = #tpu.dot_dimension_numbers<[1], [0], [0], [1], [0, 0, 1, 1], [], []>} : vector<32x16xf32>, vector<16x128xf32>, vector<32x128xf32> -> vector<32x128xf32>
    %cst_302 = arith.constant 0.000000e+00 : f32
    %596 = vector.broadcast %cst_302 : f32 to vector<1x128xf32>
    %597 = vector.extract_strided_slice %595 {offsets = [0, 0], sizes = [31, 128], strides = [1, 1]} : vector<32x128xf32> to vector<31x128xf32>
    %598 = tpu.concatenate %596, %597 in 0 : vector<1x128xf32>, vector<31x128xf32> -> vector<32x128xf32>
    %cst_303 = arith.constant 0.000000e+00 : f32
    %599 = vector.broadcast %cst_303 : f32 to vector<1x128xf32>
    %600 = vector.extract_strided_slice %595 {offsets = [1, 0], sizes = [31, 128], strides = [1, 1]} : vector<32x128xf32> to vector<31x128xf32>
    %601 = tpu.concatenate %600, %599 in 0 : vector<31x128xf32>, vector<1x128xf32> -> vector<32x128xf32>
    %cst_304 = arith.constant 0.000000e+00 : f32
    %602 = vector.broadcast %cst_304 : f32 to vector<32x128xf32>
    %c7_305 = arith.constant 7 : index
    %c0_306 = arith.constant 0 : index
    %603 = memref.load %arg5[%c7_305, %c0_306] : memref<8x9xf32, #tpu.memory_space<smem>>
    %cst_307 = arith.constant 0.000000e+00 : f32
    %604 = vector.broadcast %cst_307 : f32 to vector<32x1xf32>
    %605 = vector.extract_strided_slice %598 {offsets = [0, 0], sizes = [32, 127], strides = [1, 1]} : vector<32x128xf32> to vector<32x127xf32>
    %606 = tpu.concatenate %604, %605 in 1 : vector<32x1xf32>, vector<32x127xf32> -> vector<32x128xf32>
    %607 = vector.broadcast %603 : f32 to vector<32x128xf32>
    %608 = arith.mulf %607, %606 : vector<32x128xf32>
    %609 = arith.addf %602, %608 : vector<32x128xf32>
    %c7_308 = arith.constant 7 : index
    %c1_309 = arith.constant 1 : index
    %610 = memref.load %arg5[%c7_308, %c1_309] : memref<8x9xf32, #tpu.memory_space<smem>>
    %611 = vector.broadcast %610 : f32 to vector<32x128xf32>
    %612 = arith.mulf %611, %598 : vector<32x128xf32>
    %613 = arith.addf %609, %612 : vector<32x128xf32>
    %c7_310 = arith.constant 7 : index
    %c2_311 = arith.constant 2 : index
    %614 = memref.load %arg5[%c7_310, %c2_311] : memref<8x9xf32, #tpu.memory_space<smem>>
    %cst_312 = arith.constant 0.000000e+00 : f32
    %615 = vector.broadcast %cst_312 : f32 to vector<32x1xf32>
    %616 = vector.extract_strided_slice %598 {offsets = [0, 1], sizes = [32, 127], strides = [1, 1]} : vector<32x128xf32> to vector<32x127xf32>
    %617 = tpu.concatenate %616, %615 in 1 : vector<32x127xf32>, vector<32x1xf32> -> vector<32x128xf32>
    %618 = vector.broadcast %614 : f32 to vector<32x128xf32>
    %619 = arith.mulf %618, %617 : vector<32x128xf32>
    %620 = arith.addf %613, %619 : vector<32x128xf32>
    %c7_313 = arith.constant 7 : index
    %c3_314 = arith.constant 3 : index
    %621 = memref.load %arg5[%c7_313, %c3_314] : memref<8x9xf32, #tpu.memory_space<smem>>
    %cst_315 = arith.constant 0.000000e+00 : f32
    %622 = vector.broadcast %cst_315 : f32 to vector<32x1xf32>
    %623 = vector.extract_strided_slice %595 {offsets = [0, 0], sizes = [32, 127], strides = [1, 1]} : vector<32x128xf32> to vector<32x127xf32>
    %624 = tpu.concatenate %622, %623 in 1 : vector<32x1xf32>, vector<32x127xf32> -> vector<32x128xf32>
    %625 = vector.broadcast %621 : f32 to vector<32x128xf32>
    %626 = arith.mulf %625, %624 : vector<32x128xf32>
    %627 = arith.addf %620, %626 : vector<32x128xf32>
    %c7_316 = arith.constant 7 : index
    %c4_317 = arith.constant 4 : index
    %628 = memref.load %arg5[%c7_316, %c4_317] : memref<8x9xf32, #tpu.memory_space<smem>>
    %629 = vector.broadcast %628 : f32 to vector<32x128xf32>
    %630 = arith.mulf %629, %595 : vector<32x128xf32>
    %631 = arith.addf %627, %630 : vector<32x128xf32>
    %c7_318 = arith.constant 7 : index
    %c5_319 = arith.constant 5 : index
    %632 = memref.load %arg5[%c7_318, %c5_319] : memref<8x9xf32, #tpu.memory_space<smem>>
    %cst_320 = arith.constant 0.000000e+00 : f32
    %633 = vector.broadcast %cst_320 : f32 to vector<32x1xf32>
    %634 = vector.extract_strided_slice %595 {offsets = [0, 1], sizes = [32, 127], strides = [1, 1]} : vector<32x128xf32> to vector<32x127xf32>
    %635 = tpu.concatenate %634, %633 in 1 : vector<32x127xf32>, vector<32x1xf32> -> vector<32x128xf32>
    %636 = vector.broadcast %632 : f32 to vector<32x128xf32>
    %637 = arith.mulf %636, %635 : vector<32x128xf32>
    %638 = arith.addf %631, %637 : vector<32x128xf32>
    %c7_321 = arith.constant 7 : index
    %c6_322 = arith.constant 6 : index
    %639 = memref.load %arg5[%c7_321, %c6_322] : memref<8x9xf32, #tpu.memory_space<smem>>
    %cst_323 = arith.constant 0.000000e+00 : f32
    %640 = vector.broadcast %cst_323 : f32 to vector<32x1xf32>
    %641 = vector.extract_strided_slice %601 {offsets = [0, 0], sizes = [32, 127], strides = [1, 1]} : vector<32x128xf32> to vector<32x127xf32>
    %642 = tpu.concatenate %640, %641 in 1 : vector<32x1xf32>, vector<32x127xf32> -> vector<32x128xf32>
    %643 = vector.broadcast %639 : f32 to vector<32x128xf32>
    %644 = arith.mulf %643, %642 : vector<32x128xf32>
    %645 = arith.addf %638, %644 : vector<32x128xf32>
    %c7_324 = arith.constant 7 : index
    %c7_325 = arith.constant 7 : index
    %646 = memref.load %arg5[%c7_324, %c7_325] : memref<8x9xf32, #tpu.memory_space<smem>>
    %647 = vector.broadcast %646 : f32 to vector<32x128xf32>
    %648 = arith.mulf %647, %601 : vector<32x128xf32>
    %649 = arith.addf %645, %648 : vector<32x128xf32>
    %c7_326 = arith.constant 7 : index
    %c8_327 = arith.constant 8 : index
    %650 = memref.load %arg5[%c7_326, %c8_327] : memref<8x9xf32, #tpu.memory_space<smem>>
    %cst_328 = arith.constant 0.000000e+00 : f32
    %651 = vector.broadcast %cst_328 : f32 to vector<32x1xf32>
    %652 = vector.extract_strided_slice %601 {offsets = [0, 1], sizes = [32, 127], strides = [1, 1]} : vector<32x128xf32> to vector<32x127xf32>
    %653 = tpu.concatenate %652, %651 in 1 : vector<32x127xf32>, vector<32x1xf32> -> vector<32x128xf32>
    %654 = vector.broadcast %650 : f32 to vector<32x128xf32>
    %655 = arith.mulf %654, %653 : vector<32x128xf32>
    %656 = arith.addf %649, %655 : vector<32x128xf32>
    %c7_329 = arith.constant 7 : index
    %657 = memref.load %arg6[%c7_329] : memref<8xf32, #tpu.memory_space<smem>>
    %658 = vector.broadcast %657 : f32 to vector<32x128xf32>
    %659 = arith.addf %656, %658 : vector<32x128xf32>
    %c0_330 = arith.constant 0 : index
    %c7_331 = arith.constant 7 : index
    %660 = memref.load %arg7[%c0_330, %c7_331] : memref<4x8xf32, #tpu.memory_space<smem>>
    %661 = vector.broadcast %660 : f32 to vector<32x128xf32>
    %662 = arith.mulf %661, %659 : vector<32x128xf32>
    %663 = arith.addf %577, %662 : vector<32x128xf32>
    %c1_332 = arith.constant 1 : index
    %c7_333 = arith.constant 7 : index
    %664 = memref.load %arg7[%c1_332, %c7_333] : memref<4x8xf32, #tpu.memory_space<smem>>
    %665 = vector.broadcast %664 : f32 to vector<32x128xf32>
    %666 = arith.mulf %665, %659 : vector<32x128xf32>
    %667 = arith.addf %581, %666 : vector<32x128xf32>
    %c2_334 = arith.constant 2 : index
    %c7_335 = arith.constant 7 : index
    %668 = memref.load %arg7[%c2_334, %c7_335] : memref<4x8xf32, #tpu.memory_space<smem>>
    %669 = vector.broadcast %668 : f32 to vector<32x128xf32>
    %670 = arith.mulf %669, %659 : vector<32x128xf32>
    %671 = arith.addf %585, %670 : vector<32x128xf32>
    %c3_336 = arith.constant 3 : index
    %c7_337 = arith.constant 7 : index
    %672 = memref.load %arg7[%c3_336, %c7_337] : memref<4x8xf32, #tpu.memory_space<smem>>
    %673 = vector.broadcast %672 : f32 to vector<32x128xf32>
    %674 = arith.mulf %673, %659 : vector<32x128xf32>
    %675 = arith.addf %589, %674 : vector<32x128xf32>
    %c0_338 = arith.constant 0 : index
    %676 = memref.load %arg8[%c0_338] : memref<4xf32, #tpu.memory_space<smem>>
    %677 = vector.broadcast %676 : f32 to vector<32x128xf32>
    %678 = arith.addf %663, %677 : vector<32x128xf32>
    %679 = arith.truncf %678 : vector<32x128xf32> to vector<32x128xbf16>
    %c0_339 = arith.constant 0 : index
    %c0_340 = arith.constant 0 : index
    %c0_341 = arith.constant 0 : index
    %c0_342 = arith.constant 0 : index
    %680 = vector.load %arg9[%c0_339, %c0_340, %c0_341, %c0_342] : memref<1x4x32x128xbf16, #tpu.memory_space<vmem>>, vector<1x1x32x128xbf16>
    %681 = vector.shape_cast %680 : vector<1x1x32x128xbf16> to vector<32x128xbf16>
    %682 = vector.shape_cast %679 : vector<32x128xbf16> to vector<1x1x32x128xbf16>
    tpu.vector_store %arg9[%c0_339, %c0_340, %c0_341, %c0_342], %682 {strides = array<i32>} : memref<1x4x32x128xbf16, #tpu.memory_space<vmem>>, vector<1x1x32x128xbf16>,
    %cst_343 = arith.constant dense<0.000000e+00> : vector<32xf32>
    %683 = vector.multi_reduction <add>, %678, %cst_343 [1] : vector<32x128xf32> to vector<32xf32>
    %684 = vector.shape_cast %683 : vector<32xf32> to vector<32x1xf32>
    %cst_344 = arith.constant dense<0.000000e+00> : vector<1xf32>
    %685 = vector.multi_reduction <add>, %684, %cst_344 [0] : vector<32x1xf32> to vector<1xf32>
    %686 = vector.shape_cast %685 : vector<1xf32> to vector<1x1xf32>
    %cst_345 = arith.constant 2.44140625E-4 : f32
    %687 = vector.broadcast %cst_345 : f32 to vector<1x1xf32>
    %688 = arith.mulf %686, %687 : vector<1x1xf32>
    %689 = vector.broadcast %688 : vector<1x1xf32> to vector<32x128xf32>
    %690 = arith.subf %678, %689 : vector<32x128xf32>
    %691 = arith.mulf %690, %690 : vector<32x128xf32>
    %cst_346 = arith.constant dense<0.000000e+00> : vector<32xf32>
    %692 = vector.multi_reduction <add>, %691, %cst_346 [1] : vector<32x128xf32> to vector<32xf32>
    %693 = vector.shape_cast %692 : vector<32xf32> to vector<32x1xf32>
    %cst_347 = arith.constant dense<0.000000e+00> : vector<1xf32>
    %694 = vector.multi_reduction <add>, %693, %cst_347 [0] : vector<32x1xf32> to vector<1xf32>
    %695 = vector.shape_cast %694 : vector<1xf32> to vector<1x1xf32>
    %c1_348 = arith.constant 1 : index
    %696 = memref.load %arg8[%c1_348] : memref<4xf32, #tpu.memory_space<smem>>
    %697 = vector.broadcast %696 : f32 to vector<32x128xf32>
    %698 = arith.addf %667, %697 : vector<32x128xf32>
    %699 = arith.truncf %698 : vector<32x128xf32> to vector<32x128xbf16>
    %c0_349 = arith.constant 0 : index
    %c1_350 = arith.constant 1 : index
    %c0_351 = arith.constant 0 : index
    %c0_352 = arith.constant 0 : index
    %700 = vector.load %arg9[%c0_349, %c1_350, %c0_351, %c0_352] : memref<1x4x32x128xbf16, #tpu.memory_space<vmem>>, vector<1x1x32x128xbf16>
    %701 = vector.shape_cast %700 : vector<1x1x32x128xbf16> to vector<32x128xbf16>
    %702 = vector.shape_cast %699 : vector<32x128xbf16> to vector<1x1x32x128xbf16>
    tpu.vector_store %arg9[%c0_349, %c1_350, %c0_351, %c0_352], %702 {strides = array<i32>} : memref<1x4x32x128xbf16, #tpu.memory_space<vmem>>, vector<1x1x32x128xbf16>,
    %cst_353 = arith.constant dense<0.000000e+00> : vector<32xf32>
    %703 = vector.multi_reduction <add>, %698, %cst_353 [1] : vector<32x128xf32> to vector<32xf32>
    %704 = vector.shape_cast %703 : vector<32xf32> to vector<32x1xf32>
    %cst_354 = arith.constant dense<0.000000e+00> : vector<1xf32>
    %705 = vector.multi_reduction <add>, %704, %cst_354 [0] : vector<32x1xf32> to vector<1xf32>
    %706 = vector.shape_cast %705 : vector<1xf32> to vector<1x1xf32>
    %cst_355 = arith.constant 2.44140625E-4 : f32
    %707 = vector.broadcast %cst_355 : f32 to vector<1x1xf32>
    %708 = arith.mulf %706, %707 : vector<1x1xf32>
    %709 = vector.broadcast %708 : vector<1x1xf32> to vector<32x128xf32>
    %710 = arith.subf %698, %709 : vector<32x128xf32>
    %711 = arith.mulf %710, %710 : vector<32x128xf32>
    %cst_356 = arith.constant dense<0.000000e+00> : vector<32xf32>
    %712 = vector.multi_reduction <add>, %711, %cst_356 [1] : vector<32x128xf32> to vector<32xf32>
    %713 = vector.shape_cast %712 : vector<32xf32> to vector<32x1xf32>
    %cst_357 = arith.constant dense<0.000000e+00> : vector<1xf32>
    %714 = vector.multi_reduction <add>, %713, %cst_357 [0] : vector<32x1xf32> to vector<1xf32>
    %715 = vector.shape_cast %714 : vector<1xf32> to vector<1x1xf32>
    %c2_358 = arith.constant 2 : index
    %716 = memref.load %arg8[%c2_358] : memref<4xf32, #tpu.memory_space<smem>>
    %717 = vector.broadcast %716 : f32 to vector<32x128xf32>
    %718 = arith.addf %671, %717 : vector<32x128xf32>
    %719 = arith.truncf %718 : vector<32x128xf32> to vector<32x128xbf16>
    %c0_359 = arith.constant 0 : index
    %c2_360 = arith.constant 2 : index
    %c0_361 = arith.constant 0 : index
    %c0_362 = arith.constant 0 : index
    %720 = vector.load %arg9[%c0_359, %c2_360, %c0_361, %c0_362] : memref<1x4x32x128xbf16, #tpu.memory_space<vmem>>, vector<1x1x32x128xbf16>
    %721 = vector.shape_cast %720 : vector<1x1x32x128xbf16> to vector<32x128xbf16>
    %722 = vector.shape_cast %719 : vector<32x128xbf16> to vector<1x1x32x128xbf16>
    tpu.vector_store %arg9[%c0_359, %c2_360, %c0_361, %c0_362], %722 {strides = array<i32>} : memref<1x4x32x128xbf16, #tpu.memory_space<vmem>>, vector<1x1x32x128xbf16>,
    %cst_363 = arith.constant dense<0.000000e+00> : vector<32xf32>
    %723 = vector.multi_reduction <add>, %718, %cst_363 [1] : vector<32x128xf32> to vector<32xf32>
    %724 = vector.shape_cast %723 : vector<32xf32> to vector<32x1xf32>
    %cst_364 = arith.constant dense<0.000000e+00> : vector<1xf32>
    %725 = vector.multi_reduction <add>, %724, %cst_364 [0] : vector<32x1xf32> to vector<1xf32>
    %726 = vector.shape_cast %725 : vector<1xf32> to vector<1x1xf32>
    %cst_365 = arith.constant 2.44140625E-4 : f32
    %727 = vector.broadcast %cst_365 : f32 to vector<1x1xf32>
    %728 = arith.mulf %726, %727 : vector<1x1xf32>
    %729 = vector.broadcast %728 : vector<1x1xf32> to vector<32x128xf32>
    %730 = arith.subf %718, %729 : vector<32x128xf32>
    %731 = arith.mulf %730, %730 : vector<32x128xf32>
    %cst_366 = arith.constant dense<0.000000e+00> : vector<32xf32>
    %732 = vector.multi_reduction <add>, %731, %cst_366 [1] : vector<32x128xf32> to vector<32xf32>
    %733 = vector.shape_cast %732 : vector<32xf32> to vector<32x1xf32>
    %cst_367 = arith.constant dense<0.000000e+00> : vector<1xf32>
    %734 = vector.multi_reduction <add>, %733, %cst_367 [0] : vector<32x1xf32> to vector<1xf32>
    %735 = vector.shape_cast %734 : vector<1xf32> to vector<1x1xf32>
    %c3_368 = arith.constant 3 : index
    %736 = memref.load %arg8[%c3_368] : memref<4xf32, #tpu.memory_space<smem>>
    %737 = vector.broadcast %736 : f32 to vector<32x128xf32>
    %738 = arith.addf %675, %737 : vector<32x128xf32>
    %739 = arith.truncf %738 : vector<32x128xf32> to vector<32x128xbf16>
    %c0_369 = arith.constant 0 : index
    %c3_370 = arith.constant 3 : index
    %c0_371 = arith.constant 0 : index
    %c0_372 = arith.constant 0 : index
    %740 = vector.load %arg9[%c0_369, %c3_370, %c0_371, %c0_372] : memref<1x4x32x128xbf16, #tpu.memory_space<vmem>>, vector<1x1x32x128xbf16>
    %741 = vector.shape_cast %740 : vector<1x1x32x128xbf16> to vector<32x128xbf16>
    %742 = vector.shape_cast %739 : vector<32x128xbf16> to vector<1x1x32x128xbf16>
    tpu.vector_store %arg9[%c0_369, %c3_370, %c0_371, %c0_372], %742 {strides = array<i32>} : memref<1x4x32x128xbf16, #tpu.memory_space<vmem>>, vector<1x1x32x128xbf16>,
    %cst_373 = arith.constant dense<0.000000e+00> : vector<32xf32>
    %743 = vector.multi_reduction <add>, %738, %cst_373 [1] : vector<32x128xf32> to vector<32xf32>
    %744 = vector.shape_cast %743 : vector<32xf32> to vector<32x1xf32>
    %cst_374 = arith.constant dense<0.000000e+00> : vector<1xf32>
    %745 = vector.multi_reduction <add>, %744, %cst_374 [0] : vector<32x1xf32> to vector<1xf32>
    %746 = vector.shape_cast %745 : vector<1xf32> to vector<1x1xf32>
    %cst_375 = arith.constant 2.44140625E-4 : f32
    %747 = vector.broadcast %cst_375 : f32 to vector<1x1xf32>
    %748 = arith.mulf %746, %747 : vector<1x1xf32>
    %749 = vector.broadcast %748 : vector<1x1xf32> to vector<32x128xf32>
    %750 = arith.subf %738, %749 : vector<32x128xf32>
    %751 = arith.mulf %750, %750 : vector<32x128xf32>
    %cst_376 = arith.constant dense<0.000000e+00> : vector<32xf32>
    %752 = vector.multi_reduction <add>, %751, %cst_376 [1] : vector<32x128xf32> to vector<32xf32>
    %753 = vector.shape_cast %752 : vector<32xf32> to vector<32x1xf32>
    %cst_377 = arith.constant dense<0.000000e+00> : vector<1xf32>
    %754 = vector.multi_reduction <add>, %753, %cst_377 [0] : vector<32x1xf32> to vector<1xf32>
    %755 = vector.shape_cast %754 : vector<1xf32> to vector<1x1xf32>
    %756 = tpu.concatenate %686, %706, %726, %746 in 1 : vector<1x1xf32>, vector<1x1xf32>, vector<1x1xf32>, vector<1x1xf32> -> vector<1x4xf32>
    %757 = tpu.concatenate %695, %715, %735, %755 in 1 : vector<1x1xf32>, vector<1x1xf32>, vector<1x1xf32>, vector<1x1xf32> -> vector<1x4xf32>
    %758 = tpu.concatenate %756, %757 in 0 : vector<1x4xf32>, vector<1x4xf32> -> vector<2x4xf32>
    %c0_378 = arith.constant 0 : index
    %c0_379 = arith.constant 0 : index
    %c0_380 = arith.constant 0 : index
    %759 = vector.load %arg10[%c0_378, %c0_379, %c0_380] : memref<1x2x4xf32, #tpu.memory_space<vmem>>, vector<1x2x4xf32>
    %760 = vector.shape_cast %759 : vector<1x2x4xf32> to vector<2x4xf32>
    %761 = vector.shape_cast %758 : vector<2x4xf32> to vector<1x2x4xf32>
    tpu.vector_store %arg10[%c0_378, %c0_379, %c0_380], %761 {strides = array<i32>} : memref<1x2x4xf32, #tpu.memory_space<vmem>>, vector<1x2x4xf32>,
    return
  }
  func.func @transform_0(%arg0: i32) -> (i32, i32, i32, i32) {
    %c0_i32 = arith.constant 0 : i32
    %c0_i32_0 = arith.constant 0 : i32
    %c0_i32_1 = arith.constant 0 : i32
    %c0_i32_2 = arith.constant 0 : i32
    return %arg0, %c0_i32, %c0_i32_0, %c0_i32_1 : i32, i32, i32, i32
  }
  func.func @transform_1(%arg0: i32) -> (i32, i32, i32, i32) {
    %c0_i32 = arith.constant 0 : i32
    %c0_i32_0 = arith.constant 0 : i32
    %c0_i32_1 = arith.constant 0 : i32
    %c0_i32_2 = arith.constant 0 : i32
    return %arg0, %c0_i32, %c0_i32_0, %c0_i32_1 : i32, i32, i32, i32
  }
  func.func @transform_2(%arg0: i32) -> (i32, i32) {
    %c0_i32 = arith.constant 0 : i32
    %c0_i32_0 = arith.constant 0 : i32
    %c0_i32_1 = arith.constant 0 : i32
    return %c0_i32, %c0_i32_0 : i32, i32
  }
  func.func @transform_3(%arg0: i32) -> (i32, i32) {
    %c0_i32 = arith.constant 0 : i32
    %c0_i32_0 = arith.constant 0 : i32
    %c0_i32_1 = arith.constant 0 : i32
    return %c0_i32, %c0_i32_0 : i32, i32
  }
  func.func @transform_4(%arg0: i32) -> (i32, i32) {
    %c0_i32 = arith.constant 0 : i32
    %c0_i32_0 = arith.constant 0 : i32
    %c0_i32_1 = arith.constant 0 : i32
    return %c0_i32, %c0_i32_0 : i32, i32
  }
  func.func @transform_5(%arg0: i32) -> i32 {
    %c0_i32 = arith.constant 0 : i32
    %c0_i32_0 = arith.constant 0 : i32
    return %c0_i32 : i32
  }
  func.func @transform_6(%arg0: i32) -> (i32, i32) {
    %c0_i32 = arith.constant 0 : i32
    %c0_i32_0 = arith.constant 0 : i32
    %c0_i32_1 = arith.constant 0 : i32
    return %c0_i32, %c0_i32_0 : i32, i32
  }
  func.func @transform_7(%arg0: i32) -> i32 {
    %c0_i32 = arith.constant 0 : i32
    %c0_i32_0 = arith.constant 0 : i32
    return %c0_i32 : i32
  }
  func.func @transform_8(%arg0: i32) -> (i32, i32, i32, i32) {
    %c0_i32 = arith.constant 0 : i32
    %c0_i32_0 = arith.constant 0 : i32
    %c0_i32_1 = arith.constant 0 : i32
    %c0_i32_2 = arith.constant 0 : i32
    return %arg0, %c0_i32, %c0_i32_0, %c0_i32_1 : i32, i32, i32, i32
  }
  func.func @transform_9(%arg0: i32) -> (i32, i32, i32) {
    %c0_i32 = arith.constant 0 : i32
    %c0_i32_0 = arith.constant 0 : i32
    %c0_i32_1 = arith.constant 0 : i32
    return %arg0, %c0_i32, %c0_i32_0 : i32, i32, i32
  }
}

module attributes {stable_mosaic.version = 11 : i64} {
  func.func @_bn_relu_kernel(%arg0: i32, %arg1: memref<1x4x32x128xbf16, #tpu.memory_space<vmem>>, %arg2: memref<4xf32, #tpu.memory_space<smem>>, %arg3: memref<4xf32, #tpu.memory_space<smem>>, %arg4: memref<1x4x32x128xf32, #tpu.memory_space<vmem>>) attributes {dimension_semantics = [#tpu.dimension_semantics<parallel>], iteration_bounds = array<i64: 2>, scalar_prefetch = 0 : i64, scratch_operands = 0 : i64, tpu.core_type = #tpu.core_type<tc>, window_params = [{transform_indices = @transform_0, window_bounds = array<i64: 1, 4, 32, 128>}, {transform_indices = @transform_1, window_bounds = array<i64: 4>}, {transform_indices = @transform_2, window_bounds = array<i64: 4>}, {transform_indices = @transform_3, window_bounds = array<i64: 1, 4, 32, 128>}]} {
    %c0 = arith.constant 0 : index
    %c0_0 = arith.constant 0 : index
    %c0_1 = arith.constant 0 : index
    %c0_2 = arith.constant 0 : index
    %0 = vector.load %arg1[%c0, %c0_0, %c0_1, %c0_2] : memref<1x4x32x128xbf16, #tpu.memory_space<vmem>>, vector<1x1x32x128xbf16>
    %1 = vector.shape_cast %0 : vector<1x1x32x128xbf16> to vector<32x128xbf16>
    %2 = arith.extf %1 : vector<32x128xbf16> to vector<32x128xf32>
    %c0_3 = arith.constant 0 : index
    %3 = memref.load %arg2[%c0_3] : memref<4xf32, #tpu.memory_space<smem>>
    %4 = vector.broadcast %3 : f32 to vector<32x128xf32>
    %5 = arith.mulf %2, %4 : vector<32x128xf32>
    %c0_4 = arith.constant 0 : index
    %6 = memref.load %arg3[%c0_4] : memref<4xf32, #tpu.memory_space<smem>>
    %7 = vector.broadcast %6 : f32 to vector<32x128xf32>
    %8 = arith.addf %5, %7 : vector<32x128xf32>
    %cst = arith.constant 0.000000e+00 : f32
    %9 = vector.broadcast %cst : f32 to vector<32x128xf32>
    %10 = arith.maximumf %8, %9 : vector<32x128xf32>
    %c0_5 = arith.constant 0 : index
    %c0_6 = arith.constant 0 : index
    %c0_7 = arith.constant 0 : index
    %c0_8 = arith.constant 0 : index
    %11 = vector.load %arg4[%c0_5, %c0_6, %c0_7, %c0_8] : memref<1x4x32x128xf32, #tpu.memory_space<vmem>>, vector<1x1x32x128xf32>
    %12 = vector.shape_cast %11 : vector<1x1x32x128xf32> to vector<32x128xf32>
    %13 = vector.shape_cast %10 : vector<32x128xf32> to vector<1x1x32x128xf32>
    tpu.vector_store %arg4[%c0_5, %c0_6, %c0_7, %c0_8], %13 {strides = array<i32>} : memref<1x4x32x128xf32, #tpu.memory_space<vmem>>, vector<1x1x32x128xf32>,
    %c0_9 = arith.constant 0 : index
    %c1 = arith.constant 1 : index
    %c0_10 = arith.constant 0 : index
    %c0_11 = arith.constant 0 : index
    %14 = vector.load %arg1[%c0_9, %c1, %c0_10, %c0_11] : memref<1x4x32x128xbf16, #tpu.memory_space<vmem>>, vector<1x1x32x128xbf16>
    %15 = vector.shape_cast %14 : vector<1x1x32x128xbf16> to vector<32x128xbf16>
    %16 = arith.extf %15 : vector<32x128xbf16> to vector<32x128xf32>
    %c1_12 = arith.constant 1 : index
    %17 = memref.load %arg2[%c1_12] : memref<4xf32, #tpu.memory_space<smem>>
    %18 = vector.broadcast %17 : f32 to vector<32x128xf32>
    %19 = arith.mulf %16, %18 : vector<32x128xf32>
    %c1_13 = arith.constant 1 : index
    %20 = memref.load %arg3[%c1_13] : memref<4xf32, #tpu.memory_space<smem>>
    %21 = vector.broadcast %20 : f32 to vector<32x128xf32>
    %22 = arith.addf %19, %21 : vector<32x128xf32>
    %cst_14 = arith.constant 0.000000e+00 : f32
    %23 = vector.broadcast %cst_14 : f32 to vector<32x128xf32>
    %24 = arith.maximumf %22, %23 : vector<32x128xf32>
    %c0_15 = arith.constant 0 : index
    %c1_16 = arith.constant 1 : index
    %c0_17 = arith.constant 0 : index
    %c0_18 = arith.constant 0 : index
    %25 = vector.load %arg4[%c0_15, %c1_16, %c0_17, %c0_18] : memref<1x4x32x128xf32, #tpu.memory_space<vmem>>, vector<1x1x32x128xf32>
    %26 = vector.shape_cast %25 : vector<1x1x32x128xf32> to vector<32x128xf32>
    %27 = vector.shape_cast %24 : vector<32x128xf32> to vector<1x1x32x128xf32>
    tpu.vector_store %arg4[%c0_15, %c1_16, %c0_17, %c0_18], %27 {strides = array<i32>} : memref<1x4x32x128xf32, #tpu.memory_space<vmem>>, vector<1x1x32x128xf32>,
    %c0_19 = arith.constant 0 : index
    %c2 = arith.constant 2 : index
    %c0_20 = arith.constant 0 : index
    %c0_21 = arith.constant 0 : index
    %28 = vector.load %arg1[%c0_19, %c2, %c0_20, %c0_21] : memref<1x4x32x128xbf16, #tpu.memory_space<vmem>>, vector<1x1x32x128xbf16>
    %29 = vector.shape_cast %28 : vector<1x1x32x128xbf16> to vector<32x128xbf16>
    %30 = arith.extf %29 : vector<32x128xbf16> to vector<32x128xf32>
    %c2_22 = arith.constant 2 : index
    %31 = memref.load %arg2[%c2_22] : memref<4xf32, #tpu.memory_space<smem>>
    %32 = vector.broadcast %31 : f32 to vector<32x128xf32>
    %33 = arith.mulf %30, %32 : vector<32x128xf32>
    %c2_23 = arith.constant 2 : index
    %34 = memref.load %arg3[%c2_23] : memref<4xf32, #tpu.memory_space<smem>>
    %35 = vector.broadcast %34 : f32 to vector<32x128xf32>
    %36 = arith.addf %33, %35 : vector<32x128xf32>
    %cst_24 = arith.constant 0.000000e+00 : f32
    %37 = vector.broadcast %cst_24 : f32 to vector<32x128xf32>
    %38 = arith.maximumf %36, %37 : vector<32x128xf32>
    %c0_25 = arith.constant 0 : index
    %c2_26 = arith.constant 2 : index
    %c0_27 = arith.constant 0 : index
    %c0_28 = arith.constant 0 : index
    %39 = vector.load %arg4[%c0_25, %c2_26, %c0_27, %c0_28] : memref<1x4x32x128xf32, #tpu.memory_space<vmem>>, vector<1x1x32x128xf32>
    %40 = vector.shape_cast %39 : vector<1x1x32x128xf32> to vector<32x128xf32>
    %41 = vector.shape_cast %38 : vector<32x128xf32> to vector<1x1x32x128xf32>
    tpu.vector_store %arg4[%c0_25, %c2_26, %c0_27, %c0_28], %41 {strides = array<i32>} : memref<1x4x32x128xf32, #tpu.memory_space<vmem>>, vector<1x1x32x128xf32>,
    %c0_29 = arith.constant 0 : index
    %c3 = arith.constant 3 : index
    %c0_30 = arith.constant 0 : index
    %c0_31 = arith.constant 0 : index
    %42 = vector.load %arg1[%c0_29, %c3, %c0_30, %c0_31] : memref<1x4x32x128xbf16, #tpu.memory_space<vmem>>, vector<1x1x32x128xbf16>
    %43 = vector.shape_cast %42 : vector<1x1x32x128xbf16> to vector<32x128xbf16>
    %44 = arith.extf %43 : vector<32x128xbf16> to vector<32x128xf32>
    %c3_32 = arith.constant 3 : index
    %45 = memref.load %arg2[%c3_32] : memref<4xf32, #tpu.memory_space<smem>>
    %46 = vector.broadcast %45 : f32 to vector<32x128xf32>
    %47 = arith.mulf %44, %46 : vector<32x128xf32>
    %c3_33 = arith.constant 3 : index
    %48 = memref.load %arg3[%c3_33] : memref<4xf32, #tpu.memory_space<smem>>
    %49 = vector.broadcast %48 : f32 to vector<32x128xf32>
    %50 = arith.addf %47, %49 : vector<32x128xf32>
    %cst_34 = arith.constant 0.000000e+00 : f32
    %51 = vector.broadcast %cst_34 : f32 to vector<32x128xf32>
    %52 = arith.maximumf %50, %51 : vector<32x128xf32>
    %c0_35 = arith.constant 0 : index
    %c3_36 = arith.constant 3 : index
    %c0_37 = arith.constant 0 : index
    %c0_38 = arith.constant 0 : index
    %53 = vector.load %arg4[%c0_35, %c3_36, %c0_37, %c0_38] : memref<1x4x32x128xf32, #tpu.memory_space<vmem>>, vector<1x1x32x128xf32>
    %54 = vector.shape_cast %53 : vector<1x1x32x128xf32> to vector<32x128xf32>
    %55 = vector.shape_cast %52 : vector<32x128xf32> to vector<1x1x32x128xf32>
    tpu.vector_store %arg4[%c0_35, %c3_36, %c0_37, %c0_38], %55 {strides = array<i32>} : memref<1x4x32x128xf32, #tpu.memory_space<vmem>>, vector<1x1x32x128xf32>,
    return
  }
  func.func @transform_0(%arg0: i32) -> (i32, i32, i32, i32) {
    %c0_i32 = arith.constant 0 : i32
    %c0_i32_0 = arith.constant 0 : i32
    %c0_i32_1 = arith.constant 0 : i32
    %c0_i32_2 = arith.constant 0 : i32
    return %arg0, %c0_i32, %c0_i32_0, %c0_i32_1 : i32, i32, i32, i32
  }
  func.func @transform_1(%arg0: i32) -> i32 {
    %c0_i32 = arith.constant 0 : i32
    %c0_i32_0 = arith.constant 0 : i32
    return %c0_i32 : i32
  }
  func.func @transform_2(%arg0: i32) -> i32 {
    %c0_i32 = arith.constant 0 : i32
    %c0_i32_0 = arith.constant 0 : i32
    return %c0_i32 : i32
  }
  func.func @transform_3(%arg0: i32) -> (i32, i32, i32, i32) {
    %c0_i32 = arith.constant 0 : i32
    %c0_i32_0 = arith.constant 0 : i32
    %c0_i32_1 = arith.constant 0 : i32
    %c0_i32_2 = arith.constant 0 : i32
    return %arg0, %c0_i32, %c0_i32_0, %c0_i32_1 : i32, i32, i32, i32
  }
}

module attributes {stable_mosaic.version = 11 : i64} {
  func.func @_stage2_kernel(%arg0: i32, %arg1: memref<1x4x32x128xbf16, #tpu.memory_space<vmem>>, %arg2: memref<4xf32, #tpu.memory_space<smem>>, %arg3: memref<4xf32, #tpu.memory_space<smem>>, %arg4: memref<4x9xf32, #tpu.memory_space<smem>>, %arg5: memref<4xf32, #tpu.memory_space<smem>>, %arg6: memref<4x4xf32, #tpu.memory_space<smem>>, %arg7: memref<4xf32, #tpu.memory_space<smem>>, %arg8: memref<1x4x32x128xbf16, #tpu.memory_space<vmem>>, %arg9: memref<1x2x4xf32, #tpu.memory_space<vmem>>) attributes {dimension_semantics = [#tpu.dimension_semantics<parallel>], iteration_bounds = array<i64: 2>, scalar_prefetch = 0 : i64, scratch_operands = 0 : i64, tpu.core_type = #tpu.core_type<tc>, window_params = [{transform_indices = @transform_0, window_bounds = array<i64: 1, 4, 32, 128>}, {transform_indices = @transform_1, window_bounds = array<i64: 4>}, {transform_indices = @transform_2, window_bounds = array<i64: 4>}, {transform_indices = @transform_3, window_bounds = array<i64: 4, 9>}, {transform_indices = @transform_4, window_bounds = array<i64: 4>}, {transform_indices = @transform_5, window_bounds = array<i64: 4, 4>}, {transform_indices = @transform_6, window_bounds = array<i64: 4>}, {transform_indices = @transform_7, window_bounds = array<i64: 1, 4, 32, 128>}, {transform_indices = @transform_8, window_bounds = array<i64: 1, 2, 4>}]} {
    %cst = arith.constant 0.000000e+00 : f32
    %0 = vector.broadcast %cst : f32 to vector<32x128xf32>
    %cst_0 = arith.constant 0.000000e+00 : f32
    %1 = vector.broadcast %cst_0 : f32 to vector<32x128xf32>
    %cst_1 = arith.constant 0.000000e+00 : f32
    %2 = vector.broadcast %cst_1 : f32 to vector<32x128xf32>
    %cst_2 = arith.constant 0.000000e+00 : f32
    %3 = vector.broadcast %cst_2 : f32 to vector<32x128xf32>
    %c0 = arith.constant 0 : index
    %c0_3 = arith.constant 0 : index
    %c0_4 = arith.constant 0 : index
    %c0_5 = arith.constant 0 : index
    %4 = vector.load %arg1[%c0, %c0_3, %c0_4, %c0_5] : memref<1x4x32x128xbf16, #tpu.memory_space<vmem>>, vector<1x1x32x128xbf16>
    %5 = vector.shape_cast %4 : vector<1x1x32x128xbf16> to vector<32x128xbf16>
    %6 = arith.extf %5 : vector<32x128xbf16> to vector<32x128xf32>
    %c0_6 = arith.constant 0 : index
    %7 = memref.load %arg2[%c0_6] : memref<4xf32, #tpu.memory_space<smem>>
    %8 = vector.broadcast %7 : f32 to vector<32x128xf32>
    %9 = arith.mulf %6, %8 : vector<32x128xf32>
    %c0_7 = arith.constant 0 : index
    %10 = memref.load %arg3[%c0_7] : memref<4xf32, #tpu.memory_space<smem>>
    %11 = vector.broadcast %10 : f32 to vector<32x128xf32>
    %12 = arith.addf %9, %11 : vector<32x128xf32>
    %cst_8 = arith.constant 0.000000e+00 : f32
    %13 = vector.broadcast %cst_8 : f32 to vector<32x128xf32>
    %14 = arith.maximumf %12, %13 : vector<32x128xf32>
    %cst_9 = arith.constant 0.000000e+00 : f32
    %15 = vector.broadcast %cst_9 : f32 to vector<1x128xf32>
    %16 = vector.extract_strided_slice %14 {offsets = [0, 0], sizes = [31, 128], strides = [1, 1]} : vector<32x128xf32> to vector<31x128xf32>
    %17 = tpu.concatenate %15, %16 in 0 : vector<1x128xf32>, vector<31x128xf32> -> vector<32x128xf32>
    %cst_10 = arith.constant 0.000000e+00 : f32
    %18 = vector.broadcast %cst_10 : f32 to vector<1x128xf32>
    %19 = vector.extract_strided_slice %14 {offsets = [1, 0], sizes = [31, 128], strides = [1, 1]} : vector<32x128xf32> to vector<31x128xf32>
    %20 = tpu.concatenate %19, %18 in 0 : vector<31x128xf32>, vector<1x128xf32> -> vector<32x128xf32>
    %cst_11 = arith.constant 0.000000e+00 : f32
    %21 = vector.broadcast %cst_11 : f32 to vector<32x128xf32>
    %c0_12 = arith.constant 0 : index
    %c0_13 = arith.constant 0 : index
    %22 = memref.load %arg4[%c0_12, %c0_13] : memref<4x9xf32, #tpu.memory_space<smem>>
    %cst_14 = arith.constant 0.000000e+00 : f32
    %23 = vector.broadcast %cst_14 : f32 to vector<32x1xf32>
    %24 = vector.extract_strided_slice %17 {offsets = [0, 0], sizes = [32, 127], strides = [1, 1]} : vector<32x128xf32> to vector<32x127xf32>
    %25 = tpu.concatenate %23, %24 in 1 : vector<32x1xf32>, vector<32x127xf32> -> vector<32x128xf32>
    %26 = vector.broadcast %22 : f32 to vector<32x128xf32>
    %27 = arith.mulf %26, %25 : vector<32x128xf32>
    %28 = arith.addf %21, %27 : vector<32x128xf32>
    %c0_15 = arith.constant 0 : index
    %c1 = arith.constant 1 : index
    %29 = memref.load %arg4[%c0_15, %c1] : memref<4x9xf32, #tpu.memory_space<smem>>
    %30 = vector.broadcast %29 : f32 to vector<32x128xf32>
    %31 = arith.mulf %30, %17 : vector<32x128xf32>
    %32 = arith.addf %28, %31 : vector<32x128xf32>
    %c0_16 = arith.constant 0 : index
    %c2 = arith.constant 2 : index
    %33 = memref.load %arg4[%c0_16, %c2] : memref<4x9xf32, #tpu.memory_space<smem>>
    %cst_17 = arith.constant 0.000000e+00 : f32
    %34 = vector.broadcast %cst_17 : f32 to vector<32x1xf32>
    %35 = vector.extract_strided_slice %17 {offsets = [0, 1], sizes = [32, 127], strides = [1, 1]} : vector<32x128xf32> to vector<32x127xf32>
    %36 = tpu.concatenate %35, %34 in 1 : vector<32x127xf32>, vector<32x1xf32> -> vector<32x128xf32>
    %37 = vector.broadcast %33 : f32 to vector<32x128xf32>
    %38 = arith.mulf %37, %36 : vector<32x128xf32>
    %39 = arith.addf %32, %38 : vector<32x128xf32>
    %c0_18 = arith.constant 0 : index
    %c3 = arith.constant 3 : index
    %40 = memref.load %arg4[%c0_18, %c3] : memref<4x9xf32, #tpu.memory_space<smem>>
    %cst_19 = arith.constant 0.000000e+00 : f32
    %41 = vector.broadcast %cst_19 : f32 to vector<32x1xf32>
    %42 = vector.extract_strided_slice %14 {offsets = [0, 0], sizes = [32, 127], strides = [1, 1]} : vector<32x128xf32> to vector<32x127xf32>
    %43 = tpu.concatenate %41, %42 in 1 : vector<32x1xf32>, vector<32x127xf32> -> vector<32x128xf32>
    %44 = vector.broadcast %40 : f32 to vector<32x128xf32>
    %45 = arith.mulf %44, %43 : vector<32x128xf32>
    %46 = arith.addf %39, %45 : vector<32x128xf32>
    %c0_20 = arith.constant 0 : index
    %c4 = arith.constant 4 : index
    %47 = memref.load %arg4[%c0_20, %c4] : memref<4x9xf32, #tpu.memory_space<smem>>
    %48 = vector.broadcast %47 : f32 to vector<32x128xf32>
    %49 = arith.mulf %48, %14 : vector<32x128xf32>
    %50 = arith.addf %46, %49 : vector<32x128xf32>
    %c0_21 = arith.constant 0 : index
    %c5 = arith.constant 5 : index
    %51 = memref.load %arg4[%c0_21, %c5] : memref<4x9xf32, #tpu.memory_space<smem>>
    %cst_22 = arith.constant 0.000000e+00 : f32
    %52 = vector.broadcast %cst_22 : f32 to vector<32x1xf32>
    %53 = vector.extract_strided_slice %14 {offsets = [0, 1], sizes = [32, 127], strides = [1, 1]} : vector<32x128xf32> to vector<32x127xf32>
    %54 = tpu.concatenate %53, %52 in 1 : vector<32x127xf32>, vector<32x1xf32> -> vector<32x128xf32>
    %55 = vector.broadcast %51 : f32 to vector<32x128xf32>
    %56 = arith.mulf %55, %54 : vector<32x128xf32>
    %57 = arith.addf %50, %56 : vector<32x128xf32>
    %c0_23 = arith.constant 0 : index
    %c6 = arith.constant 6 : index
    %58 = memref.load %arg4[%c0_23, %c6] : memref<4x9xf32, #tpu.memory_space<smem>>
    %cst_24 = arith.constant 0.000000e+00 : f32
    %59 = vector.broadcast %cst_24 : f32 to vector<32x1xf32>
    %60 = vector.extract_strided_slice %20 {offsets = [0, 0], sizes = [32, 127], strides = [1, 1]} : vector<32x128xf32> to vector<32x127xf32>
    %61 = tpu.concatenate %59, %60 in 1 : vector<32x1xf32>, vector<32x127xf32> -> vector<32x128xf32>
    %62 = vector.broadcast %58 : f32 to vector<32x128xf32>
    %63 = arith.mulf %62, %61 : vector<32x128xf32>
    %64 = arith.addf %57, %63 : vector<32x128xf32>
    %c0_25 = arith.constant 0 : index
    %c7 = arith.constant 7 : index
    %65 = memref.load %arg4[%c0_25, %c7] : memref<4x9xf32, #tpu.memory_space<smem>>
    %66 = vector.broadcast %65 : f32 to vector<32x128xf32>
    %67 = arith.mulf %66, %20 : vector<32x128xf32>
    %68 = arith.addf %64, %67 : vector<32x128xf32>
    %c0_26 = arith.constant 0 : index
    %c8 = arith.constant 8 : index
    %69 = memref.load %arg4[%c0_26, %c8] : memref<4x9xf32, #tpu.memory_space<smem>>
    %cst_27 = arith.constant 0.000000e+00 : f32
    %70 = vector.broadcast %cst_27 : f32 to vector<32x1xf32>
    %71 = vector.extract_strided_slice %20 {offsets = [0, 1], sizes = [32, 127], strides = [1, 1]} : vector<32x128xf32> to vector<32x127xf32>
    %72 = tpu.concatenate %71, %70 in 1 : vector<32x127xf32>, vector<32x1xf32> -> vector<32x128xf32>
    %73 = vector.broadcast %69 : f32 to vector<32x128xf32>
    %74 = arith.mulf %73, %72 : vector<32x128xf32>
    %75 = arith.addf %68, %74 : vector<32x128xf32>
    %c0_28 = arith.constant 0 : index
    %76 = memref.load %arg5[%c0_28] : memref<4xf32, #tpu.memory_space<smem>>
    %77 = vector.broadcast %76 : f32 to vector<32x128xf32>
    %78 = arith.addf %75, %77 : vector<32x128xf32>
    %c0_29 = arith.constant 0 : index
    %c0_30 = arith.constant 0 : index
    %79 = memref.load %arg6[%c0_29, %c0_30] : memref<4x4xf32, #tpu.memory_space<smem>>
    %80 = vector.broadcast %79 : f32 to vector<32x128xf32>
    %81 = arith.mulf %80, %78 : vector<32x128xf32>
    %82 = arith.addf %0, %81 : vector<32x128xf32>
    %c1_31 = arith.constant 1 : index
    %c0_32 = arith.constant 0 : index
    %83 = memref.load %arg6[%c1_31, %c0_32] : memref<4x4xf32, #tpu.memory_space<smem>>
    %84 = vector.broadcast %83 : f32 to vector<32x128xf32>
    %85 = arith.mulf %84, %78 : vector<32x128xf32>
    %86 = arith.addf %1, %85 : vector<32x128xf32>
    %c2_33 = arith.constant 2 : index
    %c0_34 = arith.constant 0 : index
    %87 = memref.load %arg6[%c2_33, %c0_34] : memref<4x4xf32, #tpu.memory_space<smem>>
    %88 = vector.broadcast %87 : f32 to vector<32x128xf32>
    %89 = arith.mulf %88, %78 : vector<32x128xf32>
    %90 = arith.addf %2, %89 : vector<32x128xf32>
    %c3_35 = arith.constant 3 : index
    %c0_36 = arith.constant 0 : index
    %91 = memref.load %arg6[%c3_35, %c0_36] : memref<4x4xf32, #tpu.memory_space<smem>>
    %92 = vector.broadcast %91 : f32 to vector<32x128xf32>
    %93 = arith.mulf %92, %78 : vector<32x128xf32>
    %94 = arith.addf %3, %93 : vector<32x128xf32>
    %c0_37 = arith.constant 0 : index
    %c1_38 = arith.constant 1 : index
    %c0_39 = arith.constant 0 : index
    %c0_40 = arith.constant 0 : index
    %95 = vector.load %arg1[%c0_37, %c1_38, %c0_39, %c0_40] : memref<1x4x32x128xbf16, #tpu.memory_space<vmem>>, vector<1x1x32x128xbf16>
    %96 = vector.shape_cast %95 : vector<1x1x32x128xbf16> to vector<32x128xbf16>
    %97 = arith.extf %96 : vector<32x128xbf16> to vector<32x128xf32>
    %c1_41 = arith.constant 1 : index
    %98 = memref.load %arg2[%c1_41] : memref<4xf32, #tpu.memory_space<smem>>
    %99 = vector.broadcast %98 : f32 to vector<32x128xf32>
    %100 = arith.mulf %97, %99 : vector<32x128xf32>
    %c1_42 = arith.constant 1 : index
    %101 = memref.load %arg3[%c1_42] : memref<4xf32, #tpu.memory_space<smem>>
    %102 = vector.broadcast %101 : f32 to vector<32x128xf32>
    %103 = arith.addf %100, %102 : vector<32x128xf32>
    %cst_43 = arith.constant 0.000000e+00 : f32
    %104 = vector.broadcast %cst_43 : f32 to vector<32x128xf32>
    %105 = arith.maximumf %103, %104 : vector<32x128xf32>
    %cst_44 = arith.constant 0.000000e+00 : f32
    %106 = vector.broadcast %cst_44 : f32 to vector<1x128xf32>
    %107 = vector.extract_strided_slice %105 {offsets = [0, 0], sizes = [31, 128], strides = [1, 1]} : vector<32x128xf32> to vector<31x128xf32>
    %108 = tpu.concatenate %106, %107 in 0 : vector<1x128xf32>, vector<31x128xf32> -> vector<32x128xf32>
    %cst_45 = arith.constant 0.000000e+00 : f32
    %109 = vector.broadcast %cst_45 : f32 to vector<1x128xf32>
    %110 = vector.extract_strided_slice %105 {offsets = [1, 0], sizes = [31, 128], strides = [1, 1]} : vector<32x128xf32> to vector<31x128xf32>
    %111 = tpu.concatenate %110, %109 in 0 : vector<31x128xf32>, vector<1x128xf32> -> vector<32x128xf32>
    %cst_46 = arith.constant 0.000000e+00 : f32
    %112 = vector.broadcast %cst_46 : f32 to vector<32x128xf32>
    %c1_47 = arith.constant 1 : index
    %c0_48 = arith.constant 0 : index
    %113 = memref.load %arg4[%c1_47, %c0_48] : memref<4x9xf32, #tpu.memory_space<smem>>
    %cst_49 = arith.constant 0.000000e+00 : f32
    %114 = vector.broadcast %cst_49 : f32 to vector<32x1xf32>
    %115 = vector.extract_strided_slice %108 {offsets = [0, 0], sizes = [32, 127], strides = [1, 1]} : vector<32x128xf32> to vector<32x127xf32>
    %116 = tpu.concatenate %114, %115 in 1 : vector<32x1xf32>, vector<32x127xf32> -> vector<32x128xf32>
    %117 = vector.broadcast %113 : f32 to vector<32x128xf32>
    %118 = arith.mulf %117, %116 : vector<32x128xf32>
    %119 = arith.addf %112, %118 : vector<32x128xf32>
    %c1_50 = arith.constant 1 : index
    %c1_51 = arith.constant 1 : index
    %120 = memref.load %arg4[%c1_50, %c1_51] : memref<4x9xf32, #tpu.memory_space<smem>>
    %121 = vector.broadcast %120 : f32 to vector<32x128xf32>
    %122 = arith.mulf %121, %108 : vector<32x128xf32>
    %123 = arith.addf %119, %122 : vector<32x128xf32>
    %c1_52 = arith.constant 1 : index
    %c2_53 = arith.constant 2 : index
    %124 = memref.load %arg4[%c1_52, %c2_53] : memref<4x9xf32, #tpu.memory_space<smem>>
    %cst_54 = arith.constant 0.000000e+00 : f32
    %125 = vector.broadcast %cst_54 : f32 to vector<32x1xf32>
    %126 = vector.extract_strided_slice %108 {offsets = [0, 1], sizes = [32, 127], strides = [1, 1]} : vector<32x128xf32> to vector<32x127xf32>
    %127 = tpu.concatenate %126, %125 in 1 : vector<32x127xf32>, vector<32x1xf32> -> vector<32x128xf32>
    %128 = vector.broadcast %124 : f32 to vector<32x128xf32>
    %129 = arith.mulf %128, %127 : vector<32x128xf32>
    %130 = arith.addf %123, %129 : vector<32x128xf32>
    %c1_55 = arith.constant 1 : index
    %c3_56 = arith.constant 3 : index
    %131 = memref.load %arg4[%c1_55, %c3_56] : memref<4x9xf32, #tpu.memory_space<smem>>
    %cst_57 = arith.constant 0.000000e+00 : f32
    %132 = vector.broadcast %cst_57 : f32 to vector<32x1xf32>
    %133 = vector.extract_strided_slice %105 {offsets = [0, 0], sizes = [32, 127], strides = [1, 1]} : vector<32x128xf32> to vector<32x127xf32>
    %134 = tpu.concatenate %132, %133 in 1 : vector<32x1xf32>, vector<32x127xf32> -> vector<32x128xf32>
    %135 = vector.broadcast %131 : f32 to vector<32x128xf32>
    %136 = arith.mulf %135, %134 : vector<32x128xf32>
    %137 = arith.addf %130, %136 : vector<32x128xf32>
    %c1_58 = arith.constant 1 : index
    %c4_59 = arith.constant 4 : index
    %138 = memref.load %arg4[%c1_58, %c4_59] : memref<4x9xf32, #tpu.memory_space<smem>>
    %139 = vector.broadcast %138 : f32 to vector<32x128xf32>
    %140 = arith.mulf %139, %105 : vector<32x128xf32>
    %141 = arith.addf %137, %140 : vector<32x128xf32>
    %c1_60 = arith.constant 1 : index
    %c5_61 = arith.constant 5 : index
    %142 = memref.load %arg4[%c1_60, %c5_61] : memref<4x9xf32, #tpu.memory_space<smem>>
    %cst_62 = arith.constant 0.000000e+00 : f32
    %143 = vector.broadcast %cst_62 : f32 to vector<32x1xf32>
    %144 = vector.extract_strided_slice %105 {offsets = [0, 1], sizes = [32, 127], strides = [1, 1]} : vector<32x128xf32> to vector<32x127xf32>
    %145 = tpu.concatenate %144, %143 in 1 : vector<32x127xf32>, vector<32x1xf32> -> vector<32x128xf32>
    %146 = vector.broadcast %142 : f32 to vector<32x128xf32>
    %147 = arith.mulf %146, %145 : vector<32x128xf32>
    %148 = arith.addf %141, %147 : vector<32x128xf32>
    %c1_63 = arith.constant 1 : index
    %c6_64 = arith.constant 6 : index
    %149 = memref.load %arg4[%c1_63, %c6_64] : memref<4x9xf32, #tpu.memory_space<smem>>
    %cst_65 = arith.constant 0.000000e+00 : f32
    %150 = vector.broadcast %cst_65 : f32 to vector<32x1xf32>
    %151 = vector.extract_strided_slice %111 {offsets = [0, 0], sizes = [32, 127], strides = [1, 1]} : vector<32x128xf32> to vector<32x127xf32>
    %152 = tpu.concatenate %150, %151 in 1 : vector<32x1xf32>, vector<32x127xf32> -> vector<32x128xf32>
    %153 = vector.broadcast %149 : f32 to vector<32x128xf32>
    %154 = arith.mulf %153, %152 : vector<32x128xf32>
    %155 = arith.addf %148, %154 : vector<32x128xf32>
    %c1_66 = arith.constant 1 : index
    %c7_67 = arith.constant 7 : index
    %156 = memref.load %arg4[%c1_66, %c7_67] : memref<4x9xf32, #tpu.memory_space<smem>>
    %157 = vector.broadcast %156 : f32 to vector<32x128xf32>
    %158 = arith.mulf %157, %111 : vector<32x128xf32>
    %159 = arith.addf %155, %158 : vector<32x128xf32>
    %c1_68 = arith.constant 1 : index
    %c8_69 = arith.constant 8 : index
    %160 = memref.load %arg4[%c1_68, %c8_69] : memref<4x9xf32, #tpu.memory_space<smem>>
    %cst_70 = arith.constant 0.000000e+00 : f32
    %161 = vector.broadcast %cst_70 : f32 to vector<32x1xf32>
    %162 = vector.extract_strided_slice %111 {offsets = [0, 1], sizes = [32, 127], strides = [1, 1]} : vector<32x128xf32> to vector<32x127xf32>
    %163 = tpu.concatenate %162, %161 in 1 : vector<32x127xf32>, vector<32x1xf32> -> vector<32x128xf32>
    %164 = vector.broadcast %160 : f32 to vector<32x128xf32>
    %165 = arith.mulf %164, %163 : vector<32x128xf32>
    %166 = arith.addf %159, %165 : vector<32x128xf32>
    %c1_71 = arith.constant 1 : index
    %167 = memref.load %arg5[%c1_71] : memref<4xf32, #tpu.memory_space<smem>>
    %168 = vector.broadcast %167 : f32 to vector<32x128xf32>
    %169 = arith.addf %166, %168 : vector<32x128xf32>
    %c0_72 = arith.constant 0 : index
    %c1_73 = arith.constant 1 : index
    %170 = memref.load %arg6[%c0_72, %c1_73] : memref<4x4xf32, #tpu.memory_space<smem>>
    %171 = vector.broadcast %170 : f32 to vector<32x128xf32>
    %172 = arith.mulf %171, %169 : vector<32x128xf32>
    %173 = arith.addf %82, %172 : vector<32x128xf32>
    %c1_74 = arith.constant 1 : index
    %c1_75 = arith.constant 1 : index
    %174 = memref.load %arg6[%c1_74, %c1_75] : memref<4x4xf32, #tpu.memory_space<smem>>
    %175 = vector.broadcast %174 : f32 to vector<32x128xf32>
    %176 = arith.mulf %175, %169 : vector<32x128xf32>
    %177 = arith.addf %86, %176 : vector<32x128xf32>
    %c2_76 = arith.constant 2 : index
    %c1_77 = arith.constant 1 : index
    %178 = memref.load %arg6[%c2_76, %c1_77] : memref<4x4xf32, #tpu.memory_space<smem>>
    %179 = vector.broadcast %178 : f32 to vector<32x128xf32>
    %180 = arith.mulf %179, %169 : vector<32x128xf32>
    %181 = arith.addf %90, %180 : vector<32x128xf32>
    %c3_78 = arith.constant 3 : index
    %c1_79 = arith.constant 1 : index
    %182 = memref.load %arg6[%c3_78, %c1_79] : memref<4x4xf32, #tpu.memory_space<smem>>
    %183 = vector.broadcast %182 : f32 to vector<32x128xf32>
    %184 = arith.mulf %183, %169 : vector<32x128xf32>
    %185 = arith.addf %94, %184 : vector<32x128xf32>
    %c0_80 = arith.constant 0 : index
    %c2_81 = arith.constant 2 : index
    %c0_82 = arith.constant 0 : index
    %c0_83 = arith.constant 0 : index
    %186 = vector.load %arg1[%c0_80, %c2_81, %c0_82, %c0_83] : memref<1x4x32x128xbf16, #tpu.memory_space<vmem>>, vector<1x1x32x128xbf16>
    %187 = vector.shape_cast %186 : vector<1x1x32x128xbf16> to vector<32x128xbf16>
    %188 = arith.extf %187 : vector<32x128xbf16> to vector<32x128xf32>
    %c2_84 = arith.constant 2 : index
    %189 = memref.load %arg2[%c2_84] : memref<4xf32, #tpu.memory_space<smem>>
    %190 = vector.broadcast %189 : f32 to vector<32x128xf32>
    %191 = arith.mulf %188, %190 : vector<32x128xf32>
    %c2_85 = arith.constant 2 : index
    %192 = memref.load %arg3[%c2_85] : memref<4xf32, #tpu.memory_space<smem>>
    %193 = vector.broadcast %192 : f32 to vector<32x128xf32>
    %194 = arith.addf %191, %193 : vector<32x128xf32>
    %cst_86 = arith.constant 0.000000e+00 : f32
    %195 = vector.broadcast %cst_86 : f32 to vector<32x128xf32>
    %196 = arith.maximumf %194, %195 : vector<32x128xf32>
    %cst_87 = arith.constant 0.000000e+00 : f32
    %197 = vector.broadcast %cst_87 : f32 to vector<1x128xf32>
    %198 = vector.extract_strided_slice %196 {offsets = [0, 0], sizes = [31, 128], strides = [1, 1]} : vector<32x128xf32> to vector<31x128xf32>
    %199 = tpu.concatenate %197, %198 in 0 : vector<1x128xf32>, vector<31x128xf32> -> vector<32x128xf32>
    %cst_88 = arith.constant 0.000000e+00 : f32
    %200 = vector.broadcast %cst_88 : f32 to vector<1x128xf32>
    %201 = vector.extract_strided_slice %196 {offsets = [1, 0], sizes = [31, 128], strides = [1, 1]} : vector<32x128xf32> to vector<31x128xf32>
    %202 = tpu.concatenate %201, %200 in 0 : vector<31x128xf32>, vector<1x128xf32> -> vector<32x128xf32>
    %cst_89 = arith.constant 0.000000e+00 : f32
    %203 = vector.broadcast %cst_89 : f32 to vector<32x128xf32>
    %c2_90 = arith.constant 2 : index
    %c0_91 = arith.constant 0 : index
    %204 = memref.load %arg4[%c2_90, %c0_91] : memref<4x9xf32, #tpu.memory_space<smem>>
    %cst_92 = arith.constant 0.000000e+00 : f32
    %205 = vector.broadcast %cst_92 : f32 to vector<32x1xf32>
    %206 = vector.extract_strided_slice %199 {offsets = [0, 0], sizes = [32, 127], strides = [1, 1]} : vector<32x128xf32> to vector<32x127xf32>
    %207 = tpu.concatenate %205, %206 in 1 : vector<32x1xf32>, vector<32x127xf32> -> vector<32x128xf32>
    %208 = vector.broadcast %204 : f32 to vector<32x128xf32>
    %209 = arith.mulf %208, %207 : vector<32x128xf32>
    %210 = arith.addf %203, %209 : vector<32x128xf32>
    %c2_93 = arith.constant 2 : index
    %c1_94 = arith.constant 1 : index
    %211 = memref.load %arg4[%c2_93, %c1_94] : memref<4x9xf32, #tpu.memory_space<smem>>
    %212 = vector.broadcast %211 : f32 to vector<32x128xf32>
    %213 = arith.mulf %212, %199 : vector<32x128xf32>
    %214 = arith.addf %210, %213 : vector<32x128xf32>
    %c2_95 = arith.constant 2 : index
    %c2_96 = arith.constant 2 : index
    %215 = memref.load %arg4[%c2_95, %c2_96] : memref<4x9xf32, #tpu.memory_space<smem>>
    %cst_97 = arith.constant 0.000000e+00 : f32
    %216 = vector.broadcast %cst_97 : f32 to vector<32x1xf32>
    %217 = vector.extract_strided_slice %199 {offsets = [0, 1], sizes = [32, 127], strides = [1, 1]} : vector<32x128xf32> to vector<32x127xf32>
    %218 = tpu.concatenate %217, %216 in 1 : vector<32x127xf32>, vector<32x1xf32> -> vector<32x128xf32>
    %219 = vector.broadcast %215 : f32 to vector<32x128xf32>
    %220 = arith.mulf %219, %218 : vector<32x128xf32>
    %221 = arith.addf %214, %220 : vector<32x128xf32>
    %c2_98 = arith.constant 2 : index
    %c3_99 = arith.constant 3 : index
    %222 = memref.load %arg4[%c2_98, %c3_99] : memref<4x9xf32, #tpu.memory_space<smem>>
    %cst_100 = arith.constant 0.000000e+00 : f32
    %223 = vector.broadcast %cst_100 : f32 to vector<32x1xf32>
    %224 = vector.extract_strided_slice %196 {offsets = [0, 0], sizes = [32, 127], strides = [1, 1]} : vector<32x128xf32> to vector<32x127xf32>
    %225 = tpu.concatenate %223, %224 in 1 : vector<32x1xf32>, vector<32x127xf32> -> vector<32x128xf32>
    %226 = vector.broadcast %222 : f32 to vector<32x128xf32>
    %227 = arith.mulf %226, %225 : vector<32x128xf32>
    %228 = arith.addf %221, %227 : vector<32x128xf32>
    %c2_101 = arith.constant 2 : index
    %c4_102 = arith.constant 4 : index
    %229 = memref.load %arg4[%c2_101, %c4_102] : memref<4x9xf32, #tpu.memory_space<smem>>
    %230 = vector.broadcast %229 : f32 to vector<32x128xf32>
    %231 = arith.mulf %230, %196 : vector<32x128xf32>
    %232 = arith.addf %228, %231 : vector<32x128xf32>
    %c2_103 = arith.constant 2 : index
    %c5_104 = arith.constant 5 : index
    %233 = memref.load %arg4[%c2_103, %c5_104] : memref<4x9xf32, #tpu.memory_space<smem>>
    %cst_105 = arith.constant 0.000000e+00 : f32
    %234 = vector.broadcast %cst_105 : f32 to vector<32x1xf32>
    %235 = vector.extract_strided_slice %196 {offsets = [0, 1], sizes = [32, 127], strides = [1, 1]} : vector<32x128xf32> to vector<32x127xf32>
    %236 = tpu.concatenate %235, %234 in 1 : vector<32x127xf32>, vector<32x1xf32> -> vector<32x128xf32>
    %237 = vector.broadcast %233 : f32 to vector<32x128xf32>
    %238 = arith.mulf %237, %236 : vector<32x128xf32>
    %239 = arith.addf %232, %238 : vector<32x128xf32>
    %c2_106 = arith.constant 2 : index
    %c6_107 = arith.constant 6 : index
    %240 = memref.load %arg4[%c2_106, %c6_107] : memref<4x9xf32, #tpu.memory_space<smem>>
    %cst_108 = arith.constant 0.000000e+00 : f32
    %241 = vector.broadcast %cst_108 : f32 to vector<32x1xf32>
    %242 = vector.extract_strided_slice %202 {offsets = [0, 0], sizes = [32, 127], strides = [1, 1]} : vector<32x128xf32> to vector<32x127xf32>
    %243 = tpu.concatenate %241, %242 in 1 : vector<32x1xf32>, vector<32x127xf32> -> vector<32x128xf32>
    %244 = vector.broadcast %240 : f32 to vector<32x128xf32>
    %245 = arith.mulf %244, %243 : vector<32x128xf32>
    %246 = arith.addf %239, %245 : vector<32x128xf32>
    %c2_109 = arith.constant 2 : index
    %c7_110 = arith.constant 7 : index
    %247 = memref.load %arg4[%c2_109, %c7_110] : memref<4x9xf32, #tpu.memory_space<smem>>
    %248 = vector.broadcast %247 : f32 to vector<32x128xf32>
    %249 = arith.mulf %248, %202 : vector<32x128xf32>
    %250 = arith.addf %246, %249 : vector<32x128xf32>
    %c2_111 = arith.constant 2 : index
    %c8_112 = arith.constant 8 : index
    %251 = memref.load %arg4[%c2_111, %c8_112] : memref<4x9xf32, #tpu.memory_space<smem>>
    %cst_113 = arith.constant 0.000000e+00 : f32
    %252 = vector.broadcast %cst_113 : f32 to vector<32x1xf32>
    %253 = vector.extract_strided_slice %202 {offsets = [0, 1], sizes = [32, 127], strides = [1, 1]} : vector<32x128xf32> to vector<32x127xf32>
    %254 = tpu.concatenate %253, %252 in 1 : vector<32x127xf32>, vector<32x1xf32> -> vector<32x128xf32>
    %255 = vector.broadcast %251 : f32 to vector<32x128xf32>
    %256 = arith.mulf %255, %254 : vector<32x128xf32>
    %257 = arith.addf %250, %256 : vector<32x128xf32>
    %c2_114 = arith.constant 2 : index
    %258 = memref.load %arg5[%c2_114] : memref<4xf32, #tpu.memory_space<smem>>
    %259 = vector.broadcast %258 : f32 to vector<32x128xf32>
    %260 = arith.addf %257, %259 : vector<32x128xf32>
    %c0_115 = arith.constant 0 : index
    %c2_116 = arith.constant 2 : index
    %261 = memref.load %arg6[%c0_115, %c2_116] : memref<4x4xf32, #tpu.memory_space<smem>>
    %262 = vector.broadcast %261 : f32 to vector<32x128xf32>
    %263 = arith.mulf %262, %260 : vector<32x128xf32>
    %264 = arith.addf %173, %263 : vector<32x128xf32>
    %c1_117 = arith.constant 1 : index
    %c2_118 = arith.constant 2 : index
    %265 = memref.load %arg6[%c1_117, %c2_118] : memref<4x4xf32, #tpu.memory_space<smem>>
    %266 = vector.broadcast %265 : f32 to vector<32x128xf32>
    %267 = arith.mulf %266, %260 : vector<32x128xf32>
    %268 = arith.addf %177, %267 : vector<32x128xf32>
    %c2_119 = arith.constant 2 : index
    %c2_120 = arith.constant 2 : index
    %269 = memref.load %arg6[%c2_119, %c2_120] : memref<4x4xf32, #tpu.memory_space<smem>>
    %270 = vector.broadcast %269 : f32 to vector<32x128xf32>
    %271 = arith.mulf %270, %260 : vector<32x128xf32>
    %272 = arith.addf %181, %271 : vector<32x128xf32>
    %c3_121 = arith.constant 3 : index
    %c2_122 = arith.constant 2 : index
    %273 = memref.load %arg6[%c3_121, %c2_122] : memref<4x4xf32, #tpu.memory_space<smem>>
    %274 = vector.broadcast %273 : f32 to vector<32x128xf32>
    %275 = arith.mulf %274, %260 : vector<32x128xf32>
    %276 = arith.addf %185, %275 : vector<32x128xf32>
    %c0_123 = arith.constant 0 : index
    %c3_124 = arith.constant 3 : index
    %c0_125 = arith.constant 0 : index
    %c0_126 = arith.constant 0 : index
    %277 = vector.load %arg1[%c0_123, %c3_124, %c0_125, %c0_126] : memref<1x4x32x128xbf16, #tpu.memory_space<vmem>>, vector<1x1x32x128xbf16>
    %278 = vector.shape_cast %277 : vector<1x1x32x128xbf16> to vector<32x128xbf16>
    %279 = arith.extf %278 : vector<32x128xbf16> to vector<32x128xf32>
    %c3_127 = arith.constant 3 : index
    %280 = memref.load %arg2[%c3_127] : memref<4xf32, #tpu.memory_space<smem>>
    %281 = vector.broadcast %280 : f32 to vector<32x128xf32>
    %282 = arith.mulf %279, %281 : vector<32x128xf32>
    %c3_128 = arith.constant 3 : index
    %283 = memref.load %arg3[%c3_128] : memref<4xf32, #tpu.memory_space<smem>>
    %284 = vector.broadcast %283 : f32 to vector<32x128xf32>
    %285 = arith.addf %282, %284 : vector<32x128xf32>
    %cst_129 = arith.constant 0.000000e+00 : f32
    %286 = vector.broadcast %cst_129 : f32 to vector<32x128xf32>
    %287 = arith.maximumf %285, %286 : vector<32x128xf32>
    %cst_130 = arith.constant 0.000000e+00 : f32
    %288 = vector.broadcast %cst_130 : f32 to vector<1x128xf32>
    %289 = vector.extract_strided_slice %287 {offsets = [0, 0], sizes = [31, 128], strides = [1, 1]} : vector<32x128xf32> to vector<31x128xf32>
    %290 = tpu.concatenate %288, %289 in 0 : vector<1x128xf32>, vector<31x128xf32> -> vector<32x128xf32>
    %cst_131 = arith.constant 0.000000e+00 : f32
    %291 = vector.broadcast %cst_131 : f32 to vector<1x128xf32>
    %292 = vector.extract_strided_slice %287 {offsets = [1, 0], sizes = [31, 128], strides = [1, 1]} : vector<32x128xf32> to vector<31x128xf32>
    %293 = tpu.concatenate %292, %291 in 0 : vector<31x128xf32>, vector<1x128xf32> -> vector<32x128xf32>
    %cst_132 = arith.constant 0.000000e+00 : f32
    %294 = vector.broadcast %cst_132 : f32 to vector<32x128xf32>
    %c3_133 = arith.constant 3 : index
    %c0_134 = arith.constant 0 : index
    %295 = memref.load %arg4[%c3_133, %c0_134] : memref<4x9xf32, #tpu.memory_space<smem>>
    %cst_135 = arith.constant 0.000000e+00 : f32
    %296 = vector.broadcast %cst_135 : f32 to vector<32x1xf32>
    %297 = vector.extract_strided_slice %290 {offsets = [0, 0], sizes = [32, 127], strides = [1, 1]} : vector<32x128xf32> to vector<32x127xf32>
    %298 = tpu.concatenate %296, %297 in 1 : vector<32x1xf32>, vector<32x127xf32> -> vector<32x128xf32>
    %299 = vector.broadcast %295 : f32 to vector<32x128xf32>
    %300 = arith.mulf %299, %298 : vector<32x128xf32>
    %301 = arith.addf %294, %300 : vector<32x128xf32>
    %c3_136 = arith.constant 3 : index
    %c1_137 = arith.constant 1 : index
    %302 = memref.load %arg4[%c3_136, %c1_137] : memref<4x9xf32, #tpu.memory_space<smem>>
    %303 = vector.broadcast %302 : f32 to vector<32x128xf32>
    %304 = arith.mulf %303, %290 : vector<32x128xf32>
    %305 = arith.addf %301, %304 : vector<32x128xf32>
    %c3_138 = arith.constant 3 : index
    %c2_139 = arith.constant 2 : index
    %306 = memref.load %arg4[%c3_138, %c2_139] : memref<4x9xf32, #tpu.memory_space<smem>>
    %cst_140 = arith.constant 0.000000e+00 : f32
    %307 = vector.broadcast %cst_140 : f32 to vector<32x1xf32>
    %308 = vector.extract_strided_slice %290 {offsets = [0, 1], sizes = [32, 127], strides = [1, 1]} : vector<32x128xf32> to vector<32x127xf32>
    %309 = tpu.concatenate %308, %307 in 1 : vector<32x127xf32>, vector<32x1xf32> -> vector<32x128xf32>
    %310 = vector.broadcast %306 : f32 to vector<32x128xf32>
    %311 = arith.mulf %310, %309 : vector<32x128xf32>
    %312 = arith.addf %305, %311 : vector<32x128xf32>
    %c3_141 = arith.constant 3 : index
    %c3_142 = arith.constant 3 : index
    %313 = memref.load %arg4[%c3_141, %c3_142] : memref<4x9xf32, #tpu.memory_space<smem>>
    %cst_143 = arith.constant 0.000000e+00 : f32
    %314 = vector.broadcast %cst_143 : f32 to vector<32x1xf32>
    %315 = vector.extract_strided_slice %287 {offsets = [0, 0], sizes = [32, 127], strides = [1, 1]} : vector<32x128xf32> to vector<32x127xf32>
    %316 = tpu.concatenate %314, %315 in 1 : vector<32x1xf32>, vector<32x127xf32> -> vector<32x128xf32>
    %317 = vector.broadcast %313 : f32 to vector<32x128xf32>
    %318 = arith.mulf %317, %316 : vector<32x128xf32>
    %319 = arith.addf %312, %318 : vector<32x128xf32>
    %c3_144 = arith.constant 3 : index
    %c4_145 = arith.constant 4 : index
    %320 = memref.load %arg4[%c3_144, %c4_145] : memref<4x9xf32, #tpu.memory_space<smem>>
    %321 = vector.broadcast %320 : f32 to vector<32x128xf32>
    %322 = arith.mulf %321, %287 : vector<32x128xf32>
    %323 = arith.addf %319, %322 : vector<32x128xf32>
    %c3_146 = arith.constant 3 : index
    %c5_147 = arith.constant 5 : index
    %324 = memref.load %arg4[%c3_146, %c5_147] : memref<4x9xf32, #tpu.memory_space<smem>>
    %cst_148 = arith.constant 0.000000e+00 : f32
    %325 = vector.broadcast %cst_148 : f32 to vector<32x1xf32>
    %326 = vector.extract_strided_slice %287 {offsets = [0, 1], sizes = [32, 127], strides = [1, 1]} : vector<32x128xf32> to vector<32x127xf32>
    %327 = tpu.concatenate %326, %325 in 1 : vector<32x127xf32>, vector<32x1xf32> -> vector<32x128xf32>
    %328 = vector.broadcast %324 : f32 to vector<32x128xf32>
    %329 = arith.mulf %328, %327 : vector<32x128xf32>
    %330 = arith.addf %323, %329 : vector<32x128xf32>
    %c3_149 = arith.constant 3 : index
    %c6_150 = arith.constant 6 : index
    %331 = memref.load %arg4[%c3_149, %c6_150] : memref<4x9xf32, #tpu.memory_space<smem>>
    %cst_151 = arith.constant 0.000000e+00 : f32
    %332 = vector.broadcast %cst_151 : f32 to vector<32x1xf32>
    %333 = vector.extract_strided_slice %293 {offsets = [0, 0], sizes = [32, 127], strides = [1, 1]} : vector<32x128xf32> to vector<32x127xf32>
    %334 = tpu.concatenate %332, %333 in 1 : vector<32x1xf32>, vector<32x127xf32> -> vector<32x128xf32>
    %335 = vector.broadcast %331 : f32 to vector<32x128xf32>
    %336 = arith.mulf %335, %334 : vector<32x128xf32>
    %337 = arith.addf %330, %336 : vector<32x128xf32>
    %c3_152 = arith.constant 3 : index
    %c7_153 = arith.constant 7 : index
    %338 = memref.load %arg4[%c3_152, %c7_153] : memref<4x9xf32, #tpu.memory_space<smem>>
    %339 = vector.broadcast %338 : f32 to vector<32x128xf32>
    %340 = arith.mulf %339, %293 : vector<32x128xf32>
    %341 = arith.addf %337, %340 : vector<32x128xf32>
    %c3_154 = arith.constant 3 : index
    %c8_155 = arith.constant 8 : index
    %342 = memref.load %arg4[%c3_154, %c8_155] : memref<4x9xf32, #tpu.memory_space<smem>>
    %cst_156 = arith.constant 0.000000e+00 : f32
    %343 = vector.broadcast %cst_156 : f32 to vector<32x1xf32>
    %344 = vector.extract_strided_slice %293 {offsets = [0, 1], sizes = [32, 127], strides = [1, 1]} : vector<32x128xf32> to vector<32x127xf32>
    %345 = tpu.concatenate %344, %343 in 1 : vector<32x127xf32>, vector<32x1xf32> -> vector<32x128xf32>
    %346 = vector.broadcast %342 : f32 to vector<32x128xf32>
    %347 = arith.mulf %346, %345 : vector<32x128xf32>
    %348 = arith.addf %341, %347 : vector<32x128xf32>
    %c3_157 = arith.constant 3 : index
    %349 = memref.load %arg5[%c3_157] : memref<4xf32, #tpu.memory_space<smem>>
    %350 = vector.broadcast %349 : f32 to vector<32x128xf32>
    %351 = arith.addf %348, %350 : vector<32x128xf32>
    %c0_158 = arith.constant 0 : index
    %c3_159 = arith.constant 3 : index
    %352 = memref.load %arg6[%c0_158, %c3_159] : memref<4x4xf32, #tpu.memory_space<smem>>
    %353 = vector.broadcast %352 : f32 to vector<32x128xf32>
    %354 = arith.mulf %353, %351 : vector<32x128xf32>
    %355 = arith.addf %264, %354 : vector<32x128xf32>
    %c1_160 = arith.constant 1 : index
    %c3_161 = arith.constant 3 : index
    %356 = memref.load %arg6[%c1_160, %c3_161] : memref<4x4xf32, #tpu.memory_space<smem>>
    %357 = vector.broadcast %356 : f32 to vector<32x128xf32>
    %358 = arith.mulf %357, %351 : vector<32x128xf32>
    %359 = arith.addf %268, %358 : vector<32x128xf32>
    %c2_162 = arith.constant 2 : index
    %c3_163 = arith.constant 3 : index
    %360 = memref.load %arg6[%c2_162, %c3_163] : memref<4x4xf32, #tpu.memory_space<smem>>
    %361 = vector.broadcast %360 : f32 to vector<32x128xf32>
    %362 = arith.mulf %361, %351 : vector<32x128xf32>
    %363 = arith.addf %272, %362 : vector<32x128xf32>
    %c3_164 = arith.constant 3 : index
    %c3_165 = arith.constant 3 : index
    %364 = memref.load %arg6[%c3_164, %c3_165] : memref<4x4xf32, #tpu.memory_space<smem>>
    %365 = vector.broadcast %364 : f32 to vector<32x128xf32>
    %366 = arith.mulf %365, %351 : vector<32x128xf32>
    %367 = arith.addf %276, %366 : vector<32x128xf32>
    %c0_166 = arith.constant 0 : index
    %368 = memref.load %arg7[%c0_166] : memref<4xf32, #tpu.memory_space<smem>>
    %369 = vector.broadcast %368 : f32 to vector<32x128xf32>
    %370 = arith.addf %355, %369 : vector<32x128xf32>
    %371 = arith.truncf %370 : vector<32x128xf32> to vector<32x128xbf16>
    %c0_167 = arith.constant 0 : index
    %c0_168 = arith.constant 0 : index
    %c0_169 = arith.constant 0 : index
    %c0_170 = arith.constant 0 : index
    %372 = vector.load %arg8[%c0_167, %c0_168, %c0_169, %c0_170] : memref<1x4x32x128xbf16, #tpu.memory_space<vmem>>, vector<1x1x32x128xbf16>
    %373 = vector.shape_cast %372 : vector<1x1x32x128xbf16> to vector<32x128xbf16>
    %374 = vector.shape_cast %371 : vector<32x128xbf16> to vector<1x1x32x128xbf16>
    tpu.vector_store %arg8[%c0_167, %c0_168, %c0_169, %c0_170], %374 {strides = array<i32>} : memref<1x4x32x128xbf16, #tpu.memory_space<vmem>>, vector<1x1x32x128xbf16>,
    %cst_171 = arith.constant dense<0.000000e+00> : vector<32xf32>
    %375 = vector.multi_reduction <add>, %370, %cst_171 [1] : vector<32x128xf32> to vector<32xf32>
    %376 = vector.shape_cast %375 : vector<32xf32> to vector<32x1xf32>
    %cst_172 = arith.constant dense<0.000000e+00> : vector<1xf32>
    %377 = vector.multi_reduction <add>, %376, %cst_172 [0] : vector<32x1xf32> to vector<1xf32>
    %378 = vector.shape_cast %377 : vector<1xf32> to vector<1x1xf32>
    %cst_173 = arith.constant 2.44140625E-4 : f32
    %379 = vector.broadcast %cst_173 : f32 to vector<1x1xf32>
    %380 = arith.mulf %378, %379 : vector<1x1xf32>
    %381 = vector.broadcast %380 : vector<1x1xf32> to vector<32x128xf32>
    %382 = arith.subf %370, %381 : vector<32x128xf32>
    %383 = arith.mulf %382, %382 : vector<32x128xf32>
    %cst_174 = arith.constant dense<0.000000e+00> : vector<32xf32>
    %384 = vector.multi_reduction <add>, %383, %cst_174 [1] : vector<32x128xf32> to vector<32xf32>
    %385 = vector.shape_cast %384 : vector<32xf32> to vector<32x1xf32>
    %cst_175 = arith.constant dense<0.000000e+00> : vector<1xf32>
    %386 = vector.multi_reduction <add>, %385, %cst_175 [0] : vector<32x1xf32> to vector<1xf32>
    %387 = vector.shape_cast %386 : vector<1xf32> to vector<1x1xf32>
    %c1_176 = arith.constant 1 : index
    %388 = memref.load %arg7[%c1_176] : memref<4xf32, #tpu.memory_space<smem>>
    %389 = vector.broadcast %388 : f32 to vector<32x128xf32>
    %390 = arith.addf %359, %389 : vector<32x128xf32>
    %391 = arith.truncf %390 : vector<32x128xf32> to vector<32x128xbf16>
    %c0_177 = arith.constant 0 : index
    %c1_178 = arith.constant 1 : index
    %c0_179 = arith.constant 0 : index
    %c0_180 = arith.constant 0 : index
    %392 = vector.load %arg8[%c0_177, %c1_178, %c0_179, %c0_180] : memref<1x4x32x128xbf16, #tpu.memory_space<vmem>>, vector<1x1x32x128xbf16>
    %393 = vector.shape_cast %392 : vector<1x1x32x128xbf16> to vector<32x128xbf16>
    %394 = vector.shape_cast %391 : vector<32x128xbf16> to vector<1x1x32x128xbf16>
    tpu.vector_store %arg8[%c0_177, %c1_178, %c0_179, %c0_180], %394 {strides = array<i32>} : memref<1x4x32x128xbf16, #tpu.memory_space<vmem>>, vector<1x1x32x128xbf16>,
    %cst_181 = arith.constant dense<0.000000e+00> : vector<32xf32>
    %395 = vector.multi_reduction <add>, %390, %cst_181 [1] : vector<32x128xf32> to vector<32xf32>
    %396 = vector.shape_cast %395 : vector<32xf32> to vector<32x1xf32>
    %cst_182 = arith.constant dense<0.000000e+00> : vector<1xf32>
    %397 = vector.multi_reduction <add>, %396, %cst_182 [0] : vector<32x1xf32> to vector<1xf32>
    %398 = vector.shape_cast %397 : vector<1xf32> to vector<1x1xf32>
    %cst_183 = arith.constant 2.44140625E-4 : f32
    %399 = vector.broadcast %cst_183 : f32 to vector<1x1xf32>
    %400 = arith.mulf %398, %399 : vector<1x1xf32>
    %401 = vector.broadcast %400 : vector<1x1xf32> to vector<32x128xf32>
    %402 = arith.subf %390, %401 : vector<32x128xf32>
    %403 = arith.mulf %402, %402 : vector<32x128xf32>
    %cst_184 = arith.constant dense<0.000000e+00> : vector<32xf32>
    %404 = vector.multi_reduction <add>, %403, %cst_184 [1] : vector<32x128xf32> to vector<32xf32>
    %405 = vector.shape_cast %404 : vector<32xf32> to vector<32x1xf32>
    %cst_185 = arith.constant dense<0.000000e+00> : vector<1xf32>
    %406 = vector.multi_reduction <add>, %405, %cst_185 [0] : vector<32x1xf32> to vector<1xf32>
    %407 = vector.shape_cast %406 : vector<1xf32> to vector<1x1xf32>
    %c2_186 = arith.constant 2 : index
    %408 = memref.load %arg7[%c2_186] : memref<4xf32, #tpu.memory_space<smem>>
    %409 = vector.broadcast %408 : f32 to vector<32x128xf32>
    %410 = arith.addf %363, %409 : vector<32x128xf32>
    %411 = arith.truncf %410 : vector<32x128xf32> to vector<32x128xbf16>
    %c0_187 = arith.constant 0 : index
    %c2_188 = arith.constant 2 : index
    %c0_189 = arith.constant 0 : index
    %c0_190 = arith.constant 0 : index
    %412 = vector.load %arg8[%c0_187, %c2_188, %c0_189, %c0_190] : memref<1x4x32x128xbf16, #tpu.memory_space<vmem>>, vector<1x1x32x128xbf16>
    %413 = vector.shape_cast %412 : vector<1x1x32x128xbf16> to vector<32x128xbf16>
    %414 = vector.shape_cast %411 : vector<32x128xbf16> to vector<1x1x32x128xbf16>
    tpu.vector_store %arg8[%c0_187, %c2_188, %c0_189, %c0_190], %414 {strides = array<i32>} : memref<1x4x32x128xbf16, #tpu.memory_space<vmem>>, vector<1x1x32x128xbf16>,
    %cst_191 = arith.constant dense<0.000000e+00> : vector<32xf32>
    %415 = vector.multi_reduction <add>, %410, %cst_191 [1] : vector<32x128xf32> to vector<32xf32>
    %416 = vector.shape_cast %415 : vector<32xf32> to vector<32x1xf32>
    %cst_192 = arith.constant dense<0.000000e+00> : vector<1xf32>
    %417 = vector.multi_reduction <add>, %416, %cst_192 [0] : vector<32x1xf32> to vector<1xf32>
    %418 = vector.shape_cast %417 : vector<1xf32> to vector<1x1xf32>
    %cst_193 = arith.constant 2.44140625E-4 : f32
    %419 = vector.broadcast %cst_193 : f32 to vector<1x1xf32>
    %420 = arith.mulf %418, %419 : vector<1x1xf32>
    %421 = vector.broadcast %420 : vector<1x1xf32> to vector<32x128xf32>
    %422 = arith.subf %410, %421 : vector<32x128xf32>
    %423 = arith.mulf %422, %422 : vector<32x128xf32>
    %cst_194 = arith.constant dense<0.000000e+00> : vector<32xf32>
    %424 = vector.multi_reduction <add>, %423, %cst_194 [1] : vector<32x128xf32> to vector<32xf32>
    %425 = vector.shape_cast %424 : vector<32xf32> to vector<32x1xf32>
    %cst_195 = arith.constant dense<0.000000e+00> : vector<1xf32>
    %426 = vector.multi_reduction <add>, %425, %cst_195 [0] : vector<32x1xf32> to vector<1xf32>
    %427 = vector.shape_cast %426 : vector<1xf32> to vector<1x1xf32>
    %c3_196 = arith.constant 3 : index
    %428 = memref.load %arg7[%c3_196] : memref<4xf32, #tpu.memory_space<smem>>
    %429 = vector.broadcast %428 : f32 to vector<32x128xf32>
    %430 = arith.addf %367, %429 : vector<32x128xf32>
    %431 = arith.truncf %430 : vector<32x128xf32> to vector<32x128xbf16>
    %c0_197 = arith.constant 0 : index
    %c3_198 = arith.constant 3 : index
    %c0_199 = arith.constant 0 : index
    %c0_200 = arith.constant 0 : index
    %432 = vector.load %arg8[%c0_197, %c3_198, %c0_199, %c0_200] : memref<1x4x32x128xbf16, #tpu.memory_space<vmem>>, vector<1x1x32x128xbf16>
    %433 = vector.shape_cast %432 : vector<1x1x32x128xbf16> to vector<32x128xbf16>
    %434 = vector.shape_cast %431 : vector<32x128xbf16> to vector<1x1x32x128xbf16>
    tpu.vector_store %arg8[%c0_197, %c3_198, %c0_199, %c0_200], %434 {strides = array<i32>} : memref<1x4x32x128xbf16, #tpu.memory_space<vmem>>, vector<1x1x32x128xbf16>,
    %cst_201 = arith.constant dense<0.000000e+00> : vector<32xf32>
    %435 = vector.multi_reduction <add>, %430, %cst_201 [1] : vector<32x128xf32> to vector<32xf32>
    %436 = vector.shape_cast %435 : vector<32xf32> to vector<32x1xf32>
    %cst_202 = arith.constant dense<0.000000e+00> : vector<1xf32>
    %437 = vector.multi_reduction <add>, %436, %cst_202 [0] : vector<32x1xf32> to vector<1xf32>
    %438 = vector.shape_cast %437 : vector<1xf32> to vector<1x1xf32>
    %cst_203 = arith.constant 2.44140625E-4 : f32
    %439 = vector.broadcast %cst_203 : f32 to vector<1x1xf32>
    %440 = arith.mulf %438, %439 : vector<1x1xf32>
    %441 = vector.broadcast %440 : vector<1x1xf32> to vector<32x128xf32>
    %442 = arith.subf %430, %441 : vector<32x128xf32>
    %443 = arith.mulf %442, %442 : vector<32x128xf32>
    %cst_204 = arith.constant dense<0.000000e+00> : vector<32xf32>
    %444 = vector.multi_reduction <add>, %443, %cst_204 [1] : vector<32x128xf32> to vector<32xf32>
    %445 = vector.shape_cast %444 : vector<32xf32> to vector<32x1xf32>
    %cst_205 = arith.constant dense<0.000000e+00> : vector<1xf32>
    %446 = vector.multi_reduction <add>, %445, %cst_205 [0] : vector<32x1xf32> to vector<1xf32>
    %447 = vector.shape_cast %446 : vector<1xf32> to vector<1x1xf32>
    %448 = tpu.concatenate %378, %398, %418, %438 in 1 : vector<1x1xf32>, vector<1x1xf32>, vector<1x1xf32>, vector<1x1xf32> -> vector<1x4xf32>
    %449 = tpu.concatenate %387, %407, %427, %447 in 1 : vector<1x1xf32>, vector<1x1xf32>, vector<1x1xf32>, vector<1x1xf32> -> vector<1x4xf32>
    %450 = tpu.concatenate %448, %449 in 0 : vector<1x4xf32>, vector<1x4xf32> -> vector<2x4xf32>
    %c0_206 = arith.constant 0 : index
    %c0_207 = arith.constant 0 : index
    %c0_208 = arith.constant 0 : index
    %451 = vector.load %arg9[%c0_206, %c0_207, %c0_208] : memref<1x2x4xf32, #tpu.memory_space<vmem>>, vector<1x2x4xf32>
    %452 = vector.shape_cast %451 : vector<1x2x4xf32> to vector<2x4xf32>
    %453 = vector.shape_cast %450 : vector<2x4xf32> to vector<1x2x4xf32>
    tpu.vector_store %arg9[%c0_206, %c0_207, %c0_208], %453 {strides = array<i32>} : memref<1x2x4xf32, #tpu.memory_space<vmem>>, vector<1x2x4xf32>,
    return
  }
  func.func @transform_0(%arg0: i32) -> (i32, i32, i32, i32) {
    %c0_i32 = arith.constant 0 : i32
    %c0_i32_0 = arith.constant 0 : i32
    %c0_i32_1 = arith.constant 0 : i32
    %c0_i32_2 = arith.constant 0 : i32
    return %arg0, %c0_i32, %c0_i32_0, %c0_i32_1 : i32, i32, i32, i32
  }
  func.func @transform_1(%arg0: i32) -> i32 {
    %c0_i32 = arith.constant 0 : i32
    %c0_i32_0 = arith.constant 0 : i32
    return %c0_i32 : i32
  }
  func.func @transform_2(%arg0: i32) -> i32 {
    %c0_i32 = arith.constant 0 : i32
    %c0_i32_0 = arith.constant 0 : i32
    return %c0_i32 : i32
  }
  func.func @transform_3(%arg0: i32) -> (i32, i32) {
    %c0_i32 = arith.constant 0 : i32
    %c0_i32_0 = arith.constant 0 : i32
    %c0_i32_1 = arith.constant 0 : i32
    return %c0_i32, %c0_i32_0 : i32, i32
  }
  func.func @transform_4(%arg0: i32) -> i32 {
    %c0_i32 = arith.constant 0 : i32
    %c0_i32_0 = arith.constant 0 : i32
    return %c0_i32 : i32
  }
  func.func @transform_5(%arg0: i32) -> (i32, i32) {
    %c0_i32 = arith.constant 0 : i32
    %c0_i32_0 = arith.constant 0 : i32
    %c0_i32_1 = arith.constant 0 : i32
    return %c0_i32, %c0_i32_0 : i32, i32
  }
  func.func @transform_6(%arg0: i32) -> i32 {
    %c0_i32 = arith.constant 0 : i32
    %c0_i32_0 = arith.constant 0 : i32
    return %c0_i32 : i32
  }
  func.func @transform_7(%arg0: i32) -> (i32, i32, i32, i32) {
    %c0_i32 = arith.constant 0 : i32
    %c0_i32_0 = arith.constant 0 : i32
    %c0_i32_1 = arith.constant 0 : i32
    %c0_i32_2 = arith.constant 0 : i32
    return %arg0, %c0_i32, %c0_i32_0, %c0_i32_1 : i32, i32, i32, i32
  }
  func.func @transform_8(%arg0: i32) -> (i32, i32, i32) {
    %c0_i32 = arith.constant 0 : i32
    %c0_i32_0 = arith.constant 0 : i32
    %c0_i32_1 = arith.constant 0 : i32
    return %arg0, %c0_i32, %c0_i32_0 : i32, i32, i32
  }
}

</mosaic_0001>

<bundles_post_ra>
// kernel: up_ds_forward.5
= control target key start
LH: loop header
LB: loop body
LE: loop exit
PB: predicated region body
PF: predicated region fallthrough
CT: control target
= control target key end

     0   :  { %8 = vsyncpa [#allocation4], 0  ;;  %s874_s0 = inlined_call_operand.vmem [shape: bf16[2,4,32,128], index: 0, kind: input, shape index: {}]   ;;  %s875_s1 = inlined_call_operand.vmem [shape: f32[4], index: 1, kind: input, shape index: {}]   ;;  %s876_s2 = inlined_call_operand.vmem [shape: f32[4], index: 2, kind: input, shape index: {}]   ;;  %s877_s3 = inlined_call_operand.hbm [shape: f32[2,4,32,128], index: 3, kind: output, shape index: {}]  }
   0x1   :  { %9 = vsyncpa [#allocation6], 0 }
   0x2   :  { %10 = vsyncpa [#allocation3], 0 }
   0x3   :  { %12 = vsyncpa [#allocation3 + $0x1], 0  ;;  %s688_s12 = smov 0   ;;  %s690_s13 = smov 0  }
   0x4   :  { %s692_s14 = smov 0   ;;  %s694_s15 = smov 0  }
   0x5 LB: > { %s709_s16 = sadd.s32 4294967295, %s661_s15   ;;  %s412_s17 = sadd.s32 4294967294, %s661_s15   ;;  %s661_s15 = sphi %s694_s15, %s895_s15   ;;  %s657_s14 = sphi %s692_s14, %s894_s14   ;;  %s653_s13 = sphi %s690_s13, %s893_s13   ;;  %s649_s12 = sphi %s688_s12, %s892_s12  }
   0x6   : > { %s713_s18 = sadd.s32 1, %s661_s15   ;;  %s93_s19 = sadd.s32 1, %s657_s14 }
   0x7   : > { %s90_s20 = ssub.s32 %s661_s15, %s713_s18  ;;  %p103_p0 = scmp.ne.s32.totalorder %s657_s14, %s653_s13 }
   0x8   : > { %p91_p1 = scmp.eq.s32.totalorder %s90_s20, 0  ;;  %p104_p2 = scmp.eq.s32.totalorder %s709_s16, 1 }
   0x9   : > { %p109_p3 = scmp.ne.s32.totalorder %s653_s13, %s649_s12  ;;  %p110_p4 = scmp.eq.s32.totalorder %s412_s17, 1 }
   0xa   : > { %s724_s21 = scalar_select %p91_p1, %s657_s14, %s93_s19  }
   0xb   : > { %p726_p5 = por %p104_p2, %p103_p0  ;;  %p730_p6 = por %p110_p4, %p109_p3 }
   0xc   : > { %p413_p7 = scmp.ge.s32.totalorder %s661_s15, 1  ;;  %p117_p8 = scmp.lt.s32.totalorder %s661_s15, 3 }
   0xd   : > { %s881_s22 = scalar_select %p726_p5, 1, 0 }
   0xe   : > { %s882_s23 = scalar_select %p730_p6, 1, 0 }
   0xf   : > { %p878_p9 = scmp.eq.s32.totalorder %s709_s16, 0  ;;  %p737_p10 = pnand %p413_p7, %p117_p8 }
  0x10   : > { %s130_s27 = sshll.u32 %s875_s1, 4  ;;  %s141_s30 = sshll.u32 %s876_s2, 4  ;;  %s131_s27 = int_to_ptr.vmem [resolvable:$true] %s130_s27  ;;  %s142_s30 = int_to_ptr.vmem [resolvable:$true] %s141_s30 }
  0x11   : > { %s883_s24 = scalar_select %p737_p10, 1, 0 }
  0x12   : > { %p509_p11 = pneg %p737_p10  ;;  %s561_s5 = scalar_lea.vmem %s131_s27, 16 }
  0x13   : > { %p562_p13 = scmp.ne.s32.totalorder %s131_s27, %s561_s5  ;;  %p569_p3 = scmp.lt.s32.totalorder %s131_s27, %s131_s27 }
  0x14   : > { %p751_p12 = pnand %p878_p9, %p509_p11  ;;  %p570_p4 = scmp.lt.s32.totalorder %s561_s5, %s561_s5 }
  0x16   : > { %p563_p0 = pneg %p751_p12  ;;  %p571_p7 = por %p570_p4, %p569_p3 }
  0x18   : > { %p564_p1 = pnand %p563_p0, %p562_p13 }
  0x1a   : > { %p565_p2 = pneg %p564_p1 }
  0x1c   : > { %p572_p8 = pnand %p571_p7, %p565_p2 }
  0x1e   : > { %575 = shalt.err (!%p572_p8)
}
  0x1f   : > { %s663_s6 = smov [#allocation2]   ;;  %s576_s7 = scalar_lea.vmem %s142_s30, 16 }
  0x20   : > { %512 = dma.vmem_to_smem (!%p751_p12), %s131_s27, 16, %s663_s6, [#allocation4]  }
  0x21   : > { %p577_p11 = scmp.ne.s32.totalorder %s142_s30, %s576_s7  ;;  %p584_p5 = scmp.lt.s32.totalorder %s142_s30, %s142_s30 }
  0x22   : > { %p585_p10 = scmp.lt.s32.totalorder %s576_s7, %s576_s7 }
  0x23   : > { %p579_p9 = pnand %p577_p11, %p563_p0 }
  0x24   : > { %p586_p13 = por %p585_p10, %p584_p5 }
  0x25   : > { %p580_p6 = pneg %p579_p9 }
  0x27   : > { %p587_p1 = pnand %p586_p13, %p580_p6 }
  0x29   : > { %590 = shalt.err (!%p587_p1)
}
  0x2a   : > { %s664_s8 = smov [#allocation5]   ;;  %p885_p2 = scmp.ne.s32.totalorder %s883_s24, 0 }
  0x2b   : > { %515 = dma.vmem_to_smem (!%p751_p12), %s142_s30, 16, %s664_s8, [#allocation6]  }
  0x2c   : > { %162 = sbr.rel (%p885_p2) target bundleno = 101 (0x65), region = 32  ;;  %p886_p3 = scmp.eq.s32.totalorder (!%p885_p2), %s709_s16, 0 }
  0x33   : > { %636 = dma.done.wait (%p886_p3), [#allocation4], 16   ;;  %p887_p4 = pmov %p886_p3 }
  0x34   : > { %p888_p9 = pmov %p886_p3 }
  0x35   : > { %638 = vsyncadd (%p887_p4), [#allocation4], 4294967280 }
  0x36   : > { %640 = dma.done.wait (%p888_p9), [#allocation6], 16   ;;  %p889_p5 = pmov %p886_p3 }
  0x38   : > { %642 = vsyncadd (%p889_p5), [#allocation6], 4294967280 }
  0x39   : > { %172 = sfence }
  0x3a   : > { %p191_p6 = scmp.lt.s32.totalorder %s709_s16, 1  ;;  %s204_s9 = sld [smem:[#allocation2]] }
  0x3b   : > { %s210_s10 = sld [smem:[#allocation5]]  ;;  %s427_s17 = sld [smem:[#allocation2 + $0x1]] }
  0x3c   : > { %s192_s11 = scalar_select %p191_p6, %s709_s16, 1 }
  0x3d   : > { %s428_s20 = sld [smem:[#allocation5 + $0x1]]  ;;  %s188_s24 = sand.u32 1, %s653_s13  }
  0x3e   : > { %s458_s19 = sshll.u32 %s192_s11, 6  ;;  %s783_s28 = sld [smem:[#allocation2 + $0x2]] }
  0x3f   : > { %s777_s27 = scalar_lea.vmem %s874_s0, %s458_s19  ;;  %s785_s29 = sld [smem:[#allocation5 + $0x2]] }
  0x40   : > { %v461_v0 = vld [vmem:[%s777_s27] sm:$0xff]   ;;  %v205_v1 = vstv %s204_s9  ;;  %v492_v2 = vld [vmem:[%s777_s27 + $0x8] sm:$0xff]   ;;  %v493_v3 = vld [vmem:[%s777_s27 + $0x10] sm:$0xff]   ;;  %s789_s30 = sshll.u32 %s188_s24, 7  ;;  %s791_s4 = sld [smem:[#allocation2 + $0x3]] }
  0x41   : > { %v462_v4 = vunpack.c.l.bf16 %v461_v0  ;;  %v211_v5 = vstv %s210_s10  ;;  %v463_v6 = vunpack.c.h.bf16 %v461_v0  ;;  %v466_v7 = vunpack.c.l.bf16 %v492_v2  ;;  %v494_v8 = vld [vmem:[%s777_s27 + $0x18] sm:$0xff]   ;;  %s793_s5 = sld [smem:[#allocation5 + $0x3]]  ;;  %v495_v29 = vld [vmem:[%s777_s27 + $0x20] sm:$0xff]   ;;  %v496_v34 = vld [vmem:[%s777_s27 + $0x28] sm:$0xff]   ;;  %s799_s6 = scalar_lea.vmem [#allocation7], %s789_s30 }
  0x42   : > { %v467_v9 = vunpack.c.h.bf16 %v492_v2  ;;  %v470_v10 = vunpack.c.l.bf16 %v493_v3  ;;  %v471_v11 = vunpack.c.h.bf16 %v493_v3  ;;  %v474_v12 = vunpack.c.l.bf16 %v494_v8  ;;  %v497_v39 = vld [vmem:[%s777_s27 + $0x30] sm:$0xff]   ;;  %v498_v48 = vld [vmem:[%s777_s27 + $0x38] sm:$0xff]   ;;  %s459_s7 = sshll.u32 %s709_s16, 11  ;;  %s328_s8 = sshll.u32 %s799_s6, 4  ;;  %s826_s8 = int_to_ptr.vmem [resolvable:$true] %s328_s8 }
  0x43   : > { %v206_v13 = vmul.f32 %v462_v4, %v205_v1  ;;  %v207_v14 = vmul.f32 %v463_v6, %v205_v1  ;;  %v208_v15 = vmul.f32 %v466_v7, %v205_v1  ;;  %v234_v16 = vstv %s427_s17  ;;  %s824_s16 = scalar_lea.hbm %s877_s3, %s459_s7  ;;  %s833_s11 = scalar_lea.sflag [#allocation3], %s188_s24 }
  0x44   : > { %v209_v17 = vmul.f32 %v467_v9, %v205_v1  ;;  %v235_v18 = vmul.f32 %v470_v10, %v234_v16  ;;  %v240_v19 = vstv %s428_s20  ;;  %v236_v20 = vmul.f32 %v471_v11, %v234_v16  ;;  %s591_s17 = scalar_lea.vmem %s826_s8, 2048  ;;  %p890_p12 = scmp.ne.s32.totalorder %s881_s22, 0 }
  0x45   : > { %v212_v21 = vadd.f32 %v211_v5, %v206_v13  ;;  %v213_v22 = vadd.f32 %v211_v5, %v207_v14  ;;  %v214_v23 = vadd.f32 %v211_v5, %v208_v15  ;;  %v237_v24 = vmul.f32 %v474_v12, %v234_v16  ;;  %p592_p10 = scmp.ne.s32.totalorder %s826_s8, %s591_s17  ;;  %s665_s19 = smov [#allocation7]  }
  0x46   : > { %v215_v25 = vadd.f32 %v211_v5, %v209_v17  ;;  %v241_v26 = vadd.f32 %v240_v19, %v235_v18  ;;  %v242_v27 = vadd.f32 %v240_v19, %v236_v20  ;;  %v475_v28 = vunpack.c.h.bf16 %v494_v8  ;;  %s595_s20 = sshll.u32 %s665_s19, 4  ;;  %s596_s20 = int_to_ptr.vmem [resolvable:$false] %s595_s20 }
  0x47   : > { %v216_v30 = vmax.f32 %v212_v21, 0.0  ;;  %v217_v31 = vmax.f32 %v213_v22, 0.0  ;;  %v218_v32 = vmax.f32 %v214_v23, 0.0  ;;  %v243_v33 = vadd.f32 %v240_v19, %v237_v24  ;;  %p593_p0 = pnand %p592_p10, %p890_p12  ;;  %s597_s25 = scalar_lea.vmem %s596_s20, 4096 }
  0x48   : > { %v219_v35 = vmax.f32 %v215_v25, 0.0  ;;  %v245_v36 = vmax.f32 %v241_v26, 0.0  ;;  %v246_v37 = vmax.f32 %v242_v27, 0.0  ;;  %v238_v38 = vmul.f32 %v475_v28, %v234_v16  ;;  %p598_p8 = scmp.lt.s32.totalorder %s826_s8, %s596_s20  ;;  %p599_p11 = scmp.lt.s32.totalorder %s597_s25, %s591_s17 }
  0x49   : > { %220 = vst [vmem:[%s799_s6] sm:$0xff] %v216_v30  ;;  %221 = vst [vmem:[%s799_s6 + $0x8] sm:$0xff] %v217_v31  ;;  %v247_v40 = vmax.f32 %v243_v33, 0.0  ;;  %v478_v41 = vunpack.c.l.bf16 %v495_v29  ;;  %v264_v42 = vstv %s783_s28  ;;  %v270_v43 = vstv %s785_s29  ;;  %p594_p7 = pneg %p593_p0 }
  0x4a   : > { %222 = vst [vmem:[%s799_s6 + $0x10] sm:$0xff] %v218_v32  ;;  %223 = vst [vmem:[%s799_s6 + $0x18] sm:$0xff] %v219_v35  ;;  %v244_v44 = vadd.f32 %v240_v19, %v238_v38  ;;  %v479_v45 = vunpack.c.h.bf16 %v495_v29  ;;  %v482_v46 = vunpack.c.l.bf16 %v496_v34  ;;  %v483_v47 = vunpack.c.h.bf16 %v496_v34  ;;  %p600_p13 = por %p599_p11, %p598_p8 }
  0x4b   : > { %429 = vst [vmem:[%s799_s6 + $0x20] sm:$0xff] %v245_v36  ;;  %430 = vst [vmem:[%s799_s6 + $0x28] sm:$0xff] %v246_v37  ;;  %v265_v49 = vmul.f32 %v478_v41, %v264_v42  ;;  %v486_v50 = vunpack.c.l.bf16 %v497_v39  ;;  %v294_v51 = vstv %s791_s4  ;;  %v300_v52 = vstv %s793_s5 }
  0x4c   : > { %431 = vst [vmem:[%s799_s6 + $0x30] sm:$0xff] %v247_v40  ;;  %v248_v53 = vmax.f32 %v244_v44, 0.0  ;;  %v266_v54 = vmul.f32 %v479_v45, %v264_v42  ;;  %v267_v55 = vmul.f32 %v482_v46, %v264_v42  ;;  %v268_v56 = vmul.f32 %v483_v47, %v264_v42  ;;  %p601_p1 = pnand %p600_p13, %p594_p7 }
  0x4d   : > { %v271_v57 = vadd.f32 %v270_v43, %v265_v49  ;;  %v295_v58 = vmul.f32 %v486_v50, %v294_v51  ;;  %v487_v59 = vunpack.c.h.bf16 %v497_v39  ;;  %v490_v60 = vunpack.c.l.bf16 %v498_v48 }
  0x4e   : > { %432 = vst [vmem:[%s799_s6 + $0x38] sm:$0xff] %v248_v53  ;;  %v272_v61 = vadd.f32 %v270_v43, %v266_v54  ;;  %v273_v62 = vadd.f32 %v270_v43, %v267_v55  ;;  %v274_v63 = vadd.f32 %v270_v43, %v268_v56  ;;  %v491_v0 = vunpack.c.h.bf16 %v498_v48 }
  0x4f   : > { %v275_v1 = vmax.f32 %v271_v57, 0.0  ;;  %v301_v2 = vadd.f32 %v300_v52, %v295_v58  ;;  %v296_v3 = vmul.f32 %v487_v59, %v294_v51  ;;  %v297_v4 = vmul.f32 %v490_v60, %v294_v51 }
  0x50   : > { %v276_v5 = vmax.f32 %v272_v61, 0.0  ;;  %v277_v6 = vmax.f32 %v273_v62, 0.0  ;;  %v278_v7 = vmax.f32 %v274_v63, 0.0  ;;  %v298_v8 = vmul.f32 %v491_v0, %v294_v51 }
  0x51   : > { %439 = vst [vmem:[%s799_s6 + $0x40] sm:$0xff] %v275_v1  ;;  %v305_v9 = vmax.f32 %v301_v2, 0.0  ;;  %v302_v10 = vadd.f32 %v300_v52, %v296_v3  ;;  %v303_v11 = vadd.f32 %v300_v52, %v297_v4 }
  0x52   : > { %440 = vst [vmem:[%s799_s6 + $0x48] sm:$0xff] %v276_v5  ;;  %441 = vst [vmem:[%s799_s6 + $0x50] sm:$0xff] %v277_v6  ;;  %v304_v12 = vadd.f32 %v300_v52, %v298_v8 }
  0x53   : > { %442 = vst [vmem:[%s799_s6 + $0x58] sm:$0xff] %v278_v7  ;;  %449 = vst [vmem:[%s799_s6 + $0x60] sm:$0xff] %v305_v9  ;;  %v306_v13 = vmax.f32 %v302_v10, 0.0  ;;  %v307_v14 = vmax.f32 %v303_v11, 0.0 }
  0x54   : > { %v308_v15 = vmax.f32 %v304_v12, 0.0 }
  0x55   : > { %450 = vst [vmem:[%s799_s6 + $0x68] sm:$0xff] %v306_v13  ;;  %451 = vst [vmem:[%s799_s6 + $0x70] sm:$0xff] %v307_v14 }
  0x56   : > { %452 = vst [vmem:[%s799_s6 + $0x78] sm:$0xff] %v308_v15 }
  0x57   : > { %604 = shalt.err (!%p601_p1)
}
  0x58   : > { %s605_s24 = scalar_lea.hbm %s824_s16, 2048  ;;  %s609_s28 = scalar_lea.hbm %s877_s3, 4096 }
  0x59   : > { %p606_p2 = scmp.ne.s32.totalorder %s824_s16, %s605_s24  ;;  %p610_p9 = scmp.lt.u32.totalorder %s824_s16, %s877_s3 }
  0x5a   : > { %p611_p5 = scmp.lt.u32.totalorder %s609_s28, %s605_s24  ;;  %p613_p10 = scmp.lt.u32.totalorder %s605_s24, %s824_s16 }
  0x5b   : > { %p607_p3 = pnand %p606_p2, %p890_p12 }
  0x5c   : > { %p612_p6 = por %p611_p5, %p610_p9 }
  0x5d   : > { %p608_p4 = pneg %p607_p3 }
  0x5e   : > { %p614_p0 = por %p613_p10, %p612_p6 }
  0x60   : > { %p615_p7 = pnand %p614_p0, %p608_p4 }
  0x62   : > { %618 = shalt.err (!%p615_p7)
}
  0x63   : > { %s666_s4 = smov 128   ;;  %s667_s5 = smov 8  }
  0x64   : > { %507 = dma.vmem_to_hbm [thread:$0]  (%p890_p12), %s826_s8, 2048, %s824_s16, %s833_s11, %s666_s4, %s666_s4, %s667_s5  }
  0x65 PF: > { %p524_p8 = scmp.ge.s32.totalorder %s661_s15, 2  ;;  %s343_s6 = sand.u32 1, %s649_s12  }
  0x66   : > { %p891_p11 = scmp.ne.s32.totalorder %s882_s23, 0  ;;  %s344_s7 = scalar_lea.sflag [#allocation3], %s343_s6 }
  0x68   : > { %p517_p13 = pnand %p524_p8, %p891_p11 }
  0x6a   : > { %644 = dma.done.wait (!%p517_p13), %s344_s7, 2048  }
  0x6b   : > { %646 = vsyncadd (!%p517_p13), %s344_s7, 4294965248  ;;  %p15_p1 = scmp.ge.s32.totalorder %s713_s18, 4   ;;  %s892_s12 = smov %s653_s13 }
  0x6c   : > { %s893_s13 = smov %s657_s14  ;;  %s894_s14 = smov %s724_s21 }
  0x6d   : > { %s895_s15 = smov %s713_s18  ;;  %17 = sbr.rel (!%p15_p1) target bundleno = 5 (0x5), region = 82 }
  0x74   :  { %349 = vsyncpa [#allocation3], 1 }
  0x75   :  { %351 = vsyncpa [#allocation3 + $0x1], 1 }
  0x76   :  { %352 = vsyncpa [#allocation4], 1 }
  0x77   :  { %354 = vsyncpa [#allocation4 + $0x1], 1 }
  0x78   :  { %355 = vsyncpa [#allocation6], 1 }

// kernel: up_ds_forward.4
= control target key start
LH: loop header
LB: loop body
LE: loop exit
PB: predicated region body
PF: predicated region fallthrough
CT: control target
= control target key end

     0   :  { %s4123_s0 = inlined_call_operand.vmem [shape: bf16[2,4,32,128], index: 0, kind: input, shape index: {}]   ;;  %s4124_s1 = inlined_call_operand.vmem [shape: f32[4], index: 1, kind: input, shape index: {}]   ;;  %s4125_s2 = inlined_call_operand.vmem [shape: f32[4], index: 2, kind: input, shape index: {}]   ;;  %s4126_s3 = inlined_call_operand.vmem [shape: f32[4,9], index: 3, kind: input, shape index: {}]   ;;  %s4127_s4 = inlined_call_operand.vmem [shape: f32[4], index: 4, kind: input, shape index: {}]   ;;  %s4128_s5 = inlined_call_operand.vmem [shape: f32[4,4], index: 5, kind: input, shape index: {}]   ;;  %s4129_s6 = inlined_call_operand.vmem [shape: f32[4], index: 6, kind: input, shape index: {}]   ;;  %s4130_s7 = inlined_call_operand.vmem [shape: bf16[2,4,32,128], index: 7, kind: output, shape index: {0}]   ;;  %s4131_s8 = inlined_call_operand.vmem [shape: f32[2,2,4], index: 8, kind: output, shape index: {1}]  }
   0x1   :  { %4194 = sst [smem:[#allocation60_spill]] %s4123_s0 }
   0x2   :  { %4195 = sst [smem:[#allocation61_spill]] %s4124_s1 }
   0x3   :  { %4196 = sst [smem:[#allocation62_spill]] %s4125_s2 }
   0x4   :  { %4197 = sst [smem:[#allocation63_spill]] %s4126_s3 }
   0x5   :  { %4198 = sst [smem:[#allocation64_spill]] %s4127_s4 }
   0x6   :  { %4199 = sst [smem:[#allocation65_spill]] %s4128_s5 }
   0x7   :  { %4200 = sst [smem:[#allocation66_spill]] %s4129_s6 }
   0x8   :  { %4201 = sst [smem:[#allocation67_spill]] %s4130_s7 }
   0x9   :  { %4202 = sst [smem:[#allocation68_spill]] %s4131_s8 }
   0xa   :  { %14 = vsyncpa [#allocation3], 0 }
   0xb   :  { %15 = vsyncpa [#allocation5], 0 }
   0xc   :  { %16 = vsyncpa [#allocation8], 0 }
   0xd   :  { %17 = vsyncpa [#allocation11], 0  ;;  %s2452_s27 = smov 0  }
   0xe LB: > { %4203 = sst [smem:[#allocation16_spill]] %s2397_s27  ;;  %s4204_s2 = sld [smem:[#allocation62_spill]]  ;;  %s2397_s27 = sphi %s2452_s27, %s23_s27  }
   0xf   : > { %s2461_s9 = sadd.s32 4294967295, %s2397_s27   ;;  %p1986_p0 = scmp.ge.s32.totalorder %s2397_s27, 1 }
  0x10   : > { %p232_p1 = scmp.lt.s32.totalorder %s2397_s27, 3  ;;  %p4132_p2 = scmp.eq.s32.totalorder %s2461_s9, 0 }
  0x11   : > { %s4206_s4 = sld [smem:[#allocation64_spill]]  ;;  %s4207_s1 = sld [smem:[#allocation61_spill]] }
  0x12   : > { %p2466_p3 = pnand %p1986_p0, %p232_p1  ;;  %s4209_s3 = sld [smem:[#allocation63_spill]] }
  0x13   : > { %s4210_s5 = sld [smem:[#allocation65_spill]] }
  0x14   : > { %s256_s30 = sshll.u32 %s4204_s2, 4  ;;  %p2238_p4 = pneg %p2466_p3  ;;  %s257_s30 = int_to_ptr.vmem [resolvable:$true] %s256_s30 }
  0x15   : > { %s2285_s24 = scalar_lea.vmem %s257_s30, 16  ;;  %p2293_p10 = scmp.lt.s32.totalorder %s257_s30, %s257_s30 }
  0x16   : > { %p2484_p5 = pnand %p4132_p2, %p2238_p4  ;;  %p2286_p6 = scmp.ne.s32.totalorder %s257_s30, %s2285_s24 }
  0x17   : > { %s278_s13 = sshll.u32 %s4206_s4, 4  ;;  %s245_s16 = sshll.u32 %s4207_s1, 4  ;;  %s2473_s13 = int_to_ptr.vmem [resolvable:$true] %s278_s13  ;;  %s2480_s16 = int_to_ptr.vmem [resolvable:$true] %s245_s16 }
  0x18   : > { %s267_s20 = sshll.u32 %s4209_s3, 4  ;;  %p2498_p7 = pneg %p2484_p5  ;;  %s2491_s20 = int_to_ptr.vmem [resolvable:$true] %s267_s20 }
  0x19   : > { %s289_s23 = sshll.u32 %s4210_s5, 4  ;;  %p2294_p11 = scmp.lt.s32.totalorder %s2285_s24, %s2285_s24  ;;  %s290_s23 = int_to_ptr.vmem [resolvable:$true] %s289_s23 }
  0x1a   : > { %p2288_p8 = pnand %p2498_p7, %p2286_p6 }
  0x1b   : > { %p2295_p12 = por %p2294_p11, %p2293_p10 }
  0x1c   : > { %p2289_p9 = pneg %p2288_p8 }
  0x1e   : > { %p2296_p13 = pnand %p2295_p12, %p2289_p9 }
  0x20   : > { %2299 = shalt.err (!%p2296_p13)
}
  0x21   : > { %s2399_s26 = smov [#allocation4]   ;;  %s2300_s28 = scalar_lea.vmem %s2473_s13, 16 }
  0x22   : > { %2244 = dma.vmem_to_smem (!%p2484_p5), %s257_s30, 16, %s2399_s26, [#allocation5]  }
  0x23   : > { %p2301_p0 = scmp.ne.s32.totalorder %s2473_s13, %s2300_s28  ;;  %p2308_p6 = scmp.lt.s32.totalorder %s2473_s13, %s2473_s13 }
  0x24   : > { %p2309_p8 = scmp.lt.s32.totalorder %s2300_s28, %s2300_s28 }
  0x25   : > { %p2303_p1 = pnand %p2301_p0, %p2498_p7 }
  0x26   : > { %p2310_p2 = por %p2309_p8, %p2308_p6 }
  0x27   : > { %p2304_p4 = pneg %p2303_p1 }
  0x29   : > { %p2311_p10 = pnand %p2310_p2, %p2304_p4 }
  0x2b   : > { %2314 = shalt.err (!%p2311_p10)
}
  0x2c   : > { %s2400_s29 = smov [#allocation7]   ;;  %s2315_s30 = scalar_lea.vmem %s2480_s16, 16 }
  0x2d   : > { %2250 = dma.vmem_to_smem (!%p2484_p5), %s2473_s13, 16, %s2400_s29, [#allocation8]  }
  0x2e   : > { %p2316_p9 = scmp.ne.s32.totalorder %s2480_s16, %s2315_s30  ;;  %p2323_p13 = scmp.lt.s32.totalorder %s2480_s16, %s2480_s16 }
  0x2f   : > { %p2324_p0 = scmp.lt.s32.totalorder %s2315_s30, %s2315_s30 }
  0x30   : > { %p2318_p11 = pnand %p2316_p9, %p2498_p7 }
  0x31   : > { %p2325_p1 = por %p2324_p0, %p2323_p13 }
  0x32   : > { %p2319_p12 = pneg %p2318_p11 }
  0x34   : > { %p2326_p2 = pnand %p2325_p1, %p2319_p12 }
  0x36   : > { %2329 = shalt.err (!%p2326_p2)
}
  0x37   : > { %s2401_s11 = smov [#allocation2]   ;;  %s2330_s12 = scalar_lea.vmem %s2491_s20, 64 }
  0x38   : > { %2241 = dma.vmem_to_smem (!%p2484_p5), %s2480_s16, 16, %s2401_s11, [#allocation3]  }
  0x39   : > { %p2331_p4 = scmp.ne.s32.totalorder %s2491_s20, %s2330_s12  ;;  %p2338_p10 = scmp.lt.s32.totalorder %s2491_s20, %s2491_s20 }
  0x3a   : > { %p2339_p9 = scmp.lt.s32.totalorder %s2330_s12, %s2330_s12 }
  0x3b   : > { %p2333_p6 = pnand %p2331_p4, %p2498_p7 }
  0x3c   : > { %p2340_p11 = por %p2339_p9, %p2338_p10 }
  0x3d   : > { %p2334_p8 = pneg %p2333_p6 }
  0x3f   : > { %p2341_p12 = pnand %p2340_p11, %p2334_p8 }
  0x41   : > { %2344 = shalt.err (!%p2341_p12)
}
  0x42   : > { %s2402_s13 = smov [#allocation6]   ;;  %s2345_s16 = scalar_lea.vmem %s290_s23, 64 }
  0x43   : > { %2247 = dma.vmem_to_smem (!%p2484_p5), %s2491_s20, 64, %s2402_s13, [#allocation5]  }
  0x44   : > { %p2346_p13 = scmp.ne.s32.totalorder %s290_s23, %s2345_s16  ;;  %p2353_p2 = scmp.lt.s32.totalorder %s290_s23, %s290_s23 }
  0x45   : > { %p2354_p4 = scmp.lt.s32.totalorder %s2345_s16, %s2345_s16 }
  0x46   : > { %p2348_p0 = pnand %p2346_p13, %p2498_p7 }
  0x47   : > { %p2355_p6 = por %p2354_p4, %p2353_p2 }
  0x48   : > { %p2349_p1 = pneg %p2348_p0 }
  0x4a   : > { %p2356_p8 = pnand %p2355_p6, %p2349_p1 }
  0x4c   : > { %2359 = shalt.err (!%p2356_p8)
}
  0x4d   : > { %s2403_s18 = smov [#allocation9]   ;;  %s4212_s6 = sld [smem:[#allocation66_spill]] }
  0x4e   : > { %2253 = dma.vmem_to_smem (!%p2484_p5), %s290_s23, 64, %s2403_s18, [#allocation8]  }
  0x53   : > { %s300_s21 = sshll.u32 %s4212_s6, 4  ;;  %s301_s21 = int_to_ptr.vmem [resolvable:$true] %s300_s21 }
  0x54   : > { %s2360_s22 = scalar_lea.vmem %s301_s21, 16  ;;  %p2368_p12 = scmp.lt.s32.totalorder %s301_s21, %s301_s21 }
  0x55   : > { %p2361_p10 = scmp.ne.s32.totalorder %s301_s21, %s2360_s22  ;;  %p2369_p13 = scmp.lt.s32.totalorder %s2360_s22, %s2360_s22 }
  0x57   : > { %p2363_p9 = pnand %p2361_p10, %p2498_p7  ;;  %p2370_p0 = por %p2369_p13, %p2368_p12 }
  0x59   : > { %p2364_p11 = pneg %p2363_p9 }
  0x5b   : > { %p2371_p1 = pnand %p2370_p0, %p2364_p11 }
  0x5d   : > { %2374 = shalt.err (!%p2371_p1)
}
  0x5e   : > { %s2404_s24 = smov [#allocation10]   ;;  %321 = sbr.rel (%p2466_p3) target bundleno = 823 (0x337), region = 48 }
  0x5f   : > { %2256 = dma.vmem_to_smem (!%p2484_p5), %s301_s21, 16, %s2404_s24, [#allocation11]  }
  0x65   : > { %p4213_p2 = scmp.eq.s32.totalorder %s2461_s9, 0 }
  0x67   : > { %2380 = dma.done.wait (%p4213_p2), [#allocation3], 16   ;;  %p4214_p4 = pmov %p4213_p2 }
  0x68   : > { %p4215_p7 = pmov %p4213_p2 }
  0x69   : > { %2382 = vsyncadd (%p4214_p4), [#allocation3], 4294967280 }
  0x6a   : > { %2384 = dma.done.wait (%p4215_p7), [#allocation5], 80   ;;  %p4216_p6 = pmov %p4213_p2 }
  0x6b   : > { %p4217_p8 = pmov %p4213_p2 }
  0x6c   : > { %2386 = vsyncadd (%p4216_p6), [#allocation5], 4294967216 }
  0x6d   : > { %2388 = dma.done.wait (%p4217_p8), [#allocation8], 80   ;;  %p4218_p5 = pmov %p4213_p2 }
  0x6e   : > { %p4219_p3 = pmov %p4213_p2 }
  0x6f   : > { %2390 = vsyncadd (%p4218_p5), [#allocation8], 4294967216 }
  0x70   : > { %2392 = dma.done.wait (%p4219_p3), [#allocation11], 16   ;;  %p4220_p10 = pmov %p4213_p2 }
  0x72   : > { %2394 = vsyncadd (%p4220_p10), [#allocation11], 4294967280 }
  0x73   : > { %347 = sfence }
  0x74   : > { %p380_p9 = scmp.lt.s32.totalorder %s2461_s9, 1  ;;  %s2021_s10 = sld [smem:[#allocation2 + $0x1]]  ;;  %vm422_vm0 = vcmask 1040384   ;;  %vm435_vm1 = vcmask 1046528   ;;  %vm462_vm2 = vcmask 7168   ;;  %vm499_vm3 = vcmask 1039360  }
  0x75   : > { %s2022_s17 = sld [smem:[#allocation4 + $0x1]]  ;;  %s402_s23 = sld [smem:[#allocation2]]  ;;  %vm1825_vm4 = vcmask 15360   ;;  %vm1827_vm5 = vcmask 23552   ;;  %vm1836_vm6 = vcmask 25600  }
  0x76   : > { %s4380_s9 = smov (!%p380_p9, %s2461_s9), 1  ;;  %s408_s26 = sld [smem:[#allocation4]] }
  0x77   : > { %4221 = sst [smem:[#allocation17_spill]] %s4380_s9  ;;  %s4169_s25 = sshll.u32 %s4380_s9, 6 }
  0x78   : > { %s4222_s0 = sld [smem:[#allocation60_spill]]  ;;  %s2041_s11 = sld [smem:[#allocation2 + $0x2]] }
  0x79   : > { %s2042_s12 = sld [smem:[#allocation4 + $0x2]]  ;;  %s2405_s13 = smov 1  }
  0x7a   : > { %v2581_v5 = vstv %s2021_s10  ;;  %s2406_s14 = smov 127   ;;  %s2061_s15 = sld [smem:[#allocation2 + $0x3]] }
  0x7b   : > { %v2583_v6 = vstv %s2022_s17  ;;  %v403_v13 = vstv %s402_s23  ;;  %s2062_s16 = sld [smem:[#allocation4 + $0x3]]  ;;  %s2024_s18 = sld [smem:[#allocation6 + $0x81]] }
  0x7c   : > { %v409_v16 = vstv %s408_s26  ;;  %s2006_s19 = sld [smem:[#allocation6 + $0x1]]  ;;  %s2959_s22 = sld [smem:[#allocation6 + $0x80]] }
  0x7d   : > { %s2044_s20 = sld [smem:[#allocation6 + $0x101]]  ;;  %s2966_s24 = sld [smem:[#allocation6]] }
  0x7e   : > { %s2576_s30 = scalar_lea.vmem %s4222_s0, %s4169_s25  ;;  %v2610_v38 = vstv %s2041_s11  ;;  %s2064_s21 = sld [smem:[#allocation6 + $0x181]] }
  0x7f   : > { %v2201_v0 = vld [vmem:[%s2576_s30 + $0x10] sm:$0xff]   ;;  %v2129_v1 = vld [vmem:[%s2576_s30] sm:$0xff]   ;;  %v2200_v2 = vld [vmem:[%s2576_s30 + $0x8] sm:$0xff]   ;;  %v2633_v47 = vstv %s2042_s12  ;;  %s2968_s10 = sld [smem:[#allocation6 + $0x2]]  ;;  %s2974_s23 = sld [smem:[#allocation6 + $0x100]] }
  0x80   : > { %v2138_v3 = vunpack.c.l.bf16 %v2201_v0  ;;  %v2139_v4 = vunpack.c.h.bf16 %v2201_v0  ;;  %v2586_v7 = vld [vmem:[%s2576_s30 + $0x18] sm:$0xff]   ;;  %v2130_v8 = vunpack.c.l.bf16 %v2129_v1  ;;  %v2131_v9 = vunpack.c.h.bf16 %v2129_v1  ;;  %v2203_v22 = vld [vmem:[%s2576_s30 + $0x20] sm:$0xff]   ;;  %v2204_v63 = vld [vmem:[%s2576_s30 + $0x28] sm:$0xff]   ;;  %s2972_s17 = sld [smem:[#allocation6 + $0x82]]  ;;  %s2980_s26 = sld [smem:[#allocation6 + $0x4]] }
  0x81   : > { %v2134_v10 = vunpack.c.l.bf16 %v2200_v2  ;;  %v2142_v11 = vunpack.c.l.bf16 %v2586_v7  ;;  %v2146_v30 = vunpack.c.l.bf16 %v2203_v22  ;;  %v2147_v34 = vunpack.c.h.bf16 %v2203_v22  ;;  %s2982_s28 = sld [smem:[#allocation6 + $0x84]]  ;;  %s2986_s29 = sld [smem:[#allocation6 + $0x3]] }
  0x82   : > { %v695_v12 = vmul.f32 %v2138_v3, %v2581_v5  ;;  %v696_v14 = vmul.f32 %v2139_v4, %v2581_v5  ;;  %v404_v15 = vmul.f32 %v2130_v8, %v403_v13  ;;  %v405_v17 = vmul.f32 %v2131_v9, %v403_v13  ;;  %s2996_s11 = sld [smem:[#allocation6 + $0x102]]  ;;  %s2998_s12 = sld [smem:[#allocation6 + $0x180]] }
  0x83   : > { %v406_v18 = vmul.f32 %v2134_v10, %v403_v13  ;;  %v697_v21 = vmul.f32 %v2142_v11, %v2581_v5  ;;  %v982_v43 = vmul.f32 %v2146_v30, %v2610_v38  ;;  %v983_v44 = vmul.f32 %v2147_v34, %v2610_v38  ;;  %s3479_s25 = sld [smem:[#allocation6 + $0x186]]  ;;  %s3481_s0 = sld [smem:[#allocation6 + $0x108]] }
  0x84   : > { %v701_v19 = vadd.f32 %v2583_v6, %v695_v12  ;;  %v702_v20 = vadd.f32 %v2583_v6, %v696_v14  ;;  %v410_v23 = vadd.f32 %v409_v16, %v404_v15  ;;  %v411_v24 = vadd.f32 %v409_v16, %v405_v17  ;;  %s3488_s1 = sld [smem:[#allocation9 + $0x2]]  ;;  %s3518_s2 = sld [smem:[#allocation6 + $0x188]] }
  0x85   : > { %v412_v25 = vadd.f32 %v409_v16, %v406_v18  ;;  %v703_v33 = vadd.f32 %v2583_v6, %v697_v21  ;;  %v2135_v48 = vunpack.c.h.bf16 %v2200_v2  ;;  %v988_v50 = vadd.f32 %v2633_v47, %v982_v43  ;;  %s3532_s3 = sld [smem:[#allocation7 + $0x3]]  ;;  %s3561_s6 = sld [smem:[#allocation10]] }
  0x86   : > { %v2595_v26 = vmax.f32 %v701_v19, 0.0  ;;  %v2597_v27 = vmax.f32 %v702_v20, 0.0  ;;  %v2599_v28 = vmax.f32 %v410_v23, 0.0  ;;  %v2601_v29 = vmax.f32 %v411_v24, 0.0  ;;  %s3534_s4 = sld [smem:[#allocation9 + $0x3]]  ;;  %s3576_s8 = sld [smem:[#allocation10 + $0x1]] }
  0x87   : > { %v2608_v37 = vmax.f32 %v412_v25, 0.0  ;;  %v2625_v42 = vmax.f32 %v703_v33, 0.0  ;;  %v989_v51 = vadd.f32 %v2633_v47, %v983_v44  ;;  %v407_v53 = vmul.f32 %v2135_v48, %v403_v13  ;;  %s3548_s5 = sld [smem:[#allocation9 + $0x83]]  ;;  %s3578_s7 = sld [smem:[#allocation10 + $0x2]] }
  0x88   : > { %v713_v31 = vrot.slane %v2595_v26, 7  ;;  %v714_v32 = vrot.slane %v2597_v27, 7  ;;  %v423_v35 = vrot.slane %v2599_v28, 7  ;;  %v424_v36 = vrot.slane %v2601_v29, 7  ;;  %s3563_s27 = sld [smem:[#allocation9 + $0x183]] }
  0x89   : > { %4223 = vst [vmem:[#allocation18_spill] sm:$0xff] %v2608_v37  ;;  %4224 = vst [vmem:[#allocation19_spill] sm:$0xff] %v2625_v42  ;;  %v426_v46 = vrot.slane %v2608_v37, 7  ;;  %v716_v49 = vrot.slane %v2625_v42, 7  ;;  %v2652_v55 = vmax.f32 %v988_v50, 0.0  ;;  %v2654_v56 = vmax.f32 %v989_v51, 0.0 }
  0x8a   : > { %v2613_v39 = vsel %vm422_vm0, 0.0, %v713_v31  ;;  %v2618_v40 = vsel %vm422_vm0, 0.0, %v423_v35  ;;  %v2623_v41 = vsel %vm422_vm0, %v713_v31, %v714_v32  ;;  %v2630_v45 = vsel %vm422_vm0, %v423_v35, %v424_v36  ;;  %s3592_s9 = sld [smem:[#allocation10 + $0x3]] }
  0x8b   : > { %739 = vrot.lane.b32.xlu1 %v2613_v39, %s2405_s13  ;;  %450 = vrot.lane.b32.xlu0 %v2618_v40, %s2405_s13  ;;  %v2643_v52 = vsel %vm422_vm0, %v424_v36, %v426_v46  ;;  %v2650_v54 = vsel %vm422_vm0, %v714_v32, %v716_v49  ;;  %4227 = vst [vmem:[#allocation22_spill] sm:$0xff] %v2652_v55  ;;  %4228 = vst [vmem:[#allocation23_spill] sm:$0xff] %v2654_v56  ;;  %v2143_v58 = vunpack.c.h.bf16 %v2586_v7  ;;  %v2206_v32 = vld [vmem:[%s2576_s30 + $0x38] sm:$0xff]  }
  0x8c   : > { %4225 = vst [vmem:[#allocation20_spill] sm:$0xff] %v2643_v52  ;;  %4226 = vst [vmem:[#allocation21_spill] sm:$0xff] %v2650_v54  ;;  %v413_v57 = vadd.f32 %v409_v16, %v407_v53  ;;  %v1000_v59 = vrot.slane %v2652_v55, 7  ;;  %v1001_v60 = vrot.slane %v2654_v56, 7  ;;  %v2150_v4 = vunpack.c.l.bf16 %v2204_v63 }
  0x8d   : > { %v698_v62 = vmul.f32 %v2143_v58, %v2581_v5  ;;  %v2205_v5 = vld [vmem:[%s2576_s30 + $0x30] sm:$0xff]   ;;  %v1268_v11 = vstv %s2061_s15  ;;  %v1274_v15 = vstv %s2062_s16  ;;  %v2151_v21 = vunpack.c.h.bf16 %v2204_v63  ;;  %s2988_s30 = sld [smem:[#allocation6 + $0x83]]  ;;  %s3051_s16 = sld [smem:[#allocation6 + $0x182]] }
  0x8e   : > { %v2663_v61 = vmax.f32 %v413_v57, 0.0  ;;  %v2672_v0 = vsel %vm422_vm0, %v1000_v59, %v1001_v60  ;;  %v2675_v1 = vsel %vm422_vm0, 0.0, %v1000_v59  ;;  %v2154_v7 = vunpack.c.l.bf16 %v2205_v5  ;;  %s3016_s15 = sld [smem:[#allocation6 + $0x103]] }
  0x8f   : > { %741 = vrot.lane.b32.xlu1 %v2623_v41, %s2405_s13  ;;  %452 = vrot.lane.b32.xlu0 %v2630_v45, %s2405_s13  ;;  %v704_v3 = vadd.f32 %v2583_v6, %v698_v62  ;;  %v984_v10 = vmul.f32 %v2150_v4, %v2610_v38  ;;  %v2155_v14 = vunpack.c.h.bf16 %v2205_v5  ;;  %v985_v25 = vmul.f32 %v2151_v21, %v2610_v38 }
  0x90   : > { %4229 = vst [vmem:[#allocation24_spill] sm:$0xff] %v2663_v61  ;;  %v428_v2 = vrot.slane %v2663_v61, 7  ;;  %v1269_v6 = vmul.f32 %v2154_v7, %v1268_v11  ;;  %v2158_v35 = vunpack.c.l.bf16 %v2206_v32  ;;  %v2159_v53 = vunpack.c.h.bf16 %v2206_v32 }
  0x91   : > { %v2687_v9 = vmax.f32 %v704_v3, 0.0  ;;  %v990_v13 = vadd.f32 %v2633_v47, %v984_v10  ;;  %v1270_v19 = vmul.f32 %v2155_v14, %v1268_v11  ;;  %v991_v34 = vadd.f32 %v2633_v47, %v985_v25 }
  0x92   : > { %v2685_v8 = vsel %vm422_vm0, %v426_v46, %v428_v2  ;;  %v1275_v16 = vadd.f32 %v1274_v15, %v1269_v6  ;;  %v1271_v43 = vmul.f32 %v2158_v35, %v1268_v11  ;;  %v1272_v57 = vmul.f32 %v2159_v53, %v1268_v11 }
  0x93   : > { %487 = vrot.lane.b32.xlu1 %v2618_v40, %s2406_s14  ;;  %454 = vrot.lane.b32.xlu0 %v2643_v52, %s2405_s13  ;;  %4230 = vst [vmem:[#allocation25_spill] sm:$0xff] %v2687_v9  ;;  %v718_v12 = vrot.slane %v2687_v9, 7  ;;  %v2703_v18 = vmax.f32 %v990_v13, 0.0  ;;  %v1276_v23 = vadd.f32 %v1274_v15, %v1270_v19  ;;  %v2737_v38 = vmax.f32 %v991_v34, 0.0 }
  0x94   : > { %v2709_v20 = vmax.f32 %v1275_v16, 0.0  ;;  %v1277_v47 = vadd.f32 %v1274_v15, %v1271_v43  ;;  %v1278_v58 = vadd.f32 %v1274_v15, %v1272_v57  ;;  %v436_v63 = vrot.slane %v2599_v28, 1 }
  0x95   : > { %v2701_v17 = vsel %vm422_vm0, %v716_v49, %v718_v12  ;;  %4231 = vst [vmem:[#allocation26_spill] sm:$0xff] %v2703_v18  ;;  %v1003_v22 = vrot.slane %v2703_v18, 7  ;;  %v2721_v31 = vmax.f32 %v1276_v23, 0.0  ;;  %4235 = vst [vmem:[#allocation30_spill] sm:$0xff] %v2737_v38  ;;  %v1005_v46 = vrot.slane %v2737_v38, 7 }
  0x96   : > { %4232 = vst [vmem:[#allocation27_spill] sm:$0xff] %v2709_v20  ;;  %v1287_v24 = vrot.slane %v2709_v20, 7  ;;  %v2754_v49 = vmax.f32 %v1277_v47, 0.0  ;;  %v2784_v59 = vmax.f32 %v1278_v58, 0.0  ;;  %v437_v2 = vrot.slane %v2601_v29, 1 }
  0x97   : > { %743 = vrot.lane.b32.xlu1 %v2650_v54, %s2405_s13  ;;  %489 = vrot.lane.b32.xlu0 %v2630_v45, %s2406_s14  ;;  %v2719_v30 = vsel %vm422_vm0, %v1001_v60, %v1003_v22  ;;  %4234 = vst [vmem:[#allocation29_spill] sm:$0xff] %v2721_v31  ;;  %v1288_v36 = vrot.slane %v2721_v31, 7  ;;  %v2752_v48 = vsel %vm422_vm0, %v1003_v22, %v1005_v46  ;;  %v439_v4 = vrot.slane %v2608_v37, 1 }
  0x98   : > { %4233 = vst [vmem:[#allocation28_spill] sm:$0xff] %v2719_v30  ;;  %v2729_v33 = vsel %vm422_vm0, 0.0, %v1287_v24  ;;  %4236 = vst [vmem:[#allocation31_spill] sm:$0xff] %v2754_v49  ;;  %v1290_v50 = vrot.slane %v2754_v49, 7  ;;  %v1292_v60 = vrot.slane %v2784_v59, 7  ;;  %v2809_v3 = vsel %vm435_vm1, %v436_v63, %v437_v2 }
  0x99   : > { %v2740_v44 = vsel %vm422_vm0, %v1287_v24, %v1288_v36  ;;  %4238 = vst [vmem:[#allocation33_spill] sm:$0xff] %v2784_v59  ;;  %4240 = vst [vmem:[#allocation35_spill] sm:$0xff] %v2809_v3  ;;  %v726_v5 = vrot.slane %v2597_v27, 1  ;;  %v728_v7 = vrot.slane %v2625_v42, 1  ;;  %v2819_v10 = vsel %vm435_vm1, %v437_v2, %v439_v4 }
  0x9a   : > { %v2766_v51 = vsel %vm422_vm0, %v1288_v36, %v1290_v50  ;;  %v2796_v62 = vsel %vm422_vm0, %v1290_v50, %v1292_v60  ;;  %4241 = vst [vmem:[#allocation36_spill] sm:$0xff] %v2819_v10  ;;  %v725_v11 = vrot.slane %v2595_v26, 1  ;;  %v441_v14 = vrot.slane %v2663_v61, 1 }
  0x9b   : > { %777 = vrot.lane.b32.xlu1 %v2623_v41, %s2406_s14  ;;  %775 = vrot.lane.b32.xlu0 %v2613_v39, %s2406_s14  ;;  %4237 = vst [vmem:[#allocation32_spill] sm:$0xff] %v2766_v51  ;;  %4239 = vst [vmem:[#allocation34_spill] sm:$0xff] %v2796_v62  ;;  %v2827_v6 = vsel %vm435_vm1, %v726_v5, %v728_v7  ;;  %v730_v21 = vrot.slane %v2687_v9, 1  ;;  %v1013_v23 = vrot.slane %v2654_v56, 1  ;;  %v1015_v24 = vrot.slane %v2703_v18, 1 }
  0x9c   : > { %4242 = vst [vmem:[#allocation37_spill] sm:$0xff] %v2827_v6  ;;  %v2830_v12 = vsel %vm435_vm1, %v725_v11, %v726_v5  ;;  %v2856_v19 = vsel %vm435_vm1, %v439_v4, %v441_v14  ;;  %v1012_v34 = vrot.slane %v2652_v55, 1  ;;  %v2902_v57 = vsel %vm435_vm1, %v441_v14, 0.0 }
  0x9d   : > { %4243 = vst [vmem:[#allocation38_spill] sm:$0xff] %v2830_v12  ;;  %4244 = vst [vmem:[#allocation39_spill] sm:$0xff] %v2856_v19  ;;  %v2870_v32 = vsel %vm435_vm1, %v728_v7, %v730_v21  ;;  %v2880_v36 = vsel %vm435_vm1, %v1013_v23, %v1015_v24  ;;  %v2923_v5 = vsel %vm435_vm1, %v730_v21, 0.0  ;;  %v1017_v14 = vrot.slane %v2737_v38, 1 }
  0x9e   : > { %4245 = vst [vmem:[#allocation40_spill] sm:$0xff] %v2870_v32  ;;  %4247 = vst [vmem:[#allocation42_spill] sm:$0xff] %v2880_v36  ;;  %v2885_v46 = vsel %vm435_vm1, %v1012_v34, %v1013_v23  ;;  %v1300_v21 = vrot.slane %v2721_v31, 1  ;;  %v4140_v34 = vrot.slane %v2754_v49, 1 }
  0x9f   : > { %1028 = vrot.lane.b32.xlu1 %v2672_v0, %s2405_s13  ;;  %1026 = vrot.lane.b32.xlu0 %v2675_v1, %s2405_s13  ;;  %4249 = vst [vmem:[#allocation44_spill] sm:$0xff] %v2885_v46  ;;  %4250 = vst [vmem:[#allocation45_spill] sm:$0xff] %v2902_v57 }
  0xa3   : > { %491 = vrot.lane.b32.xlu1 %v2643_v52, %s2406_s14  ;;  %456 = vrot.lane.b32.xlu0 %v2685_v8, %s2405_s13  ;;  %v3095_v52 = vstv %s2988_s30  ;;  %s3440_s30 = sld [smem:[#allocation6 + $0x8]] }
  0xa7   : > { %516 = vrot.lane.b32.xlu1 %v2601_v29, %s2405_s13  ;;  %514 = vrot.lane.b32.xlu0 %v2599_v28, %s2405_s13 }
  0xab   : > { %779 = vrot.lane.b32.xlu1 %v2650_v54, %s2406_s14  ;;  %745 = vrot.lane.b32.xlu0 %v2701_v17, %s2405_s13  ;;  %v3082_v54 = vstv %s2972_s17  ;;  %s3420_s17 = sld [smem:[#allocation6 + $0x107]] }
  0xaf   : > { %803 = vrot.lane.b32.xlu1 %v2597_v27, %s2405_s13  ;;  %801 = vrot.lane.b32.xlu0 %v2595_v26, %s2405_s13 }
  0xb3   : > { %1062 = vrot.lane.b32.xlu1 %v2675_v1, %s2406_s14  ;;  %1030 = vrot.lane.b32.xlu0 %v2719_v30, %s2405_s13 }
  0xb7   : > { %1313 = vrot.lane.b32.xlu1 %v2729_v33, %s2405_s13  ;;  %1064 = vrot.lane.b32.xlu0 %v2672_v0, %s2406_s14 }
  0xbb   : > { %493 = vrot.lane.b32.xlu1 %v2685_v8, %s2406_s14  ;;  %1315 = vrot.lane.b32.xlu0 %v2740_v44, %s2405_s13 }
  0xbf   : > { %781 = vrot.lane.b32.xlu1 %v2701_v17, %s2406_s14  ;;  %518 = vrot.lane.b32.xlu0 %v2608_v37, %s2405_s13 }
  0xc3   : > { %1032 = vrot.lane.b32.xlu1 %v2752_v48, %s2405_s13  ;;  %805 = vrot.lane.b32.xlu0 %v2625_v42, %s2405_s13 }
  0xc7   : > { %1088 = vrot.lane.b32.xlu1 %v2652_v55, %s2405_s13  ;;  %1066 = vrot.lane.b32.xlu0 %v2719_v30, %s2406_s14 }
  0xcb   : > { %1317 = vrot.lane.b32.xlu1 %v2766_v51, %s2405_s13  ;;  %1090 = vrot.lane.b32.xlu0 %v2654_v56, %s2405_s13 }
  0xcf   : > { %1351 = vrot.lane.b32.xlu1 %v2740_v44, %s2406_s14  ;;  %1349 = vrot.lane.b32.xlu0 %v2729_v33, %s2406_s14 }
  0xd3   : > { %550 = vrot.lane.b32.xlu1 %v2599_v28, %s2406_s14  ;;  %520 = vrot.lane.b32.xlu0 %v2663_v61, %s2405_s13 }
  0xd7   : > { %807 = vrot.lane.b32.xlu1 %v2687_v9, %s2405_s13  ;;  %552 = vrot.lane.b32.xlu0 %v2601_v29, %s2406_s14 }
  0xdb   : > { %839 = vrot.lane.b32.xlu1 %v2597_v27, %s2406_s14  ;;  %837 = vrot.lane.b32.xlu0 %v2595_v26, %s2406_s14 }
  0xdf   : > { %1092 = vrot.lane.b32.xlu1 %v2703_v18, %s2405_s13  ;;  %1068 = vrot.lane.b32.xlu0 %v2752_v48, %s2406_s14 }
  0xe3   : > { %1353 = vrot.lane.b32.xlu1 %v2766_v51, %s2406_s14  ;;  %1319 = vrot.lane.b32.xlu0 %v2796_v62, %s2405_s13 }
  0xe7   : > { %1377 = vrot.lane.b32.xlu1 %v2721_v31, %s2405_s13  ;;  %1375 = vrot.lane.b32.xlu0 %v2709_v20, %s2405_s13 }
  0xeb   : > { %577 = vrot.lane.b32.xlu1 %v2809_v3, %s2405_s13  ;;  %554 = vrot.lane.b32.xlu0 %v2608_v37, %s2406_s14  ;;  %v3063_v37 = vstv %s2966_s24  ;;  %s3413_s24 = sld [smem:[#allocation6 + $0x7]] }
  0xef   : > { %841 = vrot.lane.b32.xlu1 %v2625_v42, %s2406_s14  ;;  %579 = vrot.lane.b32.xlu0 %v2819_v10, %s2405_s13 }
  0xf3   : > { %866 = vrot.lane.b32.xlu1 %v2827_v6, %s2405_s13  ;;  %864 = vrot.lane.b32.xlu0 %v2830_v12, %s2405_s13 }
  0xf7   : > { %1124 = vrot.lane.b32.xlu1 %v2652_v55, %s2406_s14  ;;  %1094 = vrot.lane.b32.xlu0 %v2737_v38, %s2405_s13 }
  0xfb   : > { %1355 = vrot.lane.b32.xlu1 %v2796_v62, %s2406_s14  ;;  %1126 = vrot.lane.b32.xlu0 %v2654_v56, %s2406_s14 }
  0xfd   : > { %v2844_v13 = vpop.permute.xlu1 %739  ;;  %v2847_v15 = vpop.permute.xlu0 %450 }
  0xff   : > { %556 = vrot.lane.b32.xlu1 %v2663_v61, %s2406_s14  ;;  %1379 = vrot.lane.b32.xlu0 %v2754_v49, %s2405_s13  ;;  %v1299_v61 = vrot.slane %v2709_v20, 1 }
 0x101   : > { %v2853_v16 = vpop.permute.xlu1 %741  ;;  %v2859_v22 = vpop.permute.xlu0 %452 }
 0x103   : > { %843 = vrot.lane.b32.xlu1 %v2687_v9, %s2406_s14  ;;  %581 = vrot.lane.b32.xlu0 %v2856_v19, %s2405_s13  ;;  %v2945_v9 = vsel %vm435_vm1, %v1015_v24, %v1017_v14 }
 0x105   : > { %v2867_v25 = vpop.permute.xlu1 %487  ;;  %v2873_v35 = vpop.permute.xlu0 %454 }
 0x106   : > { %4246 = vst [vmem:[#allocation41_spill] sm:$0xff] %v2873_v35  ;;  %v751_v35 = vsel %vm462_vm2, 0.0, %v2844_v13  ;;  %v4263_v13 = vrot.slane %v2754_v49, 1 }
 0x107   : > { %1128 = vrot.lane.b32.xlu1 %v2703_v18, %s2406_s14  ;;  %868 = vrot.lane.b32.xlu0 %v2870_v32, %s2405_s13 }
 0x109   : > { %v2882_v43 = vpop.permute.xlu1 %743  ;;  %v2887_v47 = vpop.permute.xlu0 %489 }
 0x10a   : > { %4248 = vst [vmem:[#allocation43_spill] sm:$0xff] %v2882_v43 }
 0x10b   : > { %1153 = vrot.lane.b32.xlu1 %v2880_v36, %s2405_s13  ;;  %1151 = vrot.lane.b32.xlu0 %v2885_v46, %s2405_s13 }
 0x10d   : > { %v2893_v50 = vpop.permute.xlu1 %777  ;;  %v2895_v53 = vpop.permute.xlu0 %775 }
 0x10f   : > { %1411 = vrot.lane.b32.xlu1 %v2709_v20, %s2406_s14  ;;  %1381 = vrot.lane.b32.xlu0 %v2784_v59, %s2405_s13 }
 0x111   : > { %v2904_v58 = vpop.permute.xlu1 %1028  ;;  %v2906_v60 = vpop.permute.xlu0 %1026 }
 0x113   : > { %583 = vrot.lane.b32.xlu1 %v2902_v57, %s2405_s13  ;;  %1413 = vrot.lane.b32.xlu0 %v2721_v31, %s2406_s14  ;;  %v2964_v31 = vsel %vm435_vm1, %v1299_v61, %v1300_v21  ;;  %v2984_v61 = vstv %s2024_s18  ;;  %s3073_s18 = sld [smem:[#allocation6 + $0x5]] }
 0x114   : > { %4254 = vst [vmem:[#allocation49_spill] sm:$0xff] %v2984_v61  ;;  %v3008_v56 = vmul.f32 %v2984_v61, %v2613_v39  ;;  %v3012_v62 = vmul.f32 %v2984_v61, %v2623_v41 }
 0x115   : > { %v2912_v63 = vpop.permute.xlu1 %491  ;;  %v2914_v2 = vpop.permute.xlu0 %456 }
 0x116   : > { %4251 = vst [vmem:[#allocation46_spill] sm:$0xff] %v2912_v63  ;;  %v3098_v63 = vstv %s2996_s11  ;;  %s3442_s11 = sld [smem:[#allocation7]] }
 0x117   : > { %615 = vrot.lane.b32.xlu1 %v2819_v10, %s2406_s14  ;;  %613 = vrot.lane.b32.xlu0 %v2809_v3, %s2406_s14  ;;  %v3002_v3 = vstv %s2064_s21  ;;  %s2047_s21 = sld [smem:[#allocation6 + $0x104]] }
 0x118   : > { %4257 = vst [vmem:[#allocation52_spill] sm:$0xff] %v3002_v3 }
 0x119   : > { %v2920_v4 = vpop.permute.xlu1 %516  ;;  %v2925_v7 = vpop.permute.xlu0 %514 }
 0x11b   : > { %900 = vrot.lane.b32.xlu1 %v2830_v12, %s2406_s14  ;;  %870 = vrot.lane.b32.xlu0 %v2923_v5, %s2405_s13 }
 0x11d   : > { %v2931_v11 = vpop.permute.xlu1 %779  ;;  %v2934_v23 = vpop.permute.xlu0 %745 }
 0x11e   : > { %4252 = vst [vmem:[#allocation47_spill] sm:$0xff] %v2931_v11  ;;  %v3085_v11 = vstv %s2974_s23  ;;  %s3424_s23 = sld [smem:[#allocation6 + $0x187]] }
 0x11f   : > { %1130 = vrot.lane.b32.xlu1 %v2737_v38, %s2406_s14  ;;  %902 = vrot.lane.b32.xlu0 %v2827_v6, %s2406_s14  ;;  %v2957_v38 = vsel %vm435_vm1, %v1300_v21, %v4140_v34  ;;  %v2992_v34 = vstv %s2006_s19  ;;  %v2994_v6 = vstv %s2044_s20  ;;  %s3229_s19 = sld [smem:[#allocation6 + $0x85]]  ;;  %s2029_s20 = sld [smem:[#allocation6 + $0x86]] }
 0x120   : > { %4255 = vst [vmem:[#allocation50_spill] sm:$0xff] %v2992_v34  ;;  %4256 = vst [vmem:[#allocation51_spill] sm:$0xff] %v2994_v6  ;;  %v3020_v55 = vmul.f32 %v2992_v34, %v2618_v40  ;;  %v3024_v39 = vmul.f32 %v2992_v34, %v2630_v45  ;;  %v3028_v41 = vmul.f32 %v2994_v6, %v2672_v0 }
 0x121   : > { %v2942_v18 = vpop.permute.xlu1 %803  ;;  %v2948_v12 = vpop.permute.xlu0 %801  ;;  %v1053_v42 = vmul.f32 %v2994_v6, %v2675_v1  ;;  %v3039_v40 = vmul.f32 %v2992_v34, %v2685_v8  ;;  %v3043_v45 = vmul.f32 %v2984_v61, %v2701_v17  ;;  %v3047_v0 = vmul.f32 %v3002_v3, %v2729_v33 }
 0x122   : > { %v3055_v1 = vmul.f32 %v3002_v3, %v2740_v44  ;;  %v1056_v8 = vmul.f32 %v2994_v6, %v2752_v48  ;;  %v3060_v17 = vstv %s2959_s22  ;;  %v1304_v33 = vrot.slane %v2784_v59, 1  ;;  %s2048_s22 = sld [smem:[#allocation6 + $0x105]] }
 0x123   : > { %1415 = vrot.lane.b32.xlu1 %v2754_v49, %s2406_s14  ;;  %1155 = vrot.lane.b32.xlu0 %v2945_v9, %s2405_s13  ;;  %v3071_v44 = vstv %s2980_s26  ;;  %v3076_v48 = vstv %s2982_s28  ;;  %v1038_v34 = vsel %vm462_vm2, 0.0, %v2906_v60  ;;  %s3430_s26 = sld [smem:[#allocation6 + $0x184]]  ;;  %s3434_s28 = sld [smem:[#allocation6 + $0x106]] }
 0x124   : > { %4258 = vst [vmem:[#allocation53_spill] sm:$0xff] %v3071_v44  ;;  %4259 = vst [vmem:[#allocation54_spill] sm:$0xff] %v3076_v48  ;;  %v3079_v61 = vstv %s2968_s10  ;;  %v3101_v3 = vstv %s2998_s12  ;;  %v3111_v6 = vmul.f32 %v3071_v44, %v2599_v28  ;;  %v3115_v60 = vmul.f32 %v3071_v44, %v2601_v29  ;;  %s3418_s10 = sld [smem:[#allocation6 + $0x87]]  ;;  %s3448_s12 = sld [smem:[#allocation6 + $0x88]] }
 0x125   : > { %v2961_v24 = vpop.permute.xlu1 %1062  ;;  %v2970_v20 = vpop.permute.xlu0 %1030  ;;  %v3119_v30 = vmul.f32 %v3076_v48, %v2597_v27  ;;  %v3128_v28 = vsel %vm435_vm1, %v4263_v13, %v1304_v33  ;;  %v3135_v29 = vmul.f32 %v3076_v48, %v2595_v26  ;;  %v463_v27 = vsel %vm462_vm2, 0.0, %v2847_v15 }
 0x126   : > { %4253 = vst [vmem:[#allocation48_spill] sm:$0xff] %v2970_v20  ;;  %4261 = vst [vmem:[#allocation56_spill] sm:$0xff] %v3115_v60  ;;  %v1043_v44 = vmul.f32 %v3085_v11, %v1038_v34  ;;  %v3143_v49 = vsel %vm435_vm1, %v1304_v33, 0.0  ;;  %v756_v13 = vmul.f32 %v3060_v17, %v751_v35  ;;  %v3152_v15 = vstv %s3051_s16  ;;  %s3456_s16 = sld [smem:[#allocation9 + $0x80]] }
 0x127   : > { %1440 = vrot.lane.b32.xlu1 %v2957_v38, %s2405_s13  ;;  %1438 = vrot.lane.b32.xlu0 %v2964_v31, %s2405_s13  ;;  %4262 = vst [vmem:[#allocation57_spill] sm:$0xff] %v3119_v30  ;;  %4264 = vst [vmem:[#allocation58_spill] sm:$0xff] %v3135_v29  ;;  %v464_v30 = vsel %vm462_vm2, 0.0, %v2859_v22  ;;  %v1039_v34 = vsel %vm462_vm2, 0.0, %v2904_v58  ;;  %v468_v22 = vmul.f32 %v3063_v37, %v463_v27 }
 0x128   : > { %v469_v58 = vmul.f32 %v3063_v37, %v464_v30  ;;  %v3177_v27 = vadd.f32 %v3008_v56, %v756_v13 }
 0x129   : > { %v2990_v21 = vpop.permute.xlu1 %1313  ;;  %v3000_v10 = vpop.permute.xlu0 %1064  ;;  %v482_v56 = vadd.f32 %v3020_v55, %v468_v22 }
 0x12a   : > { %v1325_v13 = vsel %vm462_vm2, 0.0, %v2990_v21 }
 0x12b   : > { %904 = vrot.lane.b32.xlu1 %v2870_v32, %s2406_s14  ;;  %617 = vrot.lane.b32.xlu0 %v2856_v19, %s2406_s14  ;;  %v3033_v19 = vsel %vm435_vm1, %v1017_v14, 0.0 }
 0x12d   : > { %v3030_v32 = vpop.permute.xlu1 %493  ;;  %v3049_v14 = vpop.permute.xlu0 %1315 }
 0x12f   : > { %1187 = vrot.lane.b32.xlu1 %v2885_v46, %s2406_s14  ;;  %1157 = vrot.lane.b32.xlu0 %v3033_v19, %s2405_s13  ;;  %v3088_v46 = vstv %s2986_s29  ;;  %s3436_s29 = sld [smem:[#allocation6 + $0x185]] }
 0x131   : > { %v3090_v43 = vpop.permute.xlu1 %781  ;;  %v3103_v51 = vpop.permute.xlu0 %518 }
 0x132   : > { %4260 = vst [vmem:[#allocation55_spill] sm:$0xff] %v3103_v51  ;;  %v1074_v51 = vsel %vm499_vm3, %v2961_v24, 0.0  ;;  %v752_v24 = vsel %vm462_vm2, 0.0, %v2853_v16  ;;  %v500_v16 = vsel %vm499_vm3, %v2867_v25, 0.0  ;;  %v3169_v25 = vstv %s3073_s18  ;;  %s3458_s18 = sld [smem:[#allocation9 + $0x100]] }
 0x133   : > { %1417 = vrot.lane.b32.xlu1 %v2784_v59, %s2406_s14  ;;  %1189 = vrot.lane.b32.xlu0 %v2880_v36, %s2406_s14  ;;  %v3131_v59 = vstv %s3016_s15  ;;  %v1079_v33 = vmul.f32 %v3098_v63, %v1074_v51  ;;  %v757_v35 = vmul.f32 %v3060_v17, %v752_v24  ;;  %v1057_v51 = vadd.f32 %v1053_v42, %v1043_v44  ;;  %s3450_s15 = sld [smem:[#allocation9]] }
 0x134   : > { %v505_v24 = vmul.f32 %v3079_v61, %v500_v16  ;;  %v526_v42 = vsel %vm462_vm2, 0.0, %v2925_v7  ;;  %v483_v7 = vadd.f32 %v3024_v39, %v469_v58 }
 0x135   : > { %v1033_v36 = vpop.permute.xlu1 %1032  ;;  %v3149_v48 = vpop.permute.xlu0 %805  ;;  %v3192_v44 = vadd.f32 %v3012_v62, %v757_v35  ;;  %v531_v39 = vmul.f32 %v3088_v46, %v526_v42  ;;  %v754_v42 = vsel %vm462_vm2, 0.0, %v2934_v23 }
 0x136   : > { %v1041_v26 = vsel %vm462_vm2, 0.0, %v1033_v36  ;;  %4265 = vst [vmem:[#allocation59_spill] sm:$0xff] %v3149_v48  ;;  %v501_v36 = vsel %vm499_vm3, %v2887_v47, 0.0  ;;  %v1044_v47 = vmul.f32 %v3085_v11, %v1039_v34  ;;  %v527_v34 = vsel %vm462_vm2, 0.0, %v2920_v4 }
 0x137   : > { %v1046_v29 = vmul.f32 %v3085_v11, %v1041_v26  ;;  %619 = vrot.lane.b32.xlu1 %v2902_v57, %s2406_s14  ;;  %1442 = vrot.lane.b32.xlu0 %v3128_v28, %s2405_s13  ;;  %v1075_v26 = vsel %vm499_vm3, %v3000_v10, 0.0  ;;  %v506_v30 = vmul.f32 %v3079_v61, %v501_v36  ;;  %v1083_v10 = vadd.f32 %v1079_v33, %v1057_v51 }
 0x138   : > { %v1058_v16 = vadd.f32 %v3028_v41, %v1044_v47  ;;  %v509_v22 = vadd.f32 %v505_v24, %v482_v56  ;;  %v1330_v36 = vmul.f32 %v3101_v3, %v1325_v13  ;;  %v787_v4 = vsel %vm499_vm3, %v2895_v53, 0.0 }
 0x139   : > { %v3174_v48 = vadd.f32 %v1056_v8, %v1046_v29  ;;  %v1089_v57 = vpop.permute.xlu1 %1088  ;;  %v3182_v20 = vpop.permute.xlu0 %1066  ;;  %v1326_v29 = vsel %vm462_vm2, 0.0, %v3049_v14  ;;  %v466_v14 = vsel %vm462_vm2, 0.0, %v2914_v2  ;;  %v503_v24 = vsel %vm499_vm3, %v3030_v32, 0.0 }
 0x13a   : > { %v1100_v60 = vsel %vm462_vm2, 0.0, %v1089_v57  ;;  %v1080_v57 = vmul.f32 %v3098_v63, %v1075_v26  ;;  %v1331_v35 = vmul.f32 %v3101_v3, %v1326_v29  ;;  %v471_v51 = vmul.f32 %v3063_v37, %v466_v14 }
 0x13b   : > { %v1105_v8 = vmul.f32 %v3131_v59, %v1100_v60  ;;  %1191 = vrot.lane.b32.xlu1 %v2945_v9, %s2406_s14  ;;  %906 = vrot.lane.b32.xlu0 %v2923_v5, %s2406_s14  ;;  %v788_v60 = vsel %vm499_vm3, %v2893_v50, 0.0  ;;  %v510_v50 = vadd.f32 %v506_v30, %v483_v7  ;;  %v532_v26 = vmul.f32 %v3088_v46, %v527_v34 }
 0x13c   : > { %v793_v41 = vmul.f32 %v3082_v54, %v788_v60  ;;  %v1084_v2 = vadd.f32 %v1080_v57, %v1058_v16  ;;  %v535_v30 = vadd.f32 %v531_v39, %v509_v22  ;;  %v814_v53 = vsel %vm462_vm2, 0.0, %v2942_v18 }
 0x13d   : > { %v3204_v55 = vadd.f32 %v1105_v8, %v1083_v10  ;;  %v3206_v62 = vpop.permute.xlu1 %1317  ;;  %v1091_v33 = vpop.permute.xlu0 %1090  ;;  %v1345_v57 = vadd.f32 %v3055_v1, %v1331_v35  ;;  %v1344_v7 = vadd.f32 %v3047_v0, %v1330_v36  ;;  %v508_v23 = vmul.f32 %v3079_v61, %v503_v24 }
 0x13e   : > { %v1101_v21 = vsel %vm462_vm2, 0.0, %v1091_v33  ;;  %v790_v60 = vsel %vm499_vm3, %v3090_v43, 0.0  ;;  %v792_v18 = vmul.f32 %v3082_v54, %v787_v4  ;;  %v759_v1 = vmul.f32 %v3060_v17, %v754_v42 }
 0x13f   : > { %1474 = vrot.lane.b32.xlu1 %v2964_v31, %s2406_s14  ;;  %v1106_v58 = vmul.f32 %v3131_v59, %v1101_v21  ;;  %1444 = vrot.lane.b32.xlu0 %v3143_v49, %s2405_s13  ;;  %v813_v16 = vsel %vm462_vm2, 0.0, %v2948_v12  ;;  %v485_v34 = vadd.f32 %v3039_v40, %v471_v51  ;;  %v545_v43 = vadd.f32 %v3111_v6, %v535_v30  ;;  %s3306_s13 = sld [smem:[#allocation6 + $0x183]] }
 0x140   : > { %v819_v35 = vmul.f32 %v3095_v52, %v814_v53  ;;  %v795_v21 = vmul.f32 %v3082_v54, %v790_v60  ;;  %v536_v40 = vadd.f32 %v532_v26, %v510_v50  ;;  %v797_v4 = vadd.f32 %v793_v41, %v3192_v44  ;;  %v4266_v50 = vld [vmem:[#allocation48_spill] sm:$0xff] }
 0x141   : > { %v1352_v47 = vpop.permute.xlu1 %1351  ;;  %v3233_v10 = vadd.f32 %v1106_v58, %v1084_v2  ;;  %v1350_v56 = vpop.permute.xlu0 %1349  ;;  %v818_v2 = vmul.f32 %v3095_v52, %v813_v16  ;;  %v512_v58 = vadd.f32 %v508_v23, %v485_v34  ;;  %v773_v51 = vadd.f32 %v3043_v45, %v759_v1  ;;  %v4268_v60 = vld [vmem:[#allocation28_spill] sm:$0xff] }
 0x142   : > { %v1362_v8 = vsel %vm499_vm3, %v1352_v47, 0.0  ;;  %v1361_v32 = vsel %vm499_vm3, %v1350_v56, 0.0  ;;  %v3276_v30 = vstv %s3229_s19  ;;  %v796_v42 = vadd.f32 %v792_v18, %v3177_v27  ;;  %s3460_s19 = sld [smem:[#allocation7 + $0x1]] }
 0x143   : > { %v1367_v29 = vmul.f32 %v3152_v15, %v1362_v8  ;;  %1193 = vrot.lane.b32.xlu1 %v3033_v19, %s2406_s14  ;;  %v1366_v13 = vmul.f32 %v3152_v15, %v1361_v32  ;;  %1476 = vrot.lane.b32.xlu0 %v2957_v38, %s2406_s14  ;;  %v1040_v26 = vsel %vm462_vm2, 0.0, %v4266_v50  ;;  %v1076_v32 = vsel %vm499_vm3, %v3182_v20, 0.0  ;;  %v4270_v20 = vld [vmem:[#allocation57_spill] sm:$0xff]  ;;  %v4274_v50 = vld [vmem:[#allocation52_spill] sm:$0xff] }
 0x144   : > { %v822_v41 = vadd.f32 %v818_v2, %v796_v42  ;;  %v1045_v1 = vmul.f32 %v3085_v11, %v1040_v26  ;;  %v4271_v11 = vld [vmem:[#allocation58_spill] sm:$0xff]  ;;  %v4273_v42 = vld [vmem:[#allocation32_spill] sm:$0xff] }
 0x145   : > { %v3254_v14 = vadd.f32 %v1367_v29, %v1345_v57  ;;  %v551_v0 = vpop.permute.xlu1 %550  ;;  %v3257_v39 = vadd.f32 %v1366_v13, %v1344_v7  ;;  %v521_v22 = vpop.permute.xlu0 %520  ;;  %v823_v57 = vadd.f32 %v819_v35, %v797_v4  ;;  %v799_v29 = vadd.f32 %v795_v21, %v773_v51  ;;  %v4267_v7 = vld [vmem:[#allocation56_spill] sm:$0xff]  ;;  %v4269_v13 = vld [vmem:[#allocation51_spill] sm:$0xff] }
 0x146   : > { %v562_v33 = vsel %vm499_vm3, %v551_v0, 0.0  ;;  %v529_v12 = vsel %vm462_vm2, 0.0, %v521_v22  ;;  %v546_v27 = vadd.f32 %v4267_v7, %v536_v40  ;;  %v1055_v18 = vmul.f32 %v4269_v13, %v4268_v60  ;;  %v4276_v7 = vld [vmem:[#allocation20_spill] sm:$0xff]  ;;  %v4278_v13 = vld [vmem:[#allocation43_spill] sm:$0xff] }
 0x147   : > { %v567_v36 = vmul.f32 %v3169_v25, %v562_v33  ;;  %1480 = vrot.lane.b32.xlu1 %v3143_v49, %s2406_s14  ;;  %v534_v6 = vmul.f32 %v3088_v46, %v529_v12  ;;  %1478 = vrot.lane.b32.xlu0 %v3128_v28, %s2406_s14  ;;  %v1081_v22 = vmul.f32 %v3098_v63, %v1076_v32  ;;  %v1327_v12 = vsel %vm462_vm2, 0.0, %v3206_v62  ;;  %s2011_s14 = sld [smem:[#allocation6 + $0x6]] }
 0x148   : > { %v833_v35 = vadd.f32 %v4270_v20, %v823_v57  ;;  %v832_v40 = vadd.f32 %v4271_v11, %v822_v41  ;;  %v1059_v4 = vadd.f32 %v1055_v18, %v1045_v1  ;;  %v1342_v26 = vmul.f32 %v4274_v50, %v4273_v42  ;;  %v4282_v11 = vld [vmem:[#allocation49_spill] sm:$0xff] }
 0x149   : > { %v3273_v24 = vadd.f32 %v567_v36, %v545_v43  ;;  %v808_v47 = vpop.permute.xlu1 %807  ;;  %v3281_v8 = vadd.f32 %v534_v6, %v512_v58  ;;  %v553_v53 = vpop.permute.xlu0 %552  ;;  %v4272_v58 = vld [vmem:[#allocation41_spill] sm:$0xff]  ;;  %v753_v18 = vsel %vm462_vm2, 0.0, %v4278_v13 }
 0x14a   : > { %v816_v56 = vsel %vm462_vm2, 0.0, %v808_v47  ;;  %v563_v45 = vsel %vm499_vm3, %v553_v53, 0.0  ;;  %v465_v6 = vsel %vm462_vm2, 0.0, %v4272_v58 }
 0x14b   : > { %v821_v44 = vmul.f32 %v3095_v52, %v816_v56  ;;  %v568_v23 = vmul.f32 %v3169_v25, %v563_v45  ;;  %v4275_v56 = vld [vmem:[#allocation46_spill] sm:$0xff]  ;;  %v1332_v45 = vmul.f32 %v3101_v3, %v1327_v12  ;;  %v470_v60 = vmul.f32 %v3063_v37, %v465_v6 }
 0x14c   : > { %v502_v53 = vsel %vm499_vm3, %v4275_v56, 0.0  ;;  %v3347_v56 = vstv %s3306_s13  ;;  %s3462_s13 = sld [smem:[#allocation9 + $0x180]] }
 0x14d   : > { %v3293_v16 = vadd.f32 %v821_v44, %v799_v29  ;;  %v840_v0 = vpop.permute.xlu1 %839  ;;  %v3295_v34 = vadd.f32 %v568_v23, %v546_v27  ;;  %v838_v33 = vpop.permute.xlu0 %837  ;;  %v1085_v44 = vadd.f32 %v1081_v22, %v1059_v4  ;;  %v4277_v27 = vld [vmem:[#allocation50_spill] sm:$0xff]  ;;  %v507_v20 = vmul.f32 %v3079_v61, %v502_v53 }
 0x14e   : > { %v850_v43 = vsel %vm499_vm3, %v840_v0, 0.0  ;;  %v849_v36 = vsel %vm499_vm3, %v838_v33, 0.0  ;;  %v480_v23 = vmul.f32 %v4277_v27, %v4276_v7  ;;  %v4279_v0 = vld [vmem:[#allocation55_spill] sm:$0xff]  ;;  %v1346_v58 = vadd.f32 %v1342_v26, %v1332_v45 }
 0x14f   : > { %v855_v21 = vmul.f32 %v3276_v30, %v850_v43  ;;  %v854_v2 = vmul.f32 %v3276_v30, %v849_v36  ;;  %v528_v43 = vsel %vm462_vm2, 0.0, %v4279_v0  ;;  %v3357_v27 = vstv %s2011_s14  ;;  %s3465_s14 = sld [smem:[#allocation9 + $0x1]] }
 0x150   : > { %v484_v4 = vadd.f32 %v480_v23, %v470_v60  ;;  %v533_v61 = vmul.f32 %v3088_v46, %v528_v43  ;;  %v4285_v23 = vld [vmem:[#allocation53_spill] sm:$0xff] }
 0x151   : > { %v3310_v51 = vadd.f32 %v855_v21, %v833_v35  ;;  %v1093_v47 = vpop.permute.xlu1 %1092  ;;  %v3316_v62 = vadd.f32 %v854_v2, %v832_v40  ;;  %v1069_v29 = vpop.permute.xlu0 %1068  ;;  %v4280_v35 = vld [vmem:[#allocation47_spill] sm:$0xff]  ;;  %v758_v2 = vmul.f32 %v3060_v17, %v753_v18 }
 0x152   : > { %v1102_v57 = vsel %vm462_vm2, 0.0, %v1093_v47  ;;  %v1077_v32 = vsel %vm499_vm3, %v1069_v29, 0.0  ;;  %v789_v21 = vsel %vm499_vm3, %v4280_v35, 0.0  ;;  %v4283_v47 = vld [vmem:[#allocation59_spill] sm:$0xff]  ;;  %v511_v29 = vadd.f32 %v507_v20, %v484_v4 }
 0x153   : > { %v1107_v41 = vmul.f32 %v3131_v59, %v1102_v57  ;;  %v1082_v1 = vmul.f32 %v3098_v63, %v1077_v32  ;;  %v4281_v63 = vld [vmem:[#allocation21_spill] sm:$0xff]  ;;  %v815_v42 = vsel %vm462_vm2, 0.0, %v4283_v47 }
 0x154   : > { %v768_v40 = vmul.f32 %v4282_v11, %v4281_v63  ;;  %v820_v45 = vmul.f32 %v3095_v52, %v815_v42  ;;  %v537_v32 = vadd.f32 %v533_v61, %v511_v29 }
 0x155   : > { %v3330_v33 = vadd.f32 %v1107_v41, %v1085_v44  ;;  %v1354_v22 = vpop.permute.xlu1 %1353  ;;  %v3336_v37 = vadd.f32 %v1082_v1, %v3174_v48  ;;  %v1320_v12 = vpop.permute.xlu0 %1319  ;;  %v794_v48 = vmul.f32 %v3082_v54, %v789_v21  ;;  %v4284_v54 = vld [vmem:[#allocation18_spill] sm:$0xff]  ;;  %v4286_v21 = vld [vmem:[#allocation19_spill] sm:$0xff] }
 0x156   : > { %v1363_v36 = vsel %vm499_vm3, %v1354_v22, 0.0  ;;  %v772_v26 = vadd.f32 %v768_v40, %v758_v2  ;;  %v543_v60 = vmul.f32 %v4285_v23, %v4284_v54 }
 0x157   : > { %v1368_v6 = vmul.f32 %v3152_v15, %v1363_v36  ;;  %v4287_v36 = vld [vmem:[#allocation54_spill] sm:$0xff] }
 0x158   : > { %v798_v13 = vadd.f32 %v794_v48, %v772_v26  ;;  %v830_v63 = vmul.f32 %v4287_v36, %v4286_v21  ;;  %v547_v11 = vadd.f32 %v543_v60, %v537_v32  ;;  %v3382_v48 = vstv %s2029_s20  ;;  %s3467_s20 = sld [smem:[#allocation9 + $0x81]] }
 0x159   : > { %v3350_v53 = vadd.f32 %v1368_v6, %v1346_v58  ;;  %v1378_v57 = vpop.permute.xlu1 %1377  ;;  %v1376_v17 = vpop.permute.xlu0 %1375  ;;  %v3398_v60 = vstv %s2048_s22  ;;  %s3474_s22 = sld [smem:[#allocation9 + $0x181]] }
 0x15a   : > { %v1388_v44 = vsel %vm462_vm2, 0.0, %v1378_v57  ;;  %v1387_v46 = vsel %vm462_vm2, 0.0, %v1376_v17  ;;  %v824_v22 = vadd.f32 %v820_v45, %v798_v13  ;;  %v3384_v57 = vstv %s2047_s21  ;;  %s3472_s21 = sld [smem:[#allocation9 + $0x101]] }
 0x15b   : > { %v1393_v41 = vmul.f32 %v3347_v56, %v1388_v44  ;;  %v1392_v7 = vmul.f32 %v3347_v56, %v1387_v46  ;;  %v4288_v46 = vld [vmem:[#allocation22_spill] sm:$0xff] }
 0x15c   : > { %v834_v4 = vadd.f32 %v830_v63, %v824_v22  ;;  %v1115_v32 = vmul.f32 %v3384_v57, %v4288_v46 }
 0x15d   : > { %v3362_v18 = vadd.f32 %v1393_v41, %v3254_v14  ;;  %v578_v1 = vpop.permute.xlu1 %577  ;;  %v3365_v52 = vadd.f32 %v1392_v7, %v3257_v39  ;;  %v555_v43 = vpop.permute.xlu0 %554  ;;  %v1328_v7 = vsel %vm462_vm2, 0.0, %v1320_v12 }
 0x15e   : > { %v589_v0 = vsel %vm462_vm2, 0.0, %v578_v1  ;;  %v564_v35 = vsel %vm499_vm3, %v555_v43, 0.0  ;;  %v4289_v1 = vld [vmem:[#allocation34_spill] sm:$0xff]  ;;  %v1119_v12 = vadd.f32 %v1115_v32, %v3204_v55  ;;  %v4293_v32 = vld [vmem:[#allocation36_spill] sm:$0xff] }
 0x15f   : > { %v594_v20 = vmul.f32 %v3357_v27, %v589_v0  ;;  %v569_v40 = vmul.f32 %v3169_v25, %v564_v35  ;;  %v1343_v0 = vmul.f32 %v4274_v50, %v4289_v1  ;;  %v1333_v35 = vmul.f32 %v3101_v3, %v1328_v7  ;;  %v4295_v1 = vld [vmem:[#allocation38_spill] sm:$0xff] }
 0x161   : > { %v3374_v14 = vadd.f32 %v594_v20, %v3273_v24  ;;  %v842_v39 = vpop.permute.xlu1 %841  ;;  %v3376_v2 = vadd.f32 %v569_v40, %v547_v11  ;;  %v580_v6 = vpop.permute.xlu0 %579  ;;  %v4290_v11 = vld [vmem:[#allocation23_spill] sm:$0xff] }
 0x162   : > { %v851_v58 = vsel %vm499_vm3, %v842_v39, 0.0  ;;  %v590_v47 = vsel %vm462_vm2, 0.0, %v580_v6  ;;  %v1116_v50 = vmul.f32 %v3384_v57, %v4290_v11  ;;  %v4300_v11 = vld [vmem:[#allocation44_spill] sm:$0xff] }
 0x163   : > { %v856_v61 = vmul.f32 %v3276_v30, %v851_v58  ;;  %v595_v42 = vmul.f32 %v3357_v27, %v590_v47 }
 0x165   : > { %v3386_v29 = vadd.f32 %v856_v61, %v834_v4  ;;  %v867_v24 = vpop.permute.xlu1 %866  ;;  %v3389_v44 = vadd.f32 %v595_v42, %v3295_v34  ;;  %v865_v26 = vpop.permute.xlu0 %864  ;;  %v1120_v4 = vadd.f32 %v1116_v50, %v3233_v10  ;;  %v603_v10 = vstv %s3413_s24  ;;  %s3486_s24 = sld [smem:[#allocation7 + $0x2]] }
 0x166   : > { %v877_v17 = vsel %vm462_vm2, 0.0, %v867_v24  ;;  %v876_v41 = vsel %vm462_vm2, 0.0, %v865_v26  ;;  %v890_v24 = vstv %s3418_s10  ;;  %v1177_v26 = vstv %s3420_s17  ;;  %s3500_s10 = sld [smem:[#allocation9 + $0x82]] }
 0x167   : > { %v882_v45 = vmul.f32 %v3382_v48, %v877_v17  ;;  %v881_v54 = vmul.f32 %v3382_v48, %v876_v41  ;;  %v4292_v41 = vld [vmem:[#allocation35_spill] sm:$0xff]  ;;  %v3491_v7 = vmul.f32 %v603_v10, %v4293_v32  ;;  %s3502_s17 = sld [smem:[#allocation9 + $0x102]]  ;;  %v3514_v50 = vmul.f32 %v1177_v26, %v4300_v11 }
 0x168   : > { %v3484_v46 = vmul.f32 %v603_v10, %v4292_v41 }
 0x169   : > { %v3401_v13 = vadd.f32 %v882_v45, %v3310_v51  ;;  %v1125_v34 = vpop.permute.xlu1 %1124  ;;  %v3406_v43 = vadd.f32 %v881_v54, %v3316_v62  ;;  %v1095_v20 = vpop.permute.xlu0 %1094  ;;  %v4294_v54 = vld [vmem:[#allocation37_spill] sm:$0xff]  ;;  %4301 = vst [vmem:[#allocation28_spill] sm:$0xff] %v3514_v50  ;;  %v3639_v50 = vstv %s3488_s1 }
 0x16a   : > { %v1136_v22 = vsel %vm499_vm3, %v1125_v34, 0.0  ;;  %v1103_v63 = vsel %vm462_vm2, 0.0, %v1095_v20  ;;  %v3494_v34 = vmul.f32 %v890_v24, %v4294_v54  ;;  %v4296_v20 = vld [vmem:[#allocation39_spill] sm:$0xff]  ;;  %4328 = vst [vmem:[#allocation19_spill] sm:$0xff] %v3639_v50 }
 0x16b   : > { %v1141_v21 = vmul.f32 %v3398_v60, %v1136_v22  ;;  %v1108_v51 = vmul.f32 %v3131_v59, %v1103_v63  ;;  %v1347_v59 = vadd.f32 %v1343_v0, %v1333_v35  ;;  %v3497_v0 = vmul.f32 %v890_v24, %v4295_v1  ;;  %v4298_v63 = vld [vmem:[#allocation42_spill] sm:$0xff]  ;;  %v4315_v1 = vld [vmem:[#allocation29_spill] sm:$0xff] }
 0x16c   : > { %v1464_v22 = vstv %s3424_s23  ;;  %v3505_v35 = vmul.f32 %v603_v10, %v4296_v20  ;;  %s3520_s23 = sld [smem:[#allocation9 + $0x182]]  ;;  %v4317_v20 = vld [vmem:[#allocation31_spill] sm:$0xff] }
 0x16d   : > { %v3422_v62 = vadd.f32 %v1141_v21, %v1119_v12  ;;  %v1356_v3 = vpop.permute.xlu1 %1355  ;;  %v3427_v55 = vadd.f32 %v1108_v51, %v3336_v37  ;;  %v1127_v39 = vpop.permute.xlu0 %1126  ;;  %v4297_v12 = vld [vmem:[#allocation40_spill] sm:$0xff]  ;;  %v3511_v51 = vmul.f32 %v1177_v26, %v4298_v63  ;;  %v3540_v41 = vmul.f32 %v1464_v22, %v2964_v31 }
 0x16e   : > { %v1364_v40 = vsel %vm499_vm3, %v1356_v3, 0.0  ;;  %v1137_v6 = vsel %vm499_vm3, %v1127_v39, 0.0  ;;  %v3508_v21 = vmul.f32 %v890_v24, %v4297_v12  ;;  %v3581_v63 = vstv %s3434_s28 }
 0x16f   : > { %v1369_v58 = vmul.f32 %v3152_v15, %v1364_v40  ;;  %v1142_v37 = vmul.f32 %v3398_v60, %v1137_v6  ;;  %4299 = vst [vmem:[#allocation56_spill] sm:$0xff] %v3511_v51  ;;  %v4302_v40 = vld [vmem:[#allocation45_spill] sm:$0xff]  ;;  %4307 = vst [vmem:[#allocation32_spill] sm:$0xff] %v3540_v41  ;;  %v3624_v41 = vstv %s3467_s20  ;;  %v3642_v51 = vstv %s3500_s10 }
 0x170   : > { %v3523_v39 = vmul.f32 %v603_v10, %v4302_v40  ;;  %v3543_v10 = vmul.f32 %v1177_v26, %v3033_v19  ;;  %v3584_v40 = vstv %s3436_s29  ;;  %4323 = vst [vmem:[#allocation21_spill] sm:$0xff] %v3624_v41  ;;  %4329 = vst [vmem:[#allocation54_spill] sm:$0xff] %v3642_v51  ;;  %v3668_v51 = vstv %s3561_s6 }
 0x171   : > { %v3444_v61 = vadd.f32 %v1369_v58, %v1347_v59  ;;  %v3446_v47 = vpop.permute.xlu1 %556  ;;  %v3452_v15 = vadd.f32 %v1142_v37, %v1120_v4  ;;  %v3454_v42 = vpop.permute.xlu0 %1379  ;;  %v3526_v59 = vmul.f32 %v890_v24, %v2923_v5  ;;  %v3529_v58 = vmul.f32 %v1177_v26, %v2945_v9  ;;  %v4312_v24 = vld [vmem:[#allocation25_spill] sm:$0xff]  ;;  %v4313_v26 = vld [vmem:[#allocation26_spill] sm:$0xff]  ;;  %4337 = vst [vmem:[#allocation39_spill] sm:$0xff] %v3668_v51 }
 0x172   : > { %4303 = vst [vmem:[#allocation51_spill] sm:$0xff] %v3523_v39  ;;  %v1401_v4 = vstv %s3430_s26  ;;  %v3537_v37 = vmul.f32 %v1464_v22, %v2957_v38  ;;  %4308 = vst [vmem:[#allocation52_spill] sm:$0xff] %v3543_v10  ;;  %v3546_v5 = vmul.f32 %v1464_v22, %v3128_v28  ;;  %s3550_s26 = sld [smem:[#allocation9 + $0x103]]  ;;  %v3553_v9 = vmul.f32 %v1464_v22, %v3143_v49  ;;  %v4311_v38 = vld [vmem:[#allocation24_spill] sm:$0xff]  ;;  %v4314_v49 = vld [vmem:[#allocation27_spill] sm:$0xff] }
 0x173   : > { %4291 = vst [vmem:[#allocation48_spill] sm:$0xff] %v3444_v61  ;;  %4304 = vst [vmem:[#allocation57_spill] sm:$0xff] %v3526_v59  ;;  %v544_v31 = vmul.f32 %v4285_v23, %v4311_v38  ;;  %v831_v19 = vmul.f32 %v4287_v36, %v4312_v24  ;;  %v1117_v28 = vmul.f32 %v3384_v57, %v4313_v26  ;;  %v4316_v22 = vld [vmem:[#allocation30_spill] sm:$0xff]  ;;  %v4318_v38 = vld [vmem:[#allocation33_spill] sm:$0xff]  ;;  %v3595_v26 = vstv %s3442_s11 }
 0x174   : > { %4305 = vst [vmem:[#allocation58_spill] sm:$0xff] %v3529_v58  ;;  %4306 = vst [vmem:[#allocation41_spill] sm:$0xff] %v3537_v37  ;;  %v1402_v54 = vmul.f32 %v1401_v4, %v4314_v49  ;;  %v1403_v23 = vmul.f32 %v1401_v4, %v4315_v1  ;;  %v3571_v36 = vmul.f32 %v3384_v57, %v4316_v22  ;;  %v3587_v57 = vstv %s3440_s30 }
 0x175   : > { %v3470_v17 = vpop.permute.xlu1 %843  ;;  %v3477_v45 = vpop.permute.xlu0 %581  ;;  %4309 = vst [vmem:[#allocation46_spill] sm:$0xff] %v3546_v5  ;;  %4310 = vst [vmem:[#allocation20_spill] sm:$0xff] %v3553_v9  ;;  %v3574_v12 = vmul.f32 %v1401_v4, %v4317_v20  ;;  %v3590_v24 = vmul.f32 %v1401_v4, %v4318_v38  ;;  %v3598_v49 = vstv %s3448_s12  ;;  %v3601_v1 = vstv %s3450_s15 }
 0x176   : > { %v3604_v22 = vstv %s3456_s16  ;;  %v3607_v20 = vstv %s3460_s19  ;;  %v3610_v4 = vstv %s3465_s14  ;;  %v3613_v38 = vstv %s3458_s18 }
 0x177   : > { %4319 = vst [vmem:[#allocation50_spill] sm:$0xff] %v3590_v24  ;;  %4320 = vst [vmem:[#allocation43_spill] sm:$0xff] %v3613_v38  ;;  %v3616_v9 = vstv %s3462_s13  ;;  %v3621_v10 = vstv %s3479_s25  ;;  %v3627_v37 = vstv %s3472_s21  ;;  %v3630_v58 = vstv %s3474_s22 }
 0x178   : > { %4321 = vst [vmem:[#allocation55_spill] sm:$0xff] %v3616_v9  ;;  %4322 = vst [vmem:[#allocation47_spill] sm:$0xff] %v3621_v10  ;;  %v3633_v39 = vstv %s3481_s0  ;;  %v3636_v24 = vstv %s3486_s24  ;;  %v3645_v10 = vstv %s3518_s2  ;;  %v3648_v61 = vstv %s3532_s3  ;;  %s4374_s0 = sld [smem:[#allocation17_spill]] }
 0x179   : > { %v3516_v3 = vpop.permute.xlu1 %1128  ;;  %v869_v6 = vpop.permute.xlu0 %868  ;;  %4324 = vst [vmem:[#allocation49_spill] sm:$0xff] %v3627_v37  ;;  %4325 = vst [vmem:[#allocation59_spill] sm:$0xff] %v3630_v58  ;;  %v3651_v9 = vstv %s3502_s17  ;;  %v3654_v58 = vstv %s3520_s23  ;;  %v1389_v38 = vsel %vm462_vm2, 0.0, %v3454_v42  ;;  %v3662_v37 = vstv %s3548_s5 }
 0x17a   : > { %4326 = vst [vmem:[#allocation18_spill] sm:$0xff] %v3633_v39  ;;  %4327 = vst [vmem:[#allocation53_spill] sm:$0xff] %v3636_v24  ;;  %v3659_v39 = vstv %s3534_s4  ;;  %v3665_v24 = vstv %s3550_s26  ;;  %v3677_v41 = vstv %s3563_s27  ;;  %v591_v42 = vsel %vm462_vm2, 0.0, %v3477_v45  ;;  %s4376_s4 = sld [smem:[#allocation67_spill]]  ;;  %s4377_s27 = sld [smem:[#allocation68_spill]] }
 0x17b   : > { %4330 = vst [vmem:[#allocation22_spill] sm:$0xff] %v3645_v10  ;;  %4331 = vst [vmem:[#allocation34_spill] sm:$0xff] %v3648_v61  ;;  %v3671_v10 = vstv %s3576_s8  ;;  %v3674_v61 = vstv %s3578_s7  ;;  %v1394_v51 = vmul.f32 %v3347_v56, %v1389_v38  ;;  %v609_v45 = vadd.f32 %v3491_v7, %v3389_v44 }
 0x17c   : > { %4332 = vst [vmem:[#allocation23_spill] sm:$0xff] %v3651_v9  ;;  %4333 = vst [vmem:[#allocation35_spill] sm:$0xff] %v3654_v58  ;;  %v565_v58 = vsel %vm499_vm3, %v3446_v47, 0.0  ;;  %v3685_v9 = vstv %s3592_s9  ;;  %v3695_v47 = vadd.f32 %v1403_v23, %v3362_v18  ;;  %v1138_v18 = vsel %vm499_vm3, %v3516_v3, 0.0 }
 0x17d   : > { %v3565_v32 = vpop.permute.xlu1 %1153  ;;  %v1152_v11 = vpop.permute.xlu0 %1151  ;;  %4334 = vst [vmem:[#allocation36_spill] sm:$0xff] %v3659_v39  ;;  %4335 = vst [vmem:[#allocation37_spill] sm:$0xff] %v3662_v37  ;;  %v878_v39 = vsel %vm462_vm2, 0.0, %v869_v6  ;;  %v608_v6 = vadd.f32 %v3484_v46, %v3374_v14  ;;  %v895_v44 = vadd.f32 %v3497_v0, %v3406_v43  ;;  %v1398_v14 = vadd.f32 %v1394_v51, %v3350_v53 }
 0x17e   : > { %4336 = vst [vmem:[#allocation38_spill] sm:$0xff] %v3665_v24  ;;  %4338 = vst [vmem:[#allocation40_spill] sm:$0xff] %v3671_v10  ;;  %v548_v24 = vadd.f32 %v544_v31, %v3281_v8  ;;  %v835_v10 = vadd.f32 %v831_v19, %v3293_v16  ;;  %v570_v8 = vmul.f32 %v3169_v25, %v565_v58  ;;  %v852_v31 = vsel %vm499_vm3, %v3470_v17, 0.0  ;;  %s4375_s1 = sshll.u32 %s4374_s0, 6  ;;  %s2005_s6 = sshll.u32 %s4374_s0, 1 }
 0x17f   : > { %4339 = vst [vmem:[#allocation42_spill] sm:$0xff] %v3674_v61  ;;  %4340 = vst [vmem:[#allocation44_spill] sm:$0xff] %v3677_v41  ;;  %v1121_v61 = vadd.f32 %v1117_v28, %v3330_v33  ;;  %v3692_v41 = vadd.f32 %v1402_v54, %v3365_v52  ;;  %v596_v16 = vmul.f32 %v3357_v27, %v591_v42  ;;  %v1164_v17 = vsel %vm462_vm2, 0.0, %v3565_v32 }
 0x180   : > { %v883_v33 = vmul.f32 %v3382_v48, %v878_v39  ;;  %v896_v25 = vadd.f32 %v3494_v34, %v3401_v13  ;;  %v1163_v46 = vsel %vm462_vm2, 0.0, %v1152_v11  ;;  %v857_v3 = vmul.f32 %v3276_v30, %v852_v31  ;;  %s3997_s5 = scalar_lea.vmem %s4376_s4, %s4375_s1  ;;  %s393_s9 = scalar_lea.vmem %s4377_s27, %s2005_s6 }
 0x181   : > { %v3618_v5 = vpop.permute.xlu1 %1411  ;;  %v1382_v59 = vpop.permute.xlu0 %1381  ;;  %v3723_v43 = vadd.f32 %v3571_v36, %v3427_v55  ;;  %v574_v13 = vadd.f32 %v570_v8, %v548_v24  ;;  %v600_v53 = vadd.f32 %v596_v16, %v3376_v2  ;;  %v1143_v34 = vmul.f32 %v3398_v60, %v1138_v18 }
 0x182   : > { %v887_v0 = vadd.f32 %v883_v33, %v3386_v29  ;;  %v1169_v32 = vmul.f32 %v3581_v63, %v1164_v17  ;;  %v1168_v30 = vmul.f32 %v3581_v63, %v1163_v46  ;;  %v1423_v55 = vsel %vm499_vm3, %v3618_v5, 0.0 }
 0x183   : > { %v1390_v36 = vsel %vm462_vm2, 0.0, %v1382_v59  ;;  %v3736_v24 = vadd.f32 %v3574_v12, %v1398_v14  ;;  %v3738_v29 = vadd.f32 %v857_v3, %v835_v10  ;;  %v3742_v8 = vadd.f32 %v1143_v34, %v1121_v61  ;;  %v4343_v3 = vld [vmem:[#allocation43_spill] sm:$0xff] }
 0x184   : > { %v3745_v5 = vadd.f32 %v3508_v21, %v887_v0  ;;  %v3748_v59 = vadd.f32 %v3505_v35, %v600_v53  ;;  %v1173_v12 = vadd.f32 %v1169_v32, %v3452_v15  ;;  %v1172_v10 = vadd.f32 %v1168_v30, %v3422_v62  ;;  %v4345_v34 = vld [vmem:[#allocation59_spill] sm:$0xff]  ;;  %v4347_v30 = vld [vmem:[#allocation56_spill] sm:$0xff] }
 0x185   : > { %v584_v50 = vpop.permute.xlu1 %583  ;;  %v1414_v37 = vpop.permute.xlu0 %1413  ;;  %v1428_v33 = vmul.f32 %v3584_v40, %v1423_v55 }
 0x186   : > { %v592_v38 = vsel %vm462_vm2, 0.0, %v584_v50  ;;  %v1395_v50 = vmul.f32 %v3347_v56, %v1390_v36 }
 0x187   : > { %v597_v61 = vmul.f32 %v3357_v27, %v592_v38  ;;  %v4341_v27 = vld [vmem:[#allocation21_spill] sm:$0xff] }
 0x189   : > { %v616_v52 = vpop.permute.xlu1 %615  ;;  %v614_v28 = vpop.permute.xlu0 %613  ;;  %v601_v38 = vadd.f32 %v597_v61, %v574_v13 }
 0x18a   : > { %v626_v19 = vsel %vm499_vm3, %v616_v52, 0.0  ;;  %v625_v7 = vsel %vm499_vm3, %v614_v28, 0.0  ;;  %v1424_v52 = vsel %vm499_vm3, %v1414_v37, 0.0  ;;  %v4342_v37 = vld [vmem:[#allocation49_spill] sm:$0xff] }
 0x18b   : > { %v631_v39 = vmul.f32 %v3587_v57, %v626_v19  ;;  %v630_v58 = vmul.f32 %v3587_v57, %v625_v7  ;;  %v1429_v55 = vmul.f32 %v3584_v40, %v1424_v52 }
 0x18d   : > { %v901_v51 = vpop.permute.xlu1 %900  ;;  %v634_v54 = vadd.f32 %v630_v58, %v608_v6  ;;  %v871_v11 = vpop.permute.xlu0 %870  ;;  %v635_v42 = vadd.f32 %v631_v39, %v609_v45  ;;  %v4344_v58 = vld [vmem:[#allocation55_spill] sm:$0xff] }
 0x18e   : > { %v912_v23 = vsel %vm499_vm3, %v901_v51, 0.0  ;;  %v879_v19 = vsel %vm462_vm2, 0.0, %v871_v11  ;;  %v4346_v51 = vld [vmem:[#allocation48_spill] sm:$0xff] }
 0x18f   : > { %v917_v2 = vmul.f32 %v3598_v49, %v912_v23  ;;  %v640_v6 = vadd.f32 %v3595_v26, %v634_v54  ;;  %v641_v35 = vadd.f32 %v3595_v26, %v635_v42  ;;  %v1399_v32 = vadd.f32 %v1395_v50, %v4346_v51 }
 0x190   : > { %v3771_v54 = vadd.f32 %v4347_v30, %v1173_v12  ;;  %v884_v42 = vmul.f32 %v3382_v48, %v879_v19  ;;  %v4349_v30 = vld [vmem:[#allocation28_spill] sm:$0xff] }
 0x191   : > { %v921_v31 = vadd.f32 %v917_v2, %v895_v44  ;;  %v1131_v16 = vpop.permute.xlu1 %1130  ;;  %v903_v45 = vpop.permute.xlu0 %902  ;;  %v646_v62 = vmul.f32 %v3601_v1, %v640_v6  ;;  %v656_v44 = vmul.f32 %v3604_v22, %v640_v6  ;;  %v666_v39 = vmul.f32 %v4343_v3, %v640_v6 }
 0x192   : > { %v913_v21 = vsel %vm499_vm3, %v903_v45, 0.0  ;;  %v676_v53 = vmul.f32 %v4344_v58, %v640_v6  ;;  %v657_v12 = vmul.f32 %v3604_v22, %v641_v35  ;;  %v677_v48 = vmul.f32 %v4344_v58, %v641_v35 }
 0x193   : > { %v927_v18 = vadd.f32 %v3607_v20, %v921_v31  ;;  %v918_v15 = vmul.f32 %v3598_v49, %v913_v21  ;;  %v647_v31 = vmul.f32 %v3601_v1, %v641_v35  ;;  %v667_v21 = vmul.f32 %v4343_v3, %v641_v35 }
 0x194   : > { %v1139_v19 = vsel %vm499_vm3, %v1131_v16, 0.0  ;;  %v888_v35 = vadd.f32 %v884_v42, %v3738_v29 }
 0x195   : > { %v1416_v28 = vpop.permute.xlu1 %1415  ;;  %v933_v56 = vmul.f32 %v3610_v4, %v927_v18  ;;  %v943_v14 = vmul.f32 %v4341_v27, %v927_v18  ;;  %v953_v17 = vmul.f32 %v4342_v37, %v927_v18  ;;  %v922_v46 = vadd.f32 %v918_v15, %v896_v25  ;;  %v1156_v7 = vpop.permute.xlu0 %1155 }
 0x196   : > { %v963_v0 = vmul.f32 %v4345_v34, %v927_v18  ;;  %v1165_v50 = vsel %vm462_vm2, 0.0, %v1156_v7 }
 0x197   : > { %v3773_v23 = vadd.f32 %v933_v56, %v646_v62  ;;  %v3775_v11 = vadd.f32 %v943_v14, %v656_v44  ;;  %v928_v25 = vadd.f32 %v3607_v20, %v922_v46  ;;  %v3779_v36 = vadd.f32 %v953_v17, %v666_v39 }
 0x198   : > { %v3781_v2 = vadd.f32 %v963_v0, %v676_v53  ;;  %v1425_v14 = vsel %vm499_vm3, %v1416_v28, 0.0  ;;  %v1170_v17 = vmul.f32 %v3581_v63, %v1165_v50  ;;  %v4348_v53 = vld [vmem:[#allocation47_spill] sm:$0xff]  ;;  %v1433_v50 = vadd.f32 %v1429_v55, %v3695_v47  ;;  %v4352_v55 = vld [vmem:[#allocation57_spill] sm:$0xff] }
 0x199   : > { %v1441_v6 = vpop.permute.xlu1 %1440  ;;  %v1439_v45 = vpop.permute.xlu0 %1438  ;;  %v934_v18 = vmul.f32 %v3610_v4, %v928_v25  ;;  %v944_v52 = vmul.f32 %v4341_v27, %v928_v25  ;;  %v954_v13 = vmul.f32 %v4342_v37, %v928_v25  ;;  %v964_v61 = vmul.f32 %v4345_v34, %v928_v25 }
 0x19a   : > { %v1451_v15 = vsel %vm462_vm2, 0.0, %v1441_v6  ;;  %v1450_v62 = vsel %vm462_vm2, 0.0, %v1439_v45  ;;  %v1182_v25 = vadd.f32 %v4349_v30, %v1172_v10  ;;  %v1432_v6 = vadd.f32 %v1428_v33, %v3692_v41  ;;  %v4350_v41 = vld [vmem:[#allocation50_spill] sm:$0xff] }
 0x19b   : > { %v3796_v56 = vadd.f32 %v934_v18, %v647_v31  ;;  %v3798_v44 = vadd.f32 %v944_v52, %v657_v12  ;;  %v3802_v7 = vadd.f32 %v954_v13, %v667_v21  ;;  %v3804_v39 = vadd.f32 %v964_v61, %v677_v48  ;;  %v4351_v21 = vld [vmem:[#allocation51_spill] sm:$0xff] }
 0x19c   : > { %v1456_v0 = vmul.f32 %v4348_v53, %v1451_v15  ;;  %v1455_v28 = vmul.f32 %v4348_v53, %v1450_v62  ;;  %v1144_v45 = vmul.f32 %v3398_v60, %v1139_v19  ;;  %v1430_v29 = vmul.f32 %v3584_v40, %v1425_v14  ;;  %v4353_v62 = vld [vmem:[#allocation18_spill] sm:$0xff] }
 0x19d   : > { %v905_v46 = vpop.permute.xlu1 %904  ;;  %v618_v51 = vpop.permute.xlu0 %617  ;;  %v1174_v18 = vadd.f32 %v1170_v17, %v3742_v8  ;;  %v3821_v33 = vadd.f32 %v4350_v41, %v1399_v32  ;;  %v611_v15 = vadd.f32 %v4351_v21, %v601_v38  ;;  %v3827_v61 = vadd.f32 %v4352_v55, %v888_v35 }
 0x19e   : > { %v914_v16 = vsel %vm499_vm3, %v905_v46, 0.0  ;;  %v627_v12 = vsel %vm499_vm3, %v618_v51, 0.0  ;;  %v1460_v13 = vadd.f32 %v1456_v0, %v1433_v50  ;;  %v1459_v19 = vadd.f32 %v1455_v28, %v1432_v6  ;;  %v4355_v28 = vld [vmem:[#allocation41_spill] sm:$0xff] }
 0x19f   : > { %v919_v31 = vmul.f32 %v3598_v49, %v914_v16  ;;  %v632_v42 = vmul.f32 %v3587_v57, %v627_v12  ;;  %v1148_v32 = vadd.f32 %v1144_v45, %v3723_v43  ;;  %v1434_v38 = vadd.f32 %v1430_v29, %v3736_v24  ;;  %v4354_v16 = vld [vmem:[#allocation58_spill] sm:$0xff]  ;;  %v4356_v50 = vld [vmem:[#allocation53_spill] sm:$0xff]  ;;  %v4357_v45 = vld [vmem:[#allocation32_spill] sm:$0xff] }
 0x1a0   : > { %v1184_v35 = vadd.f32 %v4354_v16, %v1174_v18  ;;  %v1469_v29 = vadd.f32 %v4357_v45, %v1459_v19 }
 0x1a1   : > { %v923_v10 = vadd.f32 %v919_v31, %v3745_v5  ;;  %v1188_v52 = vpop.permute.xlu1 %1187  ;;  %v636_v48 = vadd.f32 %v632_v42, %v3748_v59  ;;  %v1158_v60 = vpop.permute.xlu0 %1157  ;;  %v3840_v31 = vadd.f32 %v4355_v28, %v1460_v13 }
 0x1a2   : > { %v1199_v47 = vsel %vm499_vm3, %v1188_v52, 0.0  ;;  %v1166_v14 = vsel %vm462_vm2, 0.0, %v1158_v60  ;;  %v4359_v60 = vld [vmem:[#allocation54_spill] sm:$0xff] }
 0x1a3   : > { %v929_v8 = vadd.f32 %v3607_v20, %v923_v10  ;;  %v1204_v5 = vmul.f32 %v4353_v62, %v1199_v47  ;;  %v642_v17 = vadd.f32 %v3595_v26, %v636_v48  ;;  %v1171_v59 = vmul.f32 %v3581_v63, %v1166_v14  ;;  %v4358_v48 = vld [vmem:[#allocation19_spill] sm:$0xff] }
 0x1a5   : > { %v1208_v46 = vadd.f32 %v1204_v5, %v1182_v25  ;;  %v1418_v0 = vpop.permute.xlu1 %1417  ;;  %v935_v51 = vmul.f32 %v3610_v4, %v929_v8  ;;  %v945_v30 = vmul.f32 %v4341_v27, %v929_v8  ;;  %v1190_v6 = vpop.permute.xlu0 %1189  ;;  %v648_v43 = vmul.f32 %v3601_v1, %v642_v17  ;;  %v4360_v5 = vld [vmem:[#allocation23_spill] sm:$0xff] }
 0x1a6   : > { %v658_v24 = vmul.f32 %v3604_v22, %v642_v17  ;;  %v955_v12 = vmul.f32 %v4342_v37, %v929_v8  ;;  %v1200_v25 = vsel %vm499_vm3, %v1190_v6, 0.0  ;;  %v668_v42 = vmul.f32 %v4343_v3, %v642_v17 }
 0x1a7   : > { %v1214_v63 = vadd.f32 %v4356_v50, %v1208_v46  ;;  %v1175_v18 = vadd.f32 %v1171_v59, %v1148_v32  ;;  %v1205_v10 = vmul.f32 %v4353_v62, %v1200_v25  ;;  %v3850_v52 = vadd.f32 %v935_v51, %v648_v43  ;;  %v4361_v59 = vld [vmem:[#allocation35_spill] sm:$0xff] }
 0x1a8   : > { %v3852_v41 = vadd.f32 %v945_v30, %v658_v24  ;;  %v1426_v21 = vsel %vm499_vm3, %v1418_v0, 0.0  ;;  %v959_v51 = vadd.f32 %v955_v12, %v668_v42  ;;  %v965_v45 = vmul.f32 %v4345_v34, %v929_v8 }
 0x1a9   : > { %v620_v13 = vpop.permute.xlu1 %619  ;;  %v1220_v47 = vmul.f32 %v4358_v48, %v1214_v63  ;;  %v1230_v55 = vmul.f32 %v4359_v60, %v1214_v63  ;;  %v1240_v14 = vmul.f32 %v4360_v5, %v1214_v63  ;;  %v1209_v19 = vadd.f32 %v1205_v10, %v3771_v54  ;;  %v1443_v32 = vpop.permute.xlu0 %1442 }
 0x1aa   : > { %v628_v46 = vsel %vm499_vm3, %v620_v13, 0.0  ;;  %v1250_v16 = vmul.f32 %v4361_v59, %v1214_v63  ;;  %v1452_v6 = vsel %vm462_vm2, 0.0, %v1443_v32 }
 0x1ab   : > { %v633_v30 = vmul.f32 %v3587_v57, %v628_v46  ;;  %v3864_v0 = vadd.f32 %v1220_v47, %v3773_v23  ;;  %v3867_v28 = vadd.f32 %v1230_v55, %v3775_v11  ;;  %v1215_v43 = vadd.f32 %v4356_v50, %v1209_v19  ;;  %v4362_v55 = vld [vmem:[#allocation52_spill] sm:$0xff] }
 0x1ac   : > { %v1457_v54 = vmul.f32 %v4348_v53, %v1452_v6  ;;  %v3872_v24 = vadd.f32 %v1240_v14, %v3779_v36  ;;  %v3875_v63 = vadd.f32 %v1250_v16, %v3781_v2  ;;  %v1431_v57 = vmul.f32 %v3584_v40, %v1426_v21 }
 0x1ad   : > { %v637_v12 = vadd.f32 %v633_v30, %v611_v15  ;;  %v1192_v25 = vpop.permute.xlu1 %1191  ;;  %v678_v23 = vmul.f32 %v4344_v58, %v642_v17  ;;  %v907_v10 = vpop.permute.xlu0 %906  ;;  %v1221_v13 = vmul.f32 %v4358_v48, %v1215_v43  ;;  %v1231_v36 = vmul.f32 %v4359_v60, %v1215_v43  ;;  %v4363_v30 = vld [vmem:[#allocation46_spill] sm:$0xff] }
 0x1ae   : > { %v1461_v11 = vadd.f32 %v1457_v54, %v1434_v38  ;;  %v1201_v42 = vsel %vm499_vm3, %v1192_v25, 0.0  ;;  %v915_v2 = vsel %vm499_vm3, %v907_v10, 0.0  ;;  %v1185_v40 = vadd.f32 %v4362_v55, %v1175_v18  ;;  %v4366_v55 = vld [vmem:[#allocation20_spill] sm:$0xff] }
 0x1af   : > { %v1206_v47 = vmul.f32 %v4353_v62, %v1201_v42  ;;  %v1241_v15 = vmul.f32 %v4360_v5, %v1215_v43  ;;  %v3888_v17 = vadd.f32 %v3595_v26, %v637_v12  ;;  %v920_v8 = vmul.f32 %v3598_v49, %v915_v2 }
 0x1b0   : > { %v3892_v38 = vadd.f32 %v1221_v13, %v3796_v56  ;;  %v3895_v21 = vadd.f32 %v1231_v36, %v3798_v44  ;;  %v1435_v14 = vadd.f32 %v1431_v57, %v3821_v33  ;;  %v1251_v18 = vmul.f32 %v4361_v59, %v1215_v43  ;;  %v4364_v33 = vld [vmem:[#allocation22_spill] sm:$0xff] }
 0x1b1   : > { %v1210_v19 = vadd.f32 %v1206_v47, %v1184_v35  ;;  %v1475_v46 = vpop.permute.xlu1 %1474  ;;  %v3899_v32 = vadd.f32 %v1241_v15, %v3802_v7  ;;  %v924_v26 = vadd.f32 %v920_v8, %v3827_v61  ;;  %v1445_v49 = vpop.permute.xlu0 %1444  ;;  %v1471_v56 = vadd.f32 %v4363_v30, %v1461_v11 }
 0x1b2   : > { %v1486_v16 = vsel %vm499_vm3, %v1475_v46, 0.0  ;;  %v3905_v6 = vadd.f32 %v965_v45, %v678_v23  ;;  %v1453_v54 = vsel %vm462_vm2, 0.0, %v1445_v49  ;;  %v3913_v7 = vadd.f32 %v1251_v18, %v3804_v39  ;;  %v4367_v46 = vld [vmem:[#allocation36_spill] sm:$0xff] }
 0x1b3   : > { %v3908_v44 = vadd.f32 %v4356_v50, %v1210_v19  ;;  %v1491_v35 = vmul.f32 %v4364_v33, %v1486_v16  ;;  %v3916_v43 = vadd.f32 %v3607_v20, %v924_v26  ;;  %v1458_v61 = vmul.f32 %v4348_v53, %v1453_v54  ;;  %v4369_v16 = vld [vmem:[#allocation38_spill] sm:$0xff] }
 0x1b4   : > { %v649_v57 = vmul.f32 %v3601_v1, %v3888_v17  ;;  %v659_v12 = vmul.f32 %v3604_v22, %v3888_v17 }
 0x1b5   : > { %v1495_v25 = vadd.f32 %v1491_v35, %v1469_v29  ;;  %v1194_v23 = vpop.permute.xlu1 %1193  ;;  %v1222_v45 = vmul.f32 %v4358_v48, %v3908_v44  ;;  %v1232_v39 = vmul.f32 %v4359_v60, %v3908_v44  ;;  %v1242_v20 = vmul.f32 %v4360_v5, %v3908_v44  ;;  %v1477_v42 = vpop.permute.xlu0 %1476  ;;  %v4365_v29 = vld [vmem:[#allocation34_spill] sm:$0xff]  ;;  %v4370_v35 = vld [vmem:[#allocation44_spill] sm:$0xff] }
 0x1b6   : > { %v1462_v11 = vadd.f32 %v1458_v61, %v1435_v14  ;;  %v1202_v53 = vsel %vm499_vm3, %v1194_v23, 0.0  ;;  %v936_v1 = vmul.f32 %v3610_v4, %v3916_v43  ;;  %v946_v22 = vmul.f32 %v4341_v27, %v3916_v43  ;;  %v4368_v27 = vld [vmem:[#allocation37_spill] sm:$0xff] }
 0x1b7   : > { %v1501_v10 = vadd.f32 %v4365_v29, %v1495_v25  ;;  %v1207_v13 = vmul.f32 %v4353_v62, %v1202_v53  ;;  %v1487_v36 = vsel %vm499_vm3, %v1477_v42, 0.0  ;;  %v1226_v47 = vadd.f32 %v1222_v45, %v3850_v52 }
 0x1b8   : > { %v1492_v2 = vmul.f32 %v4364_v33, %v1487_v36  ;;  %v1472_v15 = vadd.f32 %v4366_v55, %v1462_v11  ;;  %v1236_v8 = vadd.f32 %v1232_v39, %v3852_v41  ;;  %v1246_v14 = vadd.f32 %v1242_v20, %v959_v51  ;;  %v4371_v11 = vld [vmem:[#allocation39_spill] sm:$0xff] }
 0x1b9   : > { %v1211_v19 = vadd.f32 %v1207_v13, %v1185_v40  ;;  %v1481_v4 = vpop.permute.xlu1 %1480  ;;  %v1507_v18 = vmul.f32 %v4367_v46, %v1501_v10  ;;  %v1517_v26 = vmul.f32 %v4368_v27, %v1501_v10  ;;  %v1527_v49 = vmul.f32 %v4369_v16, %v1501_v10  ;;  %v1479_v52 = vpop.permute.xlu0 %1478 }
 0x1ba   : > { %v1496_v62 = vadd.f32 %v1492_v2, %v3840_v31  ;;  %v1489_v30 = vsel %vm499_vm3, %v1481_v4, 0.0  ;;  %v1537_v54 = vmul.f32 %v4370_v35, %v1501_v10  ;;  %v940_v61 = vadd.f32 %v936_v1, %v649_v57  ;;  %v4372_v1 = vld [vmem:[#allocation40_spill] sm:$0xff] }
 0x1bb   : > { %v3948_v25 = vadd.f32 %v4356_v50, %v1211_v19  ;;  %v1494_v41 = vmul.f32 %v4364_v33, %v1489_v30  ;;  %v1488_v51 = vsel %vm499_vm3, %v1479_v52, 0.0  ;;  %v1511_v40 = vadd.f32 %v1507_v18, %v3864_v0 }
 0x1bc   : > { %v1502_v23 = vadd.f32 %v4365_v29, %v1496_v62  ;;  %v1493_v45 = vmul.f32 %v4364_v33, %v1488_v51  ;;  %v1521_v31 = vadd.f32 %v1517_v26, %v3867_v28  ;;  %v1531_v39 = vadd.f32 %v1527_v49, %v3872_v24  ;;  %v4373_v24 = vld [vmem:[#allocation42_spill] sm:$0xff] }
 0x1bd   : > { %v1498_v20 = vadd.f32 %v1494_v41, %v1472_v15  ;;  %v3958_v57 = vadd.f32 %v4371_v11, %v1511_v40  ;;  %v1541_v50 = vadd.f32 %v1537_v54, %v3875_v63  ;;  %v1223_v53 = vmul.f32 %v4358_v48, %v3948_v25 }
 0x1be   : > { %v1497_v42 = vadd.f32 %v1493_v45, %v1471_v56  ;;  %v3964_v0 = vadd.f32 %v4372_v1, %v1521_v31  ;;  %v1508_v10 = vmul.f32 %v4367_v46, %v1502_v23  ;;  %v1518_v33 = vmul.f32 %v4368_v27, %v1502_v23 }
 0x1bf   : > { %v1504_v28 = vadd.f32 %v4365_v29, %v1498_v20  ;;  %1571 = vadd.xlane.f32.xlu0 %v3958_v57  ;;  %v3971_v13 = vadd.f32 %v4373_v24, %v1531_v39  ;;  %v1528_v63 = vmul.f32 %v4369_v16, %v1502_v23  ;;  %v3975_v48 = vadd.f32 %v3685_v9, %v1541_v50 }
 0x1c0   : > { %v1503_v56 = vadd.f32 %v4365_v29, %v1497_v42  ;;  %v1512_v36 = vadd.f32 %v1508_v10, %v3892_v38  ;;  %v1522_v2 = vadd.f32 %v1518_v33, %v3895_v21  ;;  %v1538_v55 = vmul.f32 %v4370_v35, %v1502_v23 }
 0x1c1   : > { %v1532_v15 = vadd.f32 %v1528_v63, %v3899_v32  ;;  %v1227_v19 = vadd.f32 %v1223_v53, %v940_v61  ;;  %v1510_v4 = vmul.f32 %v4367_v46, %v1504_v28  ;;  %v950_v18 = vadd.f32 %v946_v22, %v659_v12 }
 0x1c2   : > { %v3984_v26 = vadd.f32 %v4371_v11, %v1512_v36  ;;  %v3987_v49 = vadd.f32 %v4372_v1, %v1522_v2  ;;  %v1509_v29 = vmul.f32 %v4367_v46, %v1503_v56  ;;  %v1519_v38 = vmul.f32 %v4368_v27, %v1503_v56 }
 0x1c3   : > { %1641 = vadd.xlane.f32.xlu0 %v3964_v0  ;;  %v4000_v21 = vadd.f32 %v4373_v24, %v1532_v15  ;;  %v1542_v32 = vadd.f32 %v1538_v55, %v3913_v7  ;;  %v1529_v12 = vmul.f32 %v4369_v16, %v1503_v56  ;;  %v1514_v22 = vadd.f32 %v1510_v4, %v1227_v19 }
 0x1c4   : > { %1573 = vadd.xlane.f32.xlu1 %v3984_v26  ;;  %v2163_v46 = vpack.c.bf16 %v3984_v26, %v3958_v57  ;;  %v2173_v62 = vpack.c.bf16 %v3987_v49, %v3964_v0  ;;  %v1513_v30 = vadd.f32 %v1509_v29, %v1226_v47  ;;  %v1523_v52 = vadd.f32 %v1519_v38, %v1236_v8 }
 0x1c5   : > { %v2183_v54 = vpack.c.bf16 %v4000_v21, %v3971_v13  ;;  %v4012_v61 = vadd.f32 %v3685_v9, %v1542_v32  ;;  %v1533_v7 = vadd.f32 %v1529_v12, %v1246_v14  ;;  %v4015_v41 = vadd.f32 %v4371_v11, %v1514_v22 }
 0x1c6   : > { %2164 = vst [vmem:[%s3997_s5] sm:$0xff] %v2163_v46   ;;  %2208 = vst [vmem:[%s3997_s5 + $0x10] sm:$0xff] %v2173_v62   ;;  %v4020_v51 = vadd.f32 %v4371_v11, %v1513_v30  ;;  %v1233_v47 = vmul.f32 %v4359_v60, %v3948_v25  ;;  %v1520_v8 = vmul.f32 %v4368_v27, %v1504_v28 }
 0x1c7   : > { %1643 = vadd.xlane.f32.xlu0 %v3987_v49  ;;  %2210 = vst [vmem:[%s3997_s5 + $0x20] sm:$0xff] %v2183_v54   ;;  %v2193_v14 = vpack.c.bf16 %v4012_v61, %v3975_v48  ;;  %v1252_v40 = vmul.f32 %v4361_v59, %v3908_v44  ;;  %v1539_v23 = vmul.f32 %v4370_v35, %v1503_v56 }
 0x1c8   : > { %v669_v45 = vmul.f32 %v4343_v3, %v3888_v17  ;;  %1711 = vadd.xlane.f32.xlu1 %v3971_v13  ;;  %v2168_v60 = vpack.c.bf16 %v4015_v41, %v4020_v51  ;;  %v1237_v27 = vadd.f32 %v1233_v47, %v950_v18  ;;  %v956_v31 = vmul.f32 %v4342_v37, %v3916_v43 }
 0x1c9   : > { %v1243_v39 = vmul.f32 %v4360_v5, %v3948_v25  ;;  %2212 = vst [vmem:[%s3997_s5 + $0x30] sm:$0xff] %v2193_v14   ;;  %v1256_v44 = vadd.f32 %v1252_v40, %v3905_v6  ;;  %v679_v20 = vmul.f32 %v4344_v58, %v3888_v17  ;;  %v966_v3 = vmul.f32 %v4345_v34, %v3916_v43 }
 0x1ca   : > { %v1253_v11 = vmul.f32 %v4361_v59, %v3948_v25  ;;  %v4050_v50 = vadd.f32 %v4372_v1, %v1523_v52  ;;  %2207 = vst [vmem:[%s3997_s5 + $0x8] sm:$0xff] %v2168_v60   ;;  %v1524_v37 = vadd.f32 %v1520_v8, %v1237_v27  ;;  %v960_v53 = vadd.f32 %v956_v31, %v669_v45 }
 0x1cb   : > { %v1530_v5 = vmul.f32 %v4369_v16, %v1504_v28  ;;  %1713 = vadd.xlane.f32.xlu0 %v4000_v21  ;;  %v1543_v6 = vadd.f32 %v1539_v23, %v1256_v44  ;;  %v970_v42 = vadd.f32 %v966_v3, %v679_v20  ;;  %v1540_v58 = vmul.f32 %v4370_v35, %v1504_v28 }
 0x1cc   : > { %1575 = vadd.xlane.f32.xlu1 %v4020_v51  ;;  %v4058_v34 = vadd.f32 %v4372_v1, %v1524_v37  ;;  %v1247_v59 = vadd.f32 %v1243_v39, %v960_v53  ;;  %v4061_v43 = vadd.f32 %v4373_v24, %v1533_v7 }
 0x1cd   : > { %v1257_v17 = vadd.f32 %v1253_v11, %v970_v42  ;;  %v4067_v35 = vadd.f32 %v3685_v9, %v1543_v6 }
 0x1ce   : > { %v2178_v16 = vpack.c.bf16 %v4058_v34, %v4050_v50  ;;  %v1534_v25 = vadd.f32 %v1530_v5, %v1247_v59 }
 0x1cf   : > { %1645 = vadd.xlane.f32.xlu0 %v4050_v50  ;;  %v1544_v10 = vadd.f32 %v1540_v58, %v1257_v17 }
 0x1d0   : > { %1781 = vadd.xlane.f32.xlu1 %v3975_v48  ;;  %2209 = vst [vmem:[%s3997_s5 + $0x18] sm:$0xff] %v2178_v16   ;;  %v4072_v1 = vadd.f32 %v4373_v24, %v1534_v25 }
 0x1d1   : > { %v4075_v33 = vadd.f32 %v3685_v9, %v1544_v10 }
 0x1d2   : > { %v2188_v28 = vpack.c.bf16 %v4072_v1, %v4061_v43 }
 0x1d3   : > { %1783 = vadd.xlane.f32.xlu0 %v4012_v61  ;;  %v2198_v63 = vpack.c.bf16 %v4075_v33, %v4067_v35 }
 0x1d4   : > { %1715 = vadd.xlane.f32.xlu1 %v4061_v43  ;;  %2211 = vst [vmem:[%s3997_s5 + $0x28] sm:$0xff] %v2188_v28  }
 0x1d5   : > { %2213 = vst [vmem:[%s3997_s5 + $0x38] sm:$0xff] %v2198_v63  }
 0x1d7   : > { %1577 = vadd.xlane.f32.xlu0 %v4015_v41 }
 0x1d8   : > { %1647 = vadd.xlane.f32.xlu1 %v4058_v34 }
 0x1db   : > { %1785 = vadd.xlane.f32.xlu0 %v4067_v35 }
 0x1dc   : > { %1717 = vadd.xlane.f32.xlu1 %v4072_v1 }
 0x1df   : > { %1787 = vadd.xlane.f32.xlu0 %v4075_v33 }
 0x24c   : > { %v1572_v9 = vpop.xlane.xlu0 %1571 }
 0x250   : > { %v1642_v24 = vpop.xlane.xlu0 %1641 }
 0x251   : > { %v1574_v56 = vpop.xlane.xlu1 %1573 }
 0x252   : > { %v1579_v29 = vadd.f32 %v1574_v56, %v1572_v9 }
 0x254   : > { %v1644_v36 = vpop.xlane.xlu0 %1643 }
 0x255   : > { %v1712_v2 = vpop.xlane.xlu1 %1711  ;;  %v1649_v32 = vadd.f32 %v1644_v36, %v1642_v24 }
 0x258   : > { %v1714_v55 = vpop.xlane.xlu0 %1713 }
 0x259   : > { %v1576_v15 = vpop.xlane.xlu1 %1575  ;;  %v1719_v52 = vadd.f32 %v1714_v55, %v1712_v2 }
 0x25a   : > { %v1580_v12 = vadd.f32 %v1579_v29, %v1576_v15 }
 0x25c   : > { %v1646_v19 = vpop.xlane.xlu0 %1645 }
 0x25d   : > { %v1782_v4 = vpop.xlane.xlu1 %1781  ;;  %v1650_v22 = vadd.f32 %v1649_v32, %v1646_v19 }
 0x260   : > { %v1784_v18 = vpop.xlane.xlu0 %1783 }
 0x261   : > { %v1716_v38 = vpop.xlane.xlu1 %1715  ;;  %v1789_v40 = vadd.f32 %v1784_v18, %v1782_v4 }
 0x262   : > { %v1720_v47 = vadd.f32 %v1719_v52, %v1716_v38 }
 0x264   : > { %v1578_v46 = vpop.xlane.xlu0 %1577 }
 0x265   : > { %v1581_v62 = vadd.f32 %v1580_v12, %v1578_v46  ;;  %v1648_v30 = vpop.xlane.xlu1 %1647 }
 0x266   : > { %v1651_v54 = vadd.f32 %v1650_v22, %v1648_v30 }
 0x267   : > { %v1582_v7 = vrot.slane %v1581_v62, 4 }
 0x268   : > { %v1652_v8 = vrot.slane %v1651_v54, 4  ;;  %v1786_v14 = vpop.xlane.xlu0 %1785 }
 0x269   : > { %v1583_v23 = vadd.f32 %v1582_v7, %v1581_v62  ;;  %v1718_v45 = vpop.xlane.xlu1 %1717  ;;  %v1790_v39 = vadd.f32 %v1789_v40, %v1786_v14 }
 0x26a   : > { %v1653_v60 = vadd.f32 %v1652_v8, %v1651_v54  ;;  %v1721_v27 = vadd.f32 %v1720_v47, %v1718_v45 }
 0x26b   : > { %v1584_v31 = vrot.slane %v1583_v23, 2 }
 0x26c   : > { %v1654_v44 = vrot.slane %v1653_v60, 2  ;;  %v1722_v20 = vrot.slane %v1721_v27, 4  ;;  %v1788_v3 = vpop.xlane.xlu0 %1787 }
 0x26d   : > { %v1585_v11 = vadd.f32 %v1584_v31, %v1583_v23  ;;  %v1791_v37 = vadd.f32 %v1790_v39, %v1788_v3 }
 0x26e   : > { %v1655_v53 = vadd.f32 %v1654_v44, %v1653_v60  ;;  %v1723_v5 = vadd.f32 %v1722_v20, %v1721_v27 }
 0x26f   : > { %v1586_v6 = vrot.slane %v1585_v11, 1  ;;  %v1792_v42 = vrot.slane %v1791_v37, 4 }
 0x270   : > { %v1656_v58 = vrot.slane %v1655_v53, 1  ;;  %v1724_v59 = vrot.slane %v1723_v5, 2 }
 0x271   : > { %v1587_v17 = vadd.f32 %v1586_v6, %v1585_v11  ;;  %v1793_v16 = vadd.f32 %v1792_v42, %v1791_v37 }
 0x272   : > { %v1657_v25 = vadd.f32 %v1656_v58, %v1655_v53  ;;  %v1725_v10 = vadd.f32 %v1724_v59, %v1723_v5 }
 0x273   : > { %v1588_v28 = vmul.f32 0.00024414063, %v1587_v17  ;;  %v1794_v63 = vrot.slane %v1793_v16, 2 }
 0x274   : > { %v1658_v9 = vmul.f32 0.00024414063, %v1657_v25  ;;  %v1824_v24 = vsel %vm462_vm2, %v1587_v17, %v1657_v25  ;;  %v1726_v56 = vrot.slane %v1725_v10, 1 }
 0x275   : > { %v1795_v36 = vadd.f32 %v1794_v63, %v1793_v16  ;;  %v1590_v2 = vsub.f32 %v3984_v26, %v1588_v28  ;;  %v1589_v55 = vsub.f32 %v3958_v57, %v1588_v28  ;;  %v1592_v23 = vsub.f32 %v4015_v41, %v1588_v28 }
 0x276   : > { %v1727_v15 = vadd.f32 %v1726_v56, %v1725_v10  ;;  %v1660_v19 = vsub.f32 %v3987_v49, %v1658_v9  ;;  %v1659_v38 = vsub.f32 %v3964_v0, %v1658_v9  ;;  %v1591_v0 = vsub.f32 %v4020_v51, %v1588_v28 }
 0x277   : > { %v1796_v4 = vrot.slane %v1795_v36, 1  ;;  %v1594_v18 = vmul.f32 %v1590_v2, %v1590_v2  ;;  %v1593_v29 = vmul.f32 %v1589_v55, %v1589_v55  ;;  %v1661_v7 = vsub.f32 %v4050_v50, %v1658_v9 }
 0x278   : > { %v1728_v32 = vmul.f32 0.00024414063, %v1727_v15  ;;  %v1826_v12 = vsel %vm1825_vm4, %v1824_v24, %v1727_v15  ;;  %v1664_v46 = vmul.f32 %v1660_v19, %v1660_v19  ;;  %v1663_v57 = vmul.f32 %v1659_v38, %v1659_v38 }
 0x279   : > { %v1797_v22 = vadd.f32 %v1796_v4, %v1795_v36  ;;  %1599 = vadd.xlane.f32.xlu0 %v1594_v18  ;;  %1597 = vadd.xlane.f32.xlu1 %v1593_v29  ;;  %v1665_v47 = vmul.f32 %v1661_v7, %v1661_v7  ;;  %v1595_v8 = vmul.f32 %v1591_v0, %v1591_v0 }
 0x27a   : > { %v1730_v62 = vsub.f32 %v4000_v21, %v1728_v32  ;;  %v1729_v49 = vsub.f32 %v3971_v13, %v1728_v32  ;;  %v1731_v51 = vsub.f32 %v4061_v43, %v1728_v32  ;;  %v1596_v45 = vmul.f32 %v1592_v23, %v1592_v23 }
 0x27b   : > { %v4097_v26 = vsel %vm1827_vm5, %v1826_v12, %v1797_v22  ;;  %v1798_v30 = vmul.f32 0.00024414063, %v1797_v22  ;;  %v1662_v27 = vsub.f32 %v4058_v34, %v1658_v9  ;;  %v1732_v39 = vsub.f32 %v4072_v1, %v1728_v32 }
 0x27c   : > { %v1734_v52 = vmul.f32 %v1730_v62, %v1730_v62  ;;  %v1733_v54 = vmul.f32 %v1729_v49, %v1729_v49  ;;  %v1735_v50 = vmul.f32 %v1731_v51, %v1731_v51 }
 0x27d   : > { %1669 = vadd.xlane.f32.xlu0 %v1664_v46  ;;  %1667 = vadd.xlane.f32.xlu1 %v1663_v57  ;;  %v1800_v14 = vsub.f32 %v4012_v61, %v1798_v30  ;;  %v1799_v40 = vsub.f32 %v3975_v48, %v1798_v30  ;;  %v1801_v60 = vsub.f32 %v4067_v35, %v1798_v30 }
 0x27e   : > { %v1666_v48 = vmul.f32 %v1662_v27, %v1662_v27  ;;  %v1802_v31 = vsub.f32 %v4075_v33, %v1798_v30  ;;  %v1736_v43 = vmul.f32 %v1732_v39, %v1732_v39 }
 0x27f   : > { %v1804_v13 = vmul.f32 %v1800_v14, %v1800_v14  ;;  %v1803_v21 = vmul.f32 %v1799_v40, %v1799_v40  ;;  %v1805_v61 = vmul.f32 %v1801_v60, %v1801_v60 }
 0x280   : > { %v1806_v41 = vmul.f32 %v1802_v31, %v1802_v31 }
 0x281   : > { %1739 = vadd.xlane.f32.xlu0 %v1734_v52  ;;  %1737 = vadd.xlane.f32.xlu1 %v1733_v54 }
 0x285   : > { %1671 = vadd.xlane.f32.xlu0 %v1665_v47  ;;  %1601 = vadd.xlane.f32.xlu1 %v1595_v8 }
 0x289   : > { %1809 = vadd.xlane.f32.xlu0 %v1804_v13  ;;  %1807 = vadd.xlane.f32.xlu1 %v1803_v21 }
 0x28d   : > { %1603 = vadd.xlane.f32.xlu0 %v1596_v45  ;;  %1741 = vadd.xlane.f32.xlu1 %v1735_v50 }
 0x291   : > { %1811 = vadd.xlane.f32.xlu0 %v1805_v61  ;;  %1673 = vadd.xlane.f32.xlu1 %v1666_v48 }
 0x295   : > { %1813 = vadd.xlane.f32.xlu0 %v1806_v41  ;;  %1743 = vadd.xlane.f32.xlu1 %v1736_v43 }
 0x306   : > { %v1600_v44 = vpop.xlane.xlu0 %1599  ;;  %v1598_v20 = vpop.xlane.xlu1 %1597 }
 0x307   : > { %v1605_v42 = vadd.f32 %v1600_v44, %v1598_v20 }
 0x30a   : > { %v1670_v3 = vpop.xlane.xlu0 %1669  ;;  %v1668_v35 = vpop.xlane.xlu1 %1667 }
 0x30b   : > { %v1675_v59 = vadd.f32 %v1670_v3, %v1668_v35 }
 0x30e   : > { %v1740_v11 = vpop.xlane.xlu0 %1739  ;;  %v1738_v34 = vpop.xlane.xlu1 %1737 }
 0x30f   : > { %v1745_v63 = vadd.f32 %v1740_v11, %v1738_v34 }
 0x312   : > { %v1672_v37 = vpop.xlane.xlu0 %1671  ;;  %v1602_v53 = vpop.xlane.xlu1 %1601 }
 0x313   : > { %v1606_v33 = vadd.f32 %v1605_v42, %v1602_v53  ;;  %v1676_v16 = vadd.f32 %v1675_v59, %v1672_v37 }
 0x316   : > { %v1810_v5 = vpop.xlane.xlu0 %1809  ;;  %v1808_v6 = vpop.xlane.xlu1 %1807 }
 0x317   : > { %v1815_v9 = vadd.f32 %v1810_v5, %v1808_v6 }
 0x31a   : > { %v1604_v58 = vpop.xlane.xlu0 %1603  ;;  %v1742_v1 = vpop.xlane.xlu1 %1741 }
 0x31b   : > { %v1607_v17 = vadd.f32 %v1606_v33, %v1604_v58  ;;  %v1746_v36 = vadd.f32 %v1745_v63, %v1742_v1 }
 0x31d   : > { %v1608_v25 = vrot.slane %v1607_v17, 4 }
 0x31e   : > { %v1812_v10 = vpop.xlane.xlu0 %1811  ;;  %v1674_v28 = vpop.xlane.xlu1 %1673 }
 0x31f   : > { %v1609_v24 = vadd.f32 %v1608_v25, %v1607_v17  ;;  %v1677_v56 = vadd.f32 %v1676_v16, %v1674_v28  ;;  %v1816_v2 = vadd.f32 %v1815_v9, %v1812_v10 }
 0x321   : > { %v1678_v55 = vrot.slane %v1677_v56, 4  ;;  %v1610_v15 = vrot.slane %v1609_v24, 2 }
 0x322   : > { %v1814_v19 = vpop.xlane.xlu0 %1813  ;;  %v1744_v4 = vpop.xlane.xlu1 %1743 }
 0x323   : > { %v1679_v18 = vadd.f32 %v1678_v55, %v1677_v56  ;;  %v1817_v29 = vadd.f32 %v1816_v2, %v1814_v19  ;;  %v1747_v38 = vadd.f32 %v1746_v36, %v1744_v4  ;;  %v1611_v46 = vadd.f32 %v1610_v15, %v1609_v24 }
 0x325   : > { %v1680_v32 = vrot.slane %v1679_v18, 2  ;;  %v1818_v12 = vrot.slane %v1817_v29, 4  ;;  %v1748_v22 = vrot.slane %v1747_v38, 4  ;;  %v1612_v54 = vrot.slane %v1611_v46, 1 }
 0x327   : > { %v1681_v57 = vadd.f32 %v1680_v32, %v1679_v18  ;;  %v1819_v62 = vadd.f32 %v1818_v12, %v1817_v29  ;;  %v1749_v49 = vadd.f32 %v1748_v22, %v1747_v38  ;;  %v1613_v13 = vadd.f32 %v1612_v54, %v1611_v46 }
 0x329   : > { %v1682_v0 = vrot.slane %v1681_v57, 1  ;;  %v1820_v30 = vrot.slane %v1819_v62, 2  ;;  %v1750_v52 = vrot.slane %v1749_v49, 2 }
 0x32b   : > { %v1821_v7 = vadd.f32 %v1820_v30, %v1819_v62  ;;  %v1751_v47 = vadd.f32 %v1750_v52, %v1749_v49  ;;  %v1683_v8 = vadd.f32 %v1682_v0, %v1681_v57 }
 0x32d   : > { %v1822_v14 = vrot.slane %v1821_v7, 1  ;;  %v1752_v40 = vrot.slane %v1751_v47, 1  ;;  %v1829_v51 = vsel %vm462_vm2, %v1613_v13, %v1683_v8 }
 0x32f   : > { %v1823_v21 = vadd.f32 %v1822_v14, %v1821_v7  ;;  %v1753_v23 = vadd.f32 %v1752_v40, %v1751_v47 }
 0x331   : > { %v1830_v45 = vsel %vm1825_vm4, %v1829_v51, %v1753_v23 }
 0x332   : > { %v1831_v50 = vsel %vm1827_vm5, %v1830_v45, %v1823_v21 }
 0x333   : > { %v1833_v60 = vrot.slane %v1831_v50, 7 }
 0x335   : > { %v1835_v27 = vsel %vm422_vm0, %v4097_v26, %v1833_v60 }
 0x336   : > { %1837 = vst.msk [vmem:[%s393_s9] sm:$0x3] %vm1836_vm6, %v1835_v27 }
 0x337 PF: > { %s4378_s25 = sld [smem:[#allocation16_spill]] }
 0x33d   : > { %s23_s27 = sadd.s32 1, %s4378_s25  }
 0x33e   : > { %p20_p11 = scmp.ge.s32.totalorder %s23_s27, 4  }
 0x340   :  { %22 = sbr.rel (!%p20_p11) target bundleno = 14 (0xe), region = 121 }
 0x347   :  { %1873 = vsyncpa [#allocation3], 1 }
 0x348   :  { %1875 = vsyncpa [#allocation3 + $0x1], 1 }
 0x349   :  { %1876 = vsyncpa [#allocation5], 1 }
 0x34a   :  { %1877 = vsyncpa [#allocation8], 1 }
 0x34b   :  { %1878 = vsyncpa [#allocation11], 1 }

// kernel: up_ds_forward.3
= control target key start
LH: loop header
LB: loop body
LE: loop exit
PB: predicated region body
PF: predicated region fallthrough
CT: control target
= control target key end

     0   :  { %s7362_s0 = inlined_call_operand.hbm [shape: f32[2,4,32,128], index: 0, kind: input, shape index: {}]   ;;  %s7363_s1 = inlined_call_operand.hbm [shape: f32[2,4,16,64], index: 1, kind: input, shape index: {}]   ;;  %s7364_s2 = inlined_call_operand.vmem [shape: f32[32,16], index: 2, kind: input, shape index: {}]   ;;  %s7365_s3 = inlined_call_operand.hbm [shape: f32[64,128], index: 3, kind: input, shape index: {}]   ;;  %s7366_s4 = inlined_call_operand.vmem [shape: f32[8,9], index: 4, kind: input, shape index: {}]   ;;  %s7367_s5 = inlined_call_operand.vmem [shape: f32[8], index: 5, kind: input, shape index: {}]   ;;  %s7368_s6 = inlined_call_operand.vmem [shape: f32[4,8], index: 6, kind: input, shape index: {}]   ;;  %s7369_s7 = inlined_call_operand.vmem [shape: f32[4], index: 7, kind: input, shape index: {}]   ;;  %s7370_s8 = inlined_call_operand.vmem [shape: bf16[2,4,32,128], index: 8, kind: output, shape index: {0}]   ;;  %s7371_s9 = inlined_call_operand.vmem [shape: f32[2,2,4], index: 9, kind: output, shape index: {1}]  }
   0x1   :  { %7399 = sst [smem:[#allocation54_spill]] %s7362_s0 }
   0x2   :  { %7400 = sst [smem:[#allocation55_spill]] %s7365_s3 }
   0x3   :  { %7401 = sst [smem:[#allocation56_spill]] %s7366_s4 }
   0x4   :  { %7402 = sst [smem:[#allocation57_spill]] %s7367_s5 }
   0x5   :  { %15 = vsyncpa [#allocation3], 0 }
   0x6   :  { %17 = vsyncpa [#allocation3 + $0x1], 0 }
   0x7   :  { %18 = vsyncpa [#allocation6], 0 }
   0x8   :  { %20 = vsyncpa [#allocation6 + $0x1], 0 }
   0x9   :  { %21 = vsyncpa [#allocation4], 0 }
   0xa   :  { %22 = vsyncpa [#allocation10], 0 }
   0xb   :  { %23 = vsyncpa [#allocation13], 0  ;;  %s4665_s30 = smov 0   ;;  %s4667_s10 = smov 0  }
   0xc   :  { %s4669_s11 = smov 0   ;;  %s4671_s12 = smov 0  }
   0xd LB: > { %s4604_s13 = smov [#allocation7]   ;;  %s4686_s15 = sadd.s32 4294967295, %s4602_s12   ;;  %s4602_s12 = sphi %s4671_s12, %s7517_s12   ;;  %s4598_s11 = sphi %s4669_s11, %s7516_s11   ;;  %s4594_s10 = sphi %s4667_s10, %s7515_s10   ;;  %s4590_s30 = sphi %s4665_s30, %s7514_s30  }
   0xe   : > { %s279_s14 = sshll.u32 %s4604_s13, 4  ;;  %p3755_p0 = scmp.ge.s32.totalorder %s4602_s12, 1  ;;  %s4691_s14 = int_to_ptr.vmem [resolvable:$true] %s279_s14 }
   0xf   : > { %p7376_p1 = scmp.eq.s32.totalorder %s4686_s15, 0  ;;  %p264_p2 = scmp.lt.s32.totalorder %s4602_s12, 3 }
  0x10   : > { %s7404_s5 = sld [smem:[#allocation57_spill]]  ;;  %s7406_s4 = sld [smem:[#allocation56_spill]] }
  0x11   : > { %p4693_p3 = pnand %p3755_p0, %p264_p2  ;;  %s315_s26 = sshll.u32 %s7368_s6, 4  ;;  %s316_s26 = int_to_ptr.vmem [resolvable:$true] %s315_s26 }
  0x12   : > { %s7407_s3 = sld [smem:[#allocation55_spill]] }
  0x13   : > { %p4313_p4 = pneg %p4693_p3 }
  0x15   : > { %p4706_p5 = pnand %p4313_p4, %p7376_p1 }
  0x16   : > { %s304_s19 = sshll.u32 %s7404_s5, 4  ;;  %s293_s23 = sshll.u32 %s7406_s4, 4  ;;  %s4702_s19 = int_to_ptr.vmem [resolvable:$true] %s304_s19  ;;  %s4713_s23 = int_to_ptr.vmem [resolvable:$true] %s293_s23 }
  0x17   : > { %p4726_p7 = pneg %p4706_p5 }
  0x18   : > { %s4400_s29 = scalar_lea.hbm %s7407_s3, 1024 }
  0x19   : > { %p4401_p6 = scmp.ne.s32.totalorder %s7407_s3, %s4400_s29  ;;  %p4407_p10 = scmp.lt.u32.totalorder %s4400_s29, %s7407_s3 }
  0x1b   : > { %p4403_p8 = pnand %p4726_p7, %p4401_p6 }
  0x1d   : > { %p4404_p9 = pneg %p4403_p8 }
  0x1f   : > { %p4409_p11 = pnand %p4407_p10, %p4404_p9 }
  0x21   : > { %4412 = shalt.err (!%p4409_p11)
}
  0x22   : > { %s4413_s24 = scalar_lea.vmem %s4691_s14, 1024  ;;  %p4421_p2 = scmp.lt.s32.totalorder %s4691_s14, %s4691_s14 }
  0x23   : > { %p4414_p12 = scmp.ne.s32.totalorder %s4691_s14, %s4413_s24  ;;  %p4422_p4 = scmp.lt.s32.totalorder %s4413_s24, %s4413_s24 }
  0x25   : > { %p4416_p13 = pnand %p4414_p12, %p4726_p7  ;;  %p4423_p6 = por %p4422_p4, %p4421_p2 }
  0x27   : > { %p4417_p0 = pneg %p4416_p13 }
  0x29   : > { %p4424_p8 = pnand %p4423_p6, %p4417_p0 }
  0x2b   : > { %4427 = shalt.err (!%p4424_p8)
}
  0x2c   : > { %s7372_s25 = smov 128   ;;  %s7374_s27 = smov 8  }
  0x2d   : > { %4316 = dma.hbm_to_vmem [thread:$0]  (!%p4706_p5), %s7407_s3, 1024, %s4691_s14, [#allocation6], %s7372_s25, %s7372_s25, %s7374_s27  }
  0x2e   : > { %s4428_s13 = scalar_lea.vmem %s4702_s19, 16  ;;  %p4436_p12 = scmp.lt.s32.totalorder %s4702_s19, %s4702_s19 }
  0x2f   : > { %p4429_p9 = scmp.ne.s32.totalorder %s4702_s19, %s4428_s13  ;;  %p4437_p13 = scmp.lt.s32.totalorder %s4428_s13, %s4428_s13 }
  0x31   : > { %p4431_p10 = pnand %p4429_p9, %p4726_p7  ;;  %p4438_p0 = por %p4437_p13, %p4436_p12 }
  0x33   : > { %p4432_p11 = pneg %p4431_p10 }
  0x35   : > { %p4439_p2 = pnand %p4438_p0, %p4432_p11 }
  0x37   : > { %4442 = shalt.err (!%p4439_p2)
}
  0x38   : > { %s4607_s17 = smov [#allocation9]   ;;  %s4443_s14 = scalar_lea.vmem %s4713_s23, 128 }
  0x39   : > { %4322 = dma.vmem_to_smem (!%p4706_p5), %s4702_s19, 16, %s4607_s17, [#allocation10]  }
  0x3a   : > { %p4444_p4 = scmp.ne.s32.totalorder %s4713_s23, %s4443_s14  ;;  %p4451_p9 = scmp.lt.s32.totalorder %s4713_s23, %s4713_s23 }
  0x3b   : > { %p4452_p10 = scmp.lt.s32.totalorder %s4443_s14, %s4443_s14 }
  0x3c   : > { %p4446_p6 = pnand %p4444_p4, %p4726_p7 }
  0x3d   : > { %p4453_p12 = por %p4452_p10, %p4451_p9 }
  0x3e   : > { %p4447_p8 = pneg %p4446_p6 }
  0x40   : > { %p4454_p11 = pnand %p4453_p12, %p4447_p8 }
  0x42   : > { %4457 = shalt.err (!%p4454_p11)
}
  0x43   : > { %s4608_s21 = smov [#allocation8]   ;;  %s4458_s19 = scalar_lea.vmem %s316_s26, 64 }
  0x44   : > { %4319 = dma.vmem_to_smem (!%p4706_p5), %s4713_s23, 128, %s4608_s21, [#allocation4]  }
  0x45   : > { %p4459_p13 = scmp.ne.s32.totalorder %s316_s26, %s4458_s19  ;;  %p4466_p4 = scmp.lt.s32.totalorder %s316_s26, %s316_s26 }
  0x46   : > { %p4467_p6 = scmp.lt.s32.totalorder %s4458_s19, %s4458_s19 }
  0x47   : > { %p4461_p0 = pnand %p4459_p13, %p4726_p7 }
  0x48   : > { %p4468_p8 = por %p4467_p6, %p4466_p4 }
  0x49   : > { %p4462_p2 = pneg %p4461_p0 }
  0x4b   : > { %p4469_p9 = pnand %p4468_p8, %p4462_p2 }
  0x4d   : > { %4472 = shalt.err (!%p4469_p9)
}
  0x4e   : > { %s4609_s28 = smov [#allocation11]   ;;  %s326_s13 = sshll.u32 %s7369_s7, 4  ;;  %s327_s13 = int_to_ptr.vmem [resolvable:$true] %s326_s13 }
  0x4f   : > { %4325 = dma.vmem_to_smem (!%p4706_p5), %s316_s26, 64, %s4609_s28, [#allocation10]  }
  0x50   : > { %s4473_s17 = scalar_lea.vmem %s327_s13, 16  ;;  %p4481_p13 = scmp.lt.s32.totalorder %s327_s13, %s327_s13 }
  0x51   : > { %p4474_p10 = scmp.ne.s32.totalorder %s327_s13, %s4473_s17  ;;  %p4482_p0 = scmp.lt.s32.totalorder %s4473_s17, %s4473_s17 }
  0x53   : > { %p4476_p12 = pnand %p4474_p10, %p4726_p7  ;;  %p4483_p4 = por %p4482_p0, %p4481_p13 }
  0x55   : > { %p4477_p11 = pneg %p4476_p12 }
  0x57   : > { %p4484_p2 = pnand %p4483_p4, %p4477_p11 }
  0x59   : > { %4487 = shalt.err (!%p4484_p2)
}
  0x5a   : > { %s4610_s14 = smov [#allocation12]   ;;  %s4784_s26 = sadd.s32 1, %s4602_s12  }
  0x5b   : > { %4328 = dma.vmem_to_smem (!%p4706_p5), %s327_s13, 16, %s4610_s14, [#allocation13]  }
  0x5c   : > { %s33_s18 = ssub.s32 %s4602_s12, %s4784_s26  ;;  %s36_s21 = sadd.s32 1, %s4598_s11 }
  0x5d   : > { %p34_p7 = scmp.eq.s32.totalorder %s33_s18, 0  ;;  %p43_p6 = scmp.ne.s32.totalorder %s4598_s11, %s4594_s10 }
  0x5e   : > { %p44_p8 = scmp.eq.s32.totalorder %s4602_s12, 0  ;;  %p49_p9 = scmp.ne.s32.totalorder %s4594_s10, %s4590_s30 }
  0x5f   : > { %s4795_s20 = scalar_select %p34_p7, %s4598_s11, %s36_s21  }
  0x60   : > { %p45_p10 = por %p44_p8, %p43_p6  ;;  %p4799_p12 = por %p7376_p1, %p49_p9 }
  0x61   : > { %p4341_p11 = scmp.lt.s32.totalorder %s4602_s12, 2  ;;  %s4805_s24 = sand.u32 1, %s4598_s11  }
  0x62   : > { %s7409_s22 = scalar_select %p4799_p12, 1, 0 }
  0x63   : > { %s3762_s19 = sshll.u32 %s4805_s24, 7  ;;  %s3963_s28 = sshll.u32 %s4602_s12, 11 }
  0x64   : > { %s7410_s0 = sld [smem:[#allocation54_spill]]  ;;  %s341_s13 = scalar_lea.vmem [#allocation2], %s3762_s19 }
  0x65   : > { %s348_s17 = sshll.u32 %s341_s13, 4  ;;  %p4816_p5 = pnand %p4341_p11, %p45_p10  ;;  %s4814_s17 = int_to_ptr.vmem [resolvable:$true] %s348_s17 }
  0x66   : > { %s3765_s21 = sshll.u32 %s4805_s24, 6  ;;  %s338_s25 = scalar_lea.sflag [#allocation3], %s4805_s24 }
  0x67   : > { %p4490_p0 = pneg %p4816_p5 }
  0x6a   : > { %s4812_s30 = scalar_lea.hbm %s7410_s0, %s3963_s28  ;;  %s4493_s29 = scalar_lea.hbm %s7410_s0, 4096 }
  0x6b   : > { %s4488_s23 = scalar_lea.hbm %s4812_s30, 2048  ;;  %p4494_p7 = scmp.lt.u32.totalorder %s4812_s30, %s7410_s0 }
  0x6c   : > { %p4489_p13 = scmp.ne.s32.totalorder %s4812_s30, %s4488_s23  ;;  %p4495_p6 = scmp.lt.u32.totalorder %s4493_s29, %s4488_s23 }
  0x6d   : > { %p4497_p9 = scmp.lt.u32.totalorder %s4488_s23, %s4812_s30 }
  0x6e   : > { %p4491_p4 = pnand %p4490_p0, %p4489_p13  ;;  %p4496_p8 = por %p4495_p6, %p4494_p7 }
  0x70   : > { %p4492_p2 = pneg %p4491_p4  ;;  %p4498_p10 = por %p4497_p9, %p4496_p8 }
  0x72   : > { %p4499_p11 = pnand %p4498_p10, %p4492_p2 }
  0x74   : > { %4502 = shalt.err (!%p4499_p11)
}
  0x75   : > { %s4503_s18 = scalar_lea.vmem %s4814_s17, 2048  ;;  %s4611_s19 = smov [#allocation2]  }
  0x76   : > { %p4504_p13 = scmp.ne.s32.totalorder %s4814_s17, %s4503_s18  ;;  %s4508_s28 = sshll.u32 %s4611_s19, 4  ;;  %s4509_s28 = int_to_ptr.vmem [resolvable:$false] %s4508_s28 }
  0x77   : > { %s4510_s27 = scalar_lea.vmem %s4509_s28, 4096  ;;  %p4511_p12 = scmp.lt.s32.totalorder %s4814_s17, %s4509_s28 }
  0x78   : > { %p4506_p4 = pnand %p4504_p13, %p4490_p0  ;;  %p4512_p7 = scmp.lt.s32.totalorder %s4510_s27, %s4503_s18 }
  0x7a   : > { %p4507_p1 = pneg %p4506_p4  ;;  %p4513_p6 = por %p4512_p7, %p4511_p12 }
  0x7c   : > { %p4514_p8 = pnand %p4513_p6, %p4507_p1 }
  0x7e   : > { %4517 = shalt.err (!%p4514_p8)
}
  0x7f   : > { %s7412_s23 = smov 8   ;;  %s7413_s29 = smov 128  }
  0x80   : > { %4332 = dma.hbm_to_vmem [thread:$0]  (!%p4816_p5), %s4812_s30, 2048, %s4814_s17, %s338_s25, %s7413_s29, %s7413_s29, %s7412_s23  }
  0x81   : > { %s3964_s13 = sshll.u32 %s4602_s12, 10  ;;  %s362_s27 = scalar_lea.vmem [#allocation5], %s3765_s21 }
  0x82   : > { %s4857_s28 = scalar_lea.hbm %s7363_s1, %s3964_s13  ;;  %s369_s0 = sshll.u32 %s362_s27, 4  ;;  %s4861_s0 = int_to_ptr.vmem [resolvable:$true] %s369_s0 }
  0x83   : > { %s7414_s3 = sand.u32 1, %s4602_s12   ;;  %s4518_s5 = scalar_lea.hbm %s4857_s28, 1024 }
  0x84   : > { %s4865_s4 = scalar_lea.sflag [#allocation6], %s7414_s3  ;;  %p4519_p1 = scmp.ne.s32.totalorder %s4857_s28, %s4518_s5 }
  0x85   : > { %s4523_s24 = scalar_lea.hbm %s7363_s1, 2048  ;;  %p4524_p9 = scmp.lt.u32.totalorder %s4857_s28, %s7363_s1 }
  0x86   : > { %p4521_p12 = pnand %p4519_p1, %p4490_p0  ;;  %p4525_p10 = scmp.lt.u32.totalorder %s4523_s24, %s4518_s5 }
  0x87   : > { %p4527_p13 = scmp.lt.u32.totalorder %s4518_s5, %s4857_s28 }
  0x88   : > { %p4522_p2 = pneg %p4521_p12  ;;  %p4526_p11 = por %p4525_p10, %p4524_p9 }
  0x8a   : > { %p4528_p4 = por %p4527_p13, %p4526_p11 }
  0x8c   : > { %p4529_p7 = pnand %p4528_p4, %p4522_p2 }
  0x8e   : > { %4532 = shalt.err (!%p4529_p7)
}
  0x8f   : > { %s4533_s3 = scalar_lea.vmem %s4861_s0, 1024  ;;  %s4612_s12 = smov [#allocation5]  }
  0x90   : > { %p4534_p6 = scmp.ne.s32.totalorder %s4861_s0, %s4533_s3  ;;  %s4538_s21 = sshll.u32 %s4612_s12, 4  ;;  %s4539_s21 = int_to_ptr.vmem [resolvable:$false] %s4538_s21 }
  0x91   : > { %s4540_s19 = scalar_lea.vmem %s4539_s21, 2048  ;;  %p4541_p12 = scmp.lt.s32.totalorder %s4861_s0, %s4539_s21 }
  0x92   : > { %p4536_p8 = pnand %p4534_p6, %p4490_p0  ;;  %p4542_p9 = scmp.lt.s32.totalorder %s4540_s19, %s4533_s3 }
  0x94   : > { %p4537_p1 = pneg %p4536_p8  ;;  %p4543_p10 = por %p4542_p9, %p4541_p12 }
  0x96   : > { %p4544_p11 = pnand %p4543_p10, %p4537_p1 }
  0x98   : > { %4547 = shalt.err (!%p4544_p11)
}
  0x99   : > { %4335 = dma.hbm_to_vmem [thread:$0]  (!%p4816_p5), %s4857_s28, 1024, %s4861_s0, %s4865_s4, %s7413_s29, %s7413_s29, %s7412_s23  }
  0x9a   : > { %381 = sbr.rel (%p4693_p3) target bundleno = 1883 (0x75b), region = 52 }
  0xa1   : > { %s383_s5 = sand.u32 1, %s4594_s10   ;;  %p7415_p0 = scmp.ne.s32.totalorder %s7409_s22, 0 }
  0xa2   : > { %s3769_s18 = sshll.u32 %s383_s5, 7  ;;  %s384_s27 = scalar_lea.sflag [#allocation3], %s383_s5 }
  0xa3   : > { %s4897_s25 = scalar_lea.vmem [#allocation2], %s3769_s18 }
  0xa4   : > { %4565 = dma.done.wait (%p7415_p0), %s384_s27, 2048  }
  0xa5   : > { %4567 = vsyncadd (%p7415_p0), %s384_s27, 4294965248  ;;  %s392_s14 = sand.u32 1, %s4686_s15   ;;  %s3770_s30 = sshll.u32 %s383_s5, 6 }
  0xa6   : > { %s393_s0 = scalar_lea.sflag [#allocation6], %s392_s14  ;;  %s4904_s4 = scalar_lea.vmem [#allocation5], %s3770_s30 }
  0xa7   : > { %4569 = dma.done.wait (%p7415_p0), %s393_s0, 1024  }
  0xa8   : > { %4571 = vsyncadd (%p7415_p0), %s393_s0, 4294966272  ;;  %p7416_p3 = scmp.eq.s32.totalorder %s4686_s15, 0 }
  0xaa   : > { %4573 = dma.done.wait (%p7416_p3), [#allocation6], 1024   ;;  %p7417_p5 = pmov %p7416_p3 }
  0xab   : > { %p7418_p2 = pmov %p7416_p3 }
  0xac   : > { %4575 = vsyncadd (%p7417_p5), [#allocation6], 4294966272 }
  0xad   : > { %4577 = dma.done.wait (%p7418_p2), [#allocation4], 128   ;;  %p7419_p13 = pmov %p7418_p2 }
  0xae   : > { %p7420_p4 = pmov %p7418_p2 }
  0xaf   : > { %4579 = vsyncadd (%p7419_p13), [#allocation4], 4294967168 }
  0xb0   : > { %4581 = dma.done.wait (%p7420_p4), [#allocation10], 80   ;;  %p7421_p7 = pmov %p7418_p2 }
  0xb1   : > { %p7422_p6 = pmov %p7418_p2 }
  0xb2   : > { %4583 = vsyncadd (%p7421_p7), [#allocation10], 4294967216 }
  0xb3   : > { %4585 = dma.done.wait (%p7422_p6), [#allocation13], 16   ;;  %p7423_p8 = pmov %p7418_p2 }
  0xb5   : > { %4587 = vsyncadd (%p7423_p8), [#allocation13], 4294967280 }
  0xb6   : > { %421 = sfence }
  0xb7   : > { %v1543_v0 = vld [vmem:[#allocation7] sm:$0xff]  ;;  %v1544_v1 = vld [vmem:[#allocation7 + $0x8] sm:$0xff]  ;;  %v1545_v2 = vld [vmem:[#allocation7 + $0x10] sm:$0xff]  ;;  %vm1551_vm0 = vcmask 523264   ;;  %vm1637_vm1 = vcmask 130048   ;;  %vm478_vm2 = vcmask 1040384  }
  0xb8   : > { %v4926_v3 = vpack.c.bf16 %v1544_v1, %v1543_v0  ;;  %v1546_v4 = vld [vmem:[#allocation7 + $0x18] sm:$0xff]  ;;  %v1547_v6 = vld [vmem:[#allocation7 + $0x20] sm:$0xff]  ;;  %v1548_v7 = vld [vmem:[#allocation7 + $0x28] sm:$0xff]  ;;  %s4613_s23 = smov 1   ;;  %s4614_s29 = smov 127   ;;  %vm491_vm3 = vcmask 1046528  }
  0xb9   : > { %v4928_v5 = vpack.c.bf16 %v1546_v4, %v1545_v2  ;;  %v1541_v8 = vld [vmem:[%s4904_s4] sm:$0xff]  ;;  %v4935_v9 = vpack.c.bf16 %v1548_v7, %v1547_v6  ;;  %v1549_v10 = vld [vmem:[#allocation7 + $0x30] sm:$0xff]  ;;  %v1550_v11 = vld [vmem:[#allocation7 + $0x38] sm:$0xff]  ;;  %s3779_s21 = sld [smem:[#allocation8 + $0x1]]  ;;  %s504_s19 = sld [smem:[#allocation8]]  ;;  %vm518_vm4 = vcmask 7168  }
  0xba   : > { %7424 = vst [vmem:[#allocation20_spill] sm:$0xff] %v4926_v3  ;;  %4210 = vmatprep.subr.bf16.mxu0 %v4926_v3  ;;  %4109 = vmatprep.mubr.msk.f32.mxu0 %vm1551_vm0, %v1541_v8  ;;  %v4939_v12 = vpack.c.bf16 %v1550_v11, %v1549_v10  ;;  %v1542_v13 = vld [vmem:[%s4904_s4 + $0x8] sm:$0xff]  ;;  %v4949_v14 = vld [vmem:[%s7364_s2] sm:$0xff]  ;;  %v4959_v16 = vld [vmem:[%s4897_s25 + $0x10] sm:$0xff]  ;;  %s5214_s5 = sld [smem:[#allocation8 + $0x2]]  ;;  %s5224_s18 = sld [smem:[#allocation8 + $0x3]] }
  0xbb   : > { %7425 = vst [vmem:[#allocation21_spill] sm:$0xff] %v4928_v5  ;;  %4212 = vmatpush3.bf16.msra.mxu0 %v4926_v3  ;;  %7426 = vst [vmem:[#allocation22_spill] sm:$0xff] %v4935_v9  ;;  %4116 = vmatprep.mubr.msk.f32.mxu1 %vm1637_vm1, %v4949_v14  ;;  %v4956_v15 = vld [vmem:[%s4897_s25 + $0x8] sm:$0xff]  ;;  %v482_v18 = vrot.slane %v4959_v16, 7  ;;  %v4969_v20 = vld [vmem:[%s4897_s25 + $0x18] sm:$0xff]  ;;  %v495_v28 = vrot.slane %v4959_v16, 1 }
  0xbc   : > { %4214 = vmatprep.subr.bf16.mxu0 %v4928_v5  ;;  %7427 = vst [vmem:[#allocation23_spill] sm:$0xff] %v4939_v12  ;;  %v480_v17 = vrot.slane %v4956_v15, 7  ;;  %v4972_v21 = vld [vmem:[%s4897_s25] sm:$0xff]  ;;  %v484_v22 = vrot.slane %v4969_v20, 7  ;;  %v493_v27 = vrot.slane %v4956_v15, 1  ;;  %v497_v30 = vrot.slane %v4969_v20, 1 }
  0xbd   : > { %v479_v23 = vrot.slane %v4972_v21, 7  ;;  %v492_v31 = vrot.slane %v4972_v21, 1  ;;  %v5038_v35 = vld [vmem:[%s4897_s25 + $0x20] sm:$0xff]  ;;  %v5041_v36 = vld [vmem:[%s4897_s25 + $0x28] sm:$0xff]  ;;  %v5050_v39 = vld [vmem:[%s4897_s25 + $0x30] sm:$0xff]  ;;  %vm555_vm5 = vcmask 1039360  }
  0xbe   : > { %v4964_v19 = vsel %vm478_vm2, %v480_v17, %v482_v18  ;;  %v4977_v24 = vsel %vm478_vm2, %v482_v18, %v484_v22  ;;  %v5016_v29 = vsel %vm491_vm3, %v493_v27, %v495_v28  ;;  %v5025_v32 = vsel %vm491_vm3, %v497_v30, 0.0  ;;  %v5053_v40 = vld [vmem:[%s4897_s25 + $0x38] sm:$0xff]  ;;  %v5130_v55 = vld [vmem:[%s4897_s25 + $0x40] sm:$0xff]  ;;  %v5133_v56 = vld [vmem:[%s4897_s25 + $0x48] sm:$0xff]  ;;  %s5234_s27 = sld [smem:[#allocation8 + $0x4]]  ;;  %s5276_s14 = sld [smem:[#allocation8 + $0x5]] }
  0xbf   : > { %4216 = vmatpush3.bf16.msra.mxu0 %v4928_v5  ;;  %510 = vrot.lane.b32.xlu1 %v4964_v19, %s4613_s23  ;;  %v4980_v25 = vsel %vm478_vm2, 0.0, %v479_v23  ;;  %v4987_v26 = vsel %vm478_vm2, %v479_v23, %v480_v17  ;;  %v5028_v33 = vsel %vm491_vm3, %v492_v31, %v493_v27  ;;  %v5035_v34 = vsel %vm491_vm3, %v495_v28, %v497_v30  ;;  %v5142_v59 = vld [vmem:[%s4897_s25 + $0x50] sm:$0xff]  ;;  %v5145_v60 = vld [vmem:[%s4897_s25 + $0x58] sm:$0xff]  ;;  %v5182_v8 = vld [vmem:[%s7364_s2 + $0x8] sm:$0xff]  ;;  %s5299_s30 = sld [smem:[#allocation8 + $0x7]]  ;;  %s3784_s0 = sld [smem:[#allocation8 + $0x6]] }
  0xc0   : > { %4218 = vmatprep.subr.bf16.mxu0 %v4935_v9  ;;  %506 = vrot.lane.b32.xlu0 %v4980_v25, %s4613_s23  ;;  %v749_v37 = vrot.slane %v5038_v35, 7  ;;  %v750_v38 = vrot.slane %v5041_v36, 7  ;;  %v752_v42 = vrot.slane %v5050_v39, 7  ;;  %v754_v43 = vrot.slane %v5053_v40, 7  ;;  %v5190_v10 = vld [vmem:[%s7364_s2 + $0x10] sm:$0xff]  ;;  %v5202_v11 = vld [vmem:[%s7364_s2 + $0x18] sm:$0xff] }
  0xc1   : > { %v762_v47 = vrot.slane %v5041_v36, 1  ;;  %v764_v48 = vrot.slane %v5050_v39, 1  ;;  %v766_v50 = vrot.slane %v5053_v40, 1  ;;  %v761_v51 = vrot.slane %v5038_v35, 1  ;;  %s3795_s16 = sld [smem:[#allocation8 + $0x81]]  ;;  %s3794_s22 = sld [smem:[#allocation8 + $0x80]] }
  0xc2   : > { %v5060_v41 = vsel %vm478_vm2, %v749_v37, %v750_v38  ;;  %v5069_v44 = vsel %vm478_vm2, %v752_v42, %v754_v43  ;;  %v5072_v45 = vsel %vm478_vm2, 0.0, %v749_v37  ;;  %v5079_v46 = vsel %vm478_vm2, %v750_v38, %v752_v42  ;;  %s3796_s28 = sld [smem:[#allocation8 + $0x82]]  ;;  %s5402_s24 = sld [smem:[#allocation8 + $0x83]] }
  0xc3   : > { %4220 = vmatpush3.bf16.msra.mxu0 %v4935_v9  ;;  %512 = vrot.lane.b32.xlu1 %v4977_v24, %s4613_s23  ;;  %v5108_v49 = vsel %vm491_vm3, %v762_v47, %v764_v48  ;;  %v5117_v52 = vsel %vm491_vm3, %v766_v50, 0.0  ;;  %v5120_v53 = vsel %vm491_vm3, %v761_v51, %v762_v47  ;;  %v5127_v54 = vsel %vm491_vm3, %v764_v48, %v766_v50  ;;  %s5417_s17 = sld [smem:[#allocation8 + $0x84]]  ;;  %s5423_s13 = sld [smem:[#allocation8 + $0x87]] }
  0xc4   : > { %4222 = vmatprep.subr.bf16.mxu0 %v4939_v12  ;;  %508 = vrot.lane.b32.xlu0 %v4987_v26, %s4613_s23  ;;  %v1016_v57 = vrot.slane %v5130_v55, 7  ;;  %v1017_v58 = vrot.slane %v5133_v56, 7  ;;  %v1019_v62 = vrot.slane %v5142_v59, 7  ;;  %v1021_v63 = vrot.slane %v5145_v60, 7  ;;  %s5429_s3 = sld [smem:[#allocation8 + $0x8]]  ;;  %s5432_s12 = sld [smem:[#allocation8 + $0x85]] }
  0xc5   : > { %v533_v23 = vstv %s3779_s21  ;;  %v1029_v27 = vrot.slane %v5133_v56, 1  ;;  %v1031_v28 = vrot.slane %v5142_v59, 1  ;;  %v523_v42 = vstv %s504_s19  ;;  %s5451_s21 = sld [smem:[#allocation8 + $0x86]]  ;;  %s5461_s19 = sld [smem:[#allocation9]] }
  0xc6   : > { %v5152_v61 = vsel %vm478_vm2, %v1016_v57, %v1017_v58  ;;  %v5161_v0 = vsel %vm478_vm2, %v1019_v62, %v1021_v63  ;;  %v5164_v1 = vsel %vm478_vm2, 0.0, %v1016_v57  ;;  %v5171_v2 = vsel %vm478_vm2, %v1017_v58, %v1019_v62  ;;  %p461_p1 = scmp.lt.s32.totalorder %s4686_s15, 1 }
  0xc7   : > { %4224 = vmatpush3.bf16.msra.mxu0 %v4939_v12  ;;  %545 = vrot.lane.b32.xlu1 %v4987_v26, %s4614_s29  ;;  %v535_v30 = vmul.f32 %v533_v23, %v4987_v26  ;;  %v537_v26 = vmul.f32 %v533_v23, %v4977_v24  ;;  %v534_v50 = vmul.f32 %v533_v23, %v4980_v25  ;;  %v560_v58 = vstv %s5214_s5  ;;  %s5463_s5 = sld [smem:[#allocation11]] }
  0xc8   : > { %543 = vrot.lane.b32.xlu0 %v4980_v25, %s4614_s29  ;;  %v5246_v62 = vsel %vm491_vm3, %v1029_v27, %v1031_v28  ;;  %v1033_v63 = vrot.slane %v5145_v60, 1  ;;  %s7519_s15 = smov (!%p461_p1, %s4686_s15), 1  ;;  %vm3570_vm6 = vcmask 15360   ;;  %vm3572_vm7 = vcmask 23552  }
  0xc9   : > { %vm3581_vm8 = vcmask 25600  }
  0xca   : > { %4110 = vmatmul.mubr.msk.f32.vlgmr.msra.gmra.mrb[0].mxu0 %vm1551_vm0, %v1542_v13  ;;  %v3864_v13 = vld [vmem:[%s4904_s4 + $0x10] sm:$0xff] }
  0xcb   : > { %4145 = vmatprep.mubr.msk.f32.mxu0 %vm1637_vm1, %v4949_v14  ;;  %549 = vrot.lane.b32.xlu1 %v4977_v24, %s4614_s29 }
  0xcc   : > { %547 = vrot.lane.b32.xlu0 %v4964_v19, %s4614_s29 }
  0xcf   : > { %572 = vrot.lane.b32.xlu1 %v4956_v15, %s4613_s23 }
  0xd0   : > { %570 = vrot.lane.b32.xlu0 %v4972_v21, %s4613_s23 }
  0xd3   : > { %576 = vrot.lane.b32.xlu1 %v4969_v20, %s4613_s23 }
  0xd4   : > { %574 = vrot.lane.b32.xlu0 %v4959_v16, %s4613_s23 }
  0xd7   : > { %608 = vrot.lane.b32.xlu1 %v4956_v15, %s4614_s29 }
  0xd8   : > { %606 = vrot.lane.b32.xlu0 %v4972_v21, %s4614_s29 }
  0xdb   : > { %612 = vrot.lane.b32.xlu1 %v4969_v20, %s4614_s29 }
  0xdc   : > { %610 = vrot.lane.b32.xlu0 %v4959_v16, %s4614_s29 }
  0xdf   : > { %635 = vrot.lane.b32.xlu1 %v5016_v29, %s4613_s23 }
  0xe0   : > { %633 = vrot.lane.b32.xlu0 %v5028_v33, %s4613_s23 }
  0xe3   : > { %639 = vrot.lane.b32.xlu1 %v5025_v32, %s4613_s23 }
  0xe4   : > { %637 = vrot.lane.b32.xlu0 %v5035_v34, %s4613_s23 }
  0xe7   : > { %671 = vrot.lane.b32.xlu1 %v5016_v29, %s4614_s29 }
  0xe8   : > { %669 = vrot.lane.b32.xlu0 %v5028_v33, %s4614_s29 }
  0xeb   : > { %675 = vrot.lane.b32.xlu1 %v5025_v32, %s4614_s29 }
  0xec   : > { %673 = vrot.lane.b32.xlu0 %v5035_v34, %s4614_s29 }
  0xef   : > { %777 = vrot.lane.b32.xlu1 %v5060_v41, %s4613_s23 }
  0xf0   : > { %775 = vrot.lane.b32.xlu0 %v5072_v45, %s4613_s23 }
  0xf3   : > { %781 = vrot.lane.b32.xlu1 %v5069_v44, %s4613_s23 }
  0xf4   : > { %779 = vrot.lane.b32.xlu0 %v5079_v46, %s4613_s23 }
  0xf7   : > { %813 = vrot.lane.b32.xlu1 %v5060_v41, %s4614_s29 }
  0xf8   : > { %811 = vrot.lane.b32.xlu0 %v5072_v45, %s4614_s29 }
  0xfb   : > { %817 = vrot.lane.b32.xlu1 %v5069_v44, %s4614_s29 }
  0xfc   : > { %815 = vrot.lane.b32.xlu0 %v5079_v46, %s4614_s29 }
  0xff   : > { %839 = vrot.lane.b32.xlu1 %v5041_v36, %s4613_s23 }
 0x100   : > { %837 = vrot.lane.b32.xlu0 %v5038_v35, %s4613_s23 }
 0x103   : > { %843 = vrot.lane.b32.xlu1 %v5053_v40, %s4613_s23 }
 0x104   : > { %841 = vrot.lane.b32.xlu0 %v5050_v39, %s4613_s23 }
 0x107   : > { %875 = vrot.lane.b32.xlu1 %v5041_v36, %s4614_s29 }
 0x108   : > { %873 = vrot.lane.b32.xlu0 %v5038_v35, %s4614_s29 }
 0x10b   : > { %879 = vrot.lane.b32.xlu1 %v5053_v40, %s4614_s29 }
 0x10c   : > { %877 = vrot.lane.b32.xlu0 %v5050_v39, %s4614_s29 }
 0x10f   : > { %902 = vrot.lane.b32.xlu1 %v5108_v49, %s4613_s23 }
 0x110   : > { %900 = vrot.lane.b32.xlu0 %v5120_v53, %s4613_s23 }
 0x113   : > { %906 = vrot.lane.b32.xlu1 %v5117_v52, %s4613_s23 }
 0x114   : > { %904 = vrot.lane.b32.xlu0 %v5127_v54, %s4613_s23 }
 0x117   : > { %938 = vrot.lane.b32.xlu1 %v5108_v49, %s4614_s29 }
 0x118   : > { %936 = vrot.lane.b32.xlu0 %v5120_v53, %s4614_s29 }
 0x11b   : > { %942 = vrot.lane.b32.xlu1 %v5117_v52, %s4614_s29 }
 0x11c   : > { %940 = vrot.lane.b32.xlu0 %v5127_v54, %s4614_s29 }
 0x11f   : > { %1044 = vrot.lane.b32.xlu1 %v5152_v61, %s4613_s23 }
 0x120   : > { %1042 = vrot.lane.b32.xlu0 %v5164_v1, %s4613_s23 }
 0x123   : > { %1048 = vrot.lane.b32.xlu1 %v5161_v0, %s4613_s23 }
 0x124   : > { %1046 = vrot.lane.b32.xlu0 %v5171_v2, %s4613_s23 }
 0x127   : > { %1080 = vrot.lane.b32.xlu1 %v5152_v61, %s4614_s29 }
 0x128   : > { %1078 = vrot.lane.b32.xlu0 %v5164_v1, %s4614_s29 }
 0x12b   : > { %1084 = vrot.lane.b32.xlu1 %v5161_v0, %s4614_s29 }
 0x12c   : > { %1082 = vrot.lane.b32.xlu0 %v5171_v2, %s4614_s29 }
 0x12f   : > { %1106 = vrot.lane.b32.xlu1 %v5133_v56, %s4613_s23 }
 0x130   : > { %1104 = vrot.lane.b32.xlu0 %v5130_v55, %s4613_s23 }
 0x131   : > { %v511_v17 = vpop.permute.xlu1 %510 }
 0x132   : > { %v507_v22 = vpop.permute.xlu0 %506  ;;  %v521_v24 = vsel %vm518_vm4, 0.0, %v511_v17 }
 0x133   : > { %1110 = vrot.lane.b32.xlu1 %v5145_v60, %s4613_s23  ;;  %v519_v43 = vsel %vm518_vm4, 0.0, %v507_v22  ;;  %v526_v17 = vmul.f32 %v523_v42, %v521_v24 }
 0x134   : > { %1108 = vrot.lane.b32.xlu0 %v5142_v59, %s4613_s23  ;;  %v524_v25 = vmul.f32 %v523_v42, %v519_v43 }
 0x135   : > { %v513_v18 = vpop.permute.xlu1 %512 }
 0x136   : > { %v522_v31 = vsel %vm518_vm4, 0.0, %v513_v18  ;;  %v509_v38 = vpop.permute.xlu0 %508  ;;  %v538_v43 = vadd.f32 %v534_v50, %v524_v25 }
 0x137   : > { %1142 = vrot.lane.b32.xlu1 %v5133_v56, %s4614_s29  ;;  %v520_v48 = vsel %vm518_vm4, 0.0, %v509_v38  ;;  %v3865_v56 = vld [vmem:[%s4904_s4 + $0x18] sm:$0xff]  ;;  %v527_v57 = vmul.f32 %v523_v42, %v522_v31  ;;  %v1028_v31 = vrot.slane %v5130_v55, 1  ;;  %v5261_v38 = vsel %vm491_vm3, %v1033_v63, 0.0 }
 0x138   : > { %v525_v51 = vmul.f32 %v523_v42, %v520_v48  ;;  %1140 = vrot.lane.b32.xlu0 %v5130_v55, %s4614_s29 }
 0x139   : > { %v546_v37 = vpop.permute.xlu1 %545 }
 0x13a   : > { %v557_v47 = vsel %vm555_vm5, %v546_v37, 0.0  ;;  %v586_v37 = vstv %s5224_s18  ;;  %s5476_s18 = sld [smem:[#allocation11 + $0x80]] }
 0x13b   : > { %1146 = vrot.lane.b32.xlu1 %v5145_v60, %s4614_s29  ;;  %v536_v60 = vmul.f32 %v533_v23, %v4964_v19 }
 0x13c   : > { %1144 = vrot.lane.b32.xlu0 %v5142_v59, %s4614_s29 }
 0x13f   : > { %1169 = vrot.lane.b32.xlu1 %v5246_v62, %s4613_s23 }
 0x143   : > { %1173 = vrot.lane.b32.xlu1 %v5261_v38, %s4613_s23 }
 0x147   : > { %1205 = vrot.lane.b32.xlu1 %v5246_v62, %s4614_s29 }
 0x14b   : > { %1209 = vrot.lane.b32.xlu1 %v5261_v38, %s4614_s29 }
 0x19d   : > { %v4111_v4 = vpop.f32.mrb[0].mxu0 }
 0x19e   : > { %v1624_v6 = vpop.f32.mrb[1].mxu0 }
 0x19f   : > { %v4225_v7 = vpack.c.bf16 %v4111_v4, %v1624_v6  ;;  %v562_v4 = vmul.f32 %v560_v58, %v557_v47  ;;  %v550_v6 = vpop.permute.xlu1 %549 }
 0x1a0   : > { %v559_v18 = vsel %vm555_vm5, %v550_v6, 0.0 }
 0x1a1   : > { %4226 = vmatprep.subr.bf16.mxu1 %v4225_v7  ;;  %v564_v47 = vmul.f32 %v560_v58, %v559_v18  ;;  %v5284_v18 = vld [vmem:[%s4897_s25 + $0x68] sm:$0xff] }
 0x1a2   : > { %4228 = vmatpush3.bf16.msra.mxu1 %v4225_v7  ;;  %v539_v7 = vadd.f32 %v535_v30, %v525_v51  ;;  %v541_v30 = vadd.f32 %v537_v26, %v527_v57  ;;  %v5270_v26 = vsel %vm491_vm3, %v1028_v31, %v1029_v27  ;;  %v540_v57 = vadd.f32 %v536_v60, %v526_v17 }
 0x1a3   : > { %4230 = vmatprep.subr.bf16.mxu1 %v4926_v3  ;;  %v573_v55 = vpop.permute.xlu1 %572  ;;  %1167 = vrot.lane.b32.xlu0 %v5270_v26, %s4613_s23  ;;  %v5291_v31 = vsel %vm491_vm3, %v1031_v28, %v1033_v63 }
 0x1a4   : > { %v566_v48 = vadd.f32 %v562_v4, %v539_v7  ;;  %v583_v23 = vsel %vm518_vm4, 0.0, %v573_v55  ;;  %v568_v24 = vadd.f32 %v564_v47, %v541_v30  ;;  %v1284_v55 = vrot.slane %v5284_v18, 7 }
 0x1a5   : > { %4117 = vmatmul.mubr.msk.f32.vlgmr.msra.gmra.mrb[0].mxu1 %vm1637_vm1, %v5182_v8 }
 0x1a6   : > { %4232 = vmatpush3.bf16.msra.mxu1 %v4926_v3  ;;  %4119 = vmatprep.mubr.msk.f32.mxu1 %vm1637_vm1, %v5190_v10 }
 0x1a7   : > { %4234 = vmatprep.subr.bf16.mxu1 %v4928_v5  ;;  %v577_v6 = vpop.permute.xlu1 %576  ;;  %1171 = vrot.lane.b32.xlu0 %v5291_v31, %s4613_s23 }
 0x1a9   : > { %4120 = vmatmul.mubr.msk.f32.gmra.mrb[2].mxu1 %vm1637_vm1, %v5202_v11 }
 0x1aa   : > { %4236 = vmatpush3.bf16.msra.mxu1 %v4928_v5  ;;  %4138 = vmatprep.mubr.msk.f32.mxu1 %vm1551_vm0, %v3864_v13  ;;  %v544_v13 = vpop.permute.xlu0 %543 }
 0x1ab   : > { %4238 = vmatprep.subr.bf16.mxu1 %v4935_v9  ;;  %v556_v22 = vsel %vm555_vm5, %v544_v13, 0.0  ;;  %v5281_v13 = vld [vmem:[%s4897_s25 + $0x60] sm:$0xff]  ;;  %v609_v63 = vpop.permute.xlu1 %608  ;;  %1203 = vrot.lane.b32.xlu0 %v5270_v26, %s4614_s29 }
 0x1ac   : > { %v561_v51 = vmul.f32 %v560_v58, %v556_v22  ;;  %v585_v22 = vsel %vm518_vm4, 0.0, %v577_v6  ;;  %v1283_v47 = vrot.slane %v5281_v13, 7 }
 0x1ad   : > { %v590_v60 = vmul.f32 %v586_v37, %v585_v22 }
 0x1ae   : > { %4240 = vmatpush3.bf16.msra.mxu1 %v4935_v9  ;;  %v548_v19 = vpop.permute.xlu0 %547  ;;  %v565_v4 = vadd.f32 %v561_v51, %v538_v43  ;;  %v5304_v51 = vld [vmem:[%s4897_s25 + $0x70] sm:$0xff] }
 0x1af   : > { %4242 = vmatprep.subr.bf16.mxu1 %v4939_v12  ;;  %v558_v42 = vsel %vm555_vm5, %v548_v19, 0.0  ;;  %v594_v59 = vadd.f32 %v590_v60, %v568_v24  ;;  %v5307_v19 = vld [vmem:[%s4897_s25 + $0x78] sm:$0xff]  ;;  %v622_v24 = vstv %s5276_s14  ;;  %v659_v60 = vstv %s5299_s30  ;;  %1207 = vrot.lane.b32.xlu0 %v5291_v31, %s4614_s29  ;;  %s5486_s14 = sld [smem:[#allocation11 + $0x180]] }
 0x1b0   : > { %v563_v7 = vmul.f32 %v560_v58, %v558_v42  ;;  %v1288_v6 = vrot.slane %v5307_v19, 7  ;;  %s5507_s30 = sld [smem:[#allocation8 + $0x88]] }
 0x1b2   : > { %4244 = vmatpush3.bf16.msra.mxu1 %v4939_v12  ;;  %v571_v27 = vpop.permute.xlu0 %570  ;;  %v567_v28 = vadd.f32 %v563_v7, %v540_v57 }
 0x1b5   : > { %4139 = vmatmul.mubr.msk.f32.vlgmr.msra.gmra.mrb[4].mxu1 %vm1551_vm0, %v3865_v56  ;;  %v596_v56 = vstv %s5234_s27  ;;  %s5484_s27 = sld [smem:[#allocation11 + $0x100]] }
 0x1b6   : > { %4174 = vmatprep.mubr.msk.f32.mxu1 %vm1637_vm1, %v4949_v14  ;;  %v588_v14 = vmul.f32 %v586_v37, %v583_v23  ;;  %v598_v50 = vmul.f32 %v596_v56, %v4956_v15  ;;  %v582_v15 = vsel %vm518_vm4, 0.0, %v571_v27  ;;  %v600_v58 = vmul.f32 %v596_v56, %v4969_v20  ;;  %v613_v27 = vpop.permute.xlu1 %612 }
 0x1b7   : > { %v587_v30 = vmul.f32 %v586_v37, %v582_v15  ;;  %v597_v43 = vmul.f32 %v596_v56, %v4972_v21  ;;  %v619_v21 = vsel %vm555_vm5, %v609_v63, 0.0  ;;  %v599_v57 = vmul.f32 %v596_v56, %v4959_v16 }
 0x1b8   : > { %v592_v25 = vadd.f32 %v588_v14, %v566_v48  ;;  %v575_v48 = vpop.permute.xlu0 %574  ;;  %v604_v42 = vadd.f32 %v600_v58, %v594_v59  ;;  %v624_v7 = vmul.f32 %v622_v24, %v619_v21 }
 0x1b9   : > { %v591_v20 = vadd.f32 %v587_v30, %v565_v4  ;;  %v584_v23 = vsel %vm518_vm4, 0.0, %v575_v48  ;;  %v1286_v4 = vrot.slane %v5304_v51, 7 }
 0x1ba   : > { %v602_v17 = vadd.f32 %v598_v50, %v592_v25  ;;  %v589_v14 = vmul.f32 %v586_v37, %v584_v23  ;;  %v5316_v25 = vsel %vm478_vm2, %v1283_v47, %v1284_v55  ;;  %v621_v37 = vsel %vm555_vm5, %v613_v27, 0.0  ;;  %v636_v59 = vpop.permute.xlu1 %635 }
 0x1bb   : > { %v601_v50 = vadd.f32 %v597_v43, %v591_v20  ;;  %1311 = vrot.lane.b32.xlu1 %v5316_v25, %s4613_s23  ;;  %v5327_v56 = vsel %vm478_vm2, %v1286_v4, %v1288_v6  ;;  %v626_v43 = vmul.f32 %v622_v24, %v621_v37  ;;  %v649_v20 = vstv %s3784_s0  ;;  %s5518_s0 = sld [smem:[#allocation9 + $0x1]] }
 0x1bc   : > { %v593_v22 = vadd.f32 %v589_v14, %v567_v28  ;;  %v607_v15 = vpop.permute.xlu0 %606  ;;  %7428 = vst [vmem:[#allocation24_spill] sm:$0xff] %v5327_v56  ;;  %v628_v30 = vadd.f32 %v624_v7, %v602_v17  ;;  %v646_v48 = vsel %vm518_vm4, 0.0, %v636_v59  ;;  %v5335_v23 = vsel %vm478_vm2, 0.0, %v1283_v47 }
 0x1bd   : > { %v618_v58 = vsel %vm555_vm5, %v607_v15, 0.0  ;;  %7429 = vst [vmem:[#allocation25_spill] sm:$0xff] %v5335_v23  ;;  %v661_v14 = vmul.f32 %v659_v60, %v5016_v29  ;;  %v630_v17 = vadd.f32 %v626_v43, %v604_v42  ;;  %1309 = vrot.lane.b32.xlu0 %v5335_v23, %s4613_s23  ;;  %v663_v37 = vmul.f32 %v659_v60, %v5025_v32 }
 0x1be   : > { %v603_v16 = vadd.f32 %v599_v57, %v593_v22  ;;  %v623_v28 = vmul.f32 %v622_v24, %v618_v58  ;;  %v651_v57 = vmul.f32 %v649_v20, %v646_v48  ;;  %v640_v27 = vpop.permute.xlu1 %639  ;;  %v5346_v29 = vsel %vm478_vm2, %v1284_v55, %v1286_v4 }
 0x1bf   : > { %1315 = vrot.lane.b32.xlu1 %v5327_v56, %s4613_s23  ;;  %v648_v47 = vsel %vm518_vm4, 0.0, %v640_v27  ;;  %7430 = vst [vmem:[#allocation26_spill] sm:$0xff] %v5346_v29  ;;  %v660_v59 = vmul.f32 %v659_v60, %v5028_v33  ;;  %v662_v33 = vmul.f32 %v659_v60, %v5035_v34  ;;  %v1298_v27 = vrot.slane %v5304_v51, 1 }
 0x1c0   : > { %v611_v63 = vpop.permute.xlu0 %610  ;;  %v655_v6 = vadd.f32 %v651_v57, %v628_v30  ;;  %v627_v7 = vadd.f32 %v623_v28, %v601_v50  ;;  %v653_v42 = vmul.f32 %v649_v20, %v648_v47  ;;  %v1300_v47 = vrot.slane %v5307_v19, 1 }
 0x1c1   : > { %v620_v21 = vsel %vm555_vm5, %v611_v63, 0.0  ;;  %1313 = vrot.lane.b32.xlu0 %v5346_v29, %s4613_s23 }
 0x1c2   : > { %v625_v22 = vmul.f32 %v622_v24, %v620_v21  ;;  %v5351_v50 = vadd.f32 %v661_v14, %v655_v6  ;;  %v657_v30 = vadd.f32 %v653_v42, %v630_v17  ;;  %v5353_v28 = vpop.permute.xlu1 %671 }
 0x1c3   : > { %1347 = vrot.lane.b32.xlu1 %v5316_v25, %s4614_s29 }
 0x1c4   : > { %v634_v15 = vpop.permute.xlu0 %633  ;;  %v629_v43 = vadd.f32 %v625_v22, %v603_v16  ;;  %v5361_v4 = vadd.f32 %v663_v37, %v657_v30  ;;  %v801_v30 = vstv %s3795_s16  ;;  %s5523_s16 = sld [smem:[#allocation11 + $0x1]] }
 0x1c5   : > { %v645_v58 = vsel %vm518_vm4, 0.0, %v634_v15  ;;  %1345 = vrot.lane.b32.xlu0 %v5335_v23, %s4614_s29 }
 0x1c6   : > { %v650_v24 = vmul.f32 %v649_v20, %v645_v58  ;;  %v5365_v16 = vpop.permute.xlu1 %675 }
 0x1c7   : > { %1351 = vrot.lane.b32.xlu1 %v5327_v56, %s4614_s29 }
 0x1c8   : > { %v654_v32 = vadd.f32 %v650_v24, %v627_v7  ;;  %v638_v63 = vpop.permute.xlu0 %637  ;;  %v1296_v7 = vrot.slane %v5284_v18, 1  ;;  %v1295_v24 = vrot.slane %v5281_v13, 1 }
 0x1c9   : > { %v647_v55 = vsel %vm518_vm4, 0.0, %v638_v63  ;;  %1349 = vrot.lane.b32.xlu0 %v5346_v29, %s4614_s29  ;;  %v5406_v63 = vsel %vm491_vm3, %v1298_v27, %v1300_v47 }
 0x1ca   : > { %v652_v48 = vmul.f32 %v649_v20, %v647_v55  ;;  %v5363_v21 = vadd.f32 %v660_v59, %v654_v32  ;;  %v778_v60 = vpop.permute.xlu1 %777  ;;  %v5392_v37 = vsel %vm491_vm3, %v1296_v7, %v1298_v27  ;;  %v805_v55 = vmul.f32 %v801_v30, %v5069_v44 }
 0x1cb   : > { %1373 = vrot.lane.b32.xlu1 %v5284_v18, %s4613_s23  ;;  %v788_v58 = vsel %vm518_vm4, 0.0, %v778_v60  ;;  %v802_v27 = vmul.f32 %v801_v30, %v5072_v45  ;;  %v827_v44 = vstv %s3796_s28  ;;  %s5528_s28 = sld [smem:[#allocation11 + $0x101]] }
 0x1cc   : > { %v656_v14 = vadd.f32 %v652_v48, %v629_v43  ;;  %v5369_v57 = vpop.permute.xlu0 %669  ;;  %v791_v43 = vstv %s3794_s22  ;;  %s5525_s22 = sld [smem:[#allocation11 + $0x81]] }
 0x1cd   : > { %1371 = vrot.lane.b32.xlu0 %v5281_v13, %s4613_s23  ;;  %v793_v32 = vmul.f32 %v791_v43, %v788_v58 }
 0x1ce   : > { %v5373_v34 = vadd.f32 %v662_v33, %v656_v14  ;;  %v782_v17 = vpop.permute.xlu1 %781 }
 0x1cf   : > { %1377 = vrot.lane.b32.xlu1 %v5307_v19, %s4613_s23  ;;  %v790_v42 = vsel %vm518_vm4, 0.0, %v782_v17 }
 0x1d0   : > { %v5377_v20 = vpop.permute.xlu0 %673  ;;  %v795_v33 = vmul.f32 %v791_v43, %v790_v42 }
 0x1d1   : > { %1375 = vrot.lane.b32.xlu0 %v5304_v51, %s4613_s23 }
 0x1d2   : > { %v814_v22 = vpop.permute.xlu1 %813 }
 0x1d3   : > { %1409 = vrot.lane.b32.xlu1 %v5284_v18, %s4614_s29  ;;  %v824_v48 = vsel %vm555_vm5, %v814_v22, 0.0 }
 0x1d4   : > { %v776_v6 = vpop.permute.xlu0 %775 }
 0x1d5   : > { %1407 = vrot.lane.b32.xlu0 %v5281_v13, %s4614_s29  ;;  %v787_v13 = vsel %vm518_vm4, 0.0, %v776_v6  ;;  %v829_v6 = vmul.f32 %v827_v44, %v824_v48 }
 0x1d6   : > { %v818_v59 = vpop.permute.xlu1 %817  ;;  %v792_v58 = vmul.f32 %v791_v43, %v787_v13 }
 0x1d7   : > { %1413 = vrot.lane.b32.xlu1 %v5307_v19, %s4614_s29  ;;  %v803_v19 = vmul.f32 %v801_v30, %v5060_v41  ;;  %v826_v17 = vsel %vm555_vm5, %v818_v59, 0.0  ;;  %v5415_v41 = vsel %vm491_vm3, %v1295_v24, %v1296_v7  ;;  %v809_v59 = vadd.f32 %v805_v55, %v795_v33 }
 0x1d8   : > { %v780_v15 = vpop.permute.xlu0 %779  ;;  %v831_v42 = vmul.f32 %v827_v44, %v826_v17  ;;  %v853_v33 = vstv %s5402_s24  ;;  %v806_v48 = vadd.f32 %v802_v27, %v792_v58  ;;  %s5530_s24 = sld [smem:[#allocation11 + $0x181]] }
 0x1d9   : > { %1411 = vrot.lane.b32.xlu0 %v5304_v51, %s4614_s29  ;;  %v807_v22 = vadd.f32 %v803_v19, %v793_v32  ;;  %v789_v51 = vsel %vm518_vm4, 0.0, %v780_v15  ;;  %v5435_v15 = vsel %vm491_vm3, %v1300_v47, 0.0  ;;  %v804_v32 = vmul.f32 %v801_v30, %v5079_v46 }
 0x1da   : > { %v840_v14 = vpop.permute.xlu1 %839  ;;  %v794_v55 = vmul.f32 %v791_v43, %v789_v51  ;;  %v835_v17 = vadd.f32 %v831_v42, %v809_v59  ;;  %v863_v30 = vstv %s5417_s17  ;;  %v682_v43 = vsel %vm555_vm5, %v5353_v28, 0.0  ;;  %s5862_s17 = sld [smem:[#allocation8 + $0x108]] }
 0x1db   : > { %1436 = vrot.lane.b32.xlu1 %v5392_v37, %s4613_s23  ;;  %v850_v7 = vsel %vm518_vm4, 0.0, %v840_v14  ;;  %v926_v59 = vstv %s5423_s13  ;;  %s5864_s13 = sld [smem:[#allocation9 + $0x2]] }
 0x1dc   : > { %v812_v18 = vpop.permute.xlu0 %811  ;;  %v855_v13 = vmul.f32 %v853_v33, %v850_v7  ;;  %v808_v27 = vadd.f32 %v804_v32, %v794_v55  ;;  %v867_v7 = vmul.f32 %v5053_v40, %v863_v30  ;;  %v684_v32 = vsel %vm555_vm5, %v5365_v16, 0.0 }
 0x1dd   : > { %v823_v24 = vsel %vm555_vm5, %v812_v18, 0.0  ;;  %1434 = vrot.lane.b32.xlu0 %v5415_v41, %s4613_s23  ;;  %v833_v18 = vadd.f32 %v829_v6, %v807_v22  ;;  %v865_v22 = vmul.f32 %v5041_v36, %v863_v30  ;;  %v5459_v36 = vstv %s5429_s3  ;;  %s3813_s3 = sld [smem:[#allocation8 + $0x101]] }
 0x1de   : > { %v844_v29 = vpop.permute.xlu1 %843  ;;  %v828_v14 = vmul.f32 %v827_v44, %v823_v24  ;;  %v687_v40 = vmul.f32 %v5459_v36, %v682_v43  ;;  %v681_v55 = vsel %vm555_vm5, %v5369_v57, 0.0  ;;  %v928_v57 = vmul.f32 %v926_v59, %v5108_v49 }
 0x1df   : > { %1438 = vrot.lane.b32.xlu1 %v5406_v63, %s4613_s23  ;;  %v852_v19 = vsel %vm518_vm4, 0.0, %v844_v29  ;;  %v930_v43 = vmul.f32 %v926_v59, %v5117_v52  ;;  %v916_v49 = vstv %s5451_s21  ;;  %s3814_s21 = sld [smem:[#allocation8 + $0x102]] }
 0x1e0   : > { %v816_v60 = vpop.permute.xlu0 %815  ;;  %v857_v23 = vmul.f32 %v853_v33, %v852_v19  ;;  %v832_v6 = vadd.f32 %v828_v14, %v806_v48 }
 0x1e1   : > { %v825_v29 = vsel %vm555_vm5, %v816_v60, 0.0  ;;  %1440 = vrot.lane.b32.xlu0 %v5435_v15, %s4613_s23  ;;  %v859_v60 = vadd.f32 %v855_v13, %v833_v18  ;;  %v864_v18 = vmul.f32 %v5038_v35, %v863_v30 }
 0x1e2   : > { %v876_v56 = vpop.permute.xlu1 %875  ;;  %v830_v58 = vmul.f32 %v827_v44, %v825_v29  ;;  %v861_v42 = vadd.f32 %v857_v23, %v835_v17 }
 0x1e3   : > { %1470 = vrot.lane.b32.xlu1 %v5415_v41, %s4614_s29  ;;  %v886_v44 = vsel %vm555_vm5, %v876_v56, 0.0  ;;  %v869_v56 = vadd.f32 %v865_v22, %v859_v60  ;;  %v686_v22 = vmul.f32 %v5459_v36, %v681_v55 }
 0x1e4   : > { %v838_v45 = vpop.permute.xlu0 %837  ;;  %v834_v48 = vadd.f32 %v830_v58, %v808_v27  ;;  %v871_v29 = vadd.f32 %v867_v7, %v861_v42  ;;  %v689_v27 = vmul.f32 %v5459_v36, %v684_v32 }
 0x1e5   : > { %v849_v47 = vsel %vm518_vm4, 0.0, %v838_v45  ;;  %1472 = vrot.lane.b32.xlu0 %v5392_v37, %s4614_s29  ;;  %v889_v45 = vstv %s5432_s12  ;;  %s3812_s12 = sld [smem:[#allocation8 + $0x100]] }
 0x1e6   : > { %v854_v51 = vmul.f32 %v853_v33, %v849_v47  ;;  %v880_v24 = vpop.permute.xlu1 %879  ;;  %v891_v17 = vmul.f32 %v889_v45, %v886_v44  ;;  %v693_v55 = vadd.f32 %v689_v27, %v5361_v4  ;;  %v5512_v4 = vstv %s5484_s27  ;;  %s5797_s27 = sld [smem:[#allocation8 + $0x105]] }
 0x1e7   : > { %1474 = vrot.lane.b32.xlu1 %v5406_v63, %s4614_s29  ;;  %v888_v19 = vsel %vm555_vm5, %v880_v24, 0.0  ;;  %v5482_v24 = vmul.f32 %v926_v59, %v5127_v54  ;;  %v866_v54 = vmul.f32 %v5050_v39, %v863_v30  ;;  %v683_v39 = vsel %vm555_vm5, %v5377_v20, 0.0 }
 0x1e8   : > { %v842_v46 = vpop.permute.xlu0 %841  ;;  %v858_v13 = vadd.f32 %v854_v51, %v832_v6  ;;  %v893_v47 = vmul.f32 %v889_v45, %v888_v19  ;;  %v895_v51 = vadd.f32 %v891_v17, %v869_v56  ;;  %v695_v19 = vstv %s5461_s19  ;;  %s3815_s19 = sld [smem:[#allocation8 + $0x103]] }
 0x1e9   : > { %v851_v28 = vsel %vm518_vm4, 0.0, %v842_v46  ;;  %v688_v20 = vmul.f32 %v5459_v36, %v683_v39 }
 0x1ea   : > { %v856_v14 = vmul.f32 %v853_v33, %v851_v28  ;;  %v903_v46 = vpop.permute.xlu1 %902  ;;  %v691_v33 = vadd.f32 %v687_v40, %v5351_v50  ;;  %v868_v52 = vadd.f32 %v864_v18, %v858_v13  ;;  %v897_v42 = vadd.f32 %v893_v47, %v871_v29 }
 0x1eb   : > { %1476 = vrot.lane.b32.xlu1 %v5435_v15, %s4614_s29  ;;  %v913_v35 = vsel %vm518_vm4, 0.0, %v903_v46  ;;  %v927_v50 = vmul.f32 %v926_v59, %v5120_v53  ;;  %v5505_v18 = vstv %s5476_s18  ;;  %v690_v59 = vadd.f32 %v686_v22, %v5363_v21  ;;  %s5782_s18 = sld [smem:[#allocation8 + $0x107]] }
 0x1ec   : > { %v874_v23 = vpop.permute.xlu0 %873  ;;  %v860_v60 = vadd.f32 %v856_v14, %v834_v48  ;;  %v918_v7 = vmul.f32 %v916_v49, %v913_v35  ;;  %v697_v32 = vadd.f32 %v695_v19, %v691_v33  ;;  %v5515_v46 = vstv %s5486_s14  ;;  %s5799_s14 = sld [smem:[#allocation8 + $0x181]] }
 0x1ed   : > { %v885_v16 = vsel %vm555_vm5, %v874_v23, 0.0  ;;  %v5498_v23 = vstv %s5463_s5  ;;  %v699_v33 = vadd.f32 %v695_v19, %v693_v55  ;;  %s3816_s5 = sld [smem:[#allocation8 + $0x104]] }
 0x1ee   : > { %v890_v6 = vmul.f32 %v889_v45, %v885_v16  ;;  %v907_v28 = vpop.permute.xlu1 %906  ;;  %v870_v56 = vadd.f32 %v866_v54, %v860_v60  ;;  %v922_v14 = vadd.f32 %v918_v7, %v895_v51  ;;  %v713_v35 = vmul.f32 %v5505_v18, %v697_v32 }
 0x1ef   : > { %v915_v40 = vsel %vm518_vm4, 0.0, %v907_v28  ;;  %v723_v21 = vmul.f32 %v5512_v4, %v697_v32  ;;  %v733_v27 = vmul.f32 %v5515_v46, %v697_v32  ;;  %v692_v7 = vadd.f32 %v688_v20, %v5373_v34 }
 0x1f0   : > { %v878_v58 = vpop.permute.xlu0 %877  ;;  %v920_v30 = vmul.f32 %v916_v49, %v915_v40  ;;  %v894_v48 = vadd.f32 %v890_v6, %v868_v52  ;;  %v696_v6 = vadd.f32 %v695_v19, %v690_v59  ;;  %v932_v54 = vadd.f32 %v928_v57, %v922_v14 }
 0x1f1   : > { %v887_v44 = vsel %vm555_vm5, %v878_v58, 0.0  ;;  %v952_v28 = vstv %s5507_s30  ;;  %v715_v55 = vmul.f32 %v5505_v18, %v699_v33  ;;  %v725_v57 = vmul.f32 %v5512_v4, %v699_v33  ;;  %s5805_s30 = sld [smem:[#allocation8 + $0x106]] }
 0x1f2   : > { %v892_v13 = vmul.f32 %v889_v45, %v887_v44  ;;  %v924_v17 = vadd.f32 %v920_v30, %v897_v42  ;;  %v939_v29 = vpop.permute.xlu1 %938  ;;  %v703_v45 = vmul.f32 %v5498_v23, %v697_v32  ;;  %v705_v32 = vmul.f32 %v5498_v23, %v699_v33 }
 0x1f3   : > { %v949_v36 = vsel %vm555_vm5, %v939_v29, 0.0  ;;  %v712_v14 = vmul.f32 %v5505_v18, %v696_v6  ;;  %v962_v29 = vstv %s5518_s0  ;;  %v968_v20 = vstv %s5523_s16  ;;  %s5812_s0 = sld [smem:[#allocation8 + $0x187]]  ;;  %s5834_s16 = sld [smem:[#allocation8 + $0x204]] }
 0x1f4   : > { %v901_v53 = vpop.permute.xlu0 %900  ;;  %v896_v22 = vadd.f32 %v892_v13, %v870_v56  ;;  %v934_v58 = vadd.f32 %v930_v43, %v924_v17  ;;  %v954_v39 = vmul.f32 %v952_v28, %v949_v36  ;;  %v735_v43 = vmul.f32 %v5515_v46, %v699_v33 }
 0x1f5   : > { %v912_v47 = vsel %vm518_vm4, 0.0, %v901_v53  ;;  %v698_v17 = vadd.f32 %v695_v19, %v692_v7 }
 0x1f6   : > { %v917_v16 = vmul.f32 %v916_v49, %v912_v47  ;;  %v943_v51 = vpop.permute.xlu1 %942  ;;  %v958_v13 = vadd.f32 %v954_v39, %v932_v54 }
 0x1f7   : > { %v951_v44 = vsel %vm555_vm5, %v943_v51, 0.0 }
 0x1f8   : > { %v921_v60 = vadd.f32 %v917_v16, %v894_v48  ;;  %v905_v52 = vpop.permute.xlu0 %904  ;;  %v956_v30 = vmul.f32 %v952_v28, %v951_v44  ;;  %v978_v16 = vstv %s5525_s22  ;;  %v964_v36 = vadd.f32 %v962_v29, %v958_v13  ;;  %s5836_s22 = sld [smem:[#allocation8 + $0x201]] }
 0x1f9   : > { %v914_v42 = vsel %vm518_vm4, 0.0, %v905_v52  ;;  %v988_v52 = vstv %s5528_s28  ;;  %s5838_s28 = sld [smem:[#allocation8 + $0x207]] }
 0x1fa   : > { %v919_v40 = vmul.f32 %v916_v49, %v914_v42  ;;  %v931_v34 = vadd.f32 %v927_v50, %v921_v60  ;;  %v702_v49 = vmul.f32 %v5498_v23, %v696_v6  ;;  %v960_v53 = vadd.f32 %v956_v30, %v934_v58 }
 0x1fb   : > { %v970_v60 = vmul.f32 %v968_v20, %v964_v36  ;;  %v980_v42 = vmul.f32 %v978_v16, %v964_v36  ;;  %v990_v54 = vmul.f32 %v988_v52, %v964_v36 }
 0x1fc   : > { %v923_v48 = vadd.f32 %v919_v40, %v896_v22  ;;  %v937_v56 = vpop.permute.xlu0 %936  ;;  %v966_v33 = vadd.f32 %v962_v29, %v960_v53  ;;  %v998_v22 = vstv %s5530_s24  ;;  %s5850_s24 = sld [smem:[#allocation8 + $0x180]] }
 0x1fd   : > { %v948_v59 = vsel %vm555_vm5, %v937_v56, 0.0  ;;  %v1000_v58 = vmul.f32 %v998_v22, %v964_v36  ;;  %v5550_v19 = vadd.f32 %v970_v60, %v703_v45  ;;  %v5552_v7 = vadd.f32 %v980_v42, %v713_v35 }
 0x1fe   : > { %v953_v47 = vmul.f32 %v952_v28, %v948_v59  ;;  %v933_v50 = vadd.f32 %v5482_v24, %v923_v48  ;;  %v972_v44 = vmul.f32 %v968_v20, %v966_v33  ;;  %v982_v40 = vmul.f32 %v978_v16, %v966_v33 }
 0x1ff   : > { %v992_v39 = vmul.f32 %v988_v52, %v966_v33  ;;  %v1002_v30 = vmul.f32 %v998_v22, %v966_v33  ;;  %7431 = vst [vmem:[#allocation27_spill] sm:$0xff] %v5550_v19  ;;  %7432 = vst [vmem:[#allocation28_spill] sm:$0xff] %v5552_v7  ;;  %v5554_v56 = vadd.f32 %v990_v54, %v723_v21  ;;  %v1068_v19 = vstv %s3813_s3  ;;  %s5871_s3 = sld [smem:[#allocation11 + $0x2]] }
 0x200   : > { %v957_v51 = vadd.f32 %v953_v47, %v931_v34  ;;  %v5556_v13 = vadd.f32 %v1000_v58, %v733_v27  ;;  %v5558_v53 = vadd.f32 %v972_v44, %v705_v32  ;;  %v5560_v34 = vadd.f32 %v982_v40, %v715_v55  ;;  %v941_v59 = vpop.permute.xlu0 %940 }
 0x201   : > { %7433 = vst [vmem:[#allocation29_spill] sm:$0xff] %v5554_v56  ;;  %v5562_v24 = vadd.f32 %v992_v39, %v725_v57  ;;  %v5564_v48 = vadd.f32 %v1002_v30, %v735_v43  ;;  %v722_v47 = vmul.f32 %v5512_v4, %v696_v6  ;;  %v732_v45 = vmul.f32 %v5515_v46, %v696_v6 }
 0x202   : > { %7434 = vst [vmem:[#allocation30_spill] sm:$0xff] %v5556_v13  ;;  %7435 = vst [vmem:[#allocation31_spill] sm:$0xff] %v5558_v53  ;;  %v963_v36 = vadd.f32 %v962_v29, %v957_v51  ;;  %v950_v35 = vsel %vm555_vm5, %v941_v59, 0.0  ;;  %v704_v55 = vmul.f32 %v5498_v23, %v698_v17  ;;  %v714_v6 = vmul.f32 %v5505_v18, %v698_v17 }
 0x203   : > { %7436 = vst [vmem:[#allocation32_spill] sm:$0xff] %v5560_v34  ;;  %7437 = vst [vmem:[#allocation33_spill] sm:$0xff] %v5562_v24  ;;  %v955_v21 = vmul.f32 %v952_v28, %v950_v35  ;;  %v724_v51 = vmul.f32 %v5512_v4, %v698_v17  ;;  %v734_v28 = vmul.f32 %v5515_v46, %v698_v17  ;;  %v1058_v7 = vstv %s3812_s12  ;;  %s5873_s12 = sld [smem:[#allocation11 + $0x82]] }
 0x204   : > { %7438 = vst [vmem:[#allocation34_spill] sm:$0xff] %v5564_v48  ;;  %v969_v33 = vmul.f32 %v968_v20, %v963_v36  ;;  %v979_v27 = vmul.f32 %v978_v16, %v963_v36  ;;  %v989_v60 = vmul.f32 %v988_v52, %v963_v36  ;;  %v999_v32 = vmul.f32 %v998_v22, %v963_v36  ;;  %v5593_v4 = vpop.permute.xlu0 %1042 }
 0x205   : > { %v959_v42 = vadd.f32 %v955_v21, %v933_v50 }
 0x206   : > { %v5570_v57 = vadd.f32 %v969_v33, %v702_v49  ;;  %v5572_v43 = vadd.f32 %v979_v27, %v712_v14  ;;  %v5574_v54 = vadd.f32 %v989_v60, %v722_v47  ;;  %v5576_v58 = vadd.f32 %v999_v32, %v732_v45  ;;  %v5589_v47 = vpop.permute.xlu1 %1044 }
 0x207   : > { %v965_v44 = vadd.f32 %v962_v29, %v959_v42  ;;  %v1055_v56 = vsel %vm518_vm4, 0.0, %v5589_v47  ;;  %v1054_v47 = vsel %vm518_vm4, 0.0, %v5593_v4 }
 0x208   : > { %7439 = vst [vmem:[#allocation35_spill] sm:$0xff] %v5570_v57  ;;  %7440 = vst [vmem:[#allocation36_spill] sm:$0xff] %v5572_v43  ;;  %v5597_v17 = vpop.permute.xlu0 %1046  ;;  %v1094_v57 = vstv %s3814_s21  ;;  %s5879_s21 = sld [smem:[#allocation11 + $0x102]] }
 0x209   : > { %7441 = vst [vmem:[#allocation37_spill] sm:$0xff] %v5574_v54  ;;  %7442 = vst [vmem:[#allocation38_spill] sm:$0xff] %v5576_v58  ;;  %v971_v40 = vmul.f32 %v968_v20, %v965_v44  ;;  %v981_v39 = vmul.f32 %v978_v16, %v965_v44  ;;  %v991_v30 = vmul.f32 %v988_v52, %v965_v44 }
 0x20a   : > { %v1001_v23 = vmul.f32 %v998_v22, %v965_v44  ;;  %v5591_v18 = vpop.permute.xlu1 %1048  ;;  %v1072_v54 = vmul.f32 %v1068_v19, %v5161_v0  ;;  %v1071_v0 = vmul.f32 %v1068_v19, %v5171_v2 }
 0x20b   : > { %v5581_v50 = vadd.f32 %v971_v40, %v704_v55  ;;  %v5583_v49 = vadd.f32 %v981_v39, %v714_v6  ;;  %v5585_v14 = vadd.f32 %v991_v30, %v724_v51 }
 0x20c   : > { %v5587_v59 = vadd.f32 %v1001_v23, %v734_v28  ;;  %v5601_v20 = vpop.permute.xlu0 %1078 }
 0x20d   : > { %7443 = vst [vmem:[#allocation39_spill] sm:$0xff] %v5581_v50  ;;  %7444 = vst [vmem:[#allocation40_spill] sm:$0xff] %v5583_v49 }
 0x20e   : > { %7445 = vst [vmem:[#allocation41_spill] sm:$0xff] %v5585_v14  ;;  %7446 = vst [vmem:[#allocation42_spill] sm:$0xff] %v5587_v59  ;;  %v5595_v46 = vpop.permute.xlu1 %1080 }
 0x20f   : > { %v1091_v58 = vsel %vm555_vm5, %v5595_v46, 0.0 }
 0x210   : > { %v5605_v52 = vpop.permute.xlu0 %1082  ;;  %v1096_v46 = vmul.f32 %v1094_v57, %v1091_v58  ;;  %v1120_v58 = vstv %s3815_s19  ;;  %s5881_s19 = sld [smem:[#allocation11 + $0x182]] }
 0x212   : > { %v5599_v29 = vpop.permute.xlu1 %1084 }
 0x214   : > { %v5611_v36 = vpop.permute.xlu0 %1104 }
 0x216   : > { %v5603_v16 = vpop.permute.xlu1 %1106 }
 0x217   : > { %v1117_v4 = vsel %vm518_vm4, 0.0, %v5603_v16 }
 0x218   : > { %v5645_v23 = vpop.permute.xlu0 %1108 }
 0x21a   : > { %v5607_v22 = vpop.permute.xlu1 %1110 }
 0x21b   : > { %v1119_v2 = vsel %vm518_vm4, 0.0, %v5607_v22  ;;  %v1118_v22 = vsel %vm518_vm4, 0.0, %v5645_v23 }
 0x21e   : > { %v5621_v27 = vpop.permute.xlu1 %1142 }
 0x222   : > { %v5643_v30 = vpop.permute.xlu1 %1146 }
 0x278   : > { %v5609_v45 = vpop.f32.mrb[0].mxu1 }
 0x279   : > { %v5613_v35 = vpop.f32.mrb[1].mxu1  ;;  %1865 = vrot.lane.b32.xlu1 %v5609_v45, %s4614_s29  ;;  %1829 = vrot.lane.b32.xlu0 %v5609_v45, %s4613_s23  ;;  %v1740_v21 = vrot.slane %v5609_v45, 7  ;;  %v1752_v33 = vrot.slane %v5609_v45, 1 }
 0x27a   : > { %7447 = vst [vmem:[#allocation43_spill] sm:$0xff] %v5613_v35  ;;  %v1739_v60 = vrot.slane %v5613_v35, 7  ;;  %v1751_v32 = vrot.slane %v5613_v35, 1 }
 0x27c   : > { %v5625_v55 = vpop.f32.mrb[2].mxu1  ;;  %v5628_v42 = vsel %vm478_vm2, %v1739_v60, %v1740_v21  ;;  %v5631_v6 = vsel %vm491_vm3, %v1751_v32, %v1752_v33  ;;  %v5648_v32 = vsel %vm478_vm2, 0.0, %v1739_v60  ;;  %v5672_v60 = vpop.permute.xlu0 %1140 }
 0x27d   : > { %7448 = vst [vmem:[#allocation44_spill] sm:$0xff] %v5625_v55  ;;  %7449 = vst [vmem:[#allocation45_spill] sm:$0xff] %v5631_v6  ;;  %v5633_v51 = vpop.f32.mrb[3].mxu1  ;;  %1827 = vrot.lane.b32.xlu1 %v5613_v35, %s4613_s23  ;;  %1863 = vrot.lane.b32.xlu0 %v5613_v35, %s4614_s29  ;;  %v1756_v28 = vrot.slane %v5625_v55, 1  ;;  %v1744_v40 = vrot.slane %v5625_v55, 7 }
 0x27e   : > { %7450 = vst [vmem:[#allocation46_spill] sm:$0xff] %v5633_v51  ;;  %v1742_v44 = vrot.slane %v5633_v51, 7  ;;  %v1754_v39 = vrot.slane %v5633_v51, 1 }
 0x27f   : > { %v5685_v14 = vsel %vm491_vm3, %v1756_v28, 0.0 }
 0x280   : > { %v5651_v24 = vsel %vm478_vm2, %v1740_v21, %v1742_v44  ;;  %v5654_v48 = vsel %vm478_vm2, %v1742_v44, %v1744_v40  ;;  %v5661_v34 = vsel %vm491_vm3, %v1752_v33, %v1754_v39  ;;  %v5664_v53 = vsel %vm491_vm3, %v1754_v39, %v1756_v28  ;;  %v5670_v21 = vpop.permute.xlu1 %1169  ;;  %v5680_v59 = vpop.permute.xlu0 %1144  ;;  %7455 = vst [vmem:[#allocation51_spill] sm:$0xff] %v5685_v14 }
 0x281   : > { %7451 = vst [vmem:[#allocation47_spill] sm:$0xff] %v5651_v24  ;;  %7452 = vst [vmem:[#allocation48_spill] sm:$0xff] %v5654_v48  ;;  %1767 = vrot.lane.b32.xlu1 %v5628_v42, %s4613_s23  ;;  %1765 = vrot.lane.b32.xlu0 %v5648_v32, %s4613_s23 }
 0x282   : > { %7453 = vst [vmem:[#allocation49_spill] sm:$0xff] %v5661_v34  ;;  %7454 = vst [vmem:[#allocation50_spill] sm:$0xff] %v5664_v53 }
 0x284   : > { %v5678_v39 = vpop.permute.xlu1 %1173 }
 0x285   : > { %1801 = vrot.lane.b32.xlu1 %v5648_v32, %s4614_s29  ;;  %1803 = vrot.lane.b32.xlu0 %v5628_v42, %s4614_s29 }
 0x288   : > { %v4140_v44 = vpop.f32.mrb[4].mxu1 }
 0x289   : > { %v2072_v40 = vpop.f32.mrb[5].mxu1  ;;  %1833 = vrot.lane.b32.xlu1 %v5625_v55, %s4613_s23  ;;  %1867 = vrot.lane.b32.xlu0 %v5633_v51, %s4614_s29 }
 0x28a   : > { %v4245_v33 = vpack.c.bf16 %v4140_v44, %v2072_v40  ;;  %v5695_v44 = vpop.permute.xlu1 %1205  ;;  %v5697_v40 = vpop.permute.xlu0 %1167 }
 0x28c   : > { %4246 = vmatprep.subr.bf16.mxu0 %v4245_v33 }
 0x28d   : > { %4248 = vmatpush3.bf16.msra.mxu0 %v4245_v33  ;;  %1890 = vrot.lane.b32.xlu1 %v5631_v6, %s4613_s23 }
 0x28e   : > { %1896 = vrot.lane.b32.xlu0 %v5685_v14, %s4613_s23  ;;  %4250 = vmatprep.subr.bf16.mxu0 %v4926_v3  ;;  %v5716_v28 = vpop.permute.xlu0 %1171 }
 0x290   : > { %4146 = vmatmul.mubr.msk.f32.vlgmr.msra.gmra.mrb[2].mxu0 %vm1637_vm1, %v5182_v8  ;;  %v3886_v8 = vld [vmem:[%s4904_s4 + $0x20] sm:$0xff] }
 0x291   : > { %4252 = vmatpush3.bf16.msra.mxu0 %v4926_v3  ;;  %1869 = vrot.lane.b32.xlu1 %v5625_v55, %s4614_s29  ;;  %v1060_v55 = vmul.f32 %v1058_v7, %v1055_v56 }
 0x292   : > { %1769 = vrot.lane.b32.xlu0 %v5651_v24, %s4613_s23  ;;  %4148 = vmatprep.mubr.msk.f32.mxu0 %vm1637_vm1, %v5190_v10  ;;  %v5714_v10 = vpop.permute.xlu1 %1209 }
 0x293   : > { %4254 = vmatprep.subr.bf16.mxu0 %v4928_v5 }
 0x294   : > { %4149 = vmatmul.mubr.msk.f32.gmra.mrb[4].mxu0 %vm1637_vm1, %v5202_v11  ;;  %v3887_v11 = vld [vmem:[%s4904_s4 + $0x28] sm:$0xff] }
 0x295   : > { %4256 = vmatpush3.bf16.msra.mxu0 %v4928_v5  ;;  %1926 = vrot.lane.b32.xlu1 %v5631_v6, %s4614_s29 }
 0x296   : > { %1805 = vrot.lane.b32.xlu0 %v5651_v24, %s4614_s29  ;;  %4258 = vmatprep.subr.bf16.mxu0 %v4935_v9  ;;  %v5728_v33 = vpop.permute.xlu1 %1311  ;;  %v1093_v24 = vsel %vm555_vm5, %v5599_v29, 0.0 }
 0x297   : > { %4167 = vmatprep.mubr.msk.f32.mxu0 %vm1551_vm0, %v3886_v8  ;;  %v5730_v8 = vpop.permute.xlu0 %1203  ;;  %v1098_v29 = vmul.f32 %v1094_v57, %v1093_v24 }
 0x299   : > { %4260 = vmatpush3.bf16.msra.mxu0 %v4935_v9  ;;  %1831 = vrot.lane.b32.xlu1 %v5633_v51, %s4613_s23 }
 0x29a   : > { %1807 = vrot.lane.b32.xlu0 %v5654_v48, %s4614_s29  ;;  %4262 = vmatprep.subr.bf16.mxu0 %v4939_v12  ;;  %v5743_v9 = vpop.permute.xlu1 %1315 }
 0x29b   : > { %v5745_v5 = vpop.permute.xlu0 %1207 }
 0x29d   : > { %4264 = vmatpush3.bf16.msra.mxu0 %v4939_v12  ;;  %1932 = vrot.lane.b32.xlu1 %v5685_v14, %s4614_s29  ;;  %v4388_v12 = vld [vmem:[%s7364_s2] sm:$0xff]  ;;  %v1070_v14 = vmul.f32 %v1068_v19, %v5152_v61  ;;  %v1069_v61 = vmul.f32 %v1068_v19, %v5164_v1  ;;  %v1090_v1 = vsel %vm555_vm5, %v5601_v20, 0.0 }
 0x29e   : > { %1892 = vrot.lane.b32.xlu0 %v5661_v34, %s4613_s23 }
 0x29f   : > { %v5751_v3 = vpop.permute.xlu0 %1309  ;;  %v1074_v56 = vadd.f32 %v1070_v14, %v1060_v55  ;;  %v1092_v14 = vsel %vm555_vm5, %v5605_v52, 0.0  ;;  %v1124_v55 = vmul.f32 %v1120_v58, %v1119_v2  ;;  %v1116_v52 = vsel %vm518_vm4, 0.0, %v5611_v36 }
 0x2a0   : > { %4168 = vmatmul.mubr.msk.f32.vlgmr.msra.gmra.mrb[6].mxu0 %vm1551_vm0, %v3887_v11  ;;  %v5749_v11 = vpop.permute.xlu1 %1347  ;;  %v1097_v16 = vmul.f32 %v1094_v57, %v1092_v14  ;;  %v1121_v23 = vmul.f32 %v1120_v58, %v1116_v52  ;;  %v1123_v14 = vmul.f32 %v1120_v58, %v1118_v22  ;;  %v1152_v22 = vsel %vm555_vm5, %v5672_v60, 0.0  ;;  %v7456_v60 = vld [vmem:[#allocation24_spill] sm:$0xff] }
 0x2a1   : > { %1771 = vrot.lane.b32.xlu1 %v5654_v48, %s4613_s23  ;;  %4203 = vmatprep.mubr.msk.f32.mxu0 %vm1637_vm1, %v4388_v12  ;;  %v1100_v19 = vadd.f32 %v1096_v46, %v1074_v56 }
 0x2a2   : > { %1894 = vrot.lane.b32.xlu0 %v5664_v53, %s4613_s23 }
 0x2a3   : > { %v5757_v12 = vpop.permute.xlu0 %1313 }
 0x2a4   : > { %v5755_v50 = vpop.permute.xlu1 %1351 }
 0x2a6   : > { %1928 = vrot.lane.b32.xlu0 %v5661_v34, %s4614_s29  ;;  %v1057_v34 = vsel %vm518_vm4, 0.0, %v5591_v18  ;;  %v1056_v18 = vsel %vm518_vm4, 0.0, %v5597_v17 }
 0x2a7   : > { %v5761_v13 = vpop.permute.xlu0 %1345  ;;  %v1062_v43 = vmul.f32 %v1058_v7, %v1057_v34  ;;  %v1059_v34 = vmul.f32 %v1058_v7, %v1054_v47  ;;  %v1061_v51 = vmul.f32 %v1058_v7, %v1056_v18  ;;  %v1122_v7 = vmul.f32 %v1120_v58, %v1117_v4  ;;  %v4390_v4 = vld [vmem:[%s4897_s25 + $0x58] sm:$0xff]  ;;  %v4391_v58 = vld [vmem:[%s4897_s25 + $0x40] sm:$0xff] }
 0x2a8   : > { %v5759_v49 = vpop.permute.xlu1 %1373  ;;  %v1130_v47 = vstv %s3816_s5  ;;  %s5884_s5 = sld [smem:[#allocation8 + $0x182]] }
 0x2a9   : > { %v1076_v35 = vadd.f32 %v1072_v54, %v1062_v43  ;;  %v1073_v43 = vadd.f32 %v1069_v61, %v1059_v34  ;;  %v1075_v24 = vadd.f32 %v1071_v0, %v1061_v51  ;;  %v1095_v54 = vmul.f32 %v1094_v57, %v1090_v1 }
 0x2aa   : > { %1930 = vrot.lane.b32.xlu0 %v5664_v53, %s4614_s29  ;;  %v1193_v61 = vstv %s5782_s18  ;;  %v1126_v57 = vadd.f32 %v1122_v7, %v1100_v19  ;;  %v1153_v0 = vsel %vm555_vm5, %v5621_v27, 0.0  ;;  %v1155_v1 = vsel %vm555_vm5, %v5643_v30, 0.0  ;;  %s5920_s18 = sld [smem:[#allocation8 + $0x183]] }
 0x2ab   : > { %v5769_v48 = vpop.permute.xlu0 %1349  ;;  %v1102_v20 = vadd.f32 %v1098_v29, %v1076_v35  ;;  %v4389_v35 = vld [vmem:[%s4897_s25 + $0x48] sm:$0xff]  ;;  %v1099_v36 = vadd.f32 %v1095_v54, %v1073_v43  ;;  %v1101_v46 = vadd.f32 %v1097_v16, %v1075_v24  ;;  %v1134_v29 = vmul.f32 %v4390_v4, %v1130_v47 }
 0x2ac   : > { %v5767_v53 = vpop.permute.xlu1 %1377  ;;  %v1132_v51 = vmul.f32 %v4389_v35, %v1130_v47  ;;  %v5821_v2 = vmul.f32 %v1193_v61, %v5246_v62  ;;  %v5824_v19 = vmul.f32 %v1193_v61, %v5261_v38  ;;  %v5827_v7 = vmul.f32 %v1193_v61, %v5270_v26 }
 0x2ad   : > { %v1128_v34 = vadd.f32 %v1124_v55, %v1102_v20  ;;  %v1156_v43 = vstv %s5797_s27  ;;  %v5831_v27 = vmul.f32 %v1193_v61, %v5291_v31  ;;  %v1335_v24 = vstv %s5799_s14  ;;  %v4392_v61 = vld [vmem:[%s4897_s25 + $0x50] sm:$0xff]  ;;  %s5936_s27 = sld [smem:[#allocation8 + $0x184]]  ;;  %s5938_s14 = sld [smem:[#allocation8 + $0x185]] }
 0x2ae   : > { %v1136_v30 = vadd.f32 %v1132_v51, %v1126_v57  ;;  %v1158_v54 = vmul.f32 %v1156_v43, %v1153_v0  ;;  %v1125_v62 = vadd.f32 %v1121_v23, %v1099_v36  ;;  %v1160_v38 = vmul.f32 %v1156_v43, %v1155_v1  ;;  %v7457_v23 = vld [vmem:[#allocation25_spill] sm:$0xff] }
 0x2af   : > { %v5789_v17 = vpop.permute.xlu0 %1371  ;;  %v1180_v26 = vsel %vm518_vm4, 0.0, %v5670_v21  ;;  %v1131_v16 = vmul.f32 %v4391_v58, %v1130_v47  ;;  %v1138_v55 = vadd.f32 %v1134_v29, %v1128_v34  ;;  %v1127_v52 = vadd.f32 %v1123_v14, %v1101_v46  ;;  %v7458_v34 = vld [vmem:[#allocation26_spill] sm:$0xff] }
 0x2b0   : > { %v5787_v6 = vpop.permute.xlu1 %1409  ;;  %v1133_v57 = vmul.f32 %v4392_v61, %v1130_v47  ;;  %v5853_v35 = vmul.f32 %v1335_v24, %v5316_v25  ;;  %v5856_v21 = vstv %s5805_s30  ;;  %v1182_v51 = vsel %vm518_vm4, 0.0, %v5678_v39  ;;  %s5968_s30 = sld [smem:[#allocation8 + $0x186]] }
 0x2b1   : > { %v1154_v36 = vsel %vm555_vm5, %v5680_v59, 0.0  ;;  %v5867_v46 = vmul.f32 %v1335_v24, %v7456_v60  ;;  %v1460_v47 = vstv %s5812_s0  ;;  %v1162_v0 = vadd.f32 %v1158_v54, %v1136_v30  ;;  %s5999_s0 = sld [smem:[#allocation8 + $0x188]] }
 0x2b2   : > { %v1185_v25 = vmul.f32 %v5856_v21, %v1180_v26  ;;  %v5876_v39 = vmul.f32 %v1335_v24, %v7457_v23  ;;  %v1338_v59 = vmul.f32 %v1335_v24, %v7458_v34  ;;  %v1135_v4 = vadd.f32 %v1131_v16, %v1125_v62 }
 0x2b3   : > { %v5809_v56 = vpop.permute.xlu0 %1375  ;;  %v1157_v29 = vmul.f32 %v1156_v43, %v1152_v22  ;;  %v1164_v1 = vadd.f32 %v1160_v38, %v1138_v55  ;;  %v1187_v14 = vmul.f32 %v5856_v21, %v1182_v51  ;;  %v1137_v30 = vadd.f32 %v1133_v57, %v1127_v52 }
 0x2b4   : > { %v5807_v18 = vpop.permute.xlu1 %1413  ;;  %v1159_v54 = vmul.f32 %v1156_v43, %v1154_v36  ;;  %v5887_v26 = vmul.f32 %v1460_v47, %v5392_v37  ;;  %v5890_v24 = vmul.f32 %v1460_v47, %v5406_v63  ;;  %v5893_v62 = vmul.f32 %v1460_v47, %v5415_v41 }
 0x2b5   : > { %v5896_v58 = vmul.f32 %v1460_v47, %v5435_v15  ;;  %v5903_v16 = vstv %s5834_s16  ;;  %v1189_v37 = vadd.f32 %v1185_v25, %v1162_v0  ;;  %v1179_v55 = vsel %vm518_vm4, 0.0, %v5697_v40  ;;  %s6011_s16 = sld [smem:[#allocation9 + $0x3]] }
 0x2b6   : > { %v1322_v63 = vsel %vm518_vm4, 0.0, %v5728_v33  ;;  %v5910_v41 = vstv %s5836_s22  ;;  %v5913_v15 = vstv %s5838_s28  ;;  %v1161_v52 = vadd.f32 %v1157_v29, %v1135_v4  ;;  %s6013_s22 = sld [smem:[#allocation11 + $0x3]] }
 0x2b7   : > { %v5845_v20 = vpop.permute.xlu0 %1407  ;;  %7459 = vst [vmem:[#allocation24_spill] sm:$0xff] %v5913_v15  ;;  %v1216_v22 = vsel %vm555_vm5, %v5695_v44, 0.0  ;;  %v1191_v61 = vadd.f32 %v1187_v14, %v1164_v1  ;;  %v1163_v57 = vadd.f32 %v1159_v54, %v1137_v30  ;;  %v1325_v51 = vstv %s5850_s24  ;;  %s6022_s28 = sld [smem:[#allocation11 + $0x83]] }
 0x2b8   : > { %v5843_v31 = vpop.permute.xlu1 %1436  ;;  %v1323_v40 = vsel %vm518_vm4, 0.0, %v5757_v12  ;;  %v5923_v33 = vstv %s5862_s17  ;;  %v5926_v36 = vstv %s5864_s13  ;;  %v1184_v60 = vmul.f32 %v5856_v21, %v1179_v55  ;;  %s6045_s24 = sld [smem:[#allocation11 + $0x103]]  ;;  %s6047_s17 = sld [smem:[#allocation8 + $0x200]] }
 0x2b9   : > { %v1327_v47 = vmul.f32 %v1325_v51, %v1322_v63  ;;  %v1199_v44 = vadd.f32 %v5821_v2, %v1189_v37  ;;  %v5931_v0 = vstv %s5871_s3  ;;  %v1221_v25 = vmul.f32 %v5923_v33, %v1216_v22  ;;  %s6076_s13 = sld [smem:[#allocation8 + $0x202]]  ;;  %s6084_s3 = sld [smem:[#allocation8 + $0x203]] }
 0x2ba   : > { %v1358_v23 = vsel %vm555_vm5, %v5749_v11, 0.0  ;;  %v5941_v12 = vstv %s5873_s12  ;;  %v5944_v34 = vstv %s5879_s21  ;;  %v5947_v4 = vstv %s5881_s19  ;;  %s6117_s12 = sld [smem:[#allocation8 + $0x205]]  ;;  %s6130_s21 = sld [smem:[#allocation8 + $0x206]] }
 0x2bb   : > { %v5900_v43 = vpop.permute.xlu0 %1411  ;;  %v1328_v29 = vmul.f32 %v1325_v51, %v1323_v40  ;;  %v1181_v14 = vsel %vm518_vm4, 0.0, %v5716_v28  ;;  %v1361_v30 = vstv %s5884_s5  ;;  %v1321_v11 = vsel %vm518_vm4, 0.0, %v5751_v3  ;;  %s6169_s19 = sld [smem:[#allocation8 + $0x208]]  ;;  %s6173_s5 = sld [smem:[#allocation9 + $0x4]] }
 0x2bc   : > { %v5898_v38 = vpop.permute.xlu1 %1438  ;;  %v1359_v54 = vsel %vm555_vm5, %v5769_v48, 0.0  ;;  %v1188_v37 = vadd.f32 %v1184_v60, %v1161_v52  ;;  %v1341_v55 = vadd.f32 %v5853_v35, %v1327_v47  ;;  %v1324_v63 = vsel %vm518_vm4, 0.0, %v5743_v9 }
 0x2bd   : > { %v1363_v22 = vmul.f32 %v1361_v30, %v1358_v23  ;;  %v1225_v40 = vadd.f32 %v1221_v25, %v1199_v44  ;;  %v1201_v15 = vadd.f32 %v5824_v19, %v1191_v61  ;;  %v1218_v28 = vsel %vm555_vm5, %v5714_v10, 0.0 }
 0x2be   : > { %v1384_v3 = vsel %vm518_vm4, 0.0, %v5759_v49  ;;  %v1186_v48 = vmul.f32 %v5856_v21, %v1181_v14  ;;  %v1326_v52 = vmul.f32 %v1325_v51, %v1321_v11  ;;  %v1342_v35 = vadd.f32 %v1338_v59, %v1328_v29 }
 0x2bf   : > { %v5951_v2 = vpop.permute.xlu0 %1434  ;;  %v1364_v60 = vmul.f32 %v1361_v30, %v1359_v54  ;;  %v1329_v9 = vmul.f32 %v1325_v51, %v1324_v63  ;;  %v1387_v47 = vstv %s5920_s18  ;;  %v1357_v19 = vsel %vm555_vm5, %v5761_v13, 0.0  ;;  %s6211_s18 = sld [smem:[#allocation11 + $0x4]] }
 0x2c0   : > { %v5949_v1 = vpop.permute.xlu1 %1470  ;;  %v1385_v10 = vsel %vm518_vm4, 0.0, %v5809_v56  ;;  %v5977_v61 = vadd.f32 %v5827_v7, %v1188_v37  ;;  %v1367_v49 = vadd.f32 %v1363_v22, %v1341_v55  ;;  %v1360_v21 = vsel %vm555_vm5, %v5755_v50, 0.0 }
 0x2c1   : > { %v1389_v44 = vmul.f32 %v1387_v47, %v1384_v3  ;;  %v1231_v51 = vadd.f32 %v5926_v36, %v1225_v40  ;;  %v1223_v13 = vmul.f32 %v5923_v33, %v1218_v28  ;;  %v1397_v23 = vstv %s5936_s27  ;;  %v4393_v40 = vld [vmem:[%s4897_s25 + $0x68] sm:$0xff]  ;;  %v4394_v3 = vld [vmem:[%s4897_s25 + $0x78] sm:$0xff]  ;;  %s6225_s27 = sld [smem:[#allocation11 + $0x84]] }
 0x2c2   : > { %v5989_v56 = vstv %s5938_s14  ;;  %v1340_v7 = vadd.f32 %v5876_v39, %v1326_v52  ;;  %v1362_v29 = vmul.f32 %v1361_v30, %v1357_v19  ;;  %v1368_v14 = vadd.f32 %v1364_v60, %v1342_v35  ;;  %v4395_v35 = vld [vmem:[%s4897_s25 + $0x70] sm:$0xff]  ;;  %s6227_s14 = sld [smem:[#allocation11 + $0x104]] }
 0x2c3   : > { %v5983_v59 = vpop.permute.xlu0 %1440  ;;  %v1390_v50 = vmul.f32 %v1387_v47, %v1385_v10  ;;  %v1190_v11 = vadd.f32 %v1186_v48, %v1163_v57  ;;  %v1343_v54 = vadd.f32 %v5867_v46, %v1329_v9  ;;  %v1365_v37 = vmul.f32 %v1361_v30, %v1360_v21 }
 0x2c4   : > { %v5981_v25 = vpop.permute.xlu1 %1474  ;;  %v1383_v55 = vsel %vm518_vm4, 0.0, %v5789_v17  ;;  %v1393_v63 = vadd.f32 %v1389_v44, %v1367_v49  ;;  %v1386_v22 = vsel %vm518_vm4, 0.0, %v5767_v53  ;;  %v1399_v28 = vmul.f32 %v4393_v40, %v1397_v23 }
 0x2c5   : > { %v1401_v39 = vmul.f32 %v4394_v3, %v1397_v23  ;;  %v6002_v52 = vmul.f32 %v5931_v0, %v1231_v51  ;;  %v1215_v46 = vsel %vm555_vm5, %v5730_v8, 0.0  ;;  %v1420_v17 = vsel %vm555_vm5, %v5787_v6, 0.0 }
 0x2c6   : > { %v6009_v57 = vstv %s5968_s30  ;;  %v1366_v53 = vadd.f32 %v1362_v29, %v1340_v7  ;;  %v1388_v30 = vmul.f32 %v1387_v47, %v1383_v55  ;;  %v1394_v48 = vadd.f32 %v1390_v50, %v1368_v14  ;;  %v4396_v50 = vld [vmem:[%s4897_s25 + $0x60] sm:$0xff]  ;;  %s6055_s25 = sld [smem:[#allocation11 + $0x183]]  ;;  %s6236_s30 = sld [smem:[#allocation11 + $0x184]] }
 0x2c7   : > { %v1400_v60 = vmul.f32 %v4395_v35, %v1397_v23  ;;  %v6018_v19 = vpop.permute.xlu0 %1472  ;;  %v1227_v8 = vadd.f32 %v1223_v13, %v1201_v15  ;;  %v1369_v10 = vadd.f32 %v1365_v37, %v1343_v54  ;;  %v1391_v49 = vmul.f32 %v1387_v47, %v1386_v22 }
 0x2c8   : > { %v6016_v9 = vpop.permute.xlu1 %1476  ;;  %v1421_v6 = vsel %vm555_vm5, %v5900_v43, 0.0  ;;  %v6025_v21 = vmul.f32 %v5941_v12, %v1231_v51  ;;  %v6028_v44 = vmul.f32 %v5944_v34, %v1231_v51  ;;  %v1403_v7 = vadd.f32 %v1399_v28, %v1393_v63 }
 0x2c9   : > { %v1425_v29 = vmul.f32 %v5989_v56, %v1420_v17  ;;  %v6032_v14 = vmul.f32 %v5947_v4, %v1231_v51  ;;  %v1220_v15 = vmul.f32 %v5923_v33, %v1215_v46  ;;  %v1200_v47 = vadd.f32 %v5831_v27, %v1190_v11 }
 0x2ca   : > { %v1447_v43 = vsel %vm518_vm4, 0.0, %v5843_v31  ;;  %v1392_v13 = vadd.f32 %v1388_v30, %v1366_v53  ;;  %v1398_v54 = vmul.f32 %v4396_v50, %v1397_v23  ;;  %v1404_v37 = vadd.f32 %v1400_v60, %v1394_v48 }
 0x2cb   : > { %v1426_v55 = vmul.f32 %v5989_v56, %v1421_v6  ;;  %v1233_v63 = vadd.f32 %v5926_v36, %v1227_v8  ;;  %v1395_v51 = vadd.f32 %v1391_v49, %v1369_v10  ;;  %v1419_v22 = vsel %vm555_vm5, %v5845_v20, 0.0 }
 0x2cc   : > { %v1448_v27 = vsel %vm518_vm4, 0.0, %v5898_v38  ;;  %v1429_v31 = vadd.f32 %v1425_v29, %v1403_v7  ;;  %v1422_v23 = vsel %vm555_vm5, %v5807_v18, 0.0  ;;  %v1452_v11 = vmul.f32 %v6009_v57, %v1447_v43 }
 0x2cd   : > { %v6053_v40 = vstv %s5999_s0  ;;  %v1224_v38 = vadd.f32 %v1220_v15, %v5977_v61  ;;  %v1217_v3 = vsel %vm555_vm5, %v5745_v5, 0.0  ;;  %v6063_v46 = vstv %s6011_s16  ;;  %s3884_s0 = sld [smem:[#allocation11 + $0x105]] }
 0x2ce   : > { %v6066_v17 = vstv %s6013_s22  ;;  %v1402_v18 = vadd.f32 %v1398_v54, %v1392_v13  ;;  %v1424_v53 = vmul.f32 %v5989_v56, %v1419_v22  ;;  %v1453_v30 = vmul.f32 %v6009_v57, %v1448_v27  ;;  %s3885_s16 = sld [smem:[#allocation11 + $0x185]]  ;;  %s3894_s22 = sld [smem:[#allocation8 + $0x300]] }
 0x2cf   : > { %v1430_v48 = vadd.f32 %v1426_v55, %v1404_v37  ;;  %v1405_v35 = vadd.f32 %v1401_v39, %v1395_v51  ;;  %v1427_v60 = vmul.f32 %v5989_v56, %v1422_v23  ;;  %v1446_v8 = vsel %vm518_vm4, 0.0, %v5951_v2 }
 0x2d0   : > { %v6074_v61 = vstv %s6022_s28  ;;  %v6079_v5 = vmul.f32 %v5931_v0, %v1233_v63  ;;  %v1222_v10 = vmul.f32 %v5923_v33, %v1217_v3  ;;  %v1456_v49 = vadd.f32 %v1452_v11, %v1429_v31  ;;  %s3895_s28 = sld [smem:[#allocation8 + $0x301]] }
 0x2d1   : > { %v1449_v39 = vsel %vm518_vm4, 0.0, %v5983_v59  ;;  %v6087_v6 = vmul.f32 %v5941_v12, %v1233_v63  ;;  %v6090_v7 = vmul.f32 %v5944_v34, %v1233_v63  ;;  %v6093_v29 = vmul.f32 %v5947_v4, %v1233_v63 }
 0x2d2   : > { %7460 = vst [vmem:[#allocation25_spill] sm:$0xff] %v6079_v5  ;;  %v6096_v33 = vadd.f32 %v5926_v36, %v1224_v38  ;;  %v1428_v15 = vadd.f32 %v1424_v53, %v1402_v18  ;;  %v1457_v43 = vadd.f32 %v1453_v30, %v1430_v48  ;;  %v1482_v59 = vsel %vm555_vm5, %v5949_v1, 0.0 }
 0x2d3   : > { %7461 = vst [vmem:[#allocation26_spill] sm:$0xff] %v6087_v6  ;;  %7462 = vst [vmem:[#allocation52_spill] sm:$0xff] %v6090_v7  ;;  %v1451_v13 = vmul.f32 %v6009_v57, %v1446_v8  ;;  %v1431_v50 = vadd.f32 %v1427_v60, %v1405_v35  ;;  %v6102_v54 = vstv %s6045_s24  ;;  %v1454_v37 = vmul.f32 %v6009_v57, %v1449_v39  ;;  %v7474_v7 = vld [vmem:[#allocation38_spill] sm:$0xff]  ;;  %s3896_s24 = sld [smem:[#allocation8 + $0x302]] }
 0x2d4   : > { %7463 = vst [vmem:[#allocation53_spill] sm:$0xff] %v6093_v29  ;;  %v6106_v55 = vstv %s6047_s17  ;;  %v1226_v51 = vadd.f32 %v1222_v10, %v1200_v47  ;;  %v6109_v63 = vstv %s6055_s25  ;;  %v1484_v22 = vsel %vm555_vm5, %v5981_v25, 0.0  ;;  %s3873_s25 = sld [smem:[#allocation8 + $0x281]]  ;;  %s3897_s17 = sld [smem:[#allocation8 + $0x303]] }
 0x2d5   : > { %v1466_v27 = vadd.f32 %v5887_v26, %v1456_v49  ;;  %v1487_v23 = vmul.f32 %v6053_v40, %v1482_v59  ;;  %v1483_v11 = vsel %vm555_vm5, %v6018_v19, 0.0  ;;  %v1455_v38 = vadd.f32 %v1451_v13, %v1428_v15 }
 0x2d6   : > { %v1467_v25 = vadd.f32 %v5890_v24, %v1457_v43  ;;  %v1489_v18 = vmul.f32 %v6053_v40, %v1484_v22  ;;  %v1458_v53 = vadd.f32 %v1454_v37, %v1431_v50  ;;  %v1485_v19 = vsel %vm555_vm5, %v6016_v9, 0.0 }
 0x2d7   : > { %v6128_v30 = vstv %s6076_s13  ;;  %v1793_v48 = vmul.f32 %v5910_v41, %v5628_v42  ;;  %v1792_v24 = vmul.f32 %v5910_v41, %v5648_v32  ;;  %v1488_v35 = vmul.f32 %v6053_v40, %v1483_v11  ;;  %s3872_s13 = sld [smem:[#allocation8 + $0x280]] }
 0x2d8   : > { %v6138_v60 = vstv %s6084_s3  ;;  %v1465_v13 = vadd.f32 %v5893_v62, %v1455_v38  ;;  %v1493_v50 = vadd.f32 %v1489_v18, %v1467_v25  ;;  %v1468_v37 = vadd.f32 %v5896_v58, %v1458_v53  ;;  %v7464_v38 = vld [vmem:[#allocation43_spill] sm:$0xff]  ;;  %s3875_s3 = sld [smem:[#allocation8 + $0x283]] }
 0x2d9   : > { %v6157_v62 = vstv %s6117_s12  ;;  %v1854_v25 = vmul.f32 %v5903_v16, %v7464_v38  ;;  %v1236_v53 = vmul.f32 %v5931_v0, %v6096_v33  ;;  %v6282_v29 = vstv %s6227_s14  ;;  %s3876_s12 = sld [smem:[#allocation8 + $0x284]]  ;;  %s3882_s14 = sld [smem:[#allocation11 + $0x5]] }
 0x2da   : > { %v6287_v6 = vstv %s6236_s30  ;;  %s3883_s30 = sld [smem:[#allocation11 + $0x85]] }
 0x2eb   : > { %v6057_v28 = vpop.permute.xlu1 %1865  ;;  %v1830_v20 = vpop.permute.xlu0 %1829 }
 0x2ec   : > { %v1840_v49 = vsel %vm518_vm4, 0.0, %v1830_v20  ;;  %v1490_v20 = vmul.f32 %v6053_v40, %v1485_v19  ;;  %v1855_v40 = vmul.f32 %v5609_v45, %v5903_v16  ;;  %v1491_v19 = vadd.f32 %v1487_v23, %v1465_v13 }
 0x2ed   : > { %v1256_v23 = vmul.f32 %v5944_v34, %v6096_v33 }
 0x2ef   : > { %v1828_v56 = vpop.permute.xlu1 %1827  ;;  %v1864_v2 = vpop.permute.xlu0 %1863 }
 0x2f0   : > { %v1839_v9 = vsel %vm518_vm4, 0.0, %v1828_v56  ;;  %v1845_v56 = vmul.f32 %v6138_v60, %v1840_v49  ;;  %v1875_v58 = vsel %vm555_vm5, %v1864_v2, 0.0 }
 0x2f1   : > { %v1844_v22 = vmul.f32 %v6138_v60, %v1839_v9  ;;  %v1880_v2 = vmul.f32 %v6157_v62, %v1875_v58  ;;  %v1266_v9 = vmul.f32 %v5947_v4, %v6096_v33 }
 0x2f3   : > { %v1768_v31 = vpop.permute.xlu1 %1767  ;;  %v1766_v1 = vpop.permute.xlu0 %1765 }
 0x2f4   : > { %v1778_v57 = vsel %vm518_vm4, 0.0, %v1768_v31  ;;  %v1777_v47 = vsel %vm518_vm4, 0.0, %v1766_v1 }
 0x2f5   : > { %v1783_v3 = vmul.f32 %v6106_v55, %v1778_v57  ;;  %v1782_v26 = vmul.f32 %v6106_v55, %v1777_v47  ;;  %v1232_v47 = vadd.f32 %v5926_v36, %v1226_v51  ;;  %v1499_v36 = vadd.f32 %v6063_v46, %v1493_v50  ;;  %v7465_v50 = vld [vmem:[#allocation45_spill] sm:$0xff] }
 0x2f7   : > { %v1802_v8 = vpop.permute.xlu1 %1801  ;;  %v1804_v10 = vpop.permute.xlu0 %1803  ;;  %v1797_v43 = vadd.f32 %v1793_v48, %v1783_v3  ;;  %v1796_v42 = vadd.f32 %v1792_v24, %v1782_v26  ;;  %v1492_v3 = vadd.f32 %v1488_v35, %v1466_v27  ;;  %v1494_v48 = vadd.f32 %v1490_v20, %v1468_v37 }
 0x2f8   : > { %v1813_v39 = vsel %vm555_vm5, %v1802_v8, 0.0  ;;  %v1814_v15 = vsel %vm555_vm5, %v1804_v10, 0.0  ;;  %v6167_v24 = vstv %s6130_s21  ;;  %v1246_v35 = vmul.f32 %v5941_v12, %v6096_v33  ;;  %v7466_v33 = vld [vmem:[#allocation24_spill] sm:$0xff]  ;;  %s3877_s21 = sld [smem:[#allocation8 + $0x285]] }
 0x2f9   : > { %v1818_v59 = vmul.f32 %v6128_v30, %v1813_v39  ;;  %v1819_v32 = vmul.f32 %v6128_v30, %v1814_v15  ;;  %v1498_v8 = vadd.f32 %v6063_v46, %v1492_v3  ;;  %v6188_v39 = vmul.f32 %v5931_v0, %v1232_v47 }
 0x2fa   : > { %v6201_v13 = vadd.f32 %v6063_v46, %v1494_v48  ;;  %v1917_v37 = vmul.f32 %v7466_v33, %v7465_v50  ;;  %v1497_v0 = vadd.f32 %v6063_v46, %v1491_v19  ;;  %v6207_v20 = vmul.f32 %v6066_v17, %v1499_v36  ;;  %v7470_v48 = vld [vmem:[#allocation47_spill] sm:$0xff] }
 0x2fb   : > { %v1822_v31 = vadd.f32 %v1818_v59, %v1796_v42  ;;  %v1823_v1 = vadd.f32 %v1819_v32, %v1797_v43  ;;  %v6151_v11 = vpop.permute.xlu1 %1833  ;;  %v6153_v57 = vpop.permute.xlu0 %1867  ;;  %v6192_v42 = vmul.f32 %v5941_v12, %v1232_v47  ;;  %v6195_v59 = vmul.f32 %v5944_v34, %v1232_v47 }
 0x2fc   : > { %v6198_v32 = vmul.f32 %v5947_v4, %v1232_v47  ;;  %v6214_v34 = vmul.f32 %v6074_v61, %v1499_v36  ;;  %v6217_v4 = vmul.f32 %v6102_v54, %v1499_v36  ;;  %v6223_v46 = vmul.f32 %v6066_v17, %v1498_v8 }
 0x2fd   : > { %v1848_v26 = vadd.f32 %v1844_v22, %v1822_v31  ;;  %v1849_v18 = vadd.f32 %v1845_v56, %v1823_v1  ;;  %v6220_v22 = vmul.f32 %v6109_v63, %v1499_v36  ;;  %v6230_v1 = vmul.f32 %v6074_v61, %v1498_v8 }
 0x2fe   : > { %v6233_v47 = vmul.f32 %v6102_v54, %v1498_v8  ;;  %v6244_v38 = vmul.f32 %v6074_v61, %v6201_v13  ;;  %v1794_v36 = vmul.f32 %v5910_v41, %v7470_v48  ;;  %v1503_v50 = vmul.f32 %v6066_v17, %v1497_v0  ;;  %v7473_v48 = vld [vmem:[#allocation37_spill] sm:$0xff] }
 0x2ff   : > { %v1891_v51 = vpop.permute.xlu1 %1890  ;;  %v1858_v45 = vadd.f32 %v1854_v25, %v1848_v26  ;;  %v6175_v27 = vadd.f32 %v1855_v40, %v1849_v18  ;;  %v6240_v40 = vmul.f32 %v6066_v17, %v6201_v13  ;;  %v6247_v25 = vmul.f32 %v6109_v63, %v1498_v8  ;;  %v7469_v18 = vld [vmem:[#allocation46_spill] sm:$0xff] }
 0x300   : > { %v1902_v10 = vsel %vm518_vm4, 0.0, %v1891_v51  ;;  %v6183_v49 = vpop.permute.xlu0 %1896  ;;  %7468 = vst [vmem:[#allocation45_spill] sm:$0xff] %v6244_v38  ;;  %v6250_v26 = vstv %s6169_s19  ;;  %v1856_v19 = vmul.f32 %v5903_v16, %v7469_v18  ;;  %v6258_v51 = vstv %s6173_s5  ;;  %s3878_s19 = sld [smem:[#allocation8 + $0x286]]  ;;  %s3879_s5 = sld [smem:[#allocation8 + $0x287]] }
 0x301   : > { %v1884_v15 = vadd.f32 %v1880_v2, %v1858_v45  ;;  %v1907_v43 = vmul.f32 %v6167_v24, %v1902_v10  ;;  %7467 = vst [vmem:[#allocation43_spill] sm:$0xff] %v6240_v40  ;;  %v1260_v38 = vadd.f32 %v1256_v23, %v7473_v48  ;;  %v1523_v40 = vmul.f32 %v6102_v54, %v1497_v0 }
 0x302   : > { %v1533_v17 = vmul.f32 %v6109_v63, %v1497_v0 }
 0x303   : > { %v1911_v56 = vadd.f32 %v1907_v43, %v1884_v15  ;;  %v6209_v12 = vpop.permute.xlu1 %1869  ;;  %v7471_v43 = vld [vmem:[#allocation35_spill] sm:$0xff] }
 0x304   : > { %v1770_v31 = vpop.permute.xlu0 %1769  ;;  %v1240_v8 = vadd.f32 %v1236_v53, %v7471_v43  ;;  %v1270_v53 = vadd.f32 %v1266_v9, %v7474_v7 }
 0x305   : > { %v1779_v3 = vsel %vm518_vm4, 0.0, %v1770_v31  ;;  %v1921_v58 = vadd.f32 %v1917_v37, %v1911_v56  ;;  %v7472_v37 = vld [vmem:[#allocation36_spill] sm:$0xff] }
 0x306   : > { %v1784_v2 = vmul.f32 %v6106_v55, %v1779_v3  ;;  %v1250_v56 = vadd.f32 %v1246_v35, %v7472_v37  ;;  %v1513_v3 = vmul.f32 %v6074_v61, %v1497_v0  ;;  %v1876_v35 = vsel %vm555_vm5, %v6057_v28, 0.0 }
 0x307   : > { %v1927_v45 = vpop.permute.xlu1 %1926  ;;  %v6275_v37 = vstv %s6211_s18  ;;  %v1507_v48 = vadd.f32 %v1503_v50, %v1240_v8  ;;  %v1881_v28 = vmul.f32 %v6157_v62, %v1876_v35  ;;  %s3880_s18 = sld [smem:[#allocation8 + $0x288]] }
 0x308   : > { %v1938_v10 = vsel %vm555_vm5, %v1927_v45, 0.0  ;;  %v1806_v15 = vpop.permute.xlu0 %1805 }
 0x309   : > { %v1943_v31 = vmul.f32 %v6250_v26, %v1938_v10  ;;  %v1815_v18 = vsel %vm555_vm5, %v1806_v15, 0.0  ;;  %v1798_v10 = vadd.f32 %v1794_v36, %v1784_v2  ;;  %v1527_v36 = vadd.f32 %v1523_v40, %v1260_v38 }
 0x30a   : > { %v1820_v45 = vmul.f32 %v6128_v30, %v1815_v18  ;;  %v6279_v18 = vstv %s6225_s27  ;;  %v1537_v2 = vadd.f32 %v1533_v17, %v1270_v53  ;;  %v1877_v40 = vsel %vm555_vm5, %v6153_v57, 0.0  ;;  %v7475_v57 = vld [vmem:[#allocation44_spill] sm:$0xff]  ;;  %s3881_s27 = sld [smem:[#allocation9 + $0x5]] }
 0x30b   : > { %v1947_v43 = vadd.f32 %v1943_v31, %v1921_v58  ;;  %v1832_v15 = vpop.permute.xlu1 %1831  ;;  %v1517_v58 = vadd.f32 %v1513_v3, %v1250_v56  ;;  %v1885_v53 = vadd.f32 %v1881_v28, %v6175_v27  ;;  %v7477_v27 = vld [vmem:[#allocation48_spill] sm:$0xff] }
 0x30c   : > { %v1841_v61 = vsel %vm518_vm4, 0.0, %v1832_v15  ;;  %v1808_v23 = vpop.permute.xlu0 %1807  ;;  %v1824_v9 = vadd.f32 %v1820_v45, %v1798_v10  ;;  %v6297_v45 = vmul.f32 %v6102_v54, %v6201_v13  ;;  %v6301_v10 = vmul.f32 %v6109_v63, %v6201_v13 }
 0x30d   : > { %v1953_v7 = vadd.f32 %v6258_v51, %v1947_v43  ;;  %v1846_v0 = vmul.f32 %v6138_v60, %v1841_v61  ;;  %v1857_v13 = vmul.f32 %v7475_v57, %v5903_v16  ;;  %v7479_v16 = vld [vmem:[#allocation50_spill] sm:$0xff] }
 0x30f   : > { %v1850_v31 = vadd.f32 %v1846_v0, %v1824_v9  ;;  %v6290_v15 = vpop.permute.xlu1 %1932  ;;  %v1959_v8 = vmul.f32 %v6275_v37, %v1953_v7  ;;  %v1969_v50 = vmul.f32 %v6279_v18, %v1953_v7  ;;  %v1979_v5 = vmul.f32 %v6282_v29, %v1953_v7  ;;  %v7476_v9 = vld [vmem:[#allocation51_spill] sm:$0xff] }
 0x310   : > { %v1893_v38 = vpop.permute.xlu0 %1892  ;;  %v1989_v56 = vmul.f32 %v6287_v6, %v1953_v7  ;;  %v1795_v7 = vmul.f32 %v5910_v41, %v7477_v27  ;;  %v7480_v41 = vld [vmem:[#allocation28_spill] sm:$0xff]  ;;  %v7482_v27 = vld [vmem:[#allocation29_spill] sm:$0xff] }
 0x311   : > { %v1860_v3 = vadd.f32 %v1856_v19, %v1850_v31  ;;  %v1903_v17 = vsel %vm518_vm4, 0.0, %v1893_v38  ;;  %v6308_v35 = vadd.f32 %v1959_v8, %v1507_v48  ;;  %v6311_v43 = vadd.f32 %v1969_v50, %v1517_v58  ;;  %v7478_v48 = vld [vmem:[#allocation49_spill] sm:$0xff] }
 0x312   : > { %v1908_v54 = vmul.f32 %v6167_v24, %v1903_v17  ;;  %v6313_v61 = vadd.f32 %v1979_v5, %v1527_v36  ;;  %v6315_v63 = vadd.f32 %v1989_v56, %v1537_v2  ;;  %v6321_v19 = vmul.f32 %v7466_v33, %v7476_v9  ;;  %v7481_v9 = vld [vmem:[#allocation27_spill] sm:$0xff] }
 0x313   : > { %v1918_v0 = vmul.f32 %v7466_v33, %v7478_v48  ;;  %v1772_v28 = vpop.permute.xlu1 %1771  ;;  %v1882_v58 = vmul.f32 %v6157_v62, %v1877_v40  ;;  %v1816_v5 = vsel %vm555_vm5, %v1808_v23, 0.0  ;;  %v1919_v8 = vmul.f32 %v7466_v33, %v7479_v16  ;;  %v7487_v16 = vld [vmem:[#allocation42_spill] sm:$0xff] }
 0x314   : > { %v1912_v36 = vadd.f32 %v1908_v54, %v1885_v53  ;;  %v1780_v2 = vsel %vm518_vm4, 0.0, %v1772_v28  ;;  %v1895_v31 = vpop.permute.xlu0 %1894  ;;  %v1251_v56 = vadd.f32 %v6025_v21, %v7480_v41  ;;  %v1842_v17 = vsel %vm518_vm4, 0.0, %v6151_v11 }
 0x315   : > { %v1785_v50 = vmul.f32 %v6106_v55, %v1780_v2  ;;  %v1904_v38 = vsel %vm518_vm4, 0.0, %v1895_v31  ;;  %v1886_v40 = vadd.f32 %v1882_v58, %v1860_v3  ;;  %v1821_v54 = vmul.f32 %v6128_v30, %v1816_v5  ;;  %v7483_v2 = vld [vmem:[#allocation30_spill] sm:$0xff]  ;;  %v7484_v31 = vld [vmem:[#allocation40_spill] sm:$0xff]  ;;  %v7485_v3 = vld [vmem:[#allocation39_spill] sm:$0xff] }
 0x316   : > { %v1909_v23 = vmul.f32 %v6167_v24, %v1904_v38  ;;  %v1922_v53 = vadd.f32 %v1918_v0, %v1912_v36  ;;  %v1241_v33 = vadd.f32 %v6002_v52, %v7481_v9  ;;  %v1261_v55 = vadd.f32 %v6028_v44, %v7482_v27  ;;  %v7486_v52 = vld [vmem:[#allocation41_spill] sm:$0xff] }
 0x317   : > { %v1799_v57 = vadd.f32 %v1795_v7, %v1785_v50  ;;  %v1271_v21 = vadd.f32 %v6032_v14, %v7483_v2  ;;  %v1252_v11 = vadd.f32 %v6192_v42, %v7484_v31  ;;  %v1242_v0 = vadd.f32 %v6188_v39, %v7485_v3 }
 0x318   : > { %v1913_v48 = vadd.f32 %v1909_v23, %v1886_v40  ;;  %v1929_v28 = vpop.permute.xlu0 %1928  ;;  %v1847_v30 = vmul.f32 %v6138_v60, %v1842_v17  ;;  %v1262_v5 = vadd.f32 %v6195_v59, %v7486_v52  ;;  %v1878_v44 = vsel %vm555_vm5, %v6209_v12, 0.0 }
 0x319   : > { %v1825_v7 = vadd.f32 %v1821_v54, %v1799_v57  ;;  %v1939_v58 = vsel %vm555_vm5, %v1929_v28, 0.0  ;;  %v1272_v42 = vadd.f32 %v6198_v32, %v7487_v16  ;;  %v1518_v39 = vadd.f32 %v6230_v1, %v1251_v56  ;;  %v7493_v28 = vld [vmem:[#allocation53_spill] sm:$0xff] }
 0x31a   : > { %v1944_v36 = vmul.f32 %v6250_v26, %v1939_v58  ;;  %v1923_v14 = vadd.f32 %v1919_v8, %v1913_v48  ;;  %v1508_v60 = vadd.f32 %v6223_v46, %v1241_v33  ;;  %v1528_v38 = vadd.f32 %v6233_v47, %v1261_v55  ;;  %v7491_v55 = vld [vmem:[#allocation26_spill] sm:$0xff]  ;;  %v7495_v58 = vld [vmem:[#allocation52_spill] sm:$0xff] }
 0x31b   : > { %v1851_v50 = vadd.f32 %v1847_v30, %v1825_v7  ;;  %v1905_v41 = vsel %vm518_vm4, 0.0, %v6183_v49  ;;  %v1538_v12 = vadd.f32 %v6247_v25, %v1271_v21  ;;  %v1519_v40 = vadd.f32 %v6214_v34, %v1252_v11  ;;  %v7492_v48 = vld [vmem:[#allocation34_spill] sm:$0xff]  ;;  %v7494_v7 = vld [vmem:[#allocation33_spill] sm:$0xff] }
 0x31c   : > { %v1948_v59 = vadd.f32 %v1944_v36, %v1922_v53  ;;  %v1931_v17 = vpop.permute.xlu0 %1930  ;;  %v1883_v8 = vmul.f32 %v6157_v62, %v1878_v44  ;;  %v1509_v1 = vadd.f32 %v6207_v20, %v1242_v0  ;;  %v1529_v56 = vadd.f32 %v6217_v4, %v1262_v5  ;;  %v7488_v62 = vld [vmem:[#allocation31_spill] sm:$0xff] }
 0x31d   : > { %v1861_v23 = vadd.f32 %v1857_v13, %v1851_v50  ;;  %v1940_v32 = vsel %vm555_vm5, %v1931_v17, 0.0  ;;  %v1539_v49 = vadd.f32 %v6220_v22, %v1272_v42  ;;  %v1910_v53 = vmul.f32 %v6167_v24, %v1905_v41  ;;  %v7489_v13 = vld [vmem:[#allocation25_spill] sm:$0xff]  ;;  %v7490_v22 = vld [vmem:[#allocation32_spill] sm:$0xff]  ;;  %v7496_v42 = vld [vmem:[#allocation43_spill] sm:$0xff] }
 0x31e   : > { %v1954_v46 = vadd.f32 %v6258_v51, %v1948_v59  ;;  %v1945_v47 = vmul.f32 %v6250_v26, %v1940_v32  ;;  %v1941_v34 = vsel %vm555_vm5, %v6290_v15, 0.0  ;;  %v1243_v54 = vadd.f32 %v7489_v13, %v7488_v62  ;;  %v7497_v41 = vld [vmem:[#allocation45_spill] sm:$0xff] }
 0x31f   : > { %v1887_v25 = vadd.f32 %v1883_v8, %v1861_v23  ;;  %v1253_v24 = vadd.f32 %v7491_v55, %v7490_v22  ;;  %v1273_v15 = vadd.f32 %v7493_v28, %v7492_v48  ;;  %v1946_v3 = vmul.f32 %v6250_v26, %v1941_v34  ;;  %v6493_v48 = vld [vmem:[%s7364_s2 + $0x8] sm:$0xff] }
 0x320   : > { %v1949_v57 = vadd.f32 %v1945_v47, %v1923_v14  ;;  %v1970_v20 = vmul.f32 %v6279_v18, %v1954_v46  ;;  %v1960_v9 = vmul.f32 %v6275_v37, %v1954_v46  ;;  %v1980_v33 = vmul.f32 %v6282_v29, %v1954_v46 }
 0x321   : > { %v1914_v27 = vadd.f32 %v1910_v53, %v1887_v25  ;;  %v1990_v4 = vmul.f32 %v6287_v6, %v1954_v46  ;;  %v1263_v52 = vadd.f32 %v7495_v58, %v7494_v7  ;;  %v1510_v50 = vadd.f32 %v7496_v42, %v1243_v54  ;;  %v7500_v7 = vld [vmem:[#allocation22_spill] sm:$0xff]  ;;  %v7501_v58 = vld [vmem:[#allocation23_spill] sm:$0xff] }
 0x322   : > { %v1955_v2 = vadd.f32 %v6258_v51, %v1949_v57  ;;  %v6387_v21 = vadd.f32 %v1970_v20, %v1518_v39  ;;  %v6389_v31 = vadd.f32 %v1960_v9, %v1508_v60  ;;  %v6391_v11 = vadd.f32 %v1980_v33, %v1528_v38 }
 0x323   : > { %v1924_v0 = vadd.f32 %v6321_v19, %v1914_v27  ;;  %v6395_v30 = vadd.f32 %v1990_v4, %v1538_v12  ;;  %v1520_v59 = vadd.f32 %v7497_v41, %v1253_v24  ;;  %v1540_v17 = vadd.f32 %v6301_v10, %v1273_v15  ;;  %v7498_v24 = vld [vmem:[#allocation20_spill] sm:$0xff]  ;;  %v6508_v15 = vld [vmem:[%s7364_s2 + $0x10] sm:$0xff] }
 0x324   : > { %v1971_v5 = vmul.f32 %v6279_v18, %v1955_v2  ;;  %v1961_v44 = vmul.f32 %v6275_v37, %v1955_v2  ;;  %v1981_v36 = vmul.f32 %v6282_v29, %v1955_v2  ;;  %v1991_v14 = vmul.f32 %v6287_v6, %v1955_v2  ;;  %v7499_v2 = vld [vmem:[#allocation21_spill] sm:$0xff] }
 0x325   : > { %v1950_v16 = vadd.f32 %v1946_v3, %v1924_v0  ;;  %v1530_v12 = vadd.f32 %v6297_v45, %v1263_v52  ;;  %v6516_v3 = vld [vmem:[%s7364_s2 + $0x18] sm:$0xff]  ;;  %v3908_v0 = vld [vmem:[%s4904_s4 + $0x30] sm:$0xff]  ;;  %v6553_v42 = vstv %s3872_s13  ;;  %s3899_s13 = sld [smem:[#allocation8 + $0x305]] }
 0x326   : > { %v6404_v39 = vadd.f32 %v1971_v5, %v1519_v40  ;;  %v6406_v26 = vadd.f32 %v1961_v44, %v1509_v1  ;;  %v6408_v19 = vadd.f32 %v1981_v36, %v1529_v56  ;;  %v6410_v60 = vadd.f32 %v1991_v14, %v1539_v49  ;;  %v3909_v52 = vld [vmem:[%s4904_s4 + $0x38] sm:$0xff]  ;;  %s3874_s4 = sld [smem:[#allocation8 + $0x282]] }
 0x327   : > { %v1956_v38 = vadd.f32 %v6258_v51, %v1950_v16  ;;  %v6551_v16 = vstv %s3873_s25  ;;  %s3898_s25 = sld [smem:[#allocation8 + $0x304]] }
 0x329   : > { %v1962_v8 = vmul.f32 %v6275_v37, %v1956_v38  ;;  %v1972_v23 = vmul.f32 %v6279_v18, %v1956_v38  ;;  %v1992_v40 = vmul.f32 %v6287_v6, %v1956_v38  ;;  %v1982_v32 = vmul.f32 %v6282_v29, %v1956_v38 }
 0x32b   : > { %v6420_v1 = vadd.f32 %v1962_v8, %v1510_v50  ;;  %v6422_v46 = vadd.f32 %v1972_v23, %v1520_v59  ;;  %v6424_v47 = vadd.f32 %v1992_v40, %v1540_v17  ;;  %v6426_v51 = vadd.f32 %v1982_v32, %v1530_v12 }
 0x32c   : > { %v6563_v40 = vstv %s3874_s4  ;;  %s3900_s4 = sld [smem:[#allocation8 + $0x306]] }
 0x363   : > { %v6428_v56 = vpop.f32.mrb[2].mxu0 }
 0x364   : > { %v6430_v10 = vpop.f32.mrb[3].mxu0  ;;  %2260 = vrot.lane.b32.xlu1 %v6428_v56, %s4613_s23  ;;  %v2171_v37 = vrot.slane %v6428_v56, 7  ;;  %v2183_v6 = vrot.slane %v6428_v56, 1 }
 0x365   : > { %2258 = vrot.lane.b32.xlu0 %v6430_v10, %s4613_s23  ;;  %v2170_v29 = vrot.slane %v6430_v10, 7  ;;  %v2182_v18 = vrot.slane %v6430_v10, 1 }
 0x367   : > { %v6440_v45 = vpop.f32.mrb[4].mxu0  ;;  %v6443_v49 = vsel %vm478_vm2, %v2170_v29, %v2171_v37  ;;  %v6446_v53 = vsel %vm491_vm3, %v2182_v18, %v2183_v6  ;;  %v6459_v57 = vsel %vm478_vm2, 0.0, %v2170_v29 }
 0x368   : > { %v6448_v34 = vpop.f32.mrb[5].mxu0  ;;  %2296 = vrot.lane.b32.xlu1 %v6428_v56, %s4614_s29  ;;  %v2187_v25 = vrot.slane %v6440_v45, 1  ;;  %v2175_v13 = vrot.slane %v6440_v45, 7  ;;  %v2223_v59 = vmul.f32 %v6551_v16, %v6459_v57  ;;  %v2224_v8 = vmul.f32 %v6551_v16, %v6443_v49 }
 0x369   : > { %2294 = vrot.lane.b32.xlu0 %v6430_v10, %s4614_s29  ;;  %v2173_v62 = vrot.slane %v6448_v34, 7  ;;  %v2185_v54 = vrot.slane %v6448_v34, 1 }
 0x36a   : > { %v6501_v28 = vsel %vm491_vm3, %v2187_v25, 0.0 }
 0x36b   : > { %v6462_v20 = vsel %vm478_vm2, %v2173_v62, %v2175_v13  ;;  %v6465_v9 = vsel %vm478_vm2, %v2171_v37, %v2173_v62  ;;  %v6468_v33 = vsel %vm491_vm3, %v2185_v54, %v2187_v25  ;;  %v6473_v27 = vsel %vm491_vm3, %v2183_v6, %v2185_v54 }
 0x36c   : > { %2196 = vrot.lane.b32.xlu1 %v6459_v57, %s4613_s23  ;;  %v6565_v6 = vstv %s3875_s3  ;;  %s3901_s3 = sld [smem:[#allocation8 + $0x307]] }
 0x36d   : > { %2198 = vrot.lane.b32.xlu0 %v6443_v49, %s4613_s23 }
 0x370   : > { %2234 = vrot.lane.b32.xlu1 %v6443_v49, %s4614_s29 }
 0x371   : > { %2232 = vrot.lane.b32.xlu0 %v6459_v57, %s4614_s29  ;;  %v6572_v57 = vstv %s3876_s12  ;;  %s3902_s12 = sld [smem:[#allocation8 + $0x308]] }
 0x373   : > { %v4169_v4 = vpop.f32.mrb[6].mxu0 }
 0x374   : > { %v2503_v22 = vpop.f32.mrb[7].mxu0  ;;  %2264 = vrot.lane.b32.xlu1 %v6440_v45, %s4613_s23 }
 0x375   : > { %v4265_v55 = vpack.c.bf16 %v4169_v4, %v2503_v22  ;;  %2321 = vrot.lane.b32.xlu0 %v6446_v53, %s4613_s23 }
 0x377   : > { %4266 = vmatprep.subr.bf16.mxu1 %v4265_v55 }
 0x378   : > { %4268 = vmatpush3.bf16.msra.mxu1 %v4265_v55  ;;  %2300 = vrot.lane.b32.xlu1 %v6440_v45, %s4614_s29 }
 0x379   : > { %2357 = vrot.lane.b32.xlu0 %v6446_v53, %s4614_s29  ;;  %4270 = vmatprep.subr.bf16.mxu1 %v7498_v24 }
 0x37b   : > { %4175 = vmatmul.mubr.msk.f32.vlgmr.msra.gmra.mrb[6].mxu1 %vm1637_vm1, %v6493_v48 }
 0x37c   : > { %4272 = vmatpush3.bf16.msra.mxu1 %v7498_v24  ;;  %2262 = vrot.lane.b32.xlu1 %v6448_v34, %s4613_s23 }
 0x37d   : > { %2363 = vrot.lane.b32.xlu0 %v6501_v28, %s4614_s29  ;;  %4177 = vmatprep.mubr.msk.f32.mxu1 %vm1637_vm1, %v6508_v15 }
 0x37e   : > { %4274 = vmatprep.subr.bf16.mxu1 %v7499_v2 }
 0x37f   : > { %4178 = vmatmul.mubr.msk.f32.gmra.mrb[8].mxu1 %vm1637_vm1, %v6516_v3 }
 0x380   : > { %4276 = vmatpush3.bf16.msra.mxu1 %v7499_v2  ;;  %2298 = vrot.lane.b32.xlu1 %v6448_v34, %s4614_s29 }
 0x381   : > { %2202 = vrot.lane.b32.xlu0 %v6462_v20, %s4613_s23  ;;  %4278 = vmatprep.subr.bf16.mxu1 %v7500_v7 }
 0x382   : > { %4196 = vmatprep.mubr.msk.f32.mxu1 %vm1551_vm0, %v3908_v0 }
 0x384   : > { %4280 = vmatpush3.bf16.msra.mxu1 %v7500_v7  ;;  %2327 = vrot.lane.b32.xlu1 %v6501_v28, %s4613_s23 }
 0x385   : > { %2238 = vrot.lane.b32.xlu0 %v6462_v20, %s4614_s29  ;;  %4282 = vmatprep.subr.bf16.mxu1 %v7501_v58 }
 0x388   : > { %4284 = vmatpush3.bf16.msra.mxu1 %v7501_v58  ;;  %2200 = vrot.lane.b32.xlu1 %v6465_v9, %s4613_s23  ;;  %v2286_v58 = vmul.f32 %v6428_v56, %v6572_v57 }
 0x389   : > { %2325 = vrot.lane.b32.xlu0 %v6468_v33, %s4613_s23 }
 0x38b   : > { %4197 = vmatmul.mubr.msk.f32.vlgmr.msra.gmra.mrb[10].mxu1 %vm1551_vm0, %v3909_v52  ;;  %v6579_v52 = vstv %s3877_s21  ;;  %s3903_s21 = sld [smem:[#allocation9 + $0x6]] }
 0x38c   : > { %2236 = vrot.lane.b32.xlu1 %v6465_v9, %s4614_s29 }
 0x38d   : > { %2361 = vrot.lane.b32.xlu0 %v6468_v33, %s4614_s29 }
 0x390   : > { %2323 = vrot.lane.b32.xlu1 %v6473_v27, %s4613_s23 }
 0x394   : > { %2359 = vrot.lane.b32.xlu1 %v6473_v27, %s4614_s29 }
 0x3d6   : > { %v2261_v5 = vpop.permute.xlu1 %2260 }
 0x3d7   : > { %v2259_v44 = vpop.permute.xlu0 %2258  ;;  %v2271_v29 = vsel %vm518_vm4, 0.0, %v2261_v5 }
 0x3d8   : > { %v2270_v13 = vsel %vm518_vm4, 0.0, %v2259_v44  ;;  %v2276_v22 = vmul.f32 %v6565_v6, %v2271_v29 }
 0x3d9   : > { %v2275_v2 = vmul.f32 %v6565_v6, %v2270_v13 }
 0x3da   : > { %v6549_v36 = vpop.permute.xlu1 %2296 }
 0x3db   : > { %v2295_v14 = vpop.permute.xlu0 %2294 }
 0x3dc   : > { %v2306_v5 = vsel %vm555_vm5, %v2295_v14, 0.0 }
 0x3de   : > { %v2197_v50 = vpop.permute.xlu1 %2196 }
 0x3df   : > { %v2208_v38 = vsel %vm518_vm4, 0.0, %v2197_v50  ;;  %v2199_v41 = vpop.permute.xlu0 %2198  ;;  %v2285_v50 = vmul.f32 %v6572_v57, %v6430_v10 }
 0x3e0   : > { %v2213_v17 = vmul.f32 %v6553_v42, %v2208_v38  ;;  %v2209_v12 = vsel %vm518_vm4, 0.0, %v2199_v41  ;;  %v6584_v41 = vstv %s3878_s19  ;;  %s3904_s19 = sld [smem:[#allocation11 + $0x6]] }
 0x3e1   : > { %v2214_v23 = vmul.f32 %v6553_v42, %v2209_v12 }
 0x3e2   : > { %v2227_v32 = vadd.f32 %v2223_v59, %v2213_v17  ;;  %v2235_v37 = vpop.permute.xlu1 %2234 }
 0x3e3   : > { %v2228_v18 = vadd.f32 %v2224_v8, %v2214_v23  ;;  %v2245_v25 = vsel %vm555_vm5, %v2235_v37, 0.0  ;;  %v2233_v62 = vpop.permute.xlu0 %2232  ;;  %v2311_v8 = vmul.f32 %v6579_v52, %v2306_v5  ;;  %v6593_v37 = vstv %s3880_s18  ;;  %s3906_s18 = sld [smem:[#allocation11 + $0x106]] }
 0x3e4   : > { %v2250_v49 = vmul.f32 %v6563_v40, %v2245_v25  ;;  %v2244_v54 = vsel %vm555_vm5, %v2233_v62, 0.0  ;;  %v6606_v5 = vstv %s3883_s30  ;;  %s3917_s30 = sld [smem:[#allocation8 + $0x381]] }
 0x3e5   : > { %v2249_v4 = vmul.f32 %v6563_v40, %v2244_v54 }
 0x3e6   : > { %v2254_v55 = vadd.f32 %v2250_v49, %v2228_v18  ;;  %v2265_v24 = vpop.permute.xlu1 %2264 }
 0x3e7   : > { %v2253_v0 = vadd.f32 %v2249_v4, %v2227_v32  ;;  %v2322_v7 = vpop.permute.xlu0 %2321  ;;  %v6590_v32 = vstv %s3879_s5  ;;  %v6599_v4 = vstv %s3881_s27  ;;  %s3905_s5 = sld [smem:[#allocation11 + $0x86]] }
 0x3e8   : > { %v2280_v44 = vadd.f32 %v2276_v22, %v2254_v55  ;;  %v2333_v59 = vsel %vm518_vm4, 0.0, %v2322_v7  ;;  %v2348_v25 = vmul.f32 %v6590_v32, %v6446_v53  ;;  %s3907_s27 = sld [smem:[#allocation11 + $0x186]] }
 0x3e9   : > { %v2279_v38 = vadd.f32 %v2275_v2, %v2253_v0  ;;  %v2338_v10 = vmul.f32 %v6584_v41, %v2333_v59  ;;  %v2226_v0 = vmul.f32 %v6551_v16, %v6462_v20 }
 0x3ea   : > { %v2301_v17 = vpop.permute.xlu1 %2300  ;;  %v6587_v12 = vadd.f32 %v2286_v58, %v2280_v44  ;;  %v6604_v58 = vstv %s3882_s14  ;;  %s3916_s14 = sld [smem:[#allocation8 + $0x380]] }
 0x3eb   : > { %v2289_v56 = vadd.f32 %v2285_v50, %v2279_v38  ;;  %v2358_v23 = vpop.permute.xlu0 %2357  ;;  %v6610_v50 = vstv %s3884_s0  ;;  %v6612_v38 = vstv %s3885_s16  ;;  %s3918_s0 = sld [smem:[#allocation8 + $0x382]]  ;;  %s3919_s16 = sld [smem:[#allocation8 + $0x383]] }
 0x3ec   : > { %v2369_v29 = vsel %vm555_vm5, %v2358_v23, 0.0 }
 0x3ed   : > { %v2315_v14 = vadd.f32 %v2311_v8, %v2289_v56  ;;  %v2374_v54 = vmul.f32 %v6593_v37, %v2369_v29 }
 0x3ee   : > { %v2263_v18 = vpop.permute.xlu1 %2262 }
 0x3ef   : > { %v2342_v62 = vadd.f32 %v2338_v10, %v2315_v14  ;;  %v2364_v13 = vpop.permute.xlu0 %2363  ;;  %v2273_v14 = vsel %vm518_vm4, 0.0, %v2265_v24 }
 0x3f1   : > { %v2352_v49 = vadd.f32 %v2348_v25, %v2342_v62 }
 0x3f2   : > { %v2299_v22 = vpop.permute.xlu1 %2298 }
 0x3f3   : > { %v2378_v55 = vadd.f32 %v2374_v54, %v2352_v49  ;;  %v2203_v2 = vpop.permute.xlu0 %2202 }
 0x3f4   : > { %v2211_v7 = vsel %vm518_vm4, 0.0, %v2203_v2 }
 0x3f5   : > { %v2384_v53 = vadd.f32 %v6599_v4, %v2378_v55  ;;  %v2216_v44 = vmul.f32 %v6553_v42, %v2211_v7 }
 0x3f6   : > { %v2328_v59 = vpop.permute.xlu1 %2327 }
 0x3f7   : > { %v2230_v8 = vadd.f32 %v2226_v0, %v2216_v44  ;;  %v2239_v56 = vpop.permute.xlu0 %2238  ;;  %v2390_v23 = vmul.f32 %v6604_v58, %v2384_v53  ;;  %v2400_v20 = vmul.f32 %v6606_v5, %v2384_v53  ;;  %v2410_v29 = vmul.f32 %v6610_v50, %v2384_v53 }
 0x3f8   : > { %v2247_v10 = vsel %vm555_vm5, %v2239_v56, 0.0  ;;  %v2420_v25 = vmul.f32 %v6612_v38, %v2384_v53  ;;  %v2278_v0 = vmul.f32 %v6565_v6, %v2273_v14  ;;  %v2309_v44 = vsel %vm555_vm5, %v2301_v17, 0.0 }
 0x3f9   : > { %v2252_v62 = vmul.f32 %v6563_v40, %v2247_v10  ;;  %v6622_v49 = vadd.f32 %v2390_v23, %v6308_v35  ;;  %v6625_v54 = vadd.f32 %v2400_v20, %v6311_v43  ;;  %v6628_v2 = vadd.f32 %v2410_v29, %v6313_v61 }
 0x3fa   : > { %v2201_v55 = vpop.permute.xlu1 %2200  ;;  %v6631_v24 = vadd.f32 %v2420_v25, %v6315_v63  ;;  %v2225_v35 = vmul.f32 %v6551_v16, %v6465_v9  ;;  %v2288_v56 = vmul.f32 %v6440_v45, %v6572_v57  ;;  %v2307_v63 = vsel %vm555_vm5, %v6549_v36, 0.0 }
 0x3fb   : > { %v2256_v7 = vadd.f32 %v2252_v62, %v2230_v8  ;;  %v2210_v53 = vsel %vm518_vm4, 0.0, %v2201_v55  ;;  %v2336_v23 = vsel %vm518_vm4, 0.0, %v2328_v59  ;;  %v2314_v14 = vmul.f32 %v6579_v52, %v2309_v44  ;;  %v2326_v16 = vpop.permute.xlu0 %2325 }
 0x3fc   : > { %v2215_v43 = vmul.f32 %v6553_v42, %v2210_v53  ;;  %v2272_v17 = vsel %vm518_vm4, 0.0, %v2263_v18  ;;  %v2341_v45 = vmul.f32 %v6584_v41, %v2336_v23  ;;  %v2312_v25 = vmul.f32 %v6579_v52, %v2307_v63 }
 0x3fd   : > { %v2282_v61 = vadd.f32 %v2278_v0, %v2256_v7  ;;  %v2277_v36 = vmul.f32 %v6565_v6, %v2272_v17  ;;  %v2372_v59 = vsel %vm555_vm5, %v2364_v13, 0.0  ;;  %v2351_v18 = vmul.f32 %v6590_v32, %v6501_v28 }
 0x3fe   : > { %v2229_v20 = vadd.f32 %v2225_v35, %v2215_v43  ;;  %v2237_v8 = vpop.permute.xlu1 %2236  ;;  %v2308_v0 = vsel %vm555_vm5, %v2299_v22, 0.0  ;;  %v2316_v35 = vadd.f32 %v2312_v25, %v6587_v12  ;;  %v2377_v13 = vmul.f32 %v6593_v37, %v2372_v59 }
 0x3ff   : > { %v2292_v10 = vadd.f32 %v2288_v56, %v2282_v61  ;;  %v2246_v9 = vsel %vm555_vm5, %v2237_v8, 0.0  ;;  %v2335_v56 = vsel %vm518_vm4, 0.0, %v2326_v16  ;;  %v2349_v28 = vmul.f32 %v6590_v32, %v6473_v27  ;;  %v2362_v63 = vpop.permute.xlu0 %2361 }
 0x400   : > { %v2251_v42 = vmul.f32 %v6563_v40, %v2246_v9  ;;  %v2287_v40 = vmul.f32 %v6572_v57, %v6448_v34  ;;  %v2313_v22 = vmul.f32 %v6579_v52, %v2308_v0  ;;  %v2340_v12 = vmul.f32 %v6584_v41, %v2335_v56 }
 0x401   : > { %v2318_v29 = vadd.f32 %v2314_v14, %v2292_v10  ;;  %v2371_v9 = vsel %vm555_vm5, %v2362_v63, 0.0  ;;  %v2350_v27 = vmul.f32 %v6590_v32, %v6468_v33 }
 0x402   : > { %v2255_v62 = vadd.f32 %v2251_v42, %v2229_v20  ;;  %v2324_v55 = vpop.permute.xlu1 %2323 }
 0x403   : > { %v2345_v7 = vadd.f32 %v2341_v45, %v2318_v29  ;;  %v2334_v53 = vsel %vm518_vm4, 0.0, %v2324_v55 }
 0x404   : > { %v2281_v44 = vadd.f32 %v2277_v36, %v2255_v62  ;;  %v2339_v6 = vmul.f32 %v6584_v41, %v2334_v53  ;;  %v2376_v36 = vmul.f32 %v6593_v37, %v2371_v9  ;;  %v6807_v9 = vstv %s3894_s22  ;;  %s3920_s22 = sld [smem:[#allocation8 + $0x384]] }
 0x405   : > { %v2355_v43 = vadd.f32 %v2351_v18, %v2345_v7 }
 0x406   : > { %v2291_v61 = vadd.f32 %v2287_v40, %v2281_v44  ;;  %v2343_v23 = vadd.f32 %v2339_v6, %v2316_v35  ;;  %v2360_v20 = vpop.permute.xlu1 %2359 }
 0x407   : > { %v2381_v34 = vadd.f32 %v2377_v13, %v2355_v43  ;;  %v2370_v57 = vsel %vm555_vm5, %v2360_v20, 0.0 }
 0x408   : > { %v2317_v8 = vadd.f32 %v2313_v22, %v2291_v61  ;;  %v2353_v14 = vadd.f32 %v2349_v28, %v2343_v23  ;;  %v2375_v17 = vmul.f32 %v6593_v37, %v2370_v57 }
 0x409   : > { %v2387_v10 = vadd.f32 %v6599_v4, %v2381_v34 }
 0x40a   : > { %v2344_v52 = vadd.f32 %v2340_v12, %v2317_v8  ;;  %v2379_v16 = vadd.f32 %v2375_v17, %v2353_v14 }
 0x40b   : > { %v2393_v42 = vmul.f32 %v6604_v58, %v2387_v10  ;;  %v2403_v45 = vmul.f32 %v6606_v5, %v2387_v10  ;;  %v2423_v29 = vmul.f32 %v6612_v38, %v2387_v10  ;;  %v2413_v41 = vmul.f32 %v6610_v50, %v2387_v10 }
 0x40c   : > { %v2354_v25 = vadd.f32 %v2350_v27, %v2344_v52  ;;  %v2385_v59 = vadd.f32 %v6599_v4, %v2379_v16  ;;  %v6809_v27 = vstv %s3895_s28  ;;  %s7061_s28 = sld [smem:[#allocation8 + $0x387]] }
 0x40d   : > { %v6679_v62 = vadd.f32 %v2393_v42, %v6420_v1  ;;  %v6682_v33 = vadd.f32 %v2403_v45, %v6422_v46  ;;  %v6685_v32 = vadd.f32 %v2423_v29, %v6424_v47  ;;  %v6688_v55 = vadd.f32 %v2413_v41, %v6426_v51 }
 0x40e   : > { %v2380_v18 = vadd.f32 %v2376_v36, %v2354_v25  ;;  %v2401_v0 = vmul.f32 %v6606_v5, %v2385_v59  ;;  %v2391_v7 = vmul.f32 %v6604_v58, %v2385_v59  ;;  %v2411_v37 = vmul.f32 %v6610_v50, %v2385_v59 }
 0x40f   : > { %v2421_v53 = vmul.f32 %v6612_v38, %v2385_v59  ;;  %v6816_v36 = vstv %s3896_s24  ;;  %v6818_v59 = vstv %s3897_s17  ;;  %s3924_s24 = sld [smem:[#allocation8 + $0x388]]  ;;  %s3925_s17 = sld [smem:[#allocation9 + $0x7]] }
 0x410   : > { %v2386_v1 = vadd.f32 %v6599_v4, %v2380_v18  ;;  %v6696_v46 = vadd.f32 %v2401_v0, %v6387_v21  ;;  %v6699_v47 = vadd.f32 %v2391_v7, %v6389_v31  ;;  %v6702_v51 = vadd.f32 %v2411_v37, %v6391_v11 }
 0x411   : > { %v6705_v40 = vadd.f32 %v2421_v53, %v6395_v30 }
 0x412   : > { %v2402_v44 = vmul.f32 %v6606_v5, %v2386_v1  ;;  %v2392_v35 = vmul.f32 %v6604_v58, %v2386_v1  ;;  %v2412_v6 = vmul.f32 %v6610_v50, %v2386_v1  ;;  %v2422_v4 = vmul.f32 %v6612_v38, %v2386_v1 }
 0x414   : > { %v6712_v21 = vadd.f32 %v2402_v44, %v6404_v39  ;;  %v6715_v31 = vadd.f32 %v2392_v35, %v6406_v26  ;;  %v6718_v11 = vadd.f32 %v2412_v6, %v6408_v19  ;;  %v6721_v30 = vadd.f32 %v2422_v4, %v6410_v60 }
 0x44e   : > { %v6723_v13 = vpop.f32.mrb[6].mxu1 }
 0x44f   : > { %v6725_v5 = vpop.f32.mrb[7].mxu1  ;;  %2691 = vrot.lane.b32.xlu1 %v6723_v13, %s4613_s23  ;;  %2727 = vrot.lane.b32.xlu0 %v6723_v13, %s4614_s29  ;;  %v2602_v39 = vrot.slane %v6723_v13, 7  ;;  %v2614_v26 = vrot.slane %v6723_v13, 1 }
 0x450   : > { %v2601_v19 = vrot.slane %v6725_v5, 7  ;;  %v2613_v58 = vrot.slane %v6725_v5, 1 }
 0x452   : > { %v6735_v60 = vpop.f32.mrb[8].mxu1  ;;  %v2603_v50 = vsel %vm478_vm2, %v2601_v19, %v2602_v39  ;;  %v6739_v38 = vsel %vm491_vm3, %v2613_v58, %v2614_v26  ;;  %v2612_v63 = vsel %vm478_vm2, 0.0, %v2601_v19 }
 0x453   : > { %v6741_v43 = vpop.f32.mrb[9].mxu1  ;;  %2725 = vrot.lane.b32.xlu1 %v6725_v5, %s4614_s29  ;;  %2689 = vrot.lane.b32.xlu0 %v6725_v5, %s4613_s23  ;;  %v2618_v56 = vrot.slane %v6735_v60, 1  ;;  %v2606_v28 = vrot.slane %v6735_v60, 7  ;;  %v2655_v29 = vmul.f32 %v6809_v27, %v2603_v50  ;;  %v2654_v0 = vmul.f32 %v6809_v27, %v2612_v63 }
 0x454   : > { %v2604_v22 = vrot.slane %v6741_v43, 7  ;;  %v2616_v61 = vrot.slane %v6741_v43, 1 }
 0x455   : > { %v6779_v17 = vsel %vm491_vm3, %v2618_v56, 0.0 }
 0x456   : > { %v6753_v23 = vsel %vm478_vm2, %v2602_v39, %v2604_v22  ;;  %v6756_v20 = vsel %vm491_vm3, %v2614_v26, %v2616_v61  ;;  %v6759_v34 = vsel %vm491_vm3, %v2616_v61, %v2618_v56  ;;  %v6764_v57 = vsel %vm478_vm2, %v2604_v22, %v2606_v28 }
 0x457   : > { %2629 = vrot.lane.b32.xlu1 %v2603_v50, %s4613_s23  ;;  %2627 = vrot.lane.b32.xlu0 %v2612_v63, %s4613_s23  ;;  %v6827_v26 = vstv %s3898_s25  ;;  %v6833_v61 = vstv %s3899_s13  ;;  %s3926_s25 = sld [smem:[#allocation11 + $0x7]] }
 0x458   : > { %s3927_s13 = sld [smem:[#allocation11 + $0x87]] }
 0x45b   : > { %2663 = vrot.lane.b32.xlu1 %v2612_v63, %s4614_s29  ;;  %2665 = vrot.lane.b32.xlu0 %v2603_v50, %s4614_s29 }
 0x45e   : > { %v4198_v12 = vpop.f32.mrb[10].mxu1 }
 0x45f   : > { %v2934_v8 = vpop.f32.mrb[11].mxu1  ;;  %2693 = vrot.lane.b32.xlu1 %v6741_v43, %s4613_s23  ;;  %2695 = vrot.lane.b32.xlu0 %v6735_v60, %s4613_s23 }
 0x460   : > { %v4285_v14 = vpack.c.bf16 %v4198_v12, %v2934_v8  ;;  %v2717_v8 = vmul.f32 %v6723_v13, %v6827_v26 }
 0x462   : > { %4286 = vmatprep.subr.bf16.mxu0 %v4285_v14 }
 0x463   : > { %4288 = vmatpush3.bf16.msra.mxu0 %v4285_v14  ;;  %2729 = vrot.lane.b32.xlu1 %v6741_v43, %s4614_s29  ;;  %v2716_v14 = vmul.f32 %v6827_v26, %v6725_v5 }
 0x464   : > { %2752 = vrot.lane.b32.xlu0 %v6739_v38, %s4613_s23 }
 0x466   : > { %4204 = vmatmul.mubr.msk.f32.vlgmr.msra.gmra.mrb[8].mxu0 %vm1637_vm1, %v6493_v48 }
 0x467   : > { %2758 = vrot.lane.b32.xlu1 %v6779_v17, %s4613_s23  ;;  %4206 = vmatprep.mubr.msk.f32.mxu0 %vm1637_vm1, %v6508_v15 }
 0x468   : > { %2731 = vrot.lane.b32.xlu0 %v6735_v60, %s4614_s29 }
 0x46a   : > { %4207 = vmatmul.mubr.msk.f32.gmra.mrb[10].mxu0 %vm1637_vm1, %v6516_v3 }
 0x46b   : > { %2667 = vrot.lane.b32.xlu1 %v6753_v23, %s4614_s29 }
 0x46c   : > { %2788 = vrot.lane.b32.xlu0 %v6739_v38, %s4614_s29 }
 0x46f   : > { %2754 = vrot.lane.b32.xlu1 %v6756_v20, %s4613_s23 }
 0x470   : > { %2631 = vrot.lane.b32.xlu0 %v6753_v23, %s4613_s23 }
 0x473   : > { %2756 = vrot.lane.b32.xlu1 %v6759_v34, %s4613_s23 }
 0x474   : > { %2633 = vrot.lane.b32.xlu0 %v6764_v57, %s4613_s23 }
 0x477   : > { %2790 = vrot.lane.b32.xlu1 %v6756_v20, %s4614_s29 }
 0x478   : > { %2669 = vrot.lane.b32.xlu0 %v6764_v57, %s4614_s29 }
 0x47b   : > { %2792 = vrot.lane.b32.xlu1 %v6759_v34, %s4614_s29 }
 0x4c1   : > { %v2692_v48 = vpop.permute.xlu1 %2691  ;;  %v2728_v15 = vpop.permute.xlu0 %2727 }
 0x4c2   : > { %v2702_v53 = vsel %vm518_vm4, 0.0, %v2692_v48  ;;  %v2738_v63 = vsel %vm555_vm5, %v2728_v15, 0.0 }
 0x4c3   : > { %v2707_v19 = vmul.f32 %v6818_v59, %v2702_v53 }
 0x4c5   : > { %v2726_v3 = vpop.permute.xlu1 %2725  ;;  %v2690_v10 = vpop.permute.xlu0 %2689 }
 0x4c6   : > { %v2701_v1 = vsel %vm518_vm4, 0.0, %v2690_v10  ;;  %v2737_v12 = vsel %vm555_vm5, %v2726_v3, 0.0  ;;  %v6845_v3 = vstv %s3901_s3  ;;  %s3929_s3 = sld [smem:[#allocation11 + $0x187]] }
 0x4c7   : > { %v2706_v58 = vmul.f32 %v6818_v59, %v2701_v1 }
 0x4c9   : > { %v2630_v52 = vpop.permute.xlu1 %2629  ;;  %v2628_v16 = vpop.permute.xlu0 %2627 }
 0x4ca   : > { %v2640_v42 = vsel %vm518_vm4, 0.0, %v2630_v52  ;;  %v2639_v45 = vsel %vm518_vm4, 0.0, %v2628_v16  ;;  %v6841_v52 = vstv %s3900_s4  ;;  %v2743_v16 = vmul.f32 %v6833_v61, %v2738_v63  ;;  %s3928_s4 = sld [smem:[#allocation11 + $0x107]] }
 0x4cb   : > { %v2645_v41 = vmul.f32 %v6807_v9, %v2640_v42  ;;  %v2644_v25 = vmul.f32 %v6807_v9, %v2639_v45  ;;  %v2742_v42 = vmul.f32 %v6833_v61, %v2737_v12  ;;  %v6864_v12 = vstv %s3904_s19  ;;  %s7179_s19 = sld [smem:[#allocation12 + $0x2]] }
 0x4cd   : > { %v2659_v18 = vadd.f32 %v2655_v29, %v2645_v41  ;;  %v2664_v7 = vpop.permute.xlu1 %2663  ;;  %v2666_v37 = vpop.permute.xlu0 %2665  ;;  %v2658_v6 = vadd.f32 %v2654_v0, %v2644_v25 }
 0x4ce   : > { %v2675_v44 = vsel %vm555_vm5, %v2664_v7, 0.0  ;;  %v2676_v35 = vsel %vm555_vm5, %v2666_v37, 0.0  ;;  %v2779_v7 = vmul.f32 %v6845_v3, %v6739_v38 }
 0x4cf   : > { %v2680_v4 = vmul.f32 %v6816_v36, %v2675_v44  ;;  %v2681_v39 = vmul.f32 %v6816_v36, %v2676_v35  ;;  %v6855_v35 = vstv %s3902_s12  ;;  %s3290_s12 = sld [smem:[#allocation12]] }
 0x4d1   : > { %v2684_v50 = vadd.f32 %v2680_v4, %v2658_v6  ;;  %v2685_v56 = vadd.f32 %v2681_v39, %v2659_v18  ;;  %v2694_v28 = vpop.permute.xlu1 %2693  ;;  %v6831_v22 = vpop.permute.xlu0 %2695 }
 0x4d3   : > { %v2710_v48 = vadd.f32 %v2706_v58, %v2684_v50  ;;  %v2711_v10 = vadd.f32 %v2707_v19, %v2685_v56  ;;  %v6859_v19 = vstv %s3903_s21  ;;  %v2656_v56 = vmul.f32 %v6809_v27, %v6753_v23  ;;  %s3934_s21 = sld [smem:[#allocation12 + $0x1]] }
 0x4d4   : > { %v2780_v23 = vmul.f32 %v6845_v3, %v6756_v20 }
 0x4d5   : > { %v2730_v45 = vpop.permute.xlu1 %2729  ;;  %v2720_v29 = vadd.f32 %v2716_v14, %v2710_v48  ;;  %v2721_v15 = vadd.f32 %v2717_v8, %v2711_v10  ;;  %v6869_v10 = vstv %s3905_s5  ;;  %s7181_s5 = sld [smem:[#allocation12 + $0x3]] }
 0x4d6   : > { %v2753_v41 = vpop.permute.xlu0 %2752 }
 0x4d7   : > { %v2746_v25 = vadd.f32 %v2742_v42, %v2720_v29  ;;  %v2764_v13 = vsel %vm518_vm4, 0.0, %v2753_v41  ;;  %v2747_v18 = vadd.f32 %v2743_v16, %v2721_v15  ;;  %v2703_v16 = vsel %vm518_vm4, 0.0, %v2694_v28 }
 0x4d8   : > { %v2769_v5 = vmul.f32 %v6841_v52, %v2764_v13  ;;  %v6874_v15 = vstv %s3906_s18  ;;  %v6878_v13 = vstv %s3907_s27  ;;  %s3965_s18 = sshll.u32 %s7519_s15, 6 }
 0x4d9   : > { %v6849_v0 = vpop.permute.xlu1 %2758 }
 0x4da   : > { %v2773_v37 = vadd.f32 %v2769_v5, %v2746_v25  ;;  %v6853_v53 = vpop.permute.xlu0 %2731 }
 0x4dc   : > { %v2783_v1 = vadd.f32 %v2779_v7, %v2773_v37 }
 0x4dd   : > { %v2668_v44 = vpop.permute.xlu1 %2667 }
 0x4de   : > { %v2789_v6 = vpop.permute.xlu0 %2788  ;;  %v2677_v8 = vsel %vm555_vm5, %v2668_v44, 0.0  ;;  %v2708_v44 = vmul.f32 %v6818_v59, %v2703_v16 }
 0x4df   : > { %v2800_v4 = vsel %vm555_vm5, %v2789_v6, 0.0  ;;  %v2682_v5 = vmul.f32 %v6816_v36, %v2677_v8 }
 0x4e0   : > { %v2805_v39 = vmul.f32 %v6855_v35, %v2800_v4 }
 0x4e1   : > { %v2755_v58 = vpop.permute.xlu1 %2754 }
 0x4e2   : > { %v2809_v38 = vadd.f32 %v2805_v39, %v2783_v1  ;;  %v2765_v50 = vsel %vm518_vm4, 0.0, %v2755_v58  ;;  %v2632_v63 = vpop.permute.xlu0 %2631 }
 0x4e3   : > { %v2770_v14 = vmul.f32 %v6841_v52, %v2765_v50  ;;  %v2641_v48 = vsel %vm518_vm4, 0.0, %v2632_v63  ;;  %v2718_v50 = vmul.f32 %v6827_v26, %v6741_v43 }
 0x4e4   : > { %v2815_v42 = vadd.f32 %v6859_v19, %v2809_v38  ;;  %v2646_v29 = vmul.f32 %v6807_v9, %v2641_v48 }
 0x4e5   : > { %v2774_v41 = vadd.f32 %v2770_v14, %v2747_v18  ;;  %v2757_v25 = vpop.permute.xlu1 %2756 }
 0x4e6   : > { %v2660_v7 = vadd.f32 %v2656_v56, %v2646_v29  ;;  %v2634_v37 = vpop.permute.xlu0 %2633  ;;  %v2821_v1 = vmul.f32 %v6864_v12, %v2815_v42  ;;  %v2831_v28 = vmul.f32 %v6869_v10, %v2815_v42  ;;  %v2841_v39 = vmul.f32 %v6874_v15, %v2815_v42 }
 0x4e7   : > { %v2642_v6 = vsel %vm518_vm4, 0.0, %v2634_v37  ;;  %v2784_v4 = vadd.f32 %v2780_v23, %v2774_v41  ;;  %v2739_v56 = vsel %vm555_vm5, %v2730_v45, 0.0  ;;  %v2851_v14 = vmul.f32 %v6878_v13, %v2815_v42 }
 0x4e8   : > { %v2686_v20 = vadd.f32 %v2682_v5, %v2660_v7  ;;  %v2647_v18 = vmul.f32 %v6807_v9, %v2642_v6  ;;  %v6888_v58 = vadd.f32 %v2821_v1, %v6622_v49  ;;  %v6891_v38 = vadd.f32 %v2831_v28, %v6625_v54 }
 0x4e9   : > { %v2791_v63 = vpop.permute.xlu1 %2790  ;;  %v6897_v8 = vadd.f32 %v2841_v39, %v6628_v2  ;;  %v2704_v9 = vsel %vm518_vm4, 0.0, %v6831_v22  ;;  %v2657_v49 = vmul.f32 %v6809_v27, %v6764_v57  ;;  %v2766_v43 = vsel %vm518_vm4, 0.0, %v2757_v25 }
 0x4ea   : > { %v2712_v48 = vadd.f32 %v2708_v44, %v2686_v20  ;;  %v2801_v54 = vsel %vm555_vm5, %v2791_v63, 0.0  ;;  %v2670_v16 = vpop.permute.xlu0 %2669  ;;  %v6909_v2 = vadd.f32 %v2851_v14, %v6631_v24  ;;  %v2744_v42 = vmul.f32 %v6833_v61, %v2739_v56 }
 0x4eb   : > { %v2806_v45 = vmul.f32 %v6855_v35, %v2801_v54  ;;  %v2678_v29 = vsel %vm555_vm5, %v2670_v16, 0.0  ;;  %v2661_v22 = vadd.f32 %v2657_v49, %v2647_v18  ;;  %v2709_v27 = vmul.f32 %v6818_v59, %v2704_v9 }
 0x4ec   : > { %v2722_v23 = vadd.f32 %v2718_v50, %v2712_v48  ;;  %v2683_v41 = vmul.f32 %v6816_v36, %v2678_v29  ;;  %v2771_v25 = vmul.f32 %v6841_v52, %v2766_v43  ;;  %v2719_v1 = vmul.f32 %v6735_v60, %v6827_v26 }
 0x4ed   : > { %v2810_v5 = vadd.f32 %v2806_v45, %v2784_v4  ;;  %v2793_v57 = vpop.permute.xlu1 %2792  ;;  %v2740_v24 = vsel %vm555_vm5, %v6853_v53, 0.0  ;;  %v2781_v36 = vmul.f32 %v6845_v3, %v6759_v34  ;;  %v2767_v59 = vsel %vm518_vm4, 0.0, %v6849_v0 }
 0x4ee   : > { %v2748_v7 = vadd.f32 %v2744_v42, %v2722_v23  ;;  %v2687_v37 = vadd.f32 %v2683_v41, %v2661_v22  ;;  %v2802_v44 = vsel %vm555_vm5, %v2793_v57, 0.0  ;;  %v2745_v53 = vmul.f32 %v6833_v61, %v2740_v24 }
 0x4ef   : > { %v2816_v28 = vadd.f32 %v6859_v19, %v2810_v5  ;;  %v2807_v56 = vmul.f32 %v6855_v35, %v2802_v44  ;;  %v2772_v9 = vmul.f32 %v6841_v52, %v2767_v59 }
 0x4f0   : > { %v2775_v6 = vadd.f32 %v2771_v25, %v2748_v7  ;;  %v2713_v4 = vadd.f32 %v2709_v27, %v2687_v37 }
 0x4f1   : > { %v2832_v39 = vmul.f32 %v6869_v10, %v2816_v28  ;;  %v2822_v20 = vmul.f32 %v6864_v12, %v2816_v28  ;;  %v2842_v60 = vmul.f32 %v6874_v15, %v2816_v28  ;;  %v2852_v26 = vmul.f32 %v6878_v13, %v2816_v28 }
 0x4f2   : > { %v2723_v18 = vadd.f32 %v2719_v1, %v2713_v4  ;;  %v2785_v50 = vadd.f32 %v2781_v36, %v2775_v6 }
 0x4f3   : > { %v6932_v34 = vadd.f32 %v2832_v39, %v6696_v46  ;;  %v6935_v0 = vadd.f32 %v2822_v20, %v6699_v47  ;;  %v6938_v63 = vadd.f32 %v2842_v60, %v6702_v51  ;;  %v6941_v14 = vadd.f32 %v2852_v26, %v6705_v40 }
 0x4f4   : > { %v2811_v48 = vadd.f32 %v2807_v56, %v2785_v50  ;;  %v2749_v61 = vadd.f32 %v2745_v53, %v2723_v18  ;;  %v7047_v20 = vstv %s3916_s14  ;;  %v7049_v53 = vstv %s3917_s30  ;;  %s7240_s30 = scalar_lea.vmem %s7370_s8, %s3965_s18 }
 0x4f5   : > { %7502 = vst [vmem:[#allocation24_spill] sm:$0xff] %v6938_v63  ;;  %7503 = vst [vmem:[#allocation46_spill] sm:$0xff] %v6941_v14 }
 0x4f6   : > { %v2817_v49 = vadd.f32 %v6859_v19, %v2811_v48  ;;  %v6945_v54 = vadd.f32 %v2772_v9, %v2749_v61  ;;  %v7055_v48 = vstv %s3918_s0  ;;  %v7057_v61 = vstv %s3919_s16  ;;  %s3778_s0 = sshll.u32 %s7519_s15, 1 }
 0x4f8   : > { %v2833_v46 = vmul.f32 %v6869_v10, %v2817_v49  ;;  %v2823_v16 = vmul.f32 %v6864_v12, %v2817_v49  ;;  %v2843_v47 = vmul.f32 %v6874_v15, %v2817_v49  ;;  %v2853_v51 = vmul.f32 %v6878_v13, %v2817_v49 }
 0x4fa   : > { %v6952_v43 = vadd.f32 %v2833_v46, %v6712_v21  ;;  %v6955_v40 = vadd.f32 %v2823_v16, %v6715_v31  ;;  %v6958_v52 = vadd.f32 %v2843_v47, %v6718_v11  ;;  %v6961_v45 = vadd.f32 %v2853_v51, %v6721_v30 }
 0x4fc   : > { %7504 = vst [vmem:[#allocation47_spill] sm:$0xff] %v6952_v43  ;;  %7505 = vst [vmem:[#allocation35_spill] sm:$0xff] %v6955_v40 }
 0x4fd   : > { %7506 = vst [vmem:[#allocation36_spill] sm:$0xff] %v6958_v52  ;;  %7507 = vst [vmem:[#allocation37_spill] sm:$0xff] %v6961_v45 }
 0x539   : > { %v6963_v29 = vpop.f32.mrb[8].mxu0 }
 0x53a   : > { %v6965_v42 = vpop.f32.mrb[9].mxu0  ;;  %3122 = vrot.lane.b32.xlu1 %v6963_v29, %s4613_s23  ;;  %3158 = vrot.lane.b32.xlu0 %v6963_v29, %s4614_s29  ;;  %v3033_v21 = vrot.slane %v6963_v29, 7  ;;  %v3045_v31 = vrot.slane %v6963_v29, 1 }
 0x53b   : > { %v3032_v11 = vrot.slane %v6965_v42, 7  ;;  %v3044_v23 = vrot.slane %v6965_v42, 1 }
 0x53d   : > { %v6975_v30 = vpop.f32.mrb[10].mxu0  ;;  %v3034_v22 = vsel %vm478_vm2, %v3032_v11, %v3033_v21  ;;  %v6979_v41 = vsel %vm491_vm3, %v3044_v23, %v3045_v31  ;;  %v3043_v37 = vsel %vm478_vm2, 0.0, %v3032_v11 }
 0x53e   : > { %v6981_v5 = vpop.f32.mrb[11].mxu0  ;;  %3156 = vrot.lane.b32.xlu1 %v6965_v42, %s4614_s29  ;;  %3120 = vrot.lane.b32.xlu0 %v6965_v42, %s4613_s23  ;;  %v3037_v57 = vrot.slane %v6975_v30, 7  ;;  %v3049_v27 = vrot.slane %v6975_v30, 1  ;;  %v3085_v49 = vmul.f32 %v7049_v53, %v3043_v37  ;;  %v3086_v46 = vmul.f32 %v7049_v53, %v3034_v22 }
 0x53f   : > { %v3035_v7 = vrot.slane %v6981_v5, 7  ;;  %v3047_v25 = vrot.slane %v6981_v5, 1 }
 0x540   : > { %v7025_v36 = vsel %vm491_vm3, %v3049_v27, 0.0 }
 0x541   : > { %v6993_v1 = vsel %vm478_vm2, %v3033_v21, %v3035_v7  ;;  %v6996_v24 = vsel %vm478_vm2, %v3035_v7, %v3037_v57  ;;  %v6999_v28 = vsel %vm491_vm3, %v3047_v25, %v3049_v27  ;;  %v7004_v44 = vsel %vm491_vm3, %v3045_v31, %v3047_v25 }
 0x542   : > { %3058 = vrot.lane.b32.xlu1 %v3043_v37, %s4613_s23  ;;  %3060 = vrot.lane.b32.xlu0 %v3034_v22, %s4613_s23  ;;  %v3146_v25 = vstv %s3920_s22 }
 0x543   : > { %v7125_v14 = vmul.f32 %v6975_v30, %v3146_v25 }
 0x546   : > { %3094 = vrot.lane.b32.xlu1 %v3043_v37, %s4614_s29  ;;  %3096 = vrot.lane.b32.xlu0 %v3034_v22, %s4614_s29 }
 0x54a   : > { %3183 = vrot.lane.b32.xlu1 %v6979_v41, %s4613_s23  ;;  %3126 = vrot.lane.b32.xlu0 %v6975_v30, %s4613_s23 }
 0x54e   : > { %3219 = vrot.lane.b32.xlu1 %v6979_v41, %s4614_s29  ;;  %3162 = vrot.lane.b32.xlu0 %v6975_v30, %s4614_s29 }
 0x552   : > { %3098 = vrot.lane.b32.xlu1 %v6993_v1, %s4614_s29  ;;  %3124 = vrot.lane.b32.xlu0 %v6981_v5, %s4613_s23 }
 0x556   : > { %3100 = vrot.lane.b32.xlu1 %v6996_v24, %s4614_s29  ;;  %3160 = vrot.lane.b32.xlu0 %v6981_v5, %s4614_s29 }
 0x55a   : > { %3187 = vrot.lane.b32.xlu1 %v6999_v28, %s4613_s23  ;;  %3189 = vrot.lane.b32.xlu0 %v7025_v36, %s4613_s23 }
 0x55e   : > { %2794 = vrot.lane.b32.xlu1 %v6779_v17, %s4614_s29  ;;  %3062 = vrot.lane.b32.xlu0 %v6993_v1, %s4613_s23 }
 0x562   : > { %3225 = vrot.lane.b32.xlu1 %v7025_v36, %s4614_s29  ;;  %3064 = vrot.lane.b32.xlu0 %v6996_v24, %s4613_s23 }
 0x566   : > { %3185 = vrot.lane.b32.xlu0 %v7004_v44, %s4613_s23  ;;  %s3921_s23 = sld [smem:[#allocation8 + $0x385]] }
 0x56a   : > { %3221 = vrot.lane.b32.xlu0 %v7004_v44, %s4614_s29 }
 0x56e   : > { %3223 = vrot.lane.b32.xlu0 %v6999_v28, %s4614_s29  ;;  %s3922_s29 = sld [smem:[#allocation8 + $0x386]] }
 0x5ac   : > { %v3123_v59 = vpop.permute.xlu1 %3122  ;;  %v7045_v6 = vpop.permute.xlu0 %3158 }
 0x5ad   : > { %v3133_v51 = vsel %vm518_vm4, 0.0, %v3123_v59  ;;  %v3169_v30 = vsel %vm555_vm5, %v7045_v6, 0.0 }
 0x5ae   : > { %v3138_v22 = vmul.f32 %v7057_v61, %v3133_v51 }
 0x5b0   : > { %v3157_v4 = vpop.permute.xlu1 %3156  ;;  %v3121_v39 = vpop.permute.xlu0 %3120 }
 0x5b1   : > { %v3132_v21 = vsel %vm518_vm4, 0.0, %v3121_v39 }
 0x5b2   : > { %v3137_v37 = vmul.f32 %v7057_v61, %v3132_v21 }
 0x5b4   : > { %v3059_v60 = vpop.permute.xlu1 %3058  ;;  %v3061_v26 = vpop.permute.xlu0 %3060 }
 0x5b5   : > { %v3070_v18 = vsel %vm518_vm4, 0.0, %v3059_v60  ;;  %v3071_v50 = vsel %vm518_vm4, 0.0, %v3061_v26 }
 0x5b6   : > { %v3075_v56 = vmul.f32 %v7047_v20, %v3070_v18  ;;  %v3076_v9 = vmul.f32 %v7047_v20, %v3071_v50  ;;  %v3168_v18 = vsel %vm555_vm5, %v3157_v4, 0.0  ;;  %v3148_v50 = vmul.f32 %v6963_v29, %v3146_v25 }
 0x5b8   : > { %v3095_v16 = vpop.permute.xlu1 %3094  ;;  %v3097_v47 = vpop.permute.xlu0 %3096  ;;  %v3089_v23 = vadd.f32 %v3085_v49, %v3075_v56  ;;  %v3090_v57 = vadd.f32 %v3086_v46, %v3076_v9  ;;  %v3147_v56 = vmul.f32 %v3146_v25, %v6965_v42  ;;  %v7076_v46 = vstv %s3921_s23  ;;  %s469_s23 = scalar_lea.vmem %s7371_s9, %s3778_s0 }
 0x5b9   : > { %v3106_v31 = vsel %vm555_vm5, %v3095_v16, 0.0  ;;  %v3107_v11 = vsel %vm555_vm5, %v3097_v47, 0.0  ;;  %v7078_v16 = vstv %s3922_s29  ;;  %v3173_v51 = vmul.f32 %v7076_v46, %v3168_v18 }
 0x5ba   : > { %v3111_v27 = vmul.f32 %v7055_v48, %v3106_v31  ;;  %v3112_v7 = vmul.f32 %v7055_v48, %v3107_v11  ;;  %v7087_v42 = vstv %s7061_s28  ;;  %v7096_v18 = vstv %s3925_s17 }
 0x5bc   : > { %v3115_v60 = vadd.f32 %v3111_v27, %v3089_v23  ;;  %v3116_v59 = vadd.f32 %v3112_v7, %v3090_v57  ;;  %v3184_v26 = vpop.permute.xlu1 %3183  ;;  %v7071_v39 = vpop.permute.xlu0 %3126  ;;  %v7090_v57 = vstv %s3924_s24  ;;  %v3210_v7 = vmul.f32 %v7087_v42, %v6979_v41 }
 0x5bd   : > { %v3195_v47 = vsel %vm518_vm4, 0.0, %v3184_v26  ;;  %v7104_v41 = vstv %s3929_s3 }
 0x5be   : > { %v3141_v9 = vadd.f32 %v3137_v37, %v3115_v60  ;;  %v3142_v49 = vadd.f32 %v3138_v22, %v3116_v59  ;;  %v3200_v23 = vmul.f32 %v7078_v16, %v3195_v47  ;;  %v7100_v47 = vstv %s3927_s13 }
 0x5c0   : > { %v3151_v21 = vadd.f32 %v3147_v56, %v3141_v9  ;;  %v3220_v31 = vpop.permute.xlu1 %3219  ;;  %v7082_v11 = vpop.permute.xlu0 %3162  ;;  %v7084_v29 = vadd.f32 %v3148_v50, %v3142_v49  ;;  %v7098_v49 = vstv %s3926_s25 }
 0x5c1   : > { %v3231_v27 = vsel %vm555_vm5, %v3220_v31, 0.0 }
 0x5c2   : > { %v3177_v4 = vadd.f32 %v3173_v51, %v3151_v21  ;;  %v3236_v26 = vmul.f32 %v7090_v57, %v3231_v27  ;;  %v7102_v51 = vstv %s3928_s4 }
 0x5c4   : > { %v3204_v22 = vadd.f32 %v3200_v23, %v3177_v4  ;;  %v3099_v37 = vpop.permute.xlu1 %3098  ;;  %v3125_v60 = vpop.permute.xlu0 %3124 }
 0x5c6   : > { %v3214_v59 = vadd.f32 %v3210_v7, %v3204_v22 }
 0x5c8   : > { %v3240_v50 = vadd.f32 %v3236_v26, %v3214_v59  ;;  %v3101_v56 = vpop.permute.xlu1 %3100  ;;  %v3161_v9 = vpop.permute.xlu0 %3160  ;;  %v2782_v59 = vmul.f32 %v6845_v3, %v6779_v17  ;;  %v7113_v26 = vstv %s3290_s12  ;;  %v3108_v17 = vsel %vm555_vm5, %v3099_v37, 0.0 }
 0x5c9   : > { %v3211_v37 = vmul.f32 %v7087_v42, %v7004_v44  ;;  %v3170_v6 = vsel %vm555_vm5, %v3161_v9, 0.0  ;;  %v3088_v44 = vmul.f32 %v7049_v53, %v6996_v24 }
 0x5ca   : > { %v3246_v21 = vadd.f32 %v7096_v18, %v3240_v50  ;;  %v2786_v50 = vadd.f32 %v2782_v59, %v6945_v54  ;;  %v7136_v54 = vstv %s3934_s21 }
 0x5cc   : > { %v3188_v31 = vpop.permute.xlu1 %3187  ;;  %v3190_v4 = vpop.permute.xlu0 %3189  ;;  %v3252_v23 = vmul.f32 %v7098_v49, %v3246_v21  ;;  %v3262_v27 = vmul.f32 %v7100_v47, %v3246_v21  ;;  %v3272_v7 = vmul.f32 %v7102_v51, %v3246_v21  ;;  %v3282_v22 = vmul.f32 %v7104_v41, %v3246_v21 }
 0x5cd   : > { %v3149_v21 = vmul.f32 %v3146_v25, %v6981_v5  ;;  %v3135_v5 = vsel %vm518_vm4, 0.0, %v7071_v39 }
 0x5ce   : > { %v3256_v45 = vadd.f32 %v3252_v23, %v6888_v58  ;;  %v3266_v52 = vadd.f32 %v3262_v27, %v6891_v38  ;;  %v7119_v40 = vadd.f32 %v3272_v7, %v6897_v8  ;;  %v7122_v43 = vadd.f32 %v3282_v22, %v6909_v2 }
 0x5cf   : > { %v3087_v8 = vmul.f32 %v7049_v53, %v6993_v1  ;;  %v3113_v1 = vmul.f32 %v7055_v48, %v3108_v17  ;;  %v3109_v23 = vsel %vm555_vm5, %v3101_v56, 0.0  ;;  %v3174_v22 = vmul.f32 %v7076_v46, %v3169_v30 }
 0x5d0   : > { %v2795_v3 = vpop.permute.xlu1 %2794  ;;  %v3063_v63 = vpop.permute.xlu0 %3062  ;;  %v7130_v58 = vadd.f32 %v7113_v26, %v3256_v45  ;;  %v3140_v59 = vmul.f32 %v7057_v61, %v3135_v5 }
 0x5d1   : > { %v2803_v38 = vsel %vm555_vm5, %v2795_v3, 0.0  ;;  %v3072_v2 = vsel %vm518_vm4, 0.0, %v3063_v63  ;;  %v3134_v63 = vsel %vm518_vm4, 0.0, %v3125_v60  ;;  %v3114_v3 = vmul.f32 %v7055_v48, %v3109_v23 }
 0x5d2   : > { %v2808_v25 = vmul.f32 %v6855_v35, %v2803_v38  ;;  %v3077_v45 = vmul.f32 %v7047_v20, %v3072_v2  ;;  %3316 = vadd.xlane.f32.xlu0 %v7130_v58  ;;  %v7152_v35 = vadd.f32 %v7136_v54, %v3266_v52  ;;  %v3139_v60 = vmul.f32 %v7057_v61, %v3134_v63 }
 0x5d3   : > { %v3171_v52 = vsel %vm555_vm5, %v7082_v11, 0.0  ;;  %v3175_v38 = vmul.f32 %v7076_v46, %v3170_v6  ;;  %v3178_v24 = vadd.f32 %v3174_v22, %v7084_v29  ;;  %v3212_v63 = vmul.f32 %v7087_v42, %v6999_v28 }
 0x5d4   : > { %v2812_v27 = vadd.f32 %v2808_v25, %v2786_v50  ;;  %v3091_v7 = vadd.f32 %v3087_v8, %v3077_v45  ;;  %v3065_v39 = vpop.permute.xlu0 %3064  ;;  %v3176_v23 = vmul.f32 %v7076_v46, %v3171_v52 }
 0x5d5   : > { %v3073_v17 = vsel %vm518_vm4, 0.0, %v3065_v39 }
 0x5d6   : > { %v2818_v56 = vadd.f32 %v6859_v19, %v2812_v27  ;;  %v3117_v9 = vadd.f32 %v3113_v1, %v3091_v7  ;;  %v3078_v50 = vmul.f32 %v7047_v20, %v3073_v17  ;;  %3386 = vadd.xlane.f32.xlu0 %v7152_v35  ;;  %v3197_v20 = vsel %vm518_vm4, 0.0, %v3188_v31 }
 0x5d7   : > { %v3198_v1 = vsel %vm518_vm4, 0.0, %v3190_v4 }
 0x5d8   : > { %v3143_v53 = vadd.f32 %v3139_v60, %v3117_v9  ;;  %v3092_v8 = vadd.f32 %v3088_v44, %v3078_v50  ;;  %v3186_v2 = vpop.permute.xlu0 %3185  ;;  %v2824_v61 = vmul.f32 %v6864_v12, %v2818_v56  ;;  %v2834_v19 = vmul.f32 %v6869_v10, %v2818_v56 }
 0x5d9   : > { %v3196_v30 = vsel %vm518_vm4, 0.0, %v3186_v2  ;;  %v2854_v5 = vmul.f32 %v6878_v13, %v2818_v56  ;;  %v2844_v11 = vmul.f32 %v6874_v15, %v2818_v56  ;;  %v3202_v13 = vmul.f32 %v7078_v16, %v3197_v20 }
 0x5da   : > { %v3153_v48 = vadd.f32 %v3149_v21, %v3143_v53  ;;  %v3118_v25 = vadd.f32 %v3114_v3, %v3092_v8  ;;  %v3201_v45 = vmul.f32 %v7078_v16, %v3196_v30  ;;  %v7176_v29 = vadd.f32 %v2824_v61, %v6679_v62  ;;  %v7508_v61 = vld [vmem:[#allocation24_spill] sm:$0xff]  ;;  %v7509_v30 = vld [vmem:[#allocation46_spill] sm:$0xff] }
 0x5db   : > { %v7184_v12 = vadd.f32 %v2834_v19, %v6682_v33  ;;  %v7187_v10 = vadd.f32 %v2854_v5, %v6685_v32  ;;  %v7190_v15 = vadd.f32 %v2844_v11, %v6688_v55  ;;  %v3226_v33 = vpop.permute.xlu1 %3225  ;;  %v3203_v39 = vmul.f32 %v7078_v16, %v3198_v1 }
 0x5dc   : > { %v3144_v62 = vadd.f32 %v3140_v59, %v3118_v25  ;;  %v3205_v31 = vadd.f32 %v3201_v45, %v3178_v24  ;;  %v3222_v21 = vpop.permute.xlu0 %3221  ;;  %v3179_v4 = vadd.f32 %v3175_v38, %v3153_v48  ;;  %v3234_v22 = vsel %vm555_vm5, %v3226_v33, 0.0 }
 0x5dd   : > { %v3232_v6 = vsel %vm555_vm5, %v3222_v21, 0.0  ;;  %v3239_v16 = vmul.f32 %v7090_v57, %v3234_v22  ;;  %v3430_v9 = vstv %s7179_s19  ;;  %v3500_v50 = vstv %s7181_s5 }
 0x5de   : > { %v3154_v32 = vadd.f32 %v7125_v14, %v3144_v62  ;;  %v3215_v27 = vadd.f32 %v3211_v37, %v3205_v31  ;;  %v3237_v55 = vmul.f32 %v7090_v57, %v3232_v6  ;;  %v3206_v7 = vadd.f32 %v3202_v13, %v3179_v4  ;;  %v7510_v31 = vld [vmem:[#allocation47_spill] sm:$0xff]  ;;  %v7512_v6 = vld [vmem:[#allocation36_spill] sm:$0xff] }
 0x5df   : > { %v3213_v14 = vmul.f32 %v7087_v42, %v7025_v36  ;;  %v7223_v20 = vadd.f32 %v3430_v9, %v7119_v40  ;;  %v7227_v11 = vadd.f32 %v3500_v50, %v7122_v43 }
 0x5e0   : > { %v3180_v28 = vadd.f32 %v3176_v23, %v3154_v32  ;;  %v3241_v59 = vadd.f32 %v3237_v55, %v3215_v27  ;;  %v3216_v46 = vadd.f32 %v3212_v63, %v3206_v7  ;;  %v3224_v44 = vpop.permute.xlu0 %3223  ;;  %v7511_v63 = vld [vmem:[#allocation35_spill] sm:$0xff] }
 0x5e1   : > { %v3233_v17 = vsel %vm555_vm5, %v3224_v44, 0.0 }
 0x5e2   : > { %v3207_v37 = vadd.f32 %v3203_v39, %v3180_v28  ;;  %v3247_v60 = vadd.f32 %v7096_v18, %v3241_v59  ;;  %v3238_v56 = vmul.f32 %v7090_v57, %v3233_v17 }
 0x5e4   : > { %v3217_v52 = vadd.f32 %v3213_v14, %v3207_v37  ;;  %v3242_v3 = vadd.f32 %v3238_v56, %v3216_v46  ;;  %v3263_v38 = vmul.f32 %v7100_v47, %v3247_v60  ;;  %v3253_v24 = vmul.f32 %v7098_v49, %v3247_v60 }
 0x5e5   : > { %v3273_v36 = vmul.f32 %v7102_v51, %v3247_v60  ;;  %v3283_v42 = vmul.f32 %v7104_v41, %v3247_v60 }
 0x5e6   : > { %v3243_v53 = vadd.f32 %v3239_v16, %v3217_v52  ;;  %v3248_v8 = vadd.f32 %v7096_v18, %v3242_v3  ;;  %v3267_v2 = vadd.f32 %v3263_v38, %v6932_v34  ;;  %v3257_v57 = vadd.f32 %v3253_v24, %v6935_v0 }
 0x5e7   : > { %v3277_v19 = vadd.f32 %v3273_v36, %v7508_v61  ;;  %v3287_v5 = vadd.f32 %v3283_v42, %v7509_v30 }
 0x5e8   : > { %v7230_v48 = vadd.f32 %v7136_v54, %v3267_v2  ;;  %v7233_v25 = vadd.f32 %v7113_v26, %v3257_v57  ;;  %v3264_v34 = vmul.f32 %v7100_v47, %v3248_v8  ;;  %v3254_v0 = vmul.f32 %v7098_v49, %v3248_v8 }
 0x5e9   : > { %v7242_v40 = vadd.f32 %v3430_v9, %v3277_v19  ;;  %v7244_v43 = vadd.f32 %v3500_v50, %v3287_v5  ;;  %v3249_v45 = vadd.f32 %v7096_v18, %v3243_v53  ;;  %v3274_v1 = vmul.f32 %v7102_v51, %v3248_v8 }
 0x5ea   : > { %3388 = vadd.xlane.f32.xlu0 %v7230_v48  ;;  %v3995_v13 = vpack.c.bf16 %v7230_v48, %v7152_v35  ;;  %3318 = vadd.xlane.f32.xlu1 %v7233_v25  ;;  %v3985_v62 = vpack.c.bf16 %v7233_v25, %v7130_v58  ;;  %v3268_v21 = vadd.f32 %v3264_v34, %v7510_v31 }
 0x5eb   : > { %v4005_v4 = vpack.c.bf16 %v7242_v40, %v7223_v20  ;;  %v4015_v18 = vpack.c.bf16 %v7244_v43, %v7227_v11  ;;  %v3258_v23 = vadd.f32 %v3254_v0, %v7511_v63  ;;  %v3255_v33 = vmul.f32 %v7098_v49, %v3249_v45  ;;  %v7513_v49 = vld [vmem:[#allocation37_spill] sm:$0xff] }
 0x5ec   : > { %4023 = vst [vmem:[%s7240_s30 + $0x10] sm:$0xff] %v3995_v13   ;;  %3986 = vst [vmem:[%s7240_s30] sm:$0xff] %v3985_v62   ;;  %v3278_v32 = vadd.f32 %v3274_v1, %v7512_v6  ;;  %v3284_v27 = vmul.f32 %v7104_v41, %v3248_v8  ;;  %v3265_v55 = vmul.f32 %v7100_v47, %v3249_v45 }
 0x5ed   : > { %4025 = vst [vmem:[%s7240_s30 + $0x20] sm:$0xff] %v4005_v4   ;;  %4027 = vst [vmem:[%s7240_s30 + $0x30] sm:$0xff] %v4015_v18   ;;  %v3259_v7 = vadd.f32 %v3255_v33, %v7176_v29  ;;  %v3285_v39 = vmul.f32 %v7104_v41, %v3249_v45  ;;  %v3275_v22 = vmul.f32 %v7102_v51, %v3249_v45 }
 0x5ee   : > { %3458 = vadd.xlane.f32.xlu0 %v7242_v40  ;;  %3456 = vadd.xlane.f32.xlu1 %v7223_v20  ;;  %v3288_v28 = vadd.f32 %v3284_v27, %v7513_v49  ;;  %v3269_v59 = vadd.f32 %v3265_v55, %v7184_v12  ;;  %v7276_v46 = vadd.f32 %v7113_v26, %v3258_v23 }
 0x5ef   : > { %v7279_v47 = vadd.f32 %v7113_v26, %v3259_v7  ;;  %v3289_v41 = vadd.f32 %v3285_v39, %v7187_v10  ;;  %v3279_v51 = vadd.f32 %v3275_v22, %v7190_v15  ;;  %v7284_v29 = vadd.f32 %v7136_v54, %v3268_v21 }
 0x5f0   : > { %v7286_v44 = vadd.f32 %v3430_v9, %v3278_v32  ;;  %v7289_v12 = vadd.f32 %v7136_v54, %v3269_v59  ;;  %v7293_v26 = vadd.f32 %v3500_v50, %v3288_v28 }
 0x5f1   : > { %v3990_v17 = vpack.c.bf16 %v7279_v47, %v7276_v46  ;;  %v7295_v14 = vadd.f32 %v3500_v50, %v3289_v41  ;;  %v7297_v10 = vadd.f32 %v3430_v9, %v3279_v51 }
 0x5f2   : > { %3528 = vadd.xlane.f32.xlu0 %v7244_v43  ;;  %3526 = vadd.xlane.f32.xlu1 %v7227_v11  ;;  %v4000_v15 = vpack.c.bf16 %v7289_v12, %v7284_v29 }
 0x5f3   : > { %4022 = vst [vmem:[%s7240_s30 + $0x8] sm:$0xff] %v3990_v17   ;;  %v4020_v54 = vpack.c.bf16 %v7295_v14, %v7293_v26  ;;  %v4010_v37 = vpack.c.bf16 %v7297_v10, %v7286_v44 }
 0x5f4   : > { %4024 = vst [vmem:[%s7240_s30 + $0x18] sm:$0xff] %v4000_v15  }
 0x5f5   : > { %4028 = vst [vmem:[%s7240_s30 + $0x38] sm:$0xff] %v4020_v54   ;;  %4026 = vst [vmem:[%s7240_s30 + $0x28] sm:$0xff] %v4010_v37  }
 0x5f6   : > { %3390 = vadd.xlane.f32.xlu0 %v7284_v29  ;;  %3320 = vadd.xlane.f32.xlu1 %v7276_v46 }
 0x5fa   : > { %3322 = vadd.xlane.f32.xlu0 %v7279_v47  ;;  %3460 = vadd.xlane.f32.xlu1 %v7286_v44 }
 0x5fe   : > { %3530 = vadd.xlane.f32.xlu0 %v7293_v26  ;;  %3392 = vadd.xlane.f32.xlu1 %v7289_v12 }
 0x602   : > { %3532 = vadd.xlane.f32.xlu0 %v7295_v14  ;;  %3462 = vadd.xlane.f32.xlu1 %v7297_v10 }
 0x65f   : > { %v3317_v60 = vpop.xlane.xlu0 %3316 }
 0x663   : > { %v3387_v56 = vpop.xlane.xlu0 %3386 }
 0x677   : > { %v3389_v16 = vpop.xlane.xlu0 %3388  ;;  %v3319_v9 = vpop.xlane.xlu1 %3318 }
 0x678   : > { %v3324_v42 = vadd.f32 %v3319_v9, %v3317_v60  ;;  %v3394_v57 = vadd.f32 %v3389_v16, %v3387_v56 }
 0x67b   : > { %v3459_v50 = vpop.xlane.xlu0 %3458  ;;  %v3457_v52 = vpop.xlane.xlu1 %3456 }
 0x67c   : > { %v3464_v0 = vadd.f32 %v3459_v50, %v3457_v52 }
 0x67f   : > { %v3529_v3 = vpop.xlane.xlu0 %3528  ;;  %v3527_v38 = vpop.xlane.xlu1 %3526 }
 0x680   : > { %v3534_v45 = vadd.f32 %v3529_v3, %v3527_v38 }
 0x683   : > { %v3391_v24 = vpop.xlane.xlu0 %3390  ;;  %v3321_v36 = vpop.xlane.xlu1 %3320 }
 0x684   : > { %v3325_v53 = vadd.f32 %v3324_v42, %v3321_v36  ;;  %v3395_v19 = vadd.f32 %v3394_v57, %v3391_v24 }
 0x687   : > { %v3323_v8 = vpop.xlane.xlu0 %3322  ;;  %v3461_v2 = vpop.xlane.xlu1 %3460 }
 0x688   : > { %v3326_v61 = vadd.f32 %v3325_v53, %v3323_v8  ;;  %v3465_v31 = vadd.f32 %v3464_v0, %v3461_v2 }
 0x68a   : > { %v3327_v30 = vrot.slane %v3326_v61, 4 }
 0x68b   : > { %v3531_v5 = vpop.xlane.xlu0 %3530  ;;  %v3393_v34 = vpop.xlane.xlu1 %3392 }
 0x68c   : > { %v3328_v1 = vadd.f32 %v3327_v30, %v3326_v61  ;;  %v3396_v13 = vadd.f32 %v3395_v19, %v3393_v34  ;;  %v3535_v21 = vadd.f32 %v3534_v45, %v3531_v5 }
 0x68e   : > { %v3329_v62 = vrot.slane %v3328_v1, 2  ;;  %v3397_v4 = vrot.slane %v3396_v13, 4 }
 0x68f   : > { %v3533_v18 = vpop.xlane.xlu0 %3532  ;;  %v3463_v63 = vpop.xlane.xlu1 %3462 }
 0x690   : > { %v3330_v23 = vadd.f32 %v3329_v62, %v3328_v1  ;;  %v3398_v33 = vadd.f32 %v3397_v4, %v3396_v13  ;;  %v3536_v6 = vadd.f32 %v3535_v21, %v3533_v18  ;;  %v3466_v32 = vadd.f32 %v3465_v31, %v3463_v63 }
 0x692   : > { %v3331_v27 = vrot.slane %v3330_v23, 1  ;;  %v3399_v55 = vrot.slane %v3398_v33, 2  ;;  %v3537_v7 = vrot.slane %v3536_v6, 4  ;;  %v3467_v39 = vrot.slane %v3466_v32, 4 }
 0x694   : > { %v3332_v22 = vadd.f32 %v3331_v27, %v3330_v23  ;;  %v3400_v49 = vadd.f32 %v3399_v55, %v3398_v33  ;;  %v3538_v28 = vadd.f32 %v3537_v7, %v3536_v6  ;;  %v3468_v59 = vadd.f32 %v3467_v39, %v3466_v32 }
 0x696   : > { %v3333_v41 = vmul.f32 0.00024414063, %v3332_v22  ;;  %v3401_v51 = vrot.slane %v3400_v49, 1  ;;  %v3539_v17 = vrot.slane %v3538_v28, 2  ;;  %v3469_v15 = vrot.slane %v3468_v59, 2 }
 0x698   : > { %v3402_v54 = vadd.f32 %v3401_v51, %v3400_v49  ;;  %v3540_v37 = vadd.f32 %v3539_v17, %v3538_v28  ;;  %v3470_v60 = vadd.f32 %v3469_v15, %v3468_v59  ;;  %v3335_v56 = vsub.f32 %v7233_v25, %v3333_v41 }
 0x699   : > { %v3334_v16 = vsub.f32 %v7130_v58, %v3333_v41  ;;  %v3336_v0 = vsub.f32 %v7276_v46, %v3333_v41  ;;  %v3337_v31 = vsub.f32 %v7279_v47, %v3333_v41 }
 0x69a   : > { %v3403_v9 = vmul.f32 0.00024414063, %v3402_v54  ;;  %v3569_v50 = vsel %vm518_vm4, %v3332_v22, %v3402_v54  ;;  %v3541_v52 = vrot.slane %v3540_v37, 1  ;;  %v3471_v3 = vrot.slane %v3470_v60, 1 }
 0x69b   : > { %v3339_v38 = vmul.f32 %v3335_v56, %v3335_v56  ;;  %v3338_v24 = vmul.f32 %v3334_v16, %v3334_v16  ;;  %v3340_v1 = vmul.f32 %v3336_v0, %v3336_v0 }
 0x69c   : > { %v3542_v36 = vadd.f32 %v3541_v52, %v3540_v37  ;;  %v3472_v42 = vadd.f32 %v3471_v3, %v3470_v60  ;;  %v3405_v53 = vsub.f32 %v7230_v48, %v3403_v9  ;;  %v3404_v8 = vsub.f32 %v7152_v35, %v3403_v9 }
 0x69d   : > { %3344 = vadd.xlane.f32.xlu0 %v3339_v38  ;;  %3342 = vadd.xlane.f32.xlu1 %v3338_v24  ;;  %v3406_v35 = vsub.f32 %v7284_v29, %v3403_v9  ;;  %v3341_v29 = vmul.f32 %v3337_v31, %v3337_v31  ;;  %v3407_v18 = vsub.f32 %v7289_v12, %v3403_v9 }
 0x69e   : > { %v3473_v25 = vmul.f32 0.00024414063, %v3472_v42  ;;  %v3571_v58 = vsel %vm3570_vm6, %v3569_v50, %v3472_v42  ;;  %v3409_v2 = vmul.f32 %v3405_v53, %v3405_v53  ;;  %v3408_v61 = vmul.f32 %v3404_v8, %v3404_v8 }
 0x69f   : > { %v7326_v57 = vsel %vm3572_vm7, %v3571_v58, %v3542_v36  ;;  %v3543_v34 = vmul.f32 0.00024414063, %v3542_v36  ;;  %v3410_v45 = vmul.f32 %v3406_v35, %v3406_v35 }
 0x6a0   : > { %v3475_v19 = vsub.f32 %v7242_v40, %v3473_v25  ;;  %v3474_v30 = vsub.f32 %v7223_v20, %v3473_v25  ;;  %v3476_v21 = vsub.f32 %v7286_v44, %v3473_v25  ;;  %v3477_v23 = vsub.f32 %v7297_v10, %v3473_v25 }
 0x6a1   : > { %3414 = vadd.xlane.f32.xlu0 %v3409_v2  ;;  %3412 = vadd.xlane.f32.xlu1 %v3408_v61  ;;  %v3545_v13 = vsub.f32 %v7244_v43, %v3543_v34  ;;  %v3544_v62 = vsub.f32 %v7227_v11, %v3543_v34  ;;  %v3546_v4 = vsub.f32 %v7293_v26, %v3543_v34 }
 0x6a2   : > { %v3479_v5 = vmul.f32 %v3475_v19, %v3475_v19  ;;  %v3478_v48 = vmul.f32 %v3474_v30, %v3474_v30  ;;  %v3480_v46 = vmul.f32 %v3476_v21, %v3476_v21  ;;  %v3411_v11 = vmul.f32 %v3407_v18, %v3407_v18 }
 0x6a3   : > { %v3549_v20 = vmul.f32 %v3545_v13, %v3545_v13  ;;  %v3548_v40 = vmul.f32 %v3544_v62, %v3544_v62  ;;  %v3550_v43 = vmul.f32 %v3546_v4, %v3546_v4  ;;  %v3547_v63 = vsub.f32 %v7295_v14, %v3543_v34 }
 0x6a4   : > { %v3481_v44 = vmul.f32 %v3477_v23, %v3477_v23 }
 0x6a5   : > { %3484 = vadd.xlane.f32.xlu0 %v3479_v5  ;;  %3482 = vadd.xlane.f32.xlu1 %v3478_v48  ;;  %v3551_v47 = vmul.f32 %v3547_v63, %v3547_v63 }
 0x6a9   : > { %3416 = vadd.xlane.f32.xlu0 %v3410_v45  ;;  %3346 = vadd.xlane.f32.xlu1 %v3340_v1 }
 0x6ad   : > { %3554 = vadd.xlane.f32.xlu0 %v3549_v20  ;;  %3552 = vadd.xlane.f32.xlu1 %v3548_v40 }
 0x6b1   : > { %3348 = vadd.xlane.f32.xlu0 %v3341_v29  ;;  %3486 = vadd.xlane.f32.xlu1 %v3480_v46 }
 0x6b5   : > { %3556 = vadd.xlane.f32.xlu0 %v3550_v43  ;;  %3418 = vadd.xlane.f32.xlu1 %v3411_v11 }
 0x6b9   : > { %3558 = vadd.xlane.f32.xlu0 %v3551_v47  ;;  %3488 = vadd.xlane.f32.xlu1 %v3481_v44 }
 0x72a   : > { %v3345_v33 = vpop.xlane.xlu0 %3344  ;;  %v3343_v6 = vpop.xlane.xlu1 %3342 }
 0x72b   : > { %v3350_v49 = vadd.f32 %v3345_v33, %v3343_v6 }
 0x72e   : > { %v3415_v32 = vpop.xlane.xlu0 %3414  ;;  %v3413_v26 = vpop.xlane.xlu1 %3412 }
 0x72f   : > { %v3420_v59 = vadd.f32 %v3415_v32, %v3413_v26 }
 0x732   : > { %v3485_v27 = vpop.xlane.xlu0 %3484  ;;  %v3483_v12 = vpop.xlane.xlu1 %3482 }
 0x733   : > { %v3490_v37 = vadd.f32 %v3485_v27, %v3483_v12 }
 0x736   : > { %v3417_v55 = vpop.xlane.xlu0 %3416  ;;  %v3347_v7 = vpop.xlane.xlu1 %3346 }
 0x737   : > { %v3351_v14 = vadd.f32 %v3350_v49, %v3347_v7  ;;  %v3421_v51 = vadd.f32 %v3420_v59, %v3417_v55 }
 0x73a   : > { %v3555_v39 = vpop.xlane.xlu0 %3554  ;;  %v3553_v22 = vpop.xlane.xlu1 %3552 }
 0x73b   : > { %v3560_v60 = vadd.f32 %v3555_v39, %v3553_v22 }
 0x73e   : > { %v3349_v28 = vpop.xlane.xlu0 %3348  ;;  %v3487_v10 = vpop.xlane.xlu1 %3486 }
 0x73f   : > { %v3352_v41 = vadd.f32 %v3351_v14, %v3349_v28  ;;  %v3491_v9 = vadd.f32 %v3490_v37, %v3487_v10 }
 0x741   : > { %v3353_v17 = vrot.slane %v3352_v41, 4 }
 0x742   : > { %v3557_v15 = vpop.xlane.xlu0 %3556  ;;  %v3419_v54 = vpop.xlane.xlu1 %3418 }
 0x743   : > { %v3354_v56 = vadd.f32 %v3353_v17, %v3352_v41  ;;  %v3422_v16 = vadd.f32 %v3421_v51, %v3419_v54  ;;  %v3561_v50 = vadd.f32 %v3560_v60, %v3557_v15 }
 0x745   : > { %v3423_v52 = vrot.slane %v3422_v16, 4  ;;  %v3355_v3 = vrot.slane %v3354_v56, 2 }
 0x746   : > { %v3559_v38 = vpop.xlane.xlu0 %3558  ;;  %v3489_v24 = vpop.xlane.xlu1 %3488 }
 0x747   : > { %v3424_v36 = vadd.f32 %v3423_v52, %v3422_v16  ;;  %v3562_v42 = vadd.f32 %v3561_v50, %v3559_v38  ;;  %v3492_v53 = vadd.f32 %v3491_v9, %v3489_v24  ;;  %v3356_v2 = vadd.f32 %v3355_v3, %v3354_v56 }
 0x749   : > { %v3425_v8 = vrot.slane %v3424_v36, 2  ;;  %v3563_v25 = vrot.slane %v3562_v42, 4  ;;  %v3493_v58 = vrot.slane %v3492_v53, 4  ;;  %v3357_v35 = vrot.slane %v3356_v2, 1 }
 0x74b   : > { %v3426_v61 = vadd.f32 %v3425_v8, %v3424_v36  ;;  %v3564_v19 = vadd.f32 %v3563_v25, %v3562_v42  ;;  %v3494_v30 = vadd.f32 %v3493_v58, %v3492_v53  ;;  %v3358_v20 = vadd.f32 %v3357_v35, %v3356_v2 }
 0x74d   : > { %v3427_v5 = vrot.slane %v3426_v61, 1  ;;  %v3565_v48 = vrot.slane %v3564_v19, 2  ;;  %v3495_v34 = vrot.slane %v3494_v30, 2 }
 0x74f   : > { %v3566_v0 = vadd.f32 %v3565_v48, %v3564_v19  ;;  %v3496_v45 = vadd.f32 %v3495_v34, %v3494_v30  ;;  %v3428_v1 = vadd.f32 %v3427_v5, %v3426_v61 }
 0x751   : > { %v3567_v13 = vrot.slane %v3566_v0, 1  ;;  %v3497_v62 = vrot.slane %v3496_v45, 1  ;;  %v3574_v21 = vsel %vm518_vm4, %v3358_v20, %v3428_v1 }
 0x753   : > { %v3568_v40 = vadd.f32 %v3567_v13, %v3566_v0  ;;  %v3498_v31 = vadd.f32 %v3497_v62, %v3496_v45 }
 0x755   : > { %v3575_v29 = vsel %vm3570_vm6, %v3574_v21, %v3498_v31 }
 0x756   : > { %v3576_v46 = vsel %vm3572_vm7, %v3575_v29, %v3568_v40 }
 0x757   : > { %v3578_v4 = vrot.slane %v3576_v46, 7 }
 0x759   : > { %v3580_v18 = vsel %vm478_vm2, %v7326_v57, %v3578_v4 }
 0x75a   : > { %3582 = vst.msk [vmem:[%s469_s23] sm:$0x3] %vm3581_vm8, %v3580_v18 }
 0x75b PF: > { %p26_p12 = scmp.ge.s32.totalorder %s4784_s26, 4   ;;  %s7514_s30 = smov %s4594_s10 }
 0x75c   : > { %s7515_s10 = smov %s4598_s11  ;;  %s7516_s11 = smov %s4795_s20 }
 0x75d   : > { %s7517_s12 = smov %s4784_s26  ;;  %28 = sbr.rel (!%p26_p12) target bundleno = 13 (0xd), region = 147 }
 0x764   :  { %3618 = vsyncpa [#allocation3], 1 }
 0x765   :  { %3620 = vsyncpa [#allocation3 + $0x1], 1 }
 0x766   :  { %3621 = vsyncpa [#allocation6], 1 }
 0x767   :  { %3623 = vsyncpa [#allocation6 + $0x1], 1 }
 0x768   :  { %3624 = vsyncpa [#allocation4], 1 }
 0x769   :  { %3626 = vsyncpa [#allocation4 + $0x1], 1 }
 0x76a   :  { %3627 = vsyncpa [#allocation10], 1 }
 0x76b   :  { %3628 = vsyncpa [#allocation13], 1 }

</bundles_post_ra>
